<compile_context>
chip_gen: v6e
topology: v6e:2x2x1
jax: 0.10.0
libtpu: 0.0.40
codegen_flags: <defaults>
</compile_context>

<pallas_src>
import functools

import jax
import jax.numpy as jnp
from jax import lax
from jax.experimental import pallas as pl
from jax.experimental.pallas import tpu as pltpu

# ---- hyperparameters (match TabTransformer defaults) ------------------------
INPUT_DIM = 8        # number of tabular features == sequence length
D_MODEL = 32
NHEAD = 4
HEAD_DIM = D_MODEL // NHEAD
NUM_LAYERS = 2
DIM_FF = 2048        # nn.TransformerEncoderLayer default dim_feedforward
EPS = 1e-5           # nn.LayerNorm default eps
BATCH = 2
BATCH_TILE = 128     # max rows per grid step (effective tile may be smaller)


def _layernorm(y, gamma, beta):
    mu = jnp.mean(y, axis=-1, keepdims=True)
    var = jnp.mean((y - mu) ** 2, axis=-1, keepdims=True)
    return (y - mu) * lax.rsqrt(var + EPS) * gamma + beta


# ---- the fused kernel --------------------------------------------------------
def tab_transformer_kernel(x_ref, w_in_ref, b_in_ref, pos_ref,
                           wqkv_ref, bqkv_ref, wo_ref, bo_ref,
                           g1_ref, be1_ref, w1_ref, b1_ref,
                           w2_ref, b2_ref, g2_ref, be2_ref,
                           w_out_ref, b_out_ref, out_ref):
    bt, f = x_ref.shape                      # batch tile, tokens per example
    d = D_MODEL
    n = bt * f                               # flattened token rows in this tile
    bf16 = jnp.bfloat16

    # ---- embedding: Linear(1, d_model) + positional embedding ----
    x = x_ref[...]                                               # [bt, f]
    emb = (x[:, :, None] * w_in_ref[...][None, :, :]
           + b_in_ref[...][None, :, :]
           + pos_ref[...][None, :, :])                           # [bt, f, d]
    h = emb.reshape(n, d)                                        # [n, d] f32

    for l in range(NUM_LAYERS):
        # ----- multi-head self attention (dropout = identity) -----
        # Fused QKV projection: bf16 activations x bf16 weights, f32 acc.
        # 1/sqrt(head_dim) is already folded into the q columns of wqkv/bqkv.
        qkv = jnp.dot(h.astype(bf16), wqkv_ref[l],
                      preferred_element_type=jnp.float32) + bqkv_ref[l]
        qkv3 = qkv.astype(bf16).reshape(bt, f, 3 * d)            # [bt, f, 3d]

        head_outs = []
        for hh in range(NHEAD):
            qh = qkv3[:, :, hh * HEAD_DIM:(hh + 1) * HEAD_DIM]           # [bt,f,Dh]
            kh = qkv3[:, :, d + hh * HEAD_DIM:d + (hh + 1) * HEAD_DIM]   # [bt,f,Dh]
            vh = qkv3[:, :, 2 * d + hh * HEAD_DIM:2 * d + (hh + 1) * HEAD_DIM]
            # Block-diagonal attention: batched per-example [f, f] scores,
            # no [n, n] score matrix, no additive mask.
            s = jnp.einsum('bqe,bke->bqk', qh, kh,
                           preferred_element_type=jnp.float32)           # [bt,f,f]
            s = s - jnp.max(s, axis=-1, keepdims=True)
            p = jnp.exp(s)
            p = p * pl.reciprocal(jnp.sum(p, axis=-1, keepdims=True),
                                  approx=True)
            oh = jnp.einsum('bqk,bke->bqe', p.astype(bf16), vh,
                            preferred_element_type=jnp.float32)          # [bt,f,Dh]
            head_outs.append(oh)
        o = jnp.concatenate(head_outs, axis=-1).reshape(n, d)            # [n, d]
        attn = jnp.dot(o.astype(bf16), wo_ref[l],
                       preferred_element_type=jnp.float32) + bo_ref[l]
        h = _layernorm(h + attn, g1_ref[l], be1_ref[l])

        # ----- feed-forward block (ReLU, dropout = identity) -----
        ff = jnp.dot(h.astype(bf16), w1_ref[l],
                     preferred_element_type=jnp.float32) + b1_ref[l]
        ff = jnp.maximum(ff, 0.0)
        ff = jnp.dot(ff.astype(bf16), w2_ref[l],
                     preferred_element_type=jnp.float32) + b2_ref[l]
        h = _layernorm(h + ff, g2_ref[l], be2_ref[l])

    # ----- mean pool over tokens + output head (lane-dense [1, bt] store) ----
    pooled = jnp.mean(h.reshape(bt, f, d), axis=1)               # [bt, d]
    res = jnp.einsum('od,bd->ob', w_out_ref[...], pooled,
                     preferred_element_type=jnp.float32) + b_out_ref[...]
    out_ref[...] = res                                            # [1, bt]


# ---- wrapper -----------------------------------------------------------------
_WEIGHT_ORDER = ('w_in', 'b_in', 'pos',
                 'wqkv', 'bqkv', 'wo', 'bo',
                 'g1', 'be1', 'w1', 'b1', 'w2', 'b2', 'g2', 'be2',
                 'w_out', 'b_out')


def _pinned_spec(arr):
    # Full-array block whose block index is constant across the grid -> the
    # weight is DMA'd once and stays resident in VMEM for every batch tile.
    zeros = (0,) * arr.ndim
    return pl.BlockSpec(arr.shape, lambda i, _z=zeros: _z)


@functools.partial(jax.jit, static_argnames=('batch_tile',))
def tab_transformer_forward(x, params, *, batch_tile=BATCH_TILE):
    b, f = x.shape
    # Effective tile: multiple of 8, at most batch_tile, and no larger than
    # ~ceil(b/2) so batches that span more than one tile produce >= 2 grid
    # steps (the "parallel" axis can then split across v7x's two TensorCores).
    half = -(-b // 2)
    tile = min(batch_tile, max(8, ((half + 7) // 8) * 8))
    nb = -(-b // tile)
    b_pad = nb * tile
    if b_pad != b:
        x = jnp.pad(x, ((0, b_pad - b), (0, 0)))

    weights = [params[k] for k in _WEIGHT_ORDER]

    # Advisory cost estimate (matmul FLOPs + softmax exps + bytes moved).
    n = tile * f
    per_layer = (2 * n * D_MODEL * 3 * D_MODEL                 # fused qkv proj
                 + 2 * 2 * tile * f * f * HEAD_DIM * NHEAD     # scores + P@V
                 + 2 * n * D_MODEL * D_MODEL                   # output proj
                 + 2 * 2 * n * D_MODEL * DIM_FF)               # feed-forward
    cost = pl.CostEstimate(
        flops=int(nb * (NUM_LAYERS * per_layer + 2 * tile * D_MODEL)),
        transcendentals=int(nb * NUM_LAYERS * NHEAD * tile * f * f),
        bytes_accessed=int(x.size * x.dtype.itemsize + b_pad * 4
                           + sum(w.size * w.dtype.itemsize for w in weights)))

    out = pl.pallas_call(
        tab_transformer_kernel,
        grid=(nb,),
        in_specs=([pl.BlockSpec((tile, f), lambda i: (i, 0))]
                  + [_pinned_spec(w) for w in weights]),
        out_specs=pl.BlockSpec((1, tile), lambda i: (i, 0)),
        out_shape=jax.ShapeDtypeStruct((nb, tile), jnp.float32),
        compiler_params=pltpu.CompilerParams(
            dimension_semantics=("parallel",),
            vmem_limit_bytes=32 * 1024 * 1024),
        cost_estimate=cost,
    )(x, *weights)
    return out.reshape(-1)[:b]


# ---- deterministic parameter construction -------------------------------------
def init_params(key):
    ks = jax.random.split(key, 18)

    def nrm(k, shape, dtype=jnp.float32, scale=0.05):
        return (scale * jax.random.normal(k, shape)).astype(dtype)

    L, H, D, Dh, F = NUM_LAYERS, NHEAD, D_MODEL, HEAD_DIM, INPUT_DIM
    bf16 = jnp.bfloat16
    attn_scale = 1.0 / (Dh ** 0.5)
    p = {}
    # Linear(1, d_model) + positional embedding
    p['w_in'] = nrm(ks[0], (1, D))
    p['b_in'] = nrm(ks[1], (1, D))
    p['pos'] = nrm(ks[2], (F, D))
    # Fused QKV projection, [in, out] layout, heads laid out head-major inside
    # each 32-wide q/k/v block (matches PyTorch's view(..., H, Dh) head split).
    # The 1/sqrt(head_dim) attention scale is folded into the q weights/bias.
    wq = nrm(ks[3], (L, D, D)) * attn_scale
    wk = nrm(ks[4], (L, D, D))
    wv = nrm(ks[5], (L, D, D))
    p['wqkv'] = jnp.concatenate([wq, wk, wv], axis=-1).astype(bf16)   # [L,D,3D]
    bq = nrm(ks[6], (L, 1, D)) * attn_scale
    bk = nrm(ks[7], (L, 1, D))
    bv = nrm(ks[8], (L, 1, D))
    p['bqkv'] = jnp.concatenate([bq, bk, bv], axis=-1)                # [L,1,3D]
    p['wo'] = nrm(ks[9], (L, D, D), bf16)
    p['bo'] = nrm(ks[10], (L, 1, D))
    p['g1'] = jnp.ones((L, 1, D), jnp.float32)
    p['be1'] = jnp.zeros((L, 1, D), jnp.float32)
    p['w1'] = nrm(ks[11], (L, D, DIM_FF), bf16)
    p['b1'] = nrm(ks[12], (L, 1, DIM_FF))
    p['w2'] = nrm(ks[13], (L, DIM_FF, D), bf16)
    p['b2'] = nrm(ks[14], (L, 1, D))
    p['g2'] = jnp.ones((L, 1, D), jnp.float32)
    p['be2'] = jnp.zeros((L, 1, D), jnp.float32)
    # output head, stored transposed ([1, D]) for a lane-dense [1, bt] result
    p['w_out'] = nrm(ks[15], (1, D))
    p['b_out'] = nrm(ks[16], (1, 1))
    return p


# ---- pure-JAX reference for a correctness sanity check --------------------------
def reference_forward(x, p):
    D, H, Dh = D_MODEL, NHEAD, HEAD_DIM
    f32 = lambda a: a.astype(jnp.float32)
    B, F = x.shape
    h = x[:, :, None] * p['w_in'][None] + p['b_in'][None] + p['pos'][None]
    for l in range(NUM_LAYERS):
        qkv = jnp.einsum('bfd,de->bfe', h, f32(p['wqkv'][l])) + p['bqkv'][l]
        q = qkv[..., :D].reshape(B, F, H, Dh)
        k = qkv[..., D:2 * D].reshape(B, F, H, Dh)
        v = qkv[..., 2 * D:].reshape(B, F, H, Dh)
        s = jnp.einsum('bqhe,bkhe->bhqk', q, k)   # scale already folded into wq/bq
        a = jax.nn.softmax(s, axis=-1)
        o = jnp.einsum('bhqk,bkhe->bqhe', a, v).reshape(B, F, D)
        attn = jnp.einsum('bqd,de->bqe', o, f32(p['wo'][l])) + p['bo'][l]
        h = _layernorm(h + attn, p['g1'][l], p['be1'][l])
        ff = jax.nn.relu(jnp.einsum('bfd,dk->bfk', h, f32(p['w1'][l])) + p['b1'][l])
        ff = jnp.einsum('bfk,kd->bfd', ff, f32(p['w2'][l])) + p['b2'][l]
        h = _layernorm(h + ff, p['g2'][l], p['be2'][l])
    pooled = jnp.mean(h, axis=1)
    out = jnp.einsum('bd,od->bo', pooled, p['w_out']) + p['b_out']
    return out[:, 0]


if __name__ == "__main__":
    key = jax.random.PRNGKey(0)
    kx, kp = jax.random.split(key)
    x = jax.random.normal(kx, (BATCH, INPUT_DIM), dtype=jnp.float32)
    params = init_params(kp)

    out = tab_transformer_forward(x, params)
    out = jax.block_until_ready(out)
    assert out.shape == (BATCH,)

    ref = reference_forward(x, params)
    max_err = float(jnp.max(jnp.abs(out - ref)))
    assert max_err < 2e-2, f"kernel vs reference mismatch: {max_err}"

    print("KERNEL_OK")
</pallas_src>

<mosaic_0001>
module attributes {stable_mosaic.version = 11 : i64} {
  func.func @tab_transformer_kernel(%arg0: i32, %arg1: memref<8x8xf32, #tpu.memory_space<vmem>>, %arg2: memref<1x32xf32, #tpu.memory_space<vmem>>, %arg3: memref<1x32xf32, #tpu.memory_space<vmem>>, %arg4: memref<8x32xf32, #tpu.memory_space<vmem>>, %arg5: memref<2x32x96xbf16, #tpu.memory_space<vmem>>, %arg6: memref<2x1x96xf32, #tpu.memory_space<vmem>>, %arg7: memref<2x32x32xbf16, #tpu.memory_space<vmem>>, %arg8: memref<2x1x32xf32, #tpu.memory_space<vmem>>, %arg9: memref<2x1x32xf32, #tpu.memory_space<vmem>>, %arg10: memref<2x1x32xf32, #tpu.memory_space<vmem>>, %arg11: memref<2x32x2048xbf16, #tpu.memory_space<vmem>>, %arg12: memref<2x1x2048xf32, #tpu.memory_space<vmem>>, %arg13: memref<2x2048x32xbf16, #tpu.memory_space<vmem>>, %arg14: memref<2x1x32xf32, #tpu.memory_space<vmem>>, %arg15: memref<2x1x32xf32, #tpu.memory_space<vmem>>, %arg16: memref<2x1x32xf32, #tpu.memory_space<vmem>>, %arg17: memref<1x32xf32, #tpu.memory_space<vmem>>, %arg18: memref<1x1xf32, #tpu.memory_space<vmem>>, %arg19: memref<1x8xf32, #tpu.memory_space<vmem>>) attributes {dimension_semantics = [#tpu.dimension_semantics<parallel>], iteration_bounds = array<i64: 1>, scalar_prefetch = 0 : i64, scratch_operands = 0 : i64, tpu.core_type = #tpu.core_type<tc>, window_params = [{transform_indices = @transform_0, window_bounds = array<i64: 8, 8>}, {pipeline_mode = #tpu.pipeline_mode<synchronous>, transform_indices = @transform_1, window_bounds = array<i64: 1, 32>}, {pipeline_mode = #tpu.pipeline_mode<synchronous>, transform_indices = @transform_2, window_bounds = array<i64: 1, 32>}, {pipeline_mode = #tpu.pipeline_mode<synchronous>, transform_indices = @transform_3, window_bounds = array<i64: 8, 32>}, {pipeline_mode = #tpu.pipeline_mode<synchronous>, transform_indices = @transform_4, window_bounds = array<i64: 2, 32, 96>}, {pipeline_mode = #tpu.pipeline_mode<synchronous>, transform_indices = @transform_5, window_bounds = array<i64: 2, 1, 96>}, {pipeline_mode = #tpu.pipeline_mode<synchronous>, transform_indices = @transform_6, window_bounds = array<i64: 2, 32, 32>}, {pipeline_mode = #tpu.pipeline_mode<synchronous>, transform_indices = @transform_7, window_bounds = array<i64: 2, 1, 32>}, {pipeline_mode = #tpu.pipeline_mode<synchronous>, transform_indices = @transform_8, window_bounds = array<i64: 2, 1, 32>}, {pipeline_mode = #tpu.pipeline_mode<synchronous>, transform_indices = @transform_9, window_bounds = array<i64: 2, 1, 32>}, {pipeline_mode = #tpu.pipeline_mode<synchronous>, transform_indices = @transform_10, window_bounds = array<i64: 2, 32, 2048>}, {pipeline_mode = #tpu.pipeline_mode<synchronous>, transform_indices = @transform_11, window_bounds = array<i64: 2, 1, 2048>}, {pipeline_mode = #tpu.pipeline_mode<synchronous>, transform_indices = @transform_12, window_bounds = array<i64: 2, 2048, 32>}, {pipeline_mode = #tpu.pipeline_mode<synchronous>, transform_indices = @transform_13, window_bounds = array<i64: 2, 1, 32>}, {pipeline_mode = #tpu.pipeline_mode<synchronous>, transform_indices = @transform_14, window_bounds = array<i64: 2, 1, 32>}, {pipeline_mode = #tpu.pipeline_mode<synchronous>, transform_indices = @transform_15, window_bounds = array<i64: 2, 1, 32>}, {pipeline_mode = #tpu.pipeline_mode<synchronous>, transform_indices = @transform_16, window_bounds = array<i64: 1, 32>}, {pipeline_mode = #tpu.pipeline_mode<synchronous>, transform_indices = @transform_17, window_bounds = array<i64: 1, 1>}, {transform_indices = @transform_18, window_bounds = array<i64: 1, 8>}]} {
    %c0 = arith.constant 0 : index
    %c0_0 = arith.constant 0 : index
    %0 = vector.load %arg1[%c0, %c0_0] : memref<8x8xf32, #tpu.memory_space<vmem>>, vector<8x8xf32>
    %1 = vector.shape_cast %0 : vector<8x8xf32> to vector<8x8x1xf32>
    %c0_1 = arith.constant 0 : index
    %c0_2 = arith.constant 0 : index
    %2 = vector.load %arg2[%c0_1, %c0_2] : memref<1x32xf32, #tpu.memory_space<vmem>>, vector<1x32xf32>
    %3 = vector.shape_cast %2 : vector<1x32xf32> to vector<1x1x32xf32>
    %4 = vector.broadcast %1 : vector<8x8x1xf32> to vector<8x8x32xf32>
    %5 = vector.broadcast %3 : vector<1x1x32xf32> to vector<8x8x32xf32>
    %6 = arith.mulf %4, %5 : vector<8x8x32xf32>
    %c0_3 = arith.constant 0 : index
    %c0_4 = arith.constant 0 : index
    %7 = vector.load %arg3[%c0_3, %c0_4] : memref<1x32xf32, #tpu.memory_space<vmem>>, vector<1x32xf32>
    %8 = vector.shape_cast %7 : vector<1x32xf32> to vector<1x1x32xf32>
    %9 = vector.broadcast %8 : vector<1x1x32xf32> to vector<8x8x32xf32>
    %10 = arith.addf %6, %9 : vector<8x8x32xf32>
    %c0_5 = arith.constant 0 : index
    %c0_6 = arith.constant 0 : index
    %11 = vector.load %arg4[%c0_5, %c0_6] : memref<8x32xf32, #tpu.memory_space<vmem>>, vector<8x32xf32>
    %12 = vector.shape_cast %11 : vector<8x32xf32> to vector<1x8x32xf32>
    %13 = vector.broadcast %12 : vector<1x8x32xf32> to vector<8x8x32xf32>
    %14 = arith.addf %10, %13 : vector<8x8x32xf32>
    %15 = vector.shape_cast %14 : vector<8x8x32xf32> to vector<64x32xf32>
    %16 = arith.truncf %15 : vector<64x32xf32> to vector<64x32xbf16>
    %c0_7 = arith.constant 0 : index
    %c0_8 = arith.constant 0 : index
    %c0_9 = arith.constant 0 : index
    %17 = vector.load %arg5[%c0_7, %c0_8, %c0_9] : memref<2x32x96xbf16, #tpu.memory_space<vmem>>, vector<1x32x96xbf16>
    %18 = vector.shape_cast %17 : vector<1x32x96xbf16> to vector<32x96xbf16>
    %cst = arith.constant dense<0.000000e+00> : vector<64x96xf32>
    %19 = tpu.matmul %16, %18, %cst {dimension_numbers = #tpu.dot_dimension_numbers<[1], [0], [0], [1], [0, 0, 1, 1], [], []>} : vector<64x32xbf16>, vector<32x96xbf16>, vector<64x96xf32> -> vector<64x96xf32>
    %c0_10 = arith.constant 0 : index
    %c0_11 = arith.constant 0 : index
    %c0_12 = arith.constant 0 : index
    %20 = vector.load %arg6[%c0_10, %c0_11, %c0_12] : memref<2x1x96xf32, #tpu.memory_space<vmem>>, vector<1x1x96xf32>
    %21 = vector.shape_cast %20 : vector<1x1x96xf32> to vector<1x96xf32>
    %22 = vector.broadcast %21 : vector<1x96xf32> to vector<64x96xf32>
    %23 = arith.addf %19, %22 : vector<64x96xf32>
    %24 = arith.truncf %23 : vector<64x96xf32> to vector<64x96xbf16>
    %25 = vector.shape_cast %24 : vector<64x96xbf16> to vector<8x8x96xbf16>
    %26 = vector.extract_strided_slice %25 {offsets = [0, 0, 0], sizes = [8, 8, 8], strides = [1, 1, 1]} : vector<8x8x96xbf16> to vector<8x8x8xbf16>
    %27 = vector.extract_strided_slice %25 {offsets = [0, 0, 32], sizes = [8, 8, 8], strides = [1, 1, 1]} : vector<8x8x96xbf16> to vector<8x8x8xbf16>
    %28 = vector.extract_strided_slice %25 {offsets = [0, 0, 64], sizes = [8, 8, 8], strides = [1, 1, 1]} : vector<8x8x96xbf16> to vector<8x8x8xbf16>
    "tpu.trace_start"() <{level = 10 : i32, message = "bqe,bke->bqk"}> : () -> ()
    %cst_13 = arith.constant dense<0.000000e+00> : vector<8x8x8xf32>
    %29 = tpu.matmul %26, %27, %cst_13 {dimension_numbers = #tpu.dot_dimension_numbers<[2], [2], [1], [1], [0, 0, 0, 1, 1, 1], [0], [0]>} : vector<8x8x8xbf16>, vector<8x8x8xbf16>, vector<8x8x8xf32> -> vector<8x8x8xf32>
    "tpu.trace_stop"() : () -> ()
    %cst_14 = arith.constant dense<0xFF800000> : vector<8x8xf32>
    %30 = vector.multi_reduction <maximumf>, %29, %cst_14 [2] : vector<8x8x8xf32> to vector<8x8xf32>
    %31 = vector.shape_cast %30 : vector<8x8xf32> to vector<8x8x1xf32>
    %32 = vector.broadcast %31 : vector<8x8x1xf32> to vector<8x8x8xf32>
    %33 = arith.subf %29, %32 : vector<8x8x8xf32>
    %34 = math.exp %33 : vector<8x8x8xf32>
    %cst_15 = arith.constant dense<0.000000e+00> : vector<8x8xf32>
    %35 = vector.multi_reduction <add>, %34, %cst_15 [2] : vector<8x8x8xf32> to vector<8x8xf32>
    %36 = vector.shape_cast %35 : vector<8x8xf32> to vector<8x8x1xf32>
    %37 = tpu.reciprocal %36 {approx = true} : vector<8x8x1xf32> -> vector<8x8x1xf32>
    %38 = vector.broadcast %37 : vector<8x8x1xf32> to vector<8x8x8xf32>
    %39 = arith.mulf %34, %38 : vector<8x8x8xf32>
    %40 = arith.truncf %39 : vector<8x8x8xf32> to vector<8x8x8xbf16>
    "tpu.trace_start"() <{level = 10 : i32, message = "bqk,bke->bqe"}> : () -> ()
    %cst_16 = arith.constant dense<0.000000e+00> : vector<8x8x8xf32>
    %41 = tpu.matmul %40, %28, %cst_16 {dimension_numbers = #tpu.dot_dimension_numbers<[2], [1], [1], [2], [0, 0, 0, 1, 1, 2], [0], [0]>} : vector<8x8x8xbf16>, vector<8x8x8xbf16>, vector<8x8x8xf32> -> vector<8x8x8xf32>
    "tpu.trace_stop"() : () -> ()
    %42 = vector.extract_strided_slice %25 {offsets = [0, 0, 8], sizes = [8, 8, 8], strides = [1, 1, 1]} : vector<8x8x96xbf16> to vector<8x8x8xbf16>
    %43 = vector.extract_strided_slice %25 {offsets = [0, 0, 40], sizes = [8, 8, 8], strides = [1, 1, 1]} : vector<8x8x96xbf16> to vector<8x8x8xbf16>
    %44 = vector.extract_strided_slice %25 {offsets = [0, 0, 72], sizes = [8, 8, 8], strides = [1, 1, 1]} : vector<8x8x96xbf16> to vector<8x8x8xbf16>
    "tpu.trace_start"() <{level = 10 : i32, message = "bqe,bke->bqk"}> : () -> ()
    %cst_17 = arith.constant dense<0.000000e+00> : vector<8x8x8xf32>
    %45 = tpu.matmul %42, %43, %cst_17 {dimension_numbers = #tpu.dot_dimension_numbers<[2], [2], [1], [1], [0, 0, 0, 1, 1, 1], [0], [0]>} : vector<8x8x8xbf16>, vector<8x8x8xbf16>, vector<8x8x8xf32> -> vector<8x8x8xf32>
    "tpu.trace_stop"() : () -> ()
    %cst_18 = arith.constant dense<0xFF800000> : vector<8x8xf32>
    %46 = vector.multi_reduction <maximumf>, %45, %cst_18 [2] : vector<8x8x8xf32> to vector<8x8xf32>
    %47 = vector.shape_cast %46 : vector<8x8xf32> to vector<8x8x1xf32>
    %48 = vector.broadcast %47 : vector<8x8x1xf32> to vector<8x8x8xf32>
    %49 = arith.subf %45, %48 : vector<8x8x8xf32>
    %50 = math.exp %49 : vector<8x8x8xf32>
    %cst_19 = arith.constant dense<0.000000e+00> : vector<8x8xf32>
    %51 = vector.multi_reduction <add>, %50, %cst_19 [2] : vector<8x8x8xf32> to vector<8x8xf32>
    %52 = vector.shape_cast %51 : vector<8x8xf32> to vector<8x8x1xf32>
    %53 = tpu.reciprocal %52 {approx = true} : vector<8x8x1xf32> -> vector<8x8x1xf32>
    %54 = vector.broadcast %53 : vector<8x8x1xf32> to vector<8x8x8xf32>
    %55 = arith.mulf %50, %54 : vector<8x8x8xf32>
    %56 = arith.truncf %55 : vector<8x8x8xf32> to vector<8x8x8xbf16>
    "tpu.trace_start"() <{level = 10 : i32, message = "bqk,bke->bqe"}> : () -> ()
    %cst_20 = arith.constant dense<0.000000e+00> : vector<8x8x8xf32>
    %57 = tpu.matmul %56, %44, %cst_20 {dimension_numbers = #tpu.dot_dimension_numbers<[2], [1], [1], [2], [0, 0, 0, 1, 1, 2], [0], [0]>} : vector<8x8x8xbf16>, vector<8x8x8xbf16>, vector<8x8x8xf32> -> vector<8x8x8xf32>
    "tpu.trace_stop"() : () -> ()
    %58 = vector.extract_strided_slice %25 {offsets = [0, 0, 16], sizes = [8, 8, 8], strides = [1, 1, 1]} : vector<8x8x96xbf16> to vector<8x8x8xbf16>
    %59 = vector.extract_strided_slice %25 {offsets = [0, 0, 48], sizes = [8, 8, 8], strides = [1, 1, 1]} : vector<8x8x96xbf16> to vector<8x8x8xbf16>
    %60 = vector.extract_strided_slice %25 {offsets = [0, 0, 80], sizes = [8, 8, 8], strides = [1, 1, 1]} : vector<8x8x96xbf16> to vector<8x8x8xbf16>
    "tpu.trace_start"() <{level = 10 : i32, message = "bqe,bke->bqk"}> : () -> ()
    %cst_21 = arith.constant dense<0.000000e+00> : vector<8x8x8xf32>
    %61 = tpu.matmul %58, %59, %cst_21 {dimension_numbers = #tpu.dot_dimension_numbers<[2], [2], [1], [1], [0, 0, 0, 1, 1, 1], [0], [0]>} : vector<8x8x8xbf16>, vector<8x8x8xbf16>, vector<8x8x8xf32> -> vector<8x8x8xf32>
    "tpu.trace_stop"() : () -> ()
    %cst_22 = arith.constant dense<0xFF800000> : vector<8x8xf32>
    %62 = vector.multi_reduction <maximumf>, %61, %cst_22 [2] : vector<8x8x8xf32> to vector<8x8xf32>
    %63 = vector.shape_cast %62 : vector<8x8xf32> to vector<8x8x1xf32>
    %64 = vector.broadcast %63 : vector<8x8x1xf32> to vector<8x8x8xf32>
    %65 = arith.subf %61, %64 : vector<8x8x8xf32>
    %66 = math.exp %65 : vector<8x8x8xf32>
    %cst_23 = arith.constant dense<0.000000e+00> : vector<8x8xf32>
    %67 = vector.multi_reduction <add>, %66, %cst_23 [2] : vector<8x8x8xf32> to vector<8x8xf32>
    %68 = vector.shape_cast %67 : vector<8x8xf32> to vector<8x8x1xf32>
    %69 = tpu.reciprocal %68 {approx = true} : vector<8x8x1xf32> -> vector<8x8x1xf32>
    %70 = vector.broadcast %69 : vector<8x8x1xf32> to vector<8x8x8xf32>
    %71 = arith.mulf %66, %70 : vector<8x8x8xf32>
    %72 = arith.truncf %71 : vector<8x8x8xf32> to vector<8x8x8xbf16>
    "tpu.trace_start"() <{level = 10 : i32, message = "bqk,bke->bqe"}> : () -> ()
    %cst_24 = arith.constant dense<0.000000e+00> : vector<8x8x8xf32>
    %73 = tpu.matmul %72, %60, %cst_24 {dimension_numbers = #tpu.dot_dimension_numbers<[2], [1], [1], [2], [0, 0, 0, 1, 1, 2], [0], [0]>} : vector<8x8x8xbf16>, vector<8x8x8xbf16>, vector<8x8x8xf32> -> vector<8x8x8xf32>
    "tpu.trace_stop"() : () -> ()
    %74 = vector.extract_strided_slice %25 {offsets = [0, 0, 24], sizes = [8, 8, 8], strides = [1, 1, 1]} : vector<8x8x96xbf16> to vector<8x8x8xbf16>
    %75 = vector.extract_strided_slice %25 {offsets = [0, 0, 56], sizes = [8, 8, 8], strides = [1, 1, 1]} : vector<8x8x96xbf16> to vector<8x8x8xbf16>
    %76 = vector.extract_strided_slice %25 {offsets = [0, 0, 88], sizes = [8, 8, 8], strides = [1, 1, 1]} : vector<8x8x96xbf16> to vector<8x8x8xbf16>
    "tpu.trace_start"() <{level = 10 : i32, message = "bqe,bke->bqk"}> : () -> ()
    %cst_25 = arith.constant dense<0.000000e+00> : vector<8x8x8xf32>
    %77 = tpu.matmul %74, %75, %cst_25 {dimension_numbers = #tpu.dot_dimension_numbers<[2], [2], [1], [1], [0, 0, 0, 1, 1, 1], [0], [0]>} : vector<8x8x8xbf16>, vector<8x8x8xbf16>, vector<8x8x8xf32> -> vector<8x8x8xf32>
    "tpu.trace_stop"() : () -> ()
    %cst_26 = arith.constant dense<0xFF800000> : vector<8x8xf32>
    %78 = vector.multi_reduction <maximumf>, %77, %cst_26 [2] : vector<8x8x8xf32> to vector<8x8xf32>
    %79 = vector.shape_cast %78 : vector<8x8xf32> to vector<8x8x1xf32>
    %80 = vector.broadcast %79 : vector<8x8x1xf32> to vector<8x8x8xf32>
    %81 = arith.subf %77, %80 : vector<8x8x8xf32>
    %82 = math.exp %81 : vector<8x8x8xf32>
    %cst_27 = arith.constant dense<0.000000e+00> : vector<8x8xf32>
    %83 = vector.multi_reduction <add>, %82, %cst_27 [2] : vector<8x8x8xf32> to vector<8x8xf32>
    %84 = vector.shape_cast %83 : vector<8x8xf32> to vector<8x8x1xf32>
    %85 = tpu.reciprocal %84 {approx = true} : vector<8x8x1xf32> -> vector<8x8x1xf32>
    %86 = vector.broadcast %85 : vector<8x8x1xf32> to vector<8x8x8xf32>
    %87 = arith.mulf %82, %86 : vector<8x8x8xf32>
    %88 = arith.truncf %87 : vector<8x8x8xf32> to vector<8x8x8xbf16>
    "tpu.trace_start"() <{level = 10 : i32, message = "bqk,bke->bqe"}> : () -> ()
    %cst_28 = arith.constant dense<0.000000e+00> : vector<8x8x8xf32>
    %89 = tpu.matmul %88, %76, %cst_28 {dimension_numbers = #tpu.dot_dimension_numbers<[2], [1], [1], [2], [0, 0, 0, 1, 1, 2], [0], [0]>} : vector<8x8x8xbf16>, vector<8x8x8xbf16>, vector<8x8x8xf32> -> vector<8x8x8xf32>
    "tpu.trace_stop"() : () -> ()
    %90 = tpu.concatenate %41, %57, %73, %89 in 2 : vector<8x8x8xf32>, vector<8x8x8xf32>, vector<8x8x8xf32>, vector<8x8x8xf32> -> vector<8x8x32xf32>
    %91 = vector.shape_cast %90 : vector<8x8x32xf32> to vector<64x32xf32>
    %92 = arith.truncf %91 : vector<64x32xf32> to vector<64x32xbf16>
    %c0_29 = arith.constant 0 : index
    %c0_30 = arith.constant 0 : index
    %c0_31 = arith.constant 0 : index
    %93 = vector.load %arg7[%c0_29, %c0_30, %c0_31] : memref<2x32x32xbf16, #tpu.memory_space<vmem>>, vector<1x32x32xbf16>
    %94 = vector.shape_cast %93 : vector<1x32x32xbf16> to vector<32x32xbf16>
    %cst_32 = arith.constant dense<0.000000e+00> : vector<64x32xf32>
    %95 = tpu.matmul %92, %94, %cst_32 {dimension_numbers = #tpu.dot_dimension_numbers<[1], [0], [0], [1], [0, 0, 1, 1], [], []>} : vector<64x32xbf16>, vector<32x32xbf16>, vector<64x32xf32> -> vector<64x32xf32>
    %c0_33 = arith.constant 0 : index
    %c0_34 = arith.constant 0 : index
    %c0_35 = arith.constant 0 : index
    %96 = vector.load %arg8[%c0_33, %c0_34, %c0_35] : memref<2x1x32xf32, #tpu.memory_space<vmem>>, vector<1x1x32xf32>
    %97 = vector.shape_cast %96 : vector<1x1x32xf32> to vector<1x32xf32>
    %98 = vector.broadcast %97 : vector<1x32xf32> to vector<64x32xf32>
    %99 = arith.addf %95, %98 : vector<64x32xf32>
    %100 = arith.addf %15, %99 : vector<64x32xf32>
    %c0_36 = arith.constant 0 : index
    %c0_37 = arith.constant 0 : index
    %c0_38 = arith.constant 0 : index
    %101 = vector.load %arg9[%c0_36, %c0_37, %c0_38] : memref<2x1x32xf32, #tpu.memory_space<vmem>>, vector<1x1x32xf32>
    %102 = vector.shape_cast %101 : vector<1x1x32xf32> to vector<1x32xf32>
    %c0_39 = arith.constant 0 : index
    %c0_40 = arith.constant 0 : index
    %c0_41 = arith.constant 0 : index
    %103 = vector.load %arg10[%c0_39, %c0_40, %c0_41] : memref<2x1x32xf32, #tpu.memory_space<vmem>>, vector<1x1x32xf32>
    %104 = vector.shape_cast %103 : vector<1x1x32xf32> to vector<1x32xf32>
    %cst_42 = arith.constant dense<0.000000e+00> : vector<64xf32>
    %105 = vector.multi_reduction <add>, %100, %cst_42 [1] : vector<64x32xf32> to vector<64xf32>
    %106 = vector.shape_cast %105 : vector<64xf32> to vector<64x1xf32>
    %cst_43 = arith.constant 3.200000e+01 : f32
    %107 = vector.broadcast %cst_43 : f32 to vector<64x1xf32>
    %108 = arith.divf %106, %107 : vector<64x1xf32>
    %109 = vector.broadcast %108 : vector<64x1xf32> to vector<64x32xf32>
    %110 = arith.subf %100, %109 : vector<64x32xf32>
    %111 = arith.mulf %110, %110 : vector<64x32xf32>
    %cst_44 = arith.constant dense<0.000000e+00> : vector<64xf32>
    %112 = vector.multi_reduction <add>, %111, %cst_44 [1] : vector<64x32xf32> to vector<64xf32>
    %113 = vector.shape_cast %112 : vector<64xf32> to vector<64x1xf32>
    %cst_45 = arith.constant 3.200000e+01 : f32
    %114 = vector.broadcast %cst_45 : f32 to vector<64x1xf32>
    %115 = arith.divf %113, %114 : vector<64x1xf32>
    %116 = vector.broadcast %108 : vector<64x1xf32> to vector<64x32xf32>
    %117 = arith.subf %100, %116 : vector<64x32xf32>
    %cst_46 = arith.constant 9.99999974E-6 : f32
    %118 = vector.broadcast %cst_46 : f32 to vector<64x1xf32>
    %119 = arith.addf %115, %118 : vector<64x1xf32>
    %120 = math.rsqrt %119 : vector<64x1xf32>
    %121 = vector.broadcast %120 : vector<64x1xf32> to vector<64x32xf32>
    %122 = arith.mulf %117, %121 : vector<64x32xf32>
    %123 = vector.broadcast %102 : vector<1x32xf32> to vector<64x32xf32>
    %124 = arith.mulf %122, %123 : vector<64x32xf32>
    %125 = vector.broadcast %104 : vector<1x32xf32> to vector<64x32xf32>
    %126 = arith.addf %124, %125 : vector<64x32xf32>
    %127 = arith.truncf %126 : vector<64x32xf32> to vector<64x32xbf16>
    %c0_47 = arith.constant 0 : index
    %c0_48 = arith.constant 0 : index
    %c0_49 = arith.constant 0 : index
    %128 = vector.load %arg11[%c0_47, %c0_48, %c0_49] : memref<2x32x2048xbf16, #tpu.memory_space<vmem>>, vector<1x32x2048xbf16>
    %129 = vector.shape_cast %128 : vector<1x32x2048xbf16> to vector<32x2048xbf16>
    %cst_50 = arith.constant dense<0.000000e+00> : vector<64x2048xf32>
    %130 = tpu.matmul %127, %129, %cst_50 {dimension_numbers = #tpu.dot_dimension_numbers<[1], [0], [0], [1], [0, 0, 1, 1], [], []>} : vector<64x32xbf16>, vector<32x2048xbf16>, vector<64x2048xf32> -> vector<64x2048xf32>
    %c0_51 = arith.constant 0 : index
    %c0_52 = arith.constant 0 : index
    %c0_53 = arith.constant 0 : index
    %131 = vector.load %arg12[%c0_51, %c0_52, %c0_53] : memref<2x1x2048xf32, #tpu.memory_space<vmem>>, vector<1x1x2048xf32>
    %132 = vector.shape_cast %131 : vector<1x1x2048xf32> to vector<1x2048xf32>
    %133 = vector.broadcast %132 : vector<1x2048xf32> to vector<64x2048xf32>
    %134 = arith.addf %130, %133 : vector<64x2048xf32>
    %cst_54 = arith.constant 0.000000e+00 : f32
    %135 = vector.broadcast %cst_54 : f32 to vector<64x2048xf32>
    %136 = arith.maximumf %134, %135 : vector<64x2048xf32>
    %137 = arith.truncf %136 : vector<64x2048xf32> to vector<64x2048xbf16>
    %c0_55 = arith.constant 0 : index
    %c0_56 = arith.constant 0 : index
    %c0_57 = arith.constant 0 : index
    %138 = vector.load %arg13[%c0_55, %c0_56, %c0_57] : memref<2x2048x32xbf16, #tpu.memory_space<vmem>>, vector<1x2048x32xbf16>
    %139 = vector.shape_cast %138 : vector<1x2048x32xbf16> to vector<2048x32xbf16>
    %cst_58 = arith.constant dense<0.000000e+00> : vector<64x32xf32>
    %140 = tpu.matmul %137, %139, %cst_58 {dimension_numbers = #tpu.dot_dimension_numbers<[1], [0], [0], [1], [0, 0, 1, 1], [], []>} : vector<64x2048xbf16>, vector<2048x32xbf16>, vector<64x32xf32> -> vector<64x32xf32>
    %c0_59 = arith.constant 0 : index
    %c0_60 = arith.constant 0 : index
    %c0_61 = arith.constant 0 : index
    %141 = vector.load %arg14[%c0_59, %c0_60, %c0_61] : memref<2x1x32xf32, #tpu.memory_space<vmem>>, vector<1x1x32xf32>
    %142 = vector.shape_cast %141 : vector<1x1x32xf32> to vector<1x32xf32>
    %143 = vector.broadcast %142 : vector<1x32xf32> to vector<64x32xf32>
    %144 = arith.addf %140, %143 : vector<64x32xf32>
    %145 = arith.addf %126, %144 : vector<64x32xf32>
    %c0_62 = arith.constant 0 : index
    %c0_63 = arith.constant 0 : index
    %c0_64 = arith.constant 0 : index
    %146 = vector.load %arg15[%c0_62, %c0_63, %c0_64] : memref<2x1x32xf32, #tpu.memory_space<vmem>>, vector<1x1x32xf32>
    %147 = vector.shape_cast %146 : vector<1x1x32xf32> to vector<1x32xf32>
    %c0_65 = arith.constant 0 : index
    %c0_66 = arith.constant 0 : index
    %c0_67 = arith.constant 0 : index
    %148 = vector.load %arg16[%c0_65, %c0_66, %c0_67] : memref<2x1x32xf32, #tpu.memory_space<vmem>>, vector<1x1x32xf32>
    %149 = vector.shape_cast %148 : vector<1x1x32xf32> to vector<1x32xf32>
    %cst_68 = arith.constant dense<0.000000e+00> : vector<64xf32>
    %150 = vector.multi_reduction <add>, %145, %cst_68 [1] : vector<64x32xf32> to vector<64xf32>
    %151 = vector.shape_cast %150 : vector<64xf32> to vector<64x1xf32>
    %cst_69 = arith.constant 3.200000e+01 : f32
    %152 = vector.broadcast %cst_69 : f32 to vector<64x1xf32>
    %153 = arith.divf %151, %152 : vector<64x1xf32>
    %154 = vector.broadcast %153 : vector<64x1xf32> to vector<64x32xf32>
    %155 = arith.subf %145, %154 : vector<64x32xf32>
    %156 = arith.mulf %155, %155 : vector<64x32xf32>
    %cst_70 = arith.constant dense<0.000000e+00> : vector<64xf32>
    %157 = vector.multi_reduction <add>, %156, %cst_70 [1] : vector<64x32xf32> to vector<64xf32>
    %158 = vector.shape_cast %157 : vector<64xf32> to vector<64x1xf32>
    %cst_71 = arith.constant 3.200000e+01 : f32
    %159 = vector.broadcast %cst_71 : f32 to vector<64x1xf32>
    %160 = arith.divf %158, %159 : vector<64x1xf32>
    %161 = vector.broadcast %153 : vector<64x1xf32> to vector<64x32xf32>
    %162 = arith.subf %145, %161 : vector<64x32xf32>
    %cst_72 = arith.constant 9.99999974E-6 : f32
    %163 = vector.broadcast %cst_72 : f32 to vector<64x1xf32>
    %164 = arith.addf %160, %163 : vector<64x1xf32>
    %165 = math.rsqrt %164 : vector<64x1xf32>
    %166 = vector.broadcast %165 : vector<64x1xf32> to vector<64x32xf32>
    %167 = arith.mulf %162, %166 : vector<64x32xf32>
    %168 = vector.broadcast %147 : vector<1x32xf32> to vector<64x32xf32>
    %169 = arith.mulf %167, %168 : vector<64x32xf32>
    %170 = vector.broadcast %149 : vector<1x32xf32> to vector<64x32xf32>
    %171 = arith.addf %169, %170 : vector<64x32xf32>
    %172 = arith.truncf %171 : vector<64x32xf32> to vector<64x32xbf16>
    %c1 = arith.constant 1 : index
    %c0_73 = arith.constant 0 : index
    %c0_74 = arith.constant 0 : index
    %173 = vector.load %arg5[%c1, %c0_73, %c0_74] : memref<2x32x96xbf16, #tpu.memory_space<vmem>>, vector<1x32x96xbf16>
    %174 = vector.shape_cast %173 : vector<1x32x96xbf16> to vector<32x96xbf16>
    %cst_75 = arith.constant dense<0.000000e+00> : vector<64x96xf32>
    %175 = tpu.matmul %172, %174, %cst_75 {dimension_numbers = #tpu.dot_dimension_numbers<[1], [0], [0], [1], [0, 0, 1, 1], [], []>} : vector<64x32xbf16>, vector<32x96xbf16>, vector<64x96xf32> -> vector<64x96xf32>
    %c1_76 = arith.constant 1 : index
    %c0_77 = arith.constant 0 : index
    %c0_78 = arith.constant 0 : index
    %176 = vector.load %arg6[%c1_76, %c0_77, %c0_78] : memref<2x1x96xf32, #tpu.memory_space<vmem>>, vector<1x1x96xf32>
    %177 = vector.shape_cast %176 : vector<1x1x96xf32> to vector<1x96xf32>
    %178 = vector.broadcast %177 : vector<1x96xf32> to vector<64x96xf32>
    %179 = arith.addf %175, %178 : vector<64x96xf32>
    %180 = arith.truncf %179 : vector<64x96xf32> to vector<64x96xbf16>
    %181 = vector.shape_cast %180 : vector<64x96xbf16> to vector<8x8x96xbf16>
    %182 = vector.extract_strided_slice %181 {offsets = [0, 0, 0], sizes = [8, 8, 8], strides = [1, 1, 1]} : vector<8x8x96xbf16> to vector<8x8x8xbf16>
    %183 = vector.extract_strided_slice %181 {offsets = [0, 0, 32], sizes = [8, 8, 8], strides = [1, 1, 1]} : vector<8x8x96xbf16> to vector<8x8x8xbf16>
    %184 = vector.extract_strided_slice %181 {offsets = [0, 0, 64], sizes = [8, 8, 8], strides = [1, 1, 1]} : vector<8x8x96xbf16> to vector<8x8x8xbf16>
    "tpu.trace_start"() <{level = 10 : i32, message = "bqe,bke->bqk"}> : () -> ()
    %cst_79 = arith.constant dense<0.000000e+00> : vector<8x8x8xf32>
    %185 = tpu.matmul %182, %183, %cst_79 {dimension_numbers = #tpu.dot_dimension_numbers<[2], [2], [1], [1], [0, 0, 0, 1, 1, 1], [0], [0]>} : vector<8x8x8xbf16>, vector<8x8x8xbf16>, vector<8x8x8xf32> -> vector<8x8x8xf32>
    "tpu.trace_stop"() : () -> ()
    %cst_80 = arith.constant dense<0xFF800000> : vector<8x8xf32>
    %186 = vector.multi_reduction <maximumf>, %185, %cst_80 [2] : vector<8x8x8xf32> to vector<8x8xf32>
    %187 = vector.shape_cast %186 : vector<8x8xf32> to vector<8x8x1xf32>
    %188 = vector.broadcast %187 : vector<8x8x1xf32> to vector<8x8x8xf32>
    %189 = arith.subf %185, %188 : vector<8x8x8xf32>
    %190 = math.exp %189 : vector<8x8x8xf32>
    %cst_81 = arith.constant dense<0.000000e+00> : vector<8x8xf32>
    %191 = vector.multi_reduction <add>, %190, %cst_81 [2] : vector<8x8x8xf32> to vector<8x8xf32>
    %192 = vector.shape_cast %191 : vector<8x8xf32> to vector<8x8x1xf32>
    %193 = tpu.reciprocal %192 {approx = true} : vector<8x8x1xf32> -> vector<8x8x1xf32>
    %194 = vector.broadcast %193 : vector<8x8x1xf32> to vector<8x8x8xf32>
    %195 = arith.mulf %190, %194 : vector<8x8x8xf32>
    %196 = arith.truncf %195 : vector<8x8x8xf32> to vector<8x8x8xbf16>
    "tpu.trace_start"() <{level = 10 : i32, message = "bqk,bke->bqe"}> : () -> ()
    %cst_82 = arith.constant dense<0.000000e+00> : vector<8x8x8xf32>
    %197 = tpu.matmul %196, %184, %cst_82 {dimension_numbers = #tpu.dot_dimension_numbers<[2], [1], [1], [2], [0, 0, 0, 1, 1, 2], [0], [0]>} : vector<8x8x8xbf16>, vector<8x8x8xbf16>, vector<8x8x8xf32> -> vector<8x8x8xf32>
    "tpu.trace_stop"() : () -> ()
    %198 = vector.extract_strided_slice %181 {offsets = [0, 0, 8], sizes = [8, 8, 8], strides = [1, 1, 1]} : vector<8x8x96xbf16> to vector<8x8x8xbf16>
    %199 = vector.extract_strided_slice %181 {offsets = [0, 0, 40], sizes = [8, 8, 8], strides = [1, 1, 1]} : vector<8x8x96xbf16> to vector<8x8x8xbf16>
    %200 = vector.extract_strided_slice %181 {offsets = [0, 0, 72], sizes = [8, 8, 8], strides = [1, 1, 1]} : vector<8x8x96xbf16> to vector<8x8x8xbf16>
    "tpu.trace_start"() <{level = 10 : i32, message = "bqe,bke->bqk"}> : () -> ()
    %cst_83 = arith.constant dense<0.000000e+00> : vector<8x8x8xf32>
    %201 = tpu.matmul %198, %199, %cst_83 {dimension_numbers = #tpu.dot_dimension_numbers<[2], [2], [1], [1], [0, 0, 0, 1, 1, 1], [0], [0]>} : vector<8x8x8xbf16>, vector<8x8x8xbf16>, vector<8x8x8xf32> -> vector<8x8x8xf32>
    "tpu.trace_stop"() : () -> ()
    %cst_84 = arith.constant dense<0xFF800000> : vector<8x8xf32>
    %202 = vector.multi_reduction <maximumf>, %201, %cst_84 [2] : vector<8x8x8xf32> to vector<8x8xf32>
    %203 = vector.shape_cast %202 : vector<8x8xf32> to vector<8x8x1xf32>
    %204 = vector.broadcast %203 : vector<8x8x1xf32> to vector<8x8x8xf32>
    %205 = arith.subf %201, %204 : vector<8x8x8xf32>
    %206 = math.exp %205 : vector<8x8x8xf32>
    %cst_85 = arith.constant dense<0.000000e+00> : vector<8x8xf32>
    %207 = vector.multi_reduction <add>, %206, %cst_85 [2] : vector<8x8x8xf32> to vector<8x8xf32>
    %208 = vector.shape_cast %207 : vector<8x8xf32> to vector<8x8x1xf32>
    %209 = tpu.reciprocal %208 {approx = true} : vector<8x8x1xf32> -> vector<8x8x1xf32>
    %210 = vector.broadcast %209 : vector<8x8x1xf32> to vector<8x8x8xf32>
    %211 = arith.mulf %206, %210 : vector<8x8x8xf32>
    %212 = arith.truncf %211 : vector<8x8x8xf32> to vector<8x8x8xbf16>
    "tpu.trace_start"() <{level = 10 : i32, message = "bqk,bke->bqe"}> : () -> ()
    %cst_86 = arith.constant dense<0.000000e+00> : vector<8x8x8xf32>
    %213 = tpu.matmul %212, %200, %cst_86 {dimension_numbers = #tpu.dot_dimension_numbers<[2], [1], [1], [2], [0, 0, 0, 1, 1, 2], [0], [0]>} : vector<8x8x8xbf16>, vector<8x8x8xbf16>, vector<8x8x8xf32> -> vector<8x8x8xf32>
    "tpu.trace_stop"() : () -> ()
    %214 = vector.extract_strided_slice %181 {offsets = [0, 0, 16], sizes = [8, 8, 8], strides = [1, 1, 1]} : vector<8x8x96xbf16> to vector<8x8x8xbf16>
    %215 = vector.extract_strided_slice %181 {offsets = [0, 0, 48], sizes = [8, 8, 8], strides = [1, 1, 1]} : vector<8x8x96xbf16> to vector<8x8x8xbf16>
    %216 = vector.extract_strided_slice %181 {offsets = [0, 0, 80], sizes = [8, 8, 8], strides = [1, 1, 1]} : vector<8x8x96xbf16> to vector<8x8x8xbf16>
    "tpu.trace_start"() <{level = 10 : i32, message = "bqe,bke->bqk"}> : () -> ()
    %cst_87 = arith.constant dense<0.000000e+00> : vector<8x8x8xf32>
    %217 = tpu.matmul %214, %215, %cst_87 {dimension_numbers = #tpu.dot_dimension_numbers<[2], [2], [1], [1], [0, 0, 0, 1, 1, 1], [0], [0]>} : vector<8x8x8xbf16>, vector<8x8x8xbf16>, vector<8x8x8xf32> -> vector<8x8x8xf32>
    "tpu.trace_stop"() : () -> ()
    %cst_88 = arith.constant dense<0xFF800000> : vector<8x8xf32>
    %218 = vector.multi_reduction <maximumf>, %217, %cst_88 [2] : vector<8x8x8xf32> to vector<8x8xf32>
    %219 = vector.shape_cast %218 : vector<8x8xf32> to vector<8x8x1xf32>
    %220 = vector.broadcast %219 : vector<8x8x1xf32> to vector<8x8x8xf32>
    %221 = arith.subf %217, %220 : vector<8x8x8xf32>
    %222 = math.exp %221 : vector<8x8x8xf32>
    %cst_89 = arith.constant dense<0.000000e+00> : vector<8x8xf32>
    %223 = vector.multi_reduction <add>, %222, %cst_89 [2] : vector<8x8x8xf32> to vector<8x8xf32>
    %224 = vector.shape_cast %223 : vector<8x8xf32> to vector<8x8x1xf32>
    %225 = tpu.reciprocal %224 {approx = true} : vector<8x8x1xf32> -> vector<8x8x1xf32>
    %226 = vector.broadcast %225 : vector<8x8x1xf32> to vector<8x8x8xf32>
    %227 = arith.mulf %222, %226 : vector<8x8x8xf32>
    %228 = arith.truncf %227 : vector<8x8x8xf32> to vector<8x8x8xbf16>
    "tpu.trace_start"() <{level = 10 : i32, message = "bqk,bke->bqe"}> : () -> ()
    %cst_90 = arith.constant dense<0.000000e+00> : vector<8x8x8xf32>
    %229 = tpu.matmul %228, %216, %cst_90 {dimension_numbers = #tpu.dot_dimension_numbers<[2], [1], [1], [2], [0, 0, 0, 1, 1, 2], [0], [0]>} : vector<8x8x8xbf16>, vector<8x8x8xbf16>, vector<8x8x8xf32> -> vector<8x8x8xf32>
    "tpu.trace_stop"() : () -> ()
    %230 = vector.extract_strided_slice %181 {offsets = [0, 0, 24], sizes = [8, 8, 8], strides = [1, 1, 1]} : vector<8x8x96xbf16> to vector<8x8x8xbf16>
    %231 = vector.extract_strided_slice %181 {offsets = [0, 0, 56], sizes = [8, 8, 8], strides = [1, 1, 1]} : vector<8x8x96xbf16> to vector<8x8x8xbf16>
    %232 = vector.extract_strided_slice %181 {offsets = [0, 0, 88], sizes = [8, 8, 8], strides = [1, 1, 1]} : vector<8x8x96xbf16> to vector<8x8x8xbf16>
    "tpu.trace_start"() <{level = 10 : i32, message = "bqe,bke->bqk"}> : () -> ()
    %cst_91 = arith.constant dense<0.000000e+00> : vector<8x8x8xf32>
    %233 = tpu.matmul %230, %231, %cst_91 {dimension_numbers = #tpu.dot_dimension_numbers<[2], [2], [1], [1], [0, 0, 0, 1, 1, 1], [0], [0]>} : vector<8x8x8xbf16>, vector<8x8x8xbf16>, vector<8x8x8xf32> -> vector<8x8x8xf32>
    "tpu.trace_stop"() : () -> ()
    %cst_92 = arith.constant dense<0xFF800000> : vector<8x8xf32>
    %234 = vector.multi_reduction <maximumf>, %233, %cst_92 [2] : vector<8x8x8xf32> to vector<8x8xf32>
    %235 = vector.shape_cast %234 : vector<8x8xf32> to vector<8x8x1xf32>
    %236 = vector.broadcast %235 : vector<8x8x1xf32> to vector<8x8x8xf32>
    %237 = arith.subf %233, %236 : vector<8x8x8xf32>
    %238 = math.exp %237 : vector<8x8x8xf32>
    %cst_93 = arith.constant dense<0.000000e+00> : vector<8x8xf32>
    %239 = vector.multi_reduction <add>, %238, %cst_93 [2] : vector<8x8x8xf32> to vector<8x8xf32>
    %240 = vector.shape_cast %239 : vector<8x8xf32> to vector<8x8x1xf32>
    %241 = tpu.reciprocal %240 {approx = true} : vector<8x8x1xf32> -> vector<8x8x1xf32>
    %242 = vector.broadcast %241 : vector<8x8x1xf32> to vector<8x8x8xf32>
    %243 = arith.mulf %238, %242 : vector<8x8x8xf32>
    %244 = arith.truncf %243 : vector<8x8x8xf32> to vector<8x8x8xbf16>
    "tpu.trace_start"() <{level = 10 : i32, message = "bqk,bke->bqe"}> : () -> ()
    %cst_94 = arith.constant dense<0.000000e+00> : vector<8x8x8xf32>
    %245 = tpu.matmul %244, %232, %cst_94 {dimension_numbers = #tpu.dot_dimension_numbers<[2], [1], [1], [2], [0, 0, 0, 1, 1, 2], [0], [0]>} : vector<8x8x8xbf16>, vector<8x8x8xbf16>, vector<8x8x8xf32> -> vector<8x8x8xf32>
    "tpu.trace_stop"() : () -> ()
    %246 = tpu.concatenate %197, %213, %229, %245 in 2 : vector<8x8x8xf32>, vector<8x8x8xf32>, vector<8x8x8xf32>, vector<8x8x8xf32> -> vector<8x8x32xf32>
    %247 = vector.shape_cast %246 : vector<8x8x32xf32> to vector<64x32xf32>
    %248 = arith.truncf %247 : vector<64x32xf32> to vector<64x32xbf16>
    %c1_95 = arith.constant 1 : index
    %c0_96 = arith.constant 0 : index
    %c0_97 = arith.constant 0 : index
    %249 = vector.load %arg7[%c1_95, %c0_96, %c0_97] : memref<2x32x32xbf16, #tpu.memory_space<vmem>>, vector<1x32x32xbf16>
    %250 = vector.shape_cast %249 : vector<1x32x32xbf16> to vector<32x32xbf16>
    %cst_98 = arith.constant dense<0.000000e+00> : vector<64x32xf32>
    %251 = tpu.matmul %248, %250, %cst_98 {dimension_numbers = #tpu.dot_dimension_numbers<[1], [0], [0], [1], [0, 0, 1, 1], [], []>} : vector<64x32xbf16>, vector<32x32xbf16>, vector<64x32xf32> -> vector<64x32xf32>
    %c1_99 = arith.constant 1 : index
    %c0_100 = arith.constant 0 : index
    %c0_101 = arith.constant 0 : index
    %252 = vector.load %arg8[%c1_99, %c0_100, %c0_101] : memref<2x1x32xf32, #tpu.memory_space<vmem>>, vector<1x1x32xf32>
    %253 = vector.shape_cast %252 : vector<1x1x32xf32> to vector<1x32xf32>
    %254 = vector.broadcast %253 : vector<1x32xf32> to vector<64x32xf32>
    %255 = arith.addf %251, %254 : vector<64x32xf32>
    %256 = arith.addf %171, %255 : vector<64x32xf32>
    %c1_102 = arith.constant 1 : index
    %c0_103 = arith.constant 0 : index
    %c0_104 = arith.constant 0 : index
    %257 = vector.load %arg9[%c1_102, %c0_103, %c0_104] : memref<2x1x32xf32, #tpu.memory_space<vmem>>, vector<1x1x32xf32>
    %258 = vector.shape_cast %257 : vector<1x1x32xf32> to vector<1x32xf32>
    %c1_105 = arith.constant 1 : index
    %c0_106 = arith.constant 0 : index
    %c0_107 = arith.constant 0 : index
    %259 = vector.load %arg10[%c1_105, %c0_106, %c0_107] : memref<2x1x32xf32, #tpu.memory_space<vmem>>, vector<1x1x32xf32>
    %260 = vector.shape_cast %259 : vector<1x1x32xf32> to vector<1x32xf32>
    %cst_108 = arith.constant dense<0.000000e+00> : vector<64xf32>
    %261 = vector.multi_reduction <add>, %256, %cst_108 [1] : vector<64x32xf32> to vector<64xf32>
    %262 = vector.shape_cast %261 : vector<64xf32> to vector<64x1xf32>
    %cst_109 = arith.constant 3.200000e+01 : f32
    %263 = vector.broadcast %cst_109 : f32 to vector<64x1xf32>
    %264 = arith.divf %262, %263 : vector<64x1xf32>
    %265 = vector.broadcast %264 : vector<64x1xf32> to vector<64x32xf32>
    %266 = arith.subf %256, %265 : vector<64x32xf32>
    %267 = arith.mulf %266, %266 : vector<64x32xf32>
    %cst_110 = arith.constant dense<0.000000e+00> : vector<64xf32>
    %268 = vector.multi_reduction <add>, %267, %cst_110 [1] : vector<64x32xf32> to vector<64xf32>
    %269 = vector.shape_cast %268 : vector<64xf32> to vector<64x1xf32>
    %cst_111 = arith.constant 3.200000e+01 : f32
    %270 = vector.broadcast %cst_111 : f32 to vector<64x1xf32>
    %271 = arith.divf %269, %270 : vector<64x1xf32>
    %272 = vector.broadcast %264 : vector<64x1xf32> to vector<64x32xf32>
    %273 = arith.subf %256, %272 : vector<64x32xf32>
    %cst_112 = arith.constant 9.99999974E-6 : f32
    %274 = vector.broadcast %cst_112 : f32 to vector<64x1xf32>
    %275 = arith.addf %271, %274 : vector<64x1xf32>
    %276 = math.rsqrt %275 : vector<64x1xf32>
    %277 = vector.broadcast %276 : vector<64x1xf32> to vector<64x32xf32>
    %278 = arith.mulf %273, %277 : vector<64x32xf32>
    %279 = vector.broadcast %258 : vector<1x32xf32> to vector<64x32xf32>
    %280 = arith.mulf %278, %279 : vector<64x32xf32>
    %281 = vector.broadcast %260 : vector<1x32xf32> to vector<64x32xf32>
    %282 = arith.addf %280, %281 : vector<64x32xf32>
    %283 = arith.truncf %282 : vector<64x32xf32> to vector<64x32xbf16>
    %c1_113 = arith.constant 1 : index
    %c0_114 = arith.constant 0 : index
    %c0_115 = arith.constant 0 : index
    %284 = vector.load %arg11[%c1_113, %c0_114, %c0_115] : memref<2x32x2048xbf16, #tpu.memory_space<vmem>>, vector<1x32x2048xbf16>
    %285 = vector.shape_cast %284 : vector<1x32x2048xbf16> to vector<32x2048xbf16>
    %cst_116 = arith.constant dense<0.000000e+00> : vector<64x2048xf32>
    %286 = tpu.matmul %283, %285, %cst_116 {dimension_numbers = #tpu.dot_dimension_numbers<[1], [0], [0], [1], [0, 0, 1, 1], [], []>} : vector<64x32xbf16>, vector<32x2048xbf16>, vector<64x2048xf32> -> vector<64x2048xf32>
    %c1_117 = arith.constant 1 : index
    %c0_118 = arith.constant 0 : index
    %c0_119 = arith.constant 0 : index
    %287 = vector.load %arg12[%c1_117, %c0_118, %c0_119] : memref<2x1x2048xf32, #tpu.memory_space<vmem>>, vector<1x1x2048xf32>
    %288 = vector.shape_cast %287 : vector<1x1x2048xf32> to vector<1x2048xf32>
    %289 = vector.broadcast %288 : vector<1x2048xf32> to vector<64x2048xf32>
    %290 = arith.addf %286, %289 : vector<64x2048xf32>
    %cst_120 = arith.constant 0.000000e+00 : f32
    %291 = vector.broadcast %cst_120 : f32 to vector<64x2048xf32>
    %292 = arith.maximumf %290, %291 : vector<64x2048xf32>
    %293 = arith.truncf %292 : vector<64x2048xf32> to vector<64x2048xbf16>
    %c1_121 = arith.constant 1 : index
    %c0_122 = arith.constant 0 : index
    %c0_123 = arith.constant 0 : index
    %294 = vector.load %arg13[%c1_121, %c0_122, %c0_123] : memref<2x2048x32xbf16, #tpu.memory_space<vmem>>, vector<1x2048x32xbf16>
    %295 = vector.shape_cast %294 : vector<1x2048x32xbf16> to vector<2048x32xbf16>
    %cst_124 = arith.constant dense<0.000000e+00> : vector<64x32xf32>
    %296 = tpu.matmul %293, %295, %cst_124 {dimension_numbers = #tpu.dot_dimension_numbers<[1], [0], [0], [1], [0, 0, 1, 1], [], []>} : vector<64x2048xbf16>, vector<2048x32xbf16>, vector<64x32xf32> -> vector<64x32xf32>
    %c1_125 = arith.constant 1 : index
    %c0_126 = arith.constant 0 : index
    %c0_127 = arith.constant 0 : index
    %297 = vector.load %arg14[%c1_125, %c0_126, %c0_127] : memref<2x1x32xf32, #tpu.memory_space<vmem>>, vector<1x1x32xf32>
    %298 = vector.shape_cast %297 : vector<1x1x32xf32> to vector<1x32xf32>
    %299 = vector.broadcast %298 : vector<1x32xf32> to vector<64x32xf32>
    %300 = arith.addf %296, %299 : vector<64x32xf32>
    %301 = arith.addf %282, %300 : vector<64x32xf32>
    %c1_128 = arith.constant 1 : index
    %c0_129 = arith.constant 0 : index
    %c0_130 = arith.constant 0 : index
    %302 = vector.load %arg15[%c1_128, %c0_129, %c0_130] : memref<2x1x32xf32, #tpu.memory_space<vmem>>, vector<1x1x32xf32>
    %303 = vector.shape_cast %302 : vector<1x1x32xf32> to vector<1x32xf32>
    %c1_131 = arith.constant 1 : index
    %c0_132 = arith.constant 0 : index
    %c0_133 = arith.constant 0 : index
    %304 = vector.load %arg16[%c1_131, %c0_132, %c0_133] : memref<2x1x32xf32, #tpu.memory_space<vmem>>, vector<1x1x32xf32>
    %305 = vector.shape_cast %304 : vector<1x1x32xf32> to vector<1x32xf32>
    %cst_134 = arith.constant dense<0.000000e+00> : vector<64xf32>
    %306 = vector.multi_reduction <add>, %301, %cst_134 [1] : vector<64x32xf32> to vector<64xf32>
    %307 = vector.shape_cast %306 : vector<64xf32> to vector<64x1xf32>
    %cst_135 = arith.constant 3.200000e+01 : f32
    %308 = vector.broadcast %cst_135 : f32 to vector<64x1xf32>
    %309 = arith.divf %307, %308 : vector<64x1xf32>
    %310 = vector.broadcast %309 : vector<64x1xf32> to vector<64x32xf32>
    %311 = arith.subf %301, %310 : vector<64x32xf32>
    %312 = arith.mulf %311, %311 : vector<64x32xf32>
    %cst_136 = arith.constant dense<0.000000e+00> : vector<64xf32>
    %313 = vector.multi_reduction <add>, %312, %cst_136 [1] : vector<64x32xf32> to vector<64xf32>
    %314 = vector.shape_cast %313 : vector<64xf32> to vector<64x1xf32>
    %cst_137 = arith.constant 3.200000e+01 : f32
    %315 = vector.broadcast %cst_137 : f32 to vector<64x1xf32>
    %316 = arith.divf %314, %315 : vector<64x1xf32>
    %317 = vector.broadcast %309 : vector<64x1xf32> to vector<64x32xf32>
    %318 = arith.subf %301, %317 : vector<64x32xf32>
    %cst_138 = arith.constant 9.99999974E-6 : f32
    %319 = vector.broadcast %cst_138 : f32 to vector<64x1xf32>
    %320 = arith.addf %316, %319 : vector<64x1xf32>
    %321 = math.rsqrt %320 : vector<64x1xf32>
    %322 = vector.broadcast %321 : vector<64x1xf32> to vector<64x32xf32>
    %323 = arith.mulf %318, %322 : vector<64x32xf32>
    %324 = vector.broadcast %303 : vector<1x32xf32> to vector<64x32xf32>
    %325 = arith.mulf %323, %324 : vector<64x32xf32>
    %326 = vector.broadcast %305 : vector<1x32xf32> to vector<64x32xf32>
    %327 = arith.addf %325, %326 : vector<64x32xf32>
    %328 = vector.shape_cast %327 : vector<64x32xf32> to vector<8x8x32xf32>
    %cst_139 = arith.constant dense<0.000000e+00> : vector<8x32xf32>
    %329 = vector.multi_reduction <add>, %328, %cst_139 [1] : vector<8x8x32xf32> to vector<8x32xf32>
    %cst_140 = arith.constant 8.000000e+00 : f32
    %330 = vector.broadcast %cst_140 : f32 to vector<8x32xf32>
    %331 = arith.divf %329, %330 : vector<8x32xf32>
    %c0_141 = arith.constant 0 : index
    %c0_142 = arith.constant 0 : index
    %332 = vector.load %arg17[%c0_141, %c0_142] : memref<1x32xf32, #tpu.memory_space<vmem>>, vector<1x32xf32>
    "tpu.trace_start"() <{level = 10 : i32, message = "od,bd->ob"}> : () -> ()
    %cst_143 = arith.constant dense<0.000000e+00> : vector<1x8xf32>
    %333 = tpu.matmul %332, %331, %cst_143 {dimension_numbers = #tpu.dot_dimension_numbers<[1], [1], [0], [0], [0, 0, 1, 0], [], []>} : vector<1x32xf32>, vector<8x32xf32>, vector<1x8xf32> -> vector<1x8xf32>
    "tpu.trace_stop"() : () -> ()
    %c0_144 = arith.constant 0 : index
    %c0_145 = arith.constant 0 : index
    %334 = vector.load %arg18[%c0_144, %c0_145] : memref<1x1xf32, #tpu.memory_space<vmem>>, vector<1x1xf32>
    %335 = vector.broadcast %334 : vector<1x1xf32> to vector<1x8xf32>
    %336 = arith.addf %333, %335 : vector<1x8xf32>
    %c0_146 = arith.constant 0 : index
    %c0_147 = arith.constant 0 : index
    %337 = vector.load %arg19[%c0_146, %c0_147] : memref<1x8xf32, #tpu.memory_space<vmem>>, vector<1x8xf32>
    tpu.vector_store %arg19[%c0_146, %c0_147], %336 {strides = array<i32>} : memref<1x8xf32, #tpu.memory_space<vmem>>, vector<1x8xf32>,
    return
  }
  func.func @transform_0(%arg0: i32) -> (i32, i32) {
    %c0_i32 = arith.constant 0 : i32
    %c0_i32_0 = arith.constant 0 : i32
    return %arg0, %c0_i32 : i32, i32
  }
  func.func @transform_1(%arg0: i32) -> (i32, i32) {
    %c0_i32 = arith.constant 0 : i32
    %c0_i32_0 = arith.constant 0 : i32
    %c0_i32_1 = arith.constant 0 : i32
    return %c0_i32, %c0_i32_0 : i32, i32
  }
  func.func @transform_2(%arg0: i32) -> (i32, i32) {
    %c0_i32 = arith.constant 0 : i32
    %c0_i32_0 = arith.constant 0 : i32
    %c0_i32_1 = arith.constant 0 : i32
    return %c0_i32, %c0_i32_0 : i32, i32
  }
  func.func @transform_3(%arg0: i32) -> (i32, i32) {
    %c0_i32 = arith.constant 0 : i32
    %c0_i32_0 = arith.constant 0 : i32
    %c0_i32_1 = arith.constant 0 : i32
    return %c0_i32, %c0_i32_0 : i32, i32
  }
  func.func @transform_4(%arg0: i32) -> (i32, i32, i32) {
    %c0_i32 = arith.constant 0 : i32
    %c0_i32_0 = arith.constant 0 : i32
    %c0_i32_1 = arith.constant 0 : i32
    %c0_i32_2 = arith.constant 0 : i32
    return %c0_i32, %c0_i32_0, %c0_i32_1 : i32, i32, i32
  }
  func.func @transform_5(%arg0: i32) -> (i32, i32, i32) {
    %c0_i32 = arith.constant 0 : i32
    %c0_i32_0 = arith.constant 0 : i32
    %c0_i32_1 = arith.constant 0 : i32
    %c0_i32_2 = arith.constant 0 : i32
    return %c0_i32, %c0_i32_0, %c0_i32_1 : i32, i32, i32
  }
  func.func @transform_6(%arg0: i32) -> (i32, i32, i32) {
    %c0_i32 = arith.constant 0 : i32
    %c0_i32_0 = arith.constant 0 : i32
    %c0_i32_1 = arith.constant 0 : i32
    %c0_i32_2 = arith.constant 0 : i32
    return %c0_i32, %c0_i32_0, %c0_i32_1 : i32, i32, i32
  }
  func.func @transform_7(%arg0: i32) -> (i32, i32, i32) {
    %c0_i32 = arith.constant 0 : i32
    %c0_i32_0 = arith.constant 0 : i32
    %c0_i32_1 = arith.constant 0 : i32
    %c0_i32_2 = arith.constant 0 : i32
    return %c0_i32, %c0_i32_0, %c0_i32_1 : i32, i32, i32
  }
  func.func @transform_8(%arg0: i32) -> (i32, i32, i32) {
    %c0_i32 = arith.constant 0 : i32
    %c0_i32_0 = arith.constant 0 : i32
    %c0_i32_1 = arith.constant 0 : i32
    %c0_i32_2 = arith.constant 0 : i32
    return %c0_i32, %c0_i32_0, %c0_i32_1 : i32, i32, i32
  }
  func.func @transform_9(%arg0: i32) -> (i32, i32, i32) {
    %c0_i32 = arith.constant 0 : i32
    %c0_i32_0 = arith.constant 0 : i32
    %c0_i32_1 = arith.constant 0 : i32
    %c0_i32_2 = arith.constant 0 : i32
    return %c0_i32, %c0_i32_0, %c0_i32_1 : i32, i32, i32
  }
  func.func @transform_10(%arg0: i32) -> (i32, i32, i32) {
    %c0_i32 = arith.constant 0 : i32
    %c0_i32_0 = arith.constant 0 : i32
    %c0_i32_1 = arith.constant 0 : i32
    %c0_i32_2 = arith.constant 0 : i32
    return %c0_i32, %c0_i32_0, %c0_i32_1 : i32, i32, i32
  }
  func.func @transform_11(%arg0: i32) -> (i32, i32, i32) {
    %c0_i32 = arith.constant 0 : i32
    %c0_i32_0 = arith.constant 0 : i32
    %c0_i32_1 = arith.constant 0 : i32
    %c0_i32_2 = arith.constant 0 : i32
    return %c0_i32, %c0_i32_0, %c0_i32_1 : i32, i32, i32
  }
  func.func @transform_12(%arg0: i32) -> (i32, i32, i32) {
    %c0_i32 = arith.constant 0 : i32
    %c0_i32_0 = arith.constant 0 : i32
    %c0_i32_1 = arith.constant 0 : i32
    %c0_i32_2 = arith.constant 0 : i32
    return %c0_i32, %c0_i32_0, %c0_i32_1 : i32, i32, i32
  }
  func.func @transform_13(%arg0: i32) -> (i32, i32, i32) {
    %c0_i32 = arith.constant 0 : i32
    %c0_i32_0 = arith.constant 0 : i32
    %c0_i32_1 = arith.constant 0 : i32
    %c0_i32_2 = arith.constant 0 : i32
    return %c0_i32, %c0_i32_0, %c0_i32_1 : i32, i32, i32
  }
  func.func @transform_14(%arg0: i32) -> (i32, i32, i32) {
    %c0_i32 = arith.constant 0 : i32
    %c0_i32_0 = arith.constant 0 : i32
    %c0_i32_1 = arith.constant 0 : i32
    %c0_i32_2 = arith.constant 0 : i32
    return %c0_i32, %c0_i32_0, %c0_i32_1 : i32, i32, i32
  }
  func.func @transform_15(%arg0: i32) -> (i32, i32, i32) {
    %c0_i32 = arith.constant 0 : i32
    %c0_i32_0 = arith.constant 0 : i32
    %c0_i32_1 = arith.constant 0 : i32
    %c0_i32_2 = arith.constant 0 : i32
    return %c0_i32, %c0_i32_0, %c0_i32_1 : i32, i32, i32
  }
  func.func @transform_16(%arg0: i32) -> (i32, i32) {
    %c0_i32 = arith.constant 0 : i32
    %c0_i32_0 = arith.constant 0 : i32
    %c0_i32_1 = arith.constant 0 : i32
    return %c0_i32, %c0_i32_0 : i32, i32
  }
  func.func @transform_17(%arg0: i32) -> (i32, i32) {
    %c0_i32 = arith.constant 0 : i32
    %c0_i32_0 = arith.constant 0 : i32
    %c0_i32_1 = arith.constant 0 : i32
    return %c0_i32, %c0_i32_0 : i32, i32
  }
  func.func @transform_18(%arg0: i32) -> (i32, i32) {
    %c0_i32 = arith.constant 0 : i32
    %c0_i32_0 = arith.constant 0 : i32
    return %arg0, %c0_i32 : i32, i32
  }
}

</mosaic_0001>

<bundles_post_ra>
// kernel: tab_transformer_forward.1
= control target key start
LH: loop header
LB: loop body
LE: loop exit
PB: predicated region body
PF: predicated region fallthrough
CT: control target
= control target key end

     0   :  { %v63_v0 = vlaneseq  ;;  %vm185_vm0 = vcmask 261120   ;;  %vm17237_vm1 = vmmov 0   ;;  %vm289_vm2 = vcmask 64512   ;;  %s17241_s20 = smov 120   ;;  %s21723_s21 = smov 56   ;;  %s21660_s0 = inlined_call_operand.vmem [shape: f32[8,8], index: 0, kind: input, shape index: {}]   ;;  %s21661_s11 = inlined_call_operand.vmem [shape: f32[2,1,2048], index: 11, kind: input, shape index: {}]   ;;  %s21662_s4 = inlined_call_operand.vmem [shape: bf16[2,32,96], index: 4, kind: input, shape index: {}]   ;;  %s21663_s1 = inlined_call_operand.vmem [shape: f32[1,32], index: 1, kind: input, shape index: {}]   ;;  %s21664_s2 = inlined_call_operand.vmem [shape: f32[1,32], index: 2, kind: input, shape index: {}]   ;;  %s21665_s3 = inlined_call_operand.vmem [shape: f32[8,32], index: 3, kind: input, shape index: {}]   ;;  %s21666_s5 = inlined_call_operand.vmem [shape: f32[2,1,96], index: 5, kind: input, shape index: {}]   ;;  %s21667_s6 = inlined_call_operand.vmem [shape: bf16[2,32,32], index: 6, kind: input, shape index: {}]   ;;  %s21668_s7 = inlined_call_operand.vmem [shape: f32[2,1,32], index: 7, kind: input, shape index: {}]   ;;  %s21669_s10 = inlined_call_operand.vmem [shape: bf16[2,32,2048], index: 10, kind: input, shape index: {}]   ;;  %s21670_s8 = inlined_call_operand.vmem [shape: f32[2,1,32], index: 8, kind: input, shape index: {}]   ;;  %s21671_s9 = inlined_call_operand.vmem [shape: f32[2,1,32], index: 9, kind: input, shape index: {}]   ;;  %s21672_s12 = inlined_call_operand.vmem [shape: bf16[2,2048,32], index: 12, kind: input, shape index: {}]   ;;  %s21673_s13 = inlined_call_operand.vmem [shape: f32[2,1,32], index: 13, kind: input, shape index: {}]   ;;  %s21674_s14 = inlined_call_operand.vmem [shape: f32[2,1,32], index: 14, kind: input, shape index: {}]   ;;  %s21675_s15 = inlined_call_operand.vmem [shape: f32[2,1,32], index: 15, kind: input, shape index: {}]   ;;  %s21676_s17 = inlined_call_operand.<no memory space> [shape: f32[1,1], index: 17, kind: input, shape index: {}]   ;;  %s21677_s16 = inlined_call_operand.vmem [shape: f32[1,32], index: 16, kind: input, shape index: {}]   ;;  %s21678_s18 = inlined_call_operand.vmem [shape: f32[1,8], index: 18, kind: output, shape index: {}]  }
   0x1   :  { %21746 = sst [smem:[#allocation40_spill]] %s21660_s0  ;;  %v13873_v37 = vld [vmem:[%s21663_s1] ss:$0 sm:$0xff]  ;;  %s17239_s0 = smov 64   ;;  %vm773_vm3 = vcmask 1043456   ;;  %vm3897_vm4 = vcmask 130048  }
   0x2   :  { %21747 = sst [smem:[#allocation41_spill]] %s21661_s11  ;;  %v64_v1 = vshrl.u32 %v63_v0, 7  ;;  %v13874_v41 = vld [vmem:[%s21664_s2] ss:$0 sm:$0xff]  ;;  %s17240_s11 = smov 88   ;;  %vm3906_vm5 = vcmask 195584  }
   0x3   :  { %21748 = sst [smem:[#allocation42_spill]] %s21662_s4  ;;  %v149_v47 = vld [vmem:[%s21665_s3] sm:$0xff]  ;;  %s17238_s3 = smov 96   ;;  %vm13778_vm6 = vcmask 1041409   ;;  %vm13780_vm7 = vcmask 1042434   ;;  %vm13782_vm8 = vcmask 1043459  }
   0x4   :  { %s21749_s29 = sld [smem:[#allocation40_spill]]  ;;  %v17354_v4 = vsub.s32 2, %v64_v1  ;;  %v17359_v6 = vsub.s32 0, %v64_v1  ;;  %v17361_v7 = vsub.s32 3, %v64_v1  ;;  %v17363_v8 = vsub.s32 1, %v64_v1  ;;  %s21721_s22 = smov 80  }
   0x5   :  { %s21750_s19 = sld [smem:[#allocation41_spill]]  ;;  %v17386_v18 = vsub.s32 5, %v64_v1  ;;  %v17395_v22 = vsub.s32 4, %v64_v1  ;;  %v17406_v26 = vsub.s32 7, %v64_v1  ;;  %v17412_v29 = vsub.s32 6, %v64_v1  ;;  %s21719_s23 = smov 112  }
   0x6   :  { %21751 = vst [vmem:[#allocation3_spill] sm:$0xff] %v17354_v4  ;;  %21752 = vst [vmem:[#allocation4_spill] sm:$0xff] %v17359_v6  ;;  %s21755_s4 = sld [smem:[#allocation42_spill]]  ;;  %s21717_s24 = smov 48   ;;  %vm13784_vm9 = vcmask 1044484   ;;  %vm13786_vm10 = vcmask 1045509  }
   0x7   :  { %21753 = vst [vmem:[#allocation5_spill] sm:$0xff] %v17361_v7  ;;  %21754 = vst [vmem:[#allocation6_spill] sm:$0xff] %v17363_v8  ;;  %s21715_s25 = smov 72   ;;  %s21707_s26 = smov 104   ;;  %vm13788_vm11 = vcmask 1046534   ;;  %vm13790_vm12 = vcmask 1047559  }
   0x8   :  { %21760 = vst [vmem:[#allocation11_spill] sm:$0xff] %v17386_v18  ;;  %21763 = vst [vmem:[#allocation14_spill] sm:$0xff] %v17395_v22  ;;  %s21705_s27 = smov 40   ;;  %s21713_s28 = smov 8   ;;  %vm13867_vm13 = vcmask 57344  }
   0x9   :  { %21767 = vst [vmem:[#allocation18_spill] sm:$0xff] %v17406_v26  ;;  %21769 = vst [vmem:[#allocation20_spill] sm:$0xff] %v17412_v29  ;;  %s21845_s1 = smov 40   ;;  %s21846_s2 = smov 8  }
   0xa   :  { %v62_v2 = vld [vmem:[%s21749_s29] sm:$0xff]  ;;  %s21711_s29 = smov 16  }
   0xb   :  { %v4199_v3 = vld [vmem:[%s21750_s19 + $0x8] sm:$0xff]  ;;  %v14291_v5 = vld [vmem:[%s21750_s19 + $0x18] sm:$0xff]  ;;  %v80_v11 = vrot.slane %v62_v2, %v17354_v4  ;;  %v66_v14 = vrot.slane %v62_v2, %v17359_v6  ;;  %v87_v15 = vrot.slane %v62_v2, %v17361_v7  ;;  %v73_v19 = vrot.slane %v62_v2, %v17363_v8 }
   0xc   :  { %v16650_v9 = vld [vmem:[%s21755_s4 + $0x8] sm:$0xff]   ;;  %v16651_v10 = vld [vmem:[%s21755_s4] sm:$0xff]   ;;  %v17373_v12 = vrot.slane %v4199_v3, %v17354_v4  ;;  %v17376_v13 = vrot.slane %v14291_v5, %v17354_v4  ;;  %v17381_v16 = vrot.slane %v4199_v3, %v17361_v7  ;;  %v17384_v17 = vrot.slane %v14291_v5, %v17361_v7 }
   0xd   :  { %15686 = vmatprep.subr.bf16.mxu0 %v16650_v9  ;;  %82 = vbcast.lane.b32.xlu1 %v80_v11, 256  ;;  %v17390_v20 = vrot.slane %v4199_v3, %v17363_v8  ;;  %v17393_v21 = vrot.slane %v14291_v5, %v17363_v8  ;;  %v17398_v23 = vrot.slane %v4199_v3, %v17386_v18 }
   0xe   :  { %21756 = vst [vmem:[#allocation7_spill] sm:$0xff] %v17373_v12  ;;  %21757 = vst [vmem:[#allocation8_spill] sm:$0xff] %v17376_v13  ;;  %68 = vbcast.lane.b32.xlu0 %v66_v14, 256  ;;  %15687 = vmatpush3.bf16.msra.mxu0 %v16650_v9  ;;  %v17401_v24 = vrot.slane %v14291_v5, %v17386_v18  ;;  %v17404_v25 = vrot.slane %v4199_v3, %v17395_v22 }
   0xf   :  { %21758 = vst [vmem:[#allocation9_spill] sm:$0xff] %v17381_v16  ;;  %21759 = vst [vmem:[#allocation10_spill] sm:$0xff] %v17384_v17  ;;  %15688 = vmatprep.subr.bf16.mxu0 %v16651_v10  ;;  %v101_v27 = vrot.slane %v62_v2, %v17386_v18  ;;  %v17410_v28 = vrot.slane %v14291_v5, %v17395_v22  ;;  %v94_v30 = vrot.slane %v62_v2, %v17395_v22 }
  0x10   :  { %21761 = vst [vmem:[#allocation12_spill] sm:$0xff] %v17390_v20  ;;  %21762 = vst [vmem:[#allocation13_spill] sm:$0xff] %v17393_v21  ;;  %v17416_v31 = vrot.slane %v4199_v3, %v17406_v26  ;;  %v17419_v32 = vrot.slane %v14291_v5, %v17406_v26  ;;  %v17422_v33 = vrot.slane %v4199_v3, %v17412_v29  ;;  %16507 = vmatprep.subr.bf16.mxu1 %v16650_v9 }
  0x11   :  { %21764 = vst [vmem:[#allocation15_spill] sm:$0xff] %v17398_v23  ;;  %21765 = vst [vmem:[#allocation16_spill] sm:$0xff] %v17401_v24  ;;  %89 = vbcast.lane.b32.xlu1 %v87_v15, 256  ;;  %v17425_v34 = vrot.slane %v14291_v5, %v17412_v29  ;;  %v115_v35 = vrot.slane %v62_v2, %v17406_v26  ;;  %16509 = vmatpush3.bf16.msra.mxu1 %v16650_v9 }
  0x12   :  { %21766 = vst [vmem:[#allocation17_spill] sm:$0xff] %v17404_v25  ;;  %21768 = vst [vmem:[#allocation19_spill] sm:$0xff] %v17410_v28  ;;  %75 = vbcast.lane.b32.xlu0 %v73_v19, 256  ;;  %15689 = vmatpush3.bf16.msra.mxu0 %v16651_v10  ;;  %v108_v36 = vrot.slane %v62_v2, %v17412_v29 }
  0x13   :  { %21770 = vst [vmem:[#allocation21_spill] sm:$0xff] %v17416_v31  ;;  %21771 = vst [vmem:[#allocation22_spill] sm:$0xff] %v17419_v32  ;;  %16508 = vmatprep.subr.bf16.mxu1 %v16651_v10 }
  0x14   :  { %21772 = vst [vmem:[#allocation23_spill] sm:$0xff] %v17422_v33  ;;  %21773 = vst [vmem:[#allocation24_spill] sm:$0xff] %v17425_v34 }
  0x15   :  { %103 = vbcast.lane.b32.xlu1 %v101_v27, 256  ;;  %16510 = vmatpush3.bf16.msra.mxu1 %v16651_v10 }
  0x16   :  { %96 = vbcast.lane.b32.xlu0 %v94_v30, 256  ;;  %v21681_v30 = vmov 0.0  }
  0x17   :  { %15698 = vmatprep.subr.bf16.mxu1 %v21681_v30  ;;  %15710 = vmatprep.subr.bf16.mxu0 %v21681_v30 }
  0x19   :  { %117 = vbcast.lane.b32.xlu1 %v115_v35, 256 }
  0x1a   :  { %110 = vbcast.lane.b32.xlu0 %v108_v36, 256  ;;  %v13875_v36 = vld [vmem:[%s21666_s5] ss:$0 sm:$0xff] }
  0x7f   :  { %v83_v38 = vpop.permute.xlu1 %82 }
  0x80   :  { %v128_v39 = vmul.f32 %v13873_v37, %v83_v38  ;;  %v69_v40 = vpop.permute.xlu0 %68 }
  0x81   :  { %v126_v42 = vmul.f32 %v13873_v37, %v69_v40 }
  0x82   :  { %v143_v44 = vadd.f32 %v13874_v41, %v128_v39 }
  0x83   :  { %v90_v43 = vpop.permute.xlu1 %89  ;;  %v141_v48 = vadd.f32 %v13874_v41, %v126_v42 }
  0x84   :  { %v129_v45 = vmul.f32 %v13873_v37, %v90_v43  ;;  %v76_v46 = vpop.permute.xlu0 %75  ;;  %v17438_v53 = vadd.f32 %v149_v47, %v143_v44 }
  0x85   :  { %v127_v49 = vmul.f32 %v13873_v37, %v76_v46  ;;  %v17442_v58 = vadd.f32 %v149_v47, %v141_v48 }
  0x86   :  { %v144_v50 = vadd.f32 %v13874_v41, %v129_v45 }
  0x87   :  { %v142_v51 = vadd.f32 %v13874_v41, %v127_v49  ;;  %v104_v52 = vpop.permute.xlu1 %103 }
  0x88   :  { %v17440_v54 = vadd.f32 %v149_v47, %v144_v50  ;;  %v131_v55 = vmul.f32 %v13873_v37, %v104_v52  ;;  %v97_v56 = vpop.permute.xlu0 %96 }
  0x89   :  { %v130_v57 = vmul.f32 %v13873_v37, %v97_v56  ;;  %v17444_v59 = vadd.f32 %v149_v47, %v142_v51 }
  0x8a   :  { %v146_v60 = vadd.f32 %v13874_v41, %v131_v55  ;;  %v159_v61 = vpack.c.bf16 %v17440_v54, %v17438_v53 }
  0x8b   :  { %v145_v62 = vadd.f32 %v13874_v41, %v130_v57  ;;  %v118_v63 = vpop.permute.xlu1 %117  ;;  %v158_v0 = vpack.c.bf16 %v17444_v59, %v17442_v58 }
  0x8c   :  { %v133_v1 = vmul.f32 %v13873_v37, %v118_v63  ;;  %v111_v2 = vpop.permute.xlu0 %110  ;;  %v17450_v3 = vadd.f32 %v149_v47, %v146_v60 }
  0x8d   :  { %v132_v5 = vmul.f32 %v13873_v37, %v111_v2  ;;  %15690 = vmatprep.mubr.msk.bf16.mxu0 %vm185_vm0, %v158_v0  ;;  %v17453_v9 = vadd.f32 %v149_v47, %v145_v62 }
  0x8e   :  { %v148_v10 = vadd.f32 %v13874_v41, %v133_v1  ;;  %15691 = vmatmul.mubr.msk.bf16.vlgmr.msra.gmra.mxu0 %vm185_vm0, %v159_v61 }
  0x8f   :  { %v147_v11 = vadd.f32 %v13874_v41, %v132_v5  ;;  %v160_v14 = vpack.c.bf16 %v17450_v3, %v17453_v9  ;;  %15712 = vmatprep.mubr.msk.bf16.mxu0 %vm17237_vm1, %v21681_v30 }
  0x90   :  { %v17458_v15 = vadd.f32 %v149_v47, %v148_v10 }
  0x91   :  { %v17460_v19 = vadd.f32 %v149_v47, %v147_v11  ;;  %15694 = vmatprep.mubr.msk.bf16.mxu1 %vm185_vm0, %v160_v14 }
  0x93   :  { %v161_v27 = vpack.c.bf16 %v17458_v15, %v17460_v19 }
  0x95   :  { %15695 = vmatmul.mubr.msk.bf16.vlgmr.msra.gmra.mxu1 %vm185_vm0, %v161_v27 }
  0x96   :  { %15700 = vmatprep.mubr.msk.bf16.mxu1 %vm17237_vm1, %v21681_v30 }
 0x14e   :  { %v15692_v35 = vpop.f32.mrf.mxu0 }
 0x14f   :  { %v241_v40 = vadd.f32 %v15692_v35, %v13875_v36 }
 0x150   :  { %v232_v37 = vpop.f32.mrf.mxu0 }
 0x151   :  { %v233_v38 = vadd.f32 %v13875_v36, %v232_v37  ;;  %v17479_v45 = vpack.c.bf16 %v241_v40, %v241_v40 }
 0x152   :  { %v15693_v39 = vpop.f32.mrf.mxu0 }
 0x153   :  { %v17475_v41 = vpack.c.bf16 %v233_v38, %v233_v38  ;;  %v244_v46 = vadd.f32 %v15693_v39, %v13875_v36 }
 0x154   :  { %v235_v42 = vpop.f32.mrf.mxu0 }
 0x155   :  { %v236_v43 = vadd.f32 %v13875_v36, %v235_v42  ;;  %287 = vrot.lane.b32.xlu0 %v17475_v41, %s17238_s3  ;;  %v15696_v44 = vpop.f32.mrf.mxu1  ;;  %v17489_v52 = vpack.c.bf16 %v244_v46, %v244_v46 }
 0x156   :  { %v257_v55 = vadd.f32 %v15696_v44, %v13875_v36 }
 0x157   :  { %v17481_v47 = vpack.c.bf16 %v236_v43, %v236_v43  ;;  %v248_v48 = vpop.f32.mrf.mxu1 }
 0x158   :  { %v249_v49 = vadd.f32 %v13875_v36, %v248_v48  ;;  %v17497_v61 = vpack.c.bf16 %v257_v55, %v257_v55 }
 0x159   :  { %336 = vrot.lane.b32.xlu1 %v17481_v47, %s17238_s3  ;;  %384 = vrot.lane.b32.xlu0 %v17479_v45, %s17238_s3  ;;  %v15697_v50 = vpop.f32.mrf.mxu1 }
 0x15a   :  { %v17487_v51 = vpack.c.bf16 %v249_v49, %v249_v49  ;;  %v260_v62 = vadd.f32 %v15697_v50, %v13875_v36 }
 0x15b   :  { %v251_v56 = vpop.f32.mrf.mxu1 }
 0x15c   :  { %v252_v57 = vadd.f32 %v13875_v36, %v251_v56  ;;  %v17503_v63 = vpack.c.bf16 %v260_v62, %v260_v62 }
 0x15d   :  { %432 = vrot.lane.b32.xlu1 %v17489_v52, %s17238_s3  ;;  %480 = vrot.lane.b32.xlu0 %v17487_v51, %s17238_s3 }
 0x15e   :  { %v17495_v60 = vpack.c.bf16 %v252_v57, %v252_v57 }
 0x161   :  { %528 = vrot.lane.b32.xlu1 %v17495_v60, %s17238_s3  ;;  %576 = vrot.lane.b32.xlu0 %v17497_v61, %s17238_s3 }
 0x165   :  { %624 = vrot.lane.b32.xlu1 %v17503_v63, %s17238_s3  ;;  %817 = vrot.lane.b32.xlu0 %v17481_v47, %s17239_s0 }
 0x169   :  { %768 = vrot.lane.b32.xlu1 %v17475_v41, %s17239_s0 }
 0x16d   :  { %865 = vrot.lane.b32.xlu1 %v17479_v45, %s17239_s0 }
 0x1c7   :  { %v288_v0 = vpop.permute.xlu0 %287 }
 0x1c8   :  { %v294_v1 = vsel %vm289_vm2, %v288_v0, 0 }
 0x1c9   :  { %15699 = vmatpush3.bf16.xpose.msra.mxu1 %v294_v1 }
 0x1ca   :  { %15704 = vmatprep.subr.bf16.mxu1 %v21681_v30 }
 0x1cb   :  { %v337_v2 = vpop.permute.xlu1 %336  ;;  %v385_v5 = vpop.permute.xlu0 %384 }
 0x1cc   :  { %v390_v10 = vsel %vm289_vm2, %v385_v5, 0  ;;  %v342_v14 = vsel %vm289_vm2, %v337_v2, 0 }
 0x1cd   :  { %15711 = vmatpush3.bf16.xpose.msra.mxu0 %v390_v10 }
 0x1ce   :  { %15722 = vmatprep.subr.bf16.mxu0 %v21681_v30 }
 0x1cf   :  { %v433_v11 = vpop.permute.xlu1 %432  ;;  %v481_v27 = vpop.permute.xlu0 %480 }
 0x1d0   :  { %15701 = vmatmul.mubr.msk.bf16.vlgmr.msra.gmra.mxu1 %vm289_vm2, %v17475_v41  ;;  %v486_v35 = vsel %vm289_vm2, %v481_v27, 0  ;;  %v438_v37 = vsel %vm289_vm2, %v433_v11, 0 }
 0x1d1   :  { %15705 = vmatpush3.bf16.xpose.msra.mxu1 %v342_v14  ;;  %15706 = vmatprep.mubr.msk.bf16.mxu1 %vm17237_vm1, %v21681_v30 }
 0x1d2   :  { %15716 = vmatprep.subr.bf16.mxu1 %v21681_v30 }
 0x1d3   :  { %v529_v36 = vpop.permute.xlu1 %528  ;;  %v577_v38 = vpop.permute.xlu0 %576 }
 0x1d4   :  { %15713 = vmatmul.mubr.msk.bf16.vlgmr.msra.gmra.mxu0 %vm289_vm2, %v17479_v45  ;;  %v582_v40 = vsel %vm289_vm2, %v577_v38, 0  ;;  %v534_v42 = vsel %vm289_vm2, %v529_v36, 0 }
 0x1d5   :  { %15723 = vmatpush3.bf16.xpose.msra.mxu0 %v486_v35  ;;  %15724 = vmatprep.mubr.msk.bf16.mxu0 %vm17237_vm1, %v21681_v30 }
 0x1d6   :  { %15734 = vmatprep.subr.bf16.mxu0 %v21681_v30 }
 0x1d7   :  { %v625_v39 = vpop.permute.xlu1 %624  ;;  %v818_v48 = vpop.permute.xlu0 %817 }
 0x1d8   :  { %15707 = vmatmul.mubr.msk.bf16.vlgmr.msra.gmra.mxu1 %vm289_vm2, %v17481_v47  ;;  %v630_v46 = vsel %vm289_vm2, %v625_v39, 0  ;;  %v823_v49 = vsel %vm773_vm3, %v818_v48, 0 }
 0x1d9   :  { %15717 = vmatpush3.bf16.xpose.msra.mxu1 %v438_v37  ;;  %15718 = vmatprep.mubr.msk.bf16.mxu1 %vm17237_vm1, %v21681_v30 }
 0x1da   :  { %15728 = vmatprep.subr.bf16.mxu1 %v21681_v30 }
 0x1db   :  { %v769_v43 = vpop.permute.xlu1 %768 }
 0x1dc   :  { %15725 = vmatmul.mubr.msk.bf16.vlgmr.msra.gmra.mxu0 %vm289_vm2, %v17487_v51  ;;  %v775_v44 = vsel %vm773_vm3, %v769_v43, 0 }
 0x1dd   :  { %15735 = vmatpush3.bf16.xpose.msra.mxu0 %v582_v40  ;;  %15736 = vmatprep.mubr.msk.bf16.mxu0 %vm17237_vm1, %v21681_v30 }
 0x1de   :  { %15746 = vmatprep.subr.bf16.mxu0 %v21681_v30 }
 0x1e0   :  { %15719 = vmatmul.mubr.msk.bf16.vlgmr.msra.gmra.mxu1 %vm289_vm2, %v17489_v52 }
 0x1e1   :  { %15729 = vmatpush3.bf16.xpose.msra.mxu1 %v534_v42  ;;  %15730 = vmatprep.mubr.msk.bf16.mxu1 %vm17237_vm1, %v21681_v30 }
 0x1e2   :  { %15740 = vmatprep.subr.bf16.mxu1 %v21681_v30 }
 0x1e4   :  { %15737 = vmatmul.mubr.msk.bf16.vlgmr.msra.gmra.mxu0 %vm289_vm2, %v17497_v61 }
 0x1e5   :  { %15747 = vmatpush3.bf16.msra.mxu0 %v775_v44  ;;  %15748 = vmatprep.mubr.msk.bf16.mxu0 %vm17237_vm1, %v21681_v30 }
 0x1e6   :  { %15758 = vmatprep.subr.bf16.mxu0 %v21681_v30 }
 0x1e8   :  { %15731 = vmatmul.mubr.msk.bf16.vlgmr.msra.gmra.mxu1 %vm289_vm2, %v17495_v60 }
 0x1e9   :  { %15741 = vmatpush3.bf16.xpose.msra.mxu1 %v630_v46  ;;  %15742 = vmatprep.mubr.msk.bf16.mxu1 %vm17237_vm1, %v21681_v30 }
 0x1ea   :  { %15752 = vmatprep.subr.bf16.mxu1 %v21681_v30 }
 0x1f0   :  { %15743 = vmatmul.mubr.msk.bf16.vlgmr.msra.gmra.mxu1 %vm289_vm2, %v17503_v63 }
 0x1f1   :  { %15753 = vmatpush3.bf16.msra.mxu1 %v823_v49  ;;  %15754 = vmatprep.mubr.msk.bf16.mxu1 %vm17237_vm1, %v21681_v30 }
 0x1f2   :  { %15764 = vmatprep.subr.bf16.mxu1 %v21681_v30 }
 0x290   :  { %v330_v50 = vpop.f32.mrf.mxu1 }
 0x291   :  { %v672_v10 = vsel %vm289_vm2, %v330_v50, -inf }
 0x292   :  { %v15702_v55 = vpop.f32.mrf.mxu1 }
 0x294   :  { %v333_v56 = vpop.f32.mrf.mxu1  ;;  %v426_v57 = vpop.f32.mrf.mxu0 }
 0x295   :  { %v678_v62 = vsel %vm289_vm2, %v426_v57, -inf }
 0x296   :  { %v15703_v0 = vpop.f32.mrf.mxu1  ;;  %679 = vmax.xlane.f32.xlu0 %v678_v62  ;;  %v15714_v1 = vpop.f32.mrf.mxu0 }
 0x298   :  { %v378_v2 = vpop.f32.mrf.mxu1  ;;  %v429_v5 = vpop.f32.mrf.mxu0 }
 0x299   :  { %v675_v43 = vsel %vm289_vm2, %v378_v2, -inf }
 0x29a   :  { %v15708_v11 = vpop.f32.mrf.mxu1  ;;  %673 = vmax.xlane.f32.xlu0 %v672_v10  ;;  %v15715_v14 = vpop.f32.mrf.mxu0 }
 0x29c   :  { %v381_v27 = vpop.f32.mrf.mxu1  ;;  %v17567_v35 = vpop.f32.mrf.mxu0 }
 0x29d   :  { %v684_v36 = vsel %vm289_vm2, %v17567_v35, -inf }
 0x29e   :  { %v15709_v37 = vpop.f32.mrf.mxu1  ;;  %685 = vmax.xlane.f32.xlu1 %v684_v36  ;;  %v15726_v38 = vpop.f32.mrf.mxu0 }
 0x2a0   :  { %v474_v39 = vpop.f32.mrf.mxu1  ;;  %v525_v40 = vpop.f32.mrf.mxu0 }
 0x2a1   :  { %v681_v42 = vsel %vm289_vm2, %v474_v39, -inf }
 0x2a2   :  { %v15720_v44 = vpop.f32.mrf.mxu1  ;;  %682 = vmax.xlane.f32.xlu0 %v681_v42  ;;  %676 = vmax.xlane.f32.xlu1 %v675_v43  ;;  %v15727_v46 = vpop.f32.mrf.mxu0 }
 0x2a4   :  { %v477_v48 = vpop.f32.mrf.mxu1  ;;  %v17573_v49 = vpop.f32.mrf.mxu0 }
 0x2a5   :  { %v690_v55 = vsel %vm289_vm2, %v17573_v49, -inf  ;;  %v17583_v48 = vpop.permute.xlu1 %865 }
 0x2a6   :  { %v15721_v56 = vpop.f32.mrf.mxu1  ;;  %691 = vmax.xlane.f32.xlu1 %v690_v55  ;;  %v15738_v62 = vpop.f32.mrf.mxu0 }
 0x2a8   :  { %v570_v0 = vpop.f32.mrf.mxu1  ;;  %v621_v1 = vpop.f32.mrf.mxu0 }
 0x2a9   :  { %v687_v5 = vsel %vm289_vm2, %v570_v0, -inf }
 0x2aa   :  { %v15732_v10 = vpop.f32.mrf.mxu1  ;;  %688 = vmax.xlane.f32.xlu0 %v687_v5  ;;  %v15739_v11 = vpop.f32.mrf.mxu0 }
 0x2ac   :  { %v573_v14 = vpop.f32.mrf.mxu1 }
 0x2ae   :  { %v15733_v27 = vpop.f32.mrf.mxu1 }
 0x2b0   :  { %v666_v36 = vpop.f32.mrf.mxu1 }
 0x2b1   :  { %v693_v37 = vsel %vm289_vm2, %v666_v36, -inf }
 0x2b2   :  { %v15744_v38 = vpop.f32.mrf.mxu1  ;;  %694 = vmax.xlane.f32.xlu0 %v693_v37 }
 0x2b4   :  { %v669_v40 = vpop.f32.mrf.mxu1 }
 0x2b6   :  { %v15745_v42 = vpop.f32.mrf.mxu1 }
 0x2b7   :  { %913 = vrot.lane.b32.xlu1 %v17489_v52, %s17239_s0 }
 0x2c8   :  { %961 = vrot.lane.b32.xlu0 %v17487_v51, %s17239_s0 }
 0x31f   :  { %v680_v43 = vpop.xlane.xlu0 %679 }
 0x320   :  { %v698_v44 = vsub.f32 %v426_v57, %v680_v43 }
 0x322   :  { %v708_v46 = vmul.f32 1.442695, %v698_v44 }
 0x323   :  { %v674_v55 = vpop.xlane.xlu0 %673 }
 0x324   :  { %16914 = vpow2.f32 %v708_v46  ;;  %v696_v56 = vsub.f32 %v330_v50, %v674_v55 }
 0x326   :  { %v704_v62 = vmul.f32 1.442695, %v696_v56 }
 0x327   :  { %v686_v1 = vpop.xlane.xlu1 %685 }
 0x328   :  { %16916 = vpow2.f32 %v704_v62  ;;  %v700_v62 = vsub.f32 %v17567_v35, %v686_v1 }
 0x32b   :  { %v677_v5 = vpop.xlane.xlu1 %676  ;;  %v683_v10 = vpop.xlane.xlu0 %682 }
 0x32c   :  { %v697_v11 = vsub.f32 %v378_v2, %v677_v5  ;;  %v699_v14 = vsub.f32 %v474_v39, %v683_v10  ;;  %v712_v10 = vmul.f32 1.442695, %v700_v62 }
 0x32e   :  { %v706_v27 = vmul.f32 1.442695, %v697_v11  ;;  %v710_v37 = vmul.f32 1.442695, %v699_v14 }
 0x32f   :  { %v692_v5 = vpop.xlane.xlu1 %691 }
 0x330   :  { %16918 = vpow2.f32 %v706_v27  ;;  %v702_v11 = vsub.f32 %v17573_v49, %v692_v5 }
 0x331   :  { %v17585_v38 = vpop.eup %16914  ;;  %16920 = vpow2.f32 %v710_v37 }
 0x332   :  { %v726_v57 = vsel %vm289_vm2, %v17585_v38, 0.0  ;;  %v716_v14 = vmul.f32 1.442695, %v702_v11 }
 0x333   :  { %727 = vadd.xlane.f32.xlu1 %v726_v57  ;;  %v689_v40 = vpop.xlane.xlu0 %688 }
 0x334   :  { %v701_v42 = vsub.f32 %v570_v0, %v689_v40 }
 0x335   :  { %v17589_v50 = vpop.eup %16916 }
 0x336   :  { %v714_v43 = vmul.f32 1.442695, %v701_v42  ;;  %v720_v44 = vsel %vm289_vm2, %v17589_v50, 0.0 }
 0x337   :  { %721 = vadd.xlane.f32.xlu1 %v720_v44 }
 0x338   :  { %16922 = vpow2.f32 %v714_v43 }
 0x339   :  { %16924 = vpow2.f32 %v712_v10 }
 0x33a   :  { %16926 = vpow2.f32 %v716_v14 }
 0x33b   :  { %v695_v27 = vpop.xlane.xlu0 %694 }
 0x33c   :  { %v703_v37 = vsub.f32 %v666_v36, %v695_v27  ;;  %v914_v36 = vpop.permute.xlu1 %913 }
 0x33d   :  { %v17593_v2 = vpop.eup %16918 }
 0x33e   :  { %v723_v39 = vsel %vm289_vm2, %v17593_v2, 0.0  ;;  %v17597_v46 = vpop.eup %16920  ;;  %v718_v57 = vmul.f32 1.442695, %v703_v37  ;;  %v871_v37 = vsel %vm773_vm3, %v17583_v48, 0 }
 0x33f   :  { %724 = vadd.xlane.f32.xlu0 %v723_v39  ;;  %v729_v55 = vsel %vm289_vm2, %v17597_v46, 0.0 }
 0x340   :  { %16928 = vpow2.f32 %v718_v57 }
 0x343   :  { %730 = vadd.xlane.f32.xlu0 %v729_v55  ;;  %v962_v55 = vpop.permute.xlu0 %961 }
 0x344   :  { %v967_v48 = vsel %vm773_vm3, %v962_v55, 0 }
 0x345   :  { %v17601_v0 = vpop.eup %16922 }
 0x346   :  { %v735_v56 = vsel %vm289_vm2, %v17601_v0, 0.0  ;;  %v17611_v40 = vpop.eup %16924 }
 0x347   :  { %736 = vadd.xlane.f32.xlu0 %v735_v56  ;;  %v732_v42 = vsel %vm289_vm2, %v17611_v40, 0.0  ;;  %v17615_v35 = vpop.eup %16926 }
 0x348   :  { %1009 = vrot.lane.b32.xlu1 %v17495_v60, %s17239_s0  ;;  %v738_v49 = vsel %vm289_vm2, %v17615_v35, 0.0 }
 0x34d   :  { %v17619_v1 = vpop.eup %16928 }
 0x34e   :  { %v741_v43 = vsel %vm289_vm2, %v17619_v1, 0.0 }
 0x35d   :  { %1057 = vrot.lane.b32.xlu0 %v17497_v61, %s17239_s0 }
 0x36c   :  { %733 = vadd.xlane.f32.xlu1 %v732_v42 }
 0x370   :  { %739 = vadd.xlane.f32.xlu1 %v738_v49 }
 0x37c   :  { %742 = vadd.xlane.f32.xlu0 %v741_v43 }
 0x381   :  { %1105 = vrot.lane.b32.xlu1 %v17503_v63, %s17239_s0 }
 0x385   :  { %1205 = vrot.lane.b32.xlu1 %v17481_v47, %s17240_s11 }
 0x389   :  { %1203 = vrot.lane.b32.xlu1 %v17481_v47, %s17241_s20 }
 0x38d   :  { %1305 = vrot.lane.b32.xlu1 %v17489_v52, %s17240_s11 }
 0x391   :  { %1303 = vrot.lane.b32.xlu1 %v17489_v52, %s17241_s20 }
 0x392   :  { %1155 = vrot.lane.b32.xlu0 %v17475_v41, %s17240_s11 }
 0x395   :  { %1405 = vrot.lane.b32.xlu1 %v17495_v60, %s17240_s11 }
 0x396   :  { %1153 = vrot.lane.b32.xlu0 %v17475_v41, %s17241_s20 }
 0x399   :  { %1403 = vrot.lane.b32.xlu1 %v17495_v60, %s17241_s20 }
 0x39a   :  { %1255 = vrot.lane.b32.xlu0 %v17479_v45, %s17240_s11 }
 0x39d   :  { %1505 = vrot.lane.b32.xlu1 %v17503_v63, %s17240_s11 }
 0x39e   :  { %1253 = vrot.lane.b32.xlu0 %v17479_v45, %s17241_s20 }
 0x3a1   :  { %1503 = vrot.lane.b32.xlu1 %v17503_v63, %s17241_s20 }
 0x3a2   :  { %1355 = vrot.lane.b32.xlu0 %v17487_v51, %s17240_s11 }
 0x3a5   :  { %1649 = vrot.lane.b32.xlu1 %v17475_v41, %s21723_s21 }
 0x3a6   :  { %1353 = vrot.lane.b32.xlu0 %v17487_v51, %s17241_s20 }
 0x3a9   :  { %1745 = vrot.lane.b32.xlu1 %v17479_v45, %s21723_s21 }
 0x3aa   :  { %1455 = vrot.lane.b32.xlu0 %v17497_v61, %s17240_s11 }
 0x3ad   :  { %1793 = vrot.lane.b32.xlu1 %v17489_v52, %s21723_s21 }
 0x3ae   :  { %1453 = vrot.lane.b32.xlu0 %v17497_v61, %s17241_s20 }
 0x3b2   :  { %1697 = vrot.lane.b32.xlu0 %v17481_v47, %s21723_s21 }
 0x3bc   :  { %v728_v44 = vpop.xlane.xlu1 %727 }
 0x3c0   :  { %v722_v39 = vpop.xlane.xlu1 %721 }
 0x3c1   :  { %16930 = vrcp.f32 %v722_v39  ;;  %v919_v39 = vsel %vm773_vm3, %v914_v36, 0 }
 0x3c2   :  { %16932 = vrcp.f32 %v728_v44 }
 0x3c8   :  { %v725_v56 = vpop.xlane.xlu0 %724 }
 0x3c9   :  { %16934 = vrcp.f32 %v725_v56 }
 0x3cc   :  { %v731_v62 = vpop.xlane.xlu0 %730 }
 0x3cd   :  { %16936 = vrcp.f32 %v731_v62 }
 0x3ce   :  { %v16931_v5 = vpop.eup %16930 }
 0x3cf   :  { %v752_v10 = vmul.f32 %v16931_v5, %v17589_v50  ;;  %v16933_v14 = vpop.eup %16932 }
 0x3d0   :  { %v737_v27 = vpop.xlane.xlu0 %736  ;;  %v754_v57 = vmul.f32 %v16933_v14, %v17585_v38 }
 0x3d1   :  { %v760_v11 = vpack.c.bf16 %v752_v10, %v752_v10  ;;  %16938 = vrcp.f32 %v737_v27 }
 0x3d2   :  { %v762_v43 = vpack.c.bf16 %v754_v57, %v754_v57 }
 0x3d3   :  { %15749 = vmatmul.mubr.msk.bf16.vlgmr.msra.gmra.mxu0 %vm289_vm2, %v760_v11 }
 0x3d4   :  { %15759 = vmatpush3.bf16.msra.mxu0 %v871_v37  ;;  %15760 = vmatprep.mubr.msk.bf16.mxu0 %vm17237_vm1, %v21681_v30  ;;  %v1058_v27 = vpop.permute.xlu0 %1057 }
 0x3d5   :  { %15770 = vmatprep.subr.bf16.mxu0 %v21681_v30 }
 0x3d6   :  { %v16935_v42 = vpop.eup %16934 }
 0x3d7   :  { %v753_v50 = vmul.f32 %v16935_v42, %v17593_v2  ;;  %v1010_v2 = vpop.permute.xlu1 %1009 }
 0x3d8   :  { %v1015_v56 = vsel %vm773_vm3, %v1010_v2, 0 }
 0x3d9   :  { %v761_v49 = vpack.c.bf16 %v753_v50, %v753_v50 }
 0x3da   :  { %v16937_v44 = vpop.eup %16936 }
 0x3db   :  { %15755 = vmatmul.mubr.msk.bf16.vlgmr.msra.gmra.mxu1 %vm289_vm2, %v761_v49  ;;  %15761 = vmatmul.mubr.msk.bf16.vlgmr.msra.gmra.mxu0 %vm289_vm2, %v762_v43  ;;  %v755_v38 = vmul.f32 %v16937_v44, %v17597_v46  ;;  %v1063_v44 = vsel %vm773_vm3, %v1058_v27, 0 }
 0x3dc   :  { %15765 = vmatpush3.bf16.msra.mxu1 %v919_v39  ;;  %15771 = vmatpush3.bf16.msra.mxu0 %v967_v48 }
 0x3dd   :  { %15766 = vmatprep.mubr.msk.bf16.mxu1 %vm17237_vm1, %v21681_v30  ;;  %15776 = vmatprep.subr.bf16.mxu1 %v21681_v30  ;;  %v763_v36 = vpack.c.bf16 %v755_v38, %v755_v38 }
 0x3de   :  { %15772 = vmatprep.mubr.msk.bf16.mxu0 %vm17237_vm1, %v21681_v30  ;;  %15782 = vmatprep.subr.bf16.mxu0 %v21681_v30  ;;  %v16939_v55 = vpop.eup %16938 }
 0x3df   :  { %v757_v62 = vmul.f32 %v16939_v55, %v17601_v0 }
 0x3e1   :  { %v765_v46 = vpack.c.bf16 %v757_v62, %v757_v62 }
 0x3e3   :  { %15767 = vmatmul.mubr.msk.bf16.vlgmr.msra.gmra.mxu1 %vm289_vm2, %v763_v36 }
 0x3e4   :  { %15777 = vmatpush3.bf16.msra.mxu1 %v1015_v56  ;;  %15778 = vmatprep.mubr.msk.bf16.mxu1 %vm17237_vm1, %v21681_v30 }
 0x3e5   :  { %15788 = vmatprep.subr.bf16.mxu1 %v21681_v30 }
 0x3eb   :  { %15779 = vmatmul.mubr.msk.bf16.vlgmr.msra.gmra.mxu1 %vm289_vm2, %v765_v46 }
 0x3ec   :  { %15790 = vmatprep.mubr.msk.bf16.mxu1 %vm17237_vm1, %v21681_v30 }
 0x3f5   :  { %v734_v5 = vpop.xlane.xlu1 %733 }
 0x3f6   :  { %16940 = vrcp.f32 %v734_v5 }
 0x3f9   :  { %v740_v10 = vpop.xlane.xlu1 %739 }
 0x3fa   :  { %16942 = vrcp.f32 %v740_v10 }
 0x3fd   :  { %v1106_v11 = vpop.permute.xlu1 %1105 }
 0x3fe   :  { %v1111_v14 = vsel %vm773_vm3, %v1106_v11, 0 }
 0x3ff   :  { %15789 = vmatpush3.bf16.msra.mxu1 %v1111_v14 }
 0x400   :  { %15800 = vmatprep.subr.bf16.mxu1 %v21681_v30 }
 0x401   :  { %v1206_v0 = vpop.permute.xlu1 %1205 }
 0x402   :  { %v1211_v11 = vsel %vm289_vm2, %v1206_v0, 0 }
 0x403   :  { %v16941_v37 = vpop.eup %16940 }
 0x404   :  { %v756_v57 = vmul.f32 %v16941_v37, %v17611_v40 }
 0x405   :  { %v1204_v42 = vpop.permute.xlu1 %1203  ;;  %v743_v50 = vpop.xlane.xlu0 %742 }
 0x406   :  { %16944 = vrcp.f32 %v743_v50  ;;  %v764_v49 = vpack.c.bf16 %v756_v57, %v756_v57 }
 0x407   :  { %v16943_v43 = vpop.eup %16942 }
 0x408   :  { %15773 = vmatmul.mubr.msk.bf16.vlgmr.msra.gmra.mxu0 %vm289_vm2, %v764_v49  ;;  %v758_v38 = vmul.f32 %v16943_v43, %v17615_v35 }
 0x409   :  { %15783 = vmatpush3.bf16.msra.mxu0 %v1063_v44  ;;  %v1306_v39 = vpop.permute.xlu1 %1305  ;;  %v1156_v48 = vpop.permute.xlu0 %1155  ;;  %15784 = vmatprep.mubr.msk.bf16.mxu0 %vm17237_vm1, %v21681_v30 }
 0x40a   :  { %15794 = vmatprep.subr.bf16.mxu0 %v21681_v30  ;;  %v766_v2 = vpack.c.bf16 %v758_v38, %v758_v38  ;;  %v1161_v55 = vsel %vm289_vm2, %v1156_v48, 0  ;;  %v1311_v37 = vsel %vm289_vm2, %v1306_v39, 0 }
 0x40d   :  { %v1154_v40 = vpop.permute.xlu0 %1153  ;;  %v1304_v36 = vpop.permute.xlu1 %1303 }
 0x410   :  { %15785 = vmatmul.mubr.msk.bf16.vlgmr.msra.gmra.mxu0 %vm289_vm2, %v766_v2 }
 0x411   :  { %15795 = vmatpush3.bf16.xpose.msra.mxu0 %v1161_v55  ;;  %v1256_v56 = vpop.permute.xlu0 %1255  ;;  %15796 = vmatprep.mubr.msk.bf16.mxu0 %vm17237_vm1, %v21681_v30  ;;  %v1406_v5 = vpop.permute.xlu1 %1405 }
 0x412   :  { %15806 = vmatprep.subr.bf16.mxu0 %v21681_v30  ;;  %v1261_v14 = vsel %vm289_vm2, %v1256_v56, 0  ;;  %v1411_v44 = vsel %vm289_vm2, %v1406_v5, 0 }
 0x413   :  { %v16945_v62 = vpop.eup %16944 }
 0x414   :  { %v759_v46 = vmul.f32 %v16945_v62, %v17619_v1 }
 0x415   :  { %v1254_v10 = vpop.permute.xlu0 %1253  ;;  %v1404_v1 = vpop.permute.xlu1 %1403 }
 0x416   :  { %v767_v35 = vpack.c.bf16 %v759_v46, %v759_v46 }
 0x418   :  { %15791 = vmatmul.mubr.msk.bf16.vlgmr.msra.gmra.mxu1 %vm289_vm2, %v767_v35  ;;  %15797 = vmatmul.mubr.msk.bf16.vlgmr.msra.gmra.mxu0 %vm289_vm2, %v1154_v40 }
 0x419   :  { %15801 = vmatpush3.bf16.xpose.msra.mxu1 %v1211_v11  ;;  %15807 = vmatpush3.bf16.xpose.msra.mxu0 %v1261_v14  ;;  %v1356_v27 = vpop.permute.xlu0 %1355  ;;  %v1506_v50 = vpop.permute.xlu1 %1505 }
 0x41a   :  { %15802 = vmatprep.mubr.msk.bf16.mxu1 %vm17237_vm1, %v21681_v30  ;;  %15808 = vmatprep.mubr.msk.bf16.mxu0 %vm17237_vm1, %v21681_v30  ;;  %v1361_v57 = vsel %vm289_vm2, %v1356_v27, 0  ;;  %v1511_v38 = vsel %vm289_vm2, %v1506_v50, 0 }
 0x41b   :  { %15812 = vmatprep.subr.bf16.mxu1 %v21681_v30  ;;  %15818 = vmatprep.subr.bf16.mxu0 %v21681_v30 }
 0x41d   :  { %v1354_v0 = vpop.permute.xlu0 %1353  ;;  %v1504_v43 = vpop.permute.xlu1 %1503 }
 0x420   :  { %15803 = vmatmul.mubr.msk.bf16.vlgmr.msra.gmra.mxu1 %vm289_vm2, %v1204_v42  ;;  %15809 = vmatmul.mubr.msk.bf16.vlgmr.msra.gmra.mxu0 %vm289_vm2, %v1254_v10 }
 0x421   :  { %15813 = vmatpush3.bf16.xpose.msra.mxu1 %v1311_v37  ;;  %15819 = vmatpush3.bf16.xpose.msra.mxu0 %v1361_v57  ;;  %v1456_v49 = vpop.permute.xlu0 %1455  ;;  %v1650_v39 = vpop.permute.xlu1 %1649 }
 0x422   :  { %15814 = vmatprep.mubr.msk.bf16.mxu1 %vm17237_vm1, %v21681_v30  ;;  %15820 = vmatprep.mubr.msk.bf16.mxu0 %vm17237_vm1, %v21681_v30  ;;  %v1461_v42 = vsel %vm289_vm2, %v1456_v49, 0  ;;  %v1655_v40 = vsel %vm773_vm3, %v1650_v39, 0 }
 0x423   :  { %15824 = vmatprep.subr.bf16.mxu1 %v21681_v30  ;;  %15830 = vmatprep.subr.bf16.mxu0 %v21681_v30 }
 0x425   :  { %v1454_v48 = vpop.permute.xlu0 %1453 }
 0x428   :  { %15815 = vmatmul.mubr.msk.bf16.vlgmr.msra.gmra.mxu1 %vm289_vm2, %v1304_v36  ;;  %15821 = vmatmul.mubr.msk.bf16.vlgmr.msra.gmra.mxu0 %vm289_vm2, %v1354_v0 }
 0x429   :  { %15825 = vmatpush3.bf16.xpose.msra.mxu1 %v1411_v44  ;;  %15831 = vmatpush3.bf16.xpose.msra.mxu0 %v1461_v42  ;;  %v1698_v2 = vpop.permute.xlu0 %1697 }
 0x42a   :  { %15826 = vmatprep.mubr.msk.bf16.mxu1 %vm17237_vm1, %v21681_v30  ;;  %15832 = vmatprep.mubr.msk.bf16.mxu0 %vm17237_vm1, %v21681_v30  ;;  %v1703_v36 = vsel %vm773_vm3, %v1698_v2, 0 }
 0x42b   :  { %15836 = vmatprep.subr.bf16.mxu1 %v21681_v30  ;;  %15842 = vmatprep.subr.bf16.mxu0 %v21681_v30 }
 0x430   :  { %15827 = vmatmul.mubr.msk.bf16.vlgmr.msra.gmra.mxu1 %vm289_vm2, %v1404_v1  ;;  %15833 = vmatmul.mubr.msk.bf16.vlgmr.msra.gmra.mxu0 %vm289_vm2, %v1454_v48 }
 0x431   :  { %15837 = vmatpush3.bf16.xpose.msra.mxu1 %v1511_v38  ;;  %15843 = vmatpush3.bf16.msra.mxu0 %v1655_v40 }
 0x432   :  { %15838 = vmatprep.mubr.msk.bf16.mxu1 %vm17237_vm1, %v21681_v30  ;;  %15848 = vmatprep.subr.bf16.mxu1 %v21681_v30 }
 0x433   :  { %15844 = vmatprep.mubr.msk.bf16.mxu0 %vm17237_vm1, %v21681_v30  ;;  %15854 = vmatprep.subr.bf16.mxu0 %v21681_v30 }
 0x438   :  { %15839 = vmatmul.mubr.msk.bf16.vlgmr.msra.gmra.mxu1 %vm289_vm2, %v1504_v43 }
 0x439   :  { %15849 = vmatpush3.bf16.msra.mxu1 %v1703_v36  ;;  %15850 = vmatprep.mubr.msk.bf16.mxu1 %vm17237_vm1, %v21681_v30 }
 0x43a   :  { %15860 = vmatprep.subr.bf16.mxu1 %v21681_v30 }
 0x493   :  { %v17754_v55 = vpop.f32.mrf.mxu0 }
 0x495   :  { %v15750_v56 = vpop.f32.mrf.mxu0 }
 0x497   :  { %v814_v62 = vpop.f32.mrf.mxu0 }
 0x499   :  { %v15751_v46 = vpop.f32.mrf.mxu0 }
 0x49b   :  { %v17756_v5 = vpop.f32.mrf.mxu1  ;;  %v17758_v10 = vpop.f32.mrf.mxu0 }
 0x49d   :  { %v15756_v35 = vpop.f32.mrf.mxu1  ;;  %v15762_v11 = vpop.f32.mrf.mxu0 }
 0x49f   :  { %v862_v14 = vpop.f32.mrf.mxu1  ;;  %v910_v27 = vpop.f32.mrf.mxu0 }
 0x4a1   :  { %v15757_v1 = vpop.f32.mrf.mxu1  ;;  %v15763_v0 = vpop.f32.mrf.mxu0 }
 0x4a3   :  { %v17760_v37 = vpop.f32.mrf.mxu1 }
 0x4a5   :  { %v15768_v57 = vpop.f32.mrf.mxu1 }
 0x4a7   :  { %v958_v50 = vpop.f32.mrf.mxu1 }
 0x4a9   :  { %v15769_v49 = vpop.f32.mrf.mxu1 }
 0x4ab   :  { %v17762_v43 = vpop.f32.mrf.mxu1 }
 0x4ad   :  { %v15780_v44 = vpop.f32.mrf.mxu1 }
 0x4af   :  { %v1054_v42 = vpop.f32.mrf.mxu1 }
 0x4b1   :  { %v15781_v39 = vpop.f32.mrf.mxu1 }
 0x4c8   :  { %v17764_v48 = vpop.f32.mrf.mxu0 }
 0x4ca   :  { %v15774_v38 = vpop.f32.mrf.mxu0 }
 0x4cc   :  { %v1006_v40 = vpop.f32.mrf.mxu0 }
 0x4ce   :  { %v15775_v2 = vpop.f32.mrf.mxu0 }
 0x4d0   :  { %v17766_v36 = vpop.f32.mrf.mxu0 }
 0x4d2   :  { %v15786_v56 = vpop.f32.mrf.mxu0 }
 0x4d4   :  { %v1102_v62 = vpop.f32.mrf.mxu0 }
 0x4d6   :  { %v15787_v46 = vpop.f32.mrf.mxu0 }
 0x4d8   :  { %v17768_v35 = vpop.f32.mrf.mxu1  ;;  %v1197_v11 = vpop.f32.mrf.mxu0 }
 0x4d9   :  { %v1553_v14 = vsel %vm289_vm2, %v1197_v11, -inf }
 0x4da   :  { %v15792_v27 = vpop.f32.mrf.mxu1  ;;  %1554 = vmax.xlane.f32.xlu0 %v1553_v14  ;;  %v15798_v1 = vpop.f32.mrf.mxu0 }
 0x4dc   :  { %v1150_v0 = vpop.f32.mrf.mxu1  ;;  %v1200_v57 = vpop.f32.mrf.mxu0 }
 0x4de   :  { %v15793_v50 = vpop.f32.mrf.mxu1  ;;  %v15799_v49 = vpop.f32.mrf.mxu0 }
 0x4e0   :  { %v1247_v44 = vpop.f32.mrf.mxu1  ;;  %v1297_v42 = vpop.f32.mrf.mxu0 }
 0x4e1   :  { %v1556_v39 = vsel %vm289_vm2, %v1247_v44, -inf  ;;  %v1559_v38 = vsel %vm289_vm2, %v1297_v42, -inf }
 0x4e2   :  { %1557 = vmax.xlane.f32.xlu1 %v1556_v39  ;;  %v15804_v40 = vpop.f32.mrf.mxu1  ;;  %1560 = vmax.xlane.f32.xlu0 %v1559_v38  ;;  %v15810_v2 = vpop.f32.mrf.mxu0 }
 0x4e4   :  { %v1250_v56 = vpop.f32.mrf.mxu1  ;;  %v1300_v62 = vpop.f32.mrf.mxu0 }
 0x4e6   :  { %v15805_v46 = vpop.f32.mrf.mxu1  ;;  %v15811_v27 = vpop.f32.mrf.mxu0 }
 0x4e8   :  { %v1347_v14 = vpop.f32.mrf.mxu1  ;;  %v1397_v1 = vpop.f32.mrf.mxu0 }
 0x4e9   :  { %v1562_v0 = vsel %vm289_vm2, %v1347_v14, -inf  ;;  %v1565_v57 = vsel %vm289_vm2, %v1397_v1, -inf }
 0x4ea   :  { %v15816_v50 = vpop.f32.mrf.mxu1  ;;  %1563 = vmax.xlane.f32.xlu0 %v1562_v0  ;;  %1566 = vmax.xlane.f32.xlu1 %v1565_v57  ;;  %v15822_v49 = vpop.f32.mrf.mxu0 }
 0x4ec   :  { %v1350_v30 = vpop.f32.mrf.mxu1  ;;  %v1400_v34 = vpop.f32.mrf.mxu0 }
 0x4ee   :  { %v15817_v39 = vpop.f32.mrf.mxu1  ;;  %v15823_v40 = vpop.f32.mrf.mxu0 }
 0x4f0   :  { %v1447_v38 = vpop.f32.mrf.mxu1  ;;  %v17775_v2 = vpop.f32.mrf.mxu0 }
 0x4f1   :  { %v1568_v56 = vsel %vm289_vm2, %v1447_v38, -inf  ;;  %v1571_v62 = vsel %vm289_vm2, %v17775_v2, -inf }
 0x4f2   :  { %v15828_v46 = vpop.f32.mrf.mxu1  ;;  %1569 = vmax.xlane.f32.xlu0 %v1568_v56  ;;  %1572 = vmax.xlane.f32.xlu1 %v1571_v62  ;;  %v15834_v27 = vpop.f32.mrf.mxu0 }
 0x4f3   :  { %v17785_v56 = vpop.permute.xlu1 %1745 }
 0x4f4   :  { %v1450_v50 = vpop.f32.mrf.mxu1  ;;  %v1500_v0 = vpop.f32.mrf.mxu0 }
 0x4f6   :  { %v15829_v57 = vpop.f32.mrf.mxu1  ;;  %v15835_v49 = vpop.f32.mrf.mxu0 }
 0x4f7   :  { %v17787_v50 = vpop.permute.xlu1 %1793 }
 0x4f8   :  { %v1547_v30 = vpop.f32.mrf.mxu1 }
 0x4f9   :  { %v1574_v34 = vsel %vm289_vm2, %v1547_v30, -inf }
 0x4fa   :  { %v15840_v39 = vpop.f32.mrf.mxu1  ;;  %1575 = vmax.xlane.f32.xlu0 %v1574_v34 }
 0x4fc   :  { %v1550_v40 = vpop.f32.mrf.mxu1 }
 0x4fe   :  { %v15841_v28 = vpop.f32.mrf.mxu1 }
 0x503   :  { %1889 = vrot.lane.b32.xlu1 %v17495_v60, %s21723_s21 }
 0x510   :  { %1841 = vrot.lane.b32.xlu0 %v17487_v51, %s21723_s21 }
 0x563   :  { %v1555_v62 = vpop.xlane.xlu0 %1554 }
 0x564   :  { %v1577_v46 = vsub.f32 %v1197_v11, %v1555_v62 }
 0x566   :  { %v1585_v27 = vmul.f32 1.442695, %v1577_v46 }
 0x568   :  { %16946 = vpow2.f32 %v1585_v27 }
 0x56b   :  { %v1558_v0 = vpop.xlane.xlu1 %1557  ;;  %v1561_v57 = vpop.xlane.xlu0 %1560 }
 0x56c   :  { %v1578_v49 = vsub.f32 %v1247_v44, %v1558_v0  ;;  %v1579_v34 = vsub.f32 %v1297_v42, %v1561_v57 }
 0x56e   :  { %v1587_v39 = vmul.f32 1.442695, %v1578_v49  ;;  %v1589_v28 = vmul.f32 1.442695, %v1579_v34 }
 0x570   :  { %16948 = vpow2.f32 %v1587_v39 }
 0x571   :  { %16950 = vpow2.f32 %v1589_v28 }
 0x573   :  { %v1567_v40 = vpop.xlane.xlu1 %1566  ;;  %v1564_v32 = vpop.xlane.xlu0 %1563 }
 0x574   :  { %v1581_v24 = vsub.f32 %v1397_v1, %v1567_v40  ;;  %v1580_v13 = vsub.f32 %v1347_v14, %v1564_v32 }
 0x575   :  { %v17789_v17 = vpop.eup %16946 }
 0x576   :  { %v1593_v21 = vmul.f32 1.442695, %v1581_v24  ;;  %v1591_v11 = vmul.f32 1.442695, %v1580_v13  ;;  %v1601_v62 = vsel %vm289_vm2, %v17789_v17, 0.0 }
 0x577   :  { %1602 = vadd.xlane.f32.xlu1 %v1601_v62 }
 0x578   :  { %16952 = vpow2.f32 %v1593_v21 }
 0x579   :  { %16954 = vpow2.f32 %v1591_v11 }
 0x57b   :  { %v1570_v44 = vpop.xlane.xlu0 %1569  ;;  %v1573_v49 = vpop.xlane.xlu1 %1572 }
 0x57c   :  { %v1582_v42 = vsub.f32 %v1447_v38, %v1570_v44  ;;  %v1583_v34 = vsub.f32 %v17775_v2, %v1573_v49 }
 0x57d   :  { %v17793_v46 = vpop.eup %16948 }
 0x57e   :  { %v17795_v27 = vpop.eup %16950  ;;  %v1595_v0 = vmul.f32 1.442695, %v1582_v42  ;;  %v1604_v32 = vsel %vm289_vm2, %v17793_v46, 0.0  ;;  %v1597_v39 = vmul.f32 1.442695, %v1583_v34 }
 0x57f   :  { %1605 = vadd.xlane.f32.xlu0 %v1604_v32  ;;  %v1607_v13 = vsel %vm289_vm2, %v17795_v27, 0.0 }
 0x580   :  { %1608 = vadd.xlane.f32.xlu1 %v1607_v13  ;;  %16956 = vpow2.f32 %v1595_v0 }
 0x581   :  { %16958 = vpow2.f32 %v1597_v39 }
 0x583   :  { %v1576_v28 = vpop.xlane.xlu0 %1575 }
 0x584   :  { %v1584_v40 = vsub.f32 %v1547_v30, %v1576_v28  ;;  %v1890_v30 = vpop.permute.xlu1 %1889  ;;  %v1751_v28 = vsel %vm773_vm3, %v17785_v56, 0  ;;  %v1799_v56 = vsel %vm773_vm3, %v17787_v50, 0 }
 0x585   :  { %v17801_v24 = vpop.eup %16952 }
 0x586   :  { %v17803_v21 = vpop.eup %16954  ;;  %v1613_v14 = vsel %vm289_vm2, %v17801_v24, 0.0  ;;  %v1599_v11 = vmul.f32 1.442695, %v1584_v40  ;;  %v21774_v40 = vmov 0.0  }
 0x587   :  { %1614 = vadd.xlane.f32.xlu1 %v1613_v14  ;;  %v1610_v1 = vsel %vm289_vm2, %v17803_v21, 0.0  ;;  %v1842_v32 = vpop.permute.xlu0 %1841 }
 0x588   :  { %1611 = vadd.xlane.f32.xlu0 %v1610_v1  ;;  %16960 = vpow2.f32 %v1599_v11 }
 0x58d   :  { %v17809_v38 = vpop.eup %16956 }
 0x58e   :  { %v1616_v57 = vsel %vm289_vm2, %v17809_v38, 0.0  ;;  %v17818_v62 = vpop.eup %16958 }
 0x58f   :  { %1617 = vadd.xlane.f32.xlu0 %v1616_v57  ;;  %v1619_v44 = vsel %vm289_vm2, %v17818_v62, 0.0 }
 0x595   :  { %v17822_v42 = vpop.eup %16960 }
 0x596   :  { %v1622_v2 = vsel %vm289_vm2, %v17822_v42, 0.0 }
 0x598   :  { %1985 = vrot.lane.b32.xlu1 %v17503_v63, %s21723_s21 }
 0x5a5   :  { %1937 = vrot.lane.b32.xlu0 %v17497_v61, %s21723_s21 }
 0x5bc   :  { %1620 = vadd.xlane.f32.xlu1 %v1619_v44 }
 0x5c4   :  { %1623 = vadd.xlane.f32.xlu0 %v1622_v2 }
 0x5cd   :  { %2085 = vrot.lane.b32.xlu1 %v17481_v47, %s21721_s22 }
 0x5d1   :  { %2083 = vrot.lane.b32.xlu1 %v17481_v47, %s21719_s23 }
 0x5d5   :  { %2185 = vrot.lane.b32.xlu1 %v17489_v52, %s21721_s22 }
 0x5d9   :  { %2183 = vrot.lane.b32.xlu1 %v17489_v52, %s21719_s23 }
 0x5da   :  { %2035 = vrot.lane.b32.xlu0 %v17475_v41, %s21721_s22 }
 0x5dd   :  { %2285 = vrot.lane.b32.xlu1 %v17495_v60, %s21721_s22 }
 0x5de   :  { %2033 = vrot.lane.b32.xlu0 %v17475_v41, %s21719_s23 }
 0x5e1   :  { %2283 = vrot.lane.b32.xlu1 %v17495_v60, %s21719_s23 }
 0x5e2   :  { %2135 = vrot.lane.b32.xlu0 %v17479_v45, %s21721_s22 }
 0x5e5   :  { %2385 = vrot.lane.b32.xlu1 %v17503_v63, %s21721_s22 }
 0x5e6   :  { %2133 = vrot.lane.b32.xlu0 %v17479_v45, %s21719_s23 }
 0x5e9   :  { %2383 = vrot.lane.b32.xlu1 %v17503_v63, %s21719_s23 }
 0x5ea   :  { %2235 = vrot.lane.b32.xlu0 %v17487_v51, %s21721_s22 }
 0x5ed   :  { %2529 = vrot.lane.b32.xlu1 %v17475_v41, %s21717_s24 }
 0x5ee   :  { %2233 = vrot.lane.b32.xlu0 %v17487_v51, %s21719_s23 }
 0x5f1   :  { %2625 = vrot.lane.b32.xlu1 %v17479_v45, %s21717_s24 }
 0x5f2   :  { %2335 = vrot.lane.b32.xlu0 %v17497_v61, %s21721_s22 }
 0x5f5   :  { %2673 = vrot.lane.b32.xlu1 %v17489_v52, %s21717_s24 }
 0x5f6   :  { %2333 = vrot.lane.b32.xlu0 %v17497_v61, %s21719_s23 }
 0x5fa   :  { %2577 = vrot.lane.b32.xlu0 %v17481_v47, %s21717_s24 }
 0x600   :  { %v1603_v0 = vpop.xlane.xlu1 %1602 }
 0x601   :  { %16962 = vrcp.f32 %v1603_v0 }
 0x608   :  { %v1606_v13 = vpop.xlane.xlu0 %1605 }
 0x609   :  { %v1609_v14 = vpop.xlane.xlu1 %1608  ;;  %16964 = vrcp.f32 %v1606_v13 }
 0x60a   :  { %16966 = vrcp.f32 %v1609_v14 }
 0x60e   :  { %v16963_v1 = vpop.eup %16962 }
 0x60f   :  { %v1633_v57 = vmul.f32 %v16963_v1, %v17789_v17  ;;  %v1847_v1 = vsel %vm773_vm3, %v1842_v32, 0 }
 0x610   :  { %v1615_v49 = vpop.xlane.xlu1 %1614 }
 0x611   :  { %16968 = vrcp.f32 %v1615_v49  ;;  %v1612_v34 = vpop.xlane.xlu0 %1611  ;;  %v1641_v39 = vpack.c.bf16 %v1633_v57, %v1633_v57 }
 0x612   :  { %16970 = vrcp.f32 %v1612_v34 }
 0x613   :  { %15845 = vmatmul.mubr.msk.bf16.vlgmr.msra.gmra.mxu0 %vm289_vm2, %v1641_v39  ;;  %v1895_v39 = vsel %vm773_vm3, %v1890_v30, 0 }
 0x614   :  { %15855 = vmatpush3.bf16.msra.mxu0 %v1751_v28  ;;  %15856 = vmatprep.mubr.msk.bf16.mxu0 %vm17237_vm1, %v21774_v40  ;;  %v1986_v30 = vpop.permute.xlu1 %1985 }
 0x615   :  { %15866 = vmatprep.subr.bf16.mxu0 %v21774_v40 }
 0x616   :  { %v16965_v11 = vpop.eup %16964 }
 0x617   :  { %v16967_v44 = vpop.eup %16966  ;;  %v1634_v17 = vmul.f32 %v16965_v11, %v17793_v46 }
 0x618   :  { %v1635_v2 = vmul.f32 %v16967_v44, %v17795_v27  ;;  %v1618_v0 = vpop.xlane.xlu0 %1617  ;;  %v1991_v44 = vsel %vm773_vm3, %v1986_v30, 0 }
 0x619   :  { %v1642_v13 = vpack.c.bf16 %v1634_v17, %v1634_v17  ;;  %16972 = vrcp.f32 %v1618_v0 }
 0x61a   :  { %v1643_v14 = vpack.c.bf16 %v1635_v2, %v1635_v2 }
 0x61b   :  { %15851 = vmatmul.mubr.msk.bf16.vlgmr.msra.gmra.mxu1 %vm289_vm2, %v1642_v13 }
 0x61c   :  { %15857 = vmatmul.mubr.msk.bf16.vlgmr.msra.gmra.mxu0 %vm289_vm2, %v1643_v14  ;;  %15861 = vmatpush3.bf16.msra.mxu1 %v1799_v56  ;;  %v1938_v57 = vpop.permute.xlu0 %1937 }
 0x61d   :  { %15867 = vmatpush3.bf16.msra.mxu0 %v1847_v1  ;;  %15862 = vmatprep.mubr.msk.bf16.mxu1 %vm17237_vm1, %v21774_v40  ;;  %v1943_v28 = vsel %vm773_vm3, %v1938_v57, 0 }
 0x61e   :  { %v16969_v46 = vpop.eup %16968  ;;  %15868 = vmatprep.mubr.msk.bf16.mxu0 %vm17237_vm1, %v21774_v40  ;;  %15872 = vmatprep.subr.bf16.mxu1 %v21774_v40 }
 0x61f   :  { %v16971_v27 = vpop.eup %16970  ;;  %15878 = vmatprep.subr.bf16.mxu0 %v21774_v40  ;;  %v1637_v50 = vmul.f32 %v16969_v46, %v17801_v24 }
 0x620   :  { %v1636_v32 = vmul.f32 %v16971_v27, %v17803_v21 }
 0x621   :  { %v1645_v49 = vpack.c.bf16 %v1637_v50, %v1637_v50 }
 0x622   :  { %v1644_v34 = vpack.c.bf16 %v1636_v32, %v1636_v32 }
 0x624   :  { %15863 = vmatmul.mubr.msk.bf16.vlgmr.msra.gmra.mxu1 %vm289_vm2, %v1644_v34  ;;  %15869 = vmatmul.mubr.msk.bf16.vlgmr.msra.gmra.mxu0 %vm289_vm2, %v1645_v49 }
 0x625   :  { %15873 = vmatpush3.bf16.msra.mxu1 %v1895_v39  ;;  %15879 = vmatpush3.bf16.msra.mxu0 %v1943_v28 }
 0x626   :  { %15874 = vmatprep.mubr.msk.bf16.mxu1 %vm17237_vm1, %v21774_v40  ;;  %15884 = vmatprep.subr.bf16.mxu1 %v21774_v40  ;;  %v16973_v24 = vpop.eup %16972 }
 0x627   :  { %15880 = vmatprep.mubr.msk.bf16.mxu0 %vm17237_vm1, %v21774_v40  ;;  %15890 = vmatprep.subr.bf16.mxu0 %v21774_v40  ;;  %v1638_v21 = vmul.f32 %v16973_v24, %v17809_v38 }
 0x629   :  { %v1646_v11 = vpack.c.bf16 %v1638_v21, %v1638_v21 }
 0x62c   :  { %15875 = vmatmul.mubr.msk.bf16.vlgmr.msra.gmra.mxu1 %vm289_vm2, %v1646_v11 }
 0x62d   :  { %15885 = vmatpush3.bf16.msra.mxu1 %v1991_v44  ;;  %15886 = vmatprep.mubr.msk.bf16.mxu1 %vm17237_vm1, %v21774_v40 }
 0x62e   :  { %15896 = vmatprep.subr.bf16.mxu1 %v21774_v40 }
 0x645   :  { %v1621_v17 = vpop.xlane.xlu1 %1620 }
 0x646   :  { %16974 = vrcp.f32 %v1621_v17 }
 0x649   :  { %v2086_v2 = vpop.permute.xlu1 %2085 }
 0x64a   :  { %v2091_v21 = vsel %vm289_vm2, %v2086_v2, 0 }
 0x64d   :  { %v2084_v0 = vpop.permute.xlu1 %2083  ;;  %v1624_v13 = vpop.xlane.xlu0 %1623 }
 0x64e   :  { %16976 = vrcp.f32 %v1624_v13 }
 0x651   :  { %v2186_v14 = vpop.permute.xlu1 %2185  ;;  %v2036_v38 = vpop.permute.xlu0 %2035 }
 0x652   :  { %v2041_v32 = vsel %vm289_vm2, %v2036_v38, 0  ;;  %v2191_v17 = vsel %vm289_vm2, %v2186_v14, 0 }
 0x653   :  { %v16975_v56 = vpop.eup %16974 }
 0x654   :  { %v1639_v1 = vmul.f32 %v16975_v56, %v17818_v62 }
 0x655   :  { %v2034_v46 = vpop.permute.xlu0 %2033  ;;  %v2184_v50 = vpop.permute.xlu1 %2183 }
 0x656   :  { %v1647_v27 = vpack.c.bf16 %v1639_v1, %v1639_v1 }
 0x658   :  { %15881 = vmatmul.mubr.msk.bf16.vlgmr.msra.gmra.mxu0 %vm289_vm2, %v1647_v27 }
 0x659   :  { %15891 = vmatpush3.bf16.xpose.msra.mxu0 %v2041_v32  ;;  %15892 = vmatprep.mubr.msk.bf16.mxu0 %vm17237_vm1, %v21774_v40  ;;  %v2136_v57 = vpop.permute.xlu0 %2135  ;;  %v2286_v34 = vpop.permute.xlu1 %2285 }
 0x65a   :  { %15902 = vmatprep.subr.bf16.mxu0 %v21774_v40  ;;  %v2141_v24 = vsel %vm289_vm2, %v2136_v57, 0 }
 0x65b   :  { %v16977_v49 = vpop.eup %16976 }
 0x65c   :  { %v1640_v39 = vmul.f32 %v16977_v49, %v17822_v42 }
 0x65d   :  { %v2134_v28 = vpop.permute.xlu0 %2133  ;;  %v2284_v11 = vpop.permute.xlu1 %2283 }
 0x65e   :  { %v1648_v62 = vpack.c.bf16 %v1640_v39, %v1640_v39 }
 0x660   :  { %15893 = vmatmul.mubr.msk.bf16.vlgmr.msra.gmra.mxu0 %vm289_vm2, %v2034_v46  ;;  %15887 = vmatmul.mubr.msk.bf16.vlgmr.msra.gmra.mxu1 %vm289_vm2, %v1648_v62 }
 0x661   :  { %15903 = vmatpush3.bf16.xpose.msra.mxu0 %v2141_v24  ;;  %15897 = vmatpush3.bf16.xpose.msra.mxu1 %v2091_v21  ;;  %v2236_v30 = vpop.permute.xlu0 %2235  ;;  %v2386_v2 = vpop.permute.xlu1 %2385 }
 0x662   :  { %15898 = vmatprep.mubr.msk.bf16.mxu1 %vm17237_vm1, %v21774_v40  ;;  %15904 = vmatprep.mubr.msk.bf16.mxu0 %vm17237_vm1, %v21774_v40  ;;  %v2241_v44 = vsel %vm289_vm2, %v2236_v30, 0  ;;  %v2391_v27 = vsel %vm289_vm2, %v2386_v2, 0 }
 0x663   :  { %15908 = vmatprep.subr.bf16.mxu1 %v21774_v40  ;;  %15914 = vmatprep.subr.bf16.mxu0 %v21774_v40 }
 0x665   :  { %v2234_v42 = vpop.permute.xlu0 %2233  ;;  %v2384_v38 = vpop.permute.xlu1 %2383 }
 0x668   :  { %15905 = vmatmul.mubr.msk.bf16.vlgmr.msra.gmra.mxu0 %vm289_vm2, %v2134_v28  ;;  %15899 = vmatmul.mubr.msk.bf16.vlgmr.msra.gmra.mxu1 %vm289_vm2, %v2084_v0  ;;  %v2291_v0 = vsel %vm289_vm2, %v2286_v34, 0 }
 0x669   :  { %15915 = vmatpush3.bf16.xpose.msra.mxu0 %v2241_v44  ;;  %15909 = vmatpush3.bf16.xpose.msra.mxu1 %v2191_v17  ;;  %v2336_v13 = vpop.permute.xlu0 %2335  ;;  %v2530_v14 = vpop.permute.xlu1 %2529 }
 0x66a   :  { %15910 = vmatprep.mubr.msk.bf16.mxu1 %vm17237_vm1, %v21774_v40  ;;  %15916 = vmatprep.mubr.msk.bf16.mxu0 %vm17237_vm1, %v21774_v40  ;;  %v2341_v56 = vsel %vm289_vm2, %v2336_v13, 0  ;;  %v2535_v46 = vsel %vm773_vm3, %v2530_v14, 0 }
 0x66b   :  { %15920 = vmatprep.subr.bf16.mxu1 %v21774_v40  ;;  %15926 = vmatprep.subr.bf16.mxu0 %v21774_v40 }
 0x66d   :  { %v2334_v1 = vpop.permute.xlu0 %2333 }
 0x670   :  { %15917 = vmatmul.mubr.msk.bf16.vlgmr.msra.gmra.mxu0 %vm289_vm2, %v2234_v42  ;;  %15911 = vmatmul.mubr.msk.bf16.vlgmr.msra.gmra.mxu1 %vm289_vm2, %v2184_v50 }
 0x671   :  { %15927 = vmatpush3.bf16.xpose.msra.mxu0 %v2341_v56  ;;  %15921 = vmatpush3.bf16.xpose.msra.mxu1 %v2291_v0  ;;  %v2578_v50 = vpop.permute.xlu0 %2577 }
 0x672   :  { %15922 = vmatprep.mubr.msk.bf16.mxu1 %vm17237_vm1, %v21774_v40  ;;  %15928 = vmatprep.mubr.msk.bf16.mxu0 %vm17237_vm1, %v21774_v40  ;;  %v2583_v32 = vsel %vm773_vm3, %v2578_v50, 0 }
 0x673   :  { %15932 = vmatprep.subr.bf16.mxu1 %v21774_v40  ;;  %15938 = vmatprep.subr.bf16.mxu0 %v21774_v40 }
 0x678   :  { %15929 = vmatmul.mubr.msk.bf16.vlgmr.msra.gmra.mxu0 %vm289_vm2, %v2334_v1  ;;  %15923 = vmatmul.mubr.msk.bf16.vlgmr.msra.gmra.mxu1 %vm289_vm2, %v2284_v11 }
 0x679   :  { %15939 = vmatpush3.bf16.msra.mxu0 %v2535_v46  ;;  %15933 = vmatpush3.bf16.xpose.msra.mxu1 %v2391_v27 }
 0x67a   :  { %15934 = vmatprep.mubr.msk.bf16.mxu1 %vm17237_vm1, %v21774_v40  ;;  %15944 = vmatprep.subr.bf16.mxu1 %v21774_v40 }
 0x67b   :  { %15940 = vmatprep.mubr.msk.bf16.mxu0 %vm17237_vm1, %v21774_v40  ;;  %15950 = vmatprep.subr.bf16.mxu0 %v21774_v40 }
 0x680   :  { %15935 = vmatmul.mubr.msk.bf16.vlgmr.msra.gmra.mxu1 %vm289_vm2, %v2384_v38 }
 0x681   :  { %15945 = vmatpush3.bf16.msra.mxu1 %v2583_v32  ;;  %15946 = vmatprep.mubr.msk.bf16.mxu1 %vm17237_vm1, %v21774_v40 }
 0x682   :  { %15956 = vmatprep.subr.bf16.mxu1 %v21774_v40 }
 0x6d3   :  { %v17956_v57 = vpop.f32.mrf.mxu0 }
 0x6d5   :  { %v15846_v49 = vpop.f32.mrf.mxu0 }
 0x6d7   :  { %v1694_v34 = vpop.f32.mrf.mxu0 }
 0x6d9   :  { %v15847_v39 = vpop.f32.mrf.mxu0 }
 0x6db   :  { %v17958_v28 = vpop.f32.mrf.mxu1 }
 0x6dc   :  { %v17962_v24 = vpop.f32.mrf.mxu0 }
 0x6dd   :  { %v15852_v21 = vpop.f32.mrf.mxu1 }
 0x6de   :  { %v15858_v30 = vpop.f32.mrf.mxu0 }
 0x6df   :  { %v1742_v11 = vpop.f32.mrf.mxu1 }
 0x6e0   :  { %v1790_v42 = vpop.f32.mrf.mxu0 }
 0x6e1   :  { %v15853_v44 = vpop.f32.mrf.mxu1 }
 0x6e2   :  { %v15859_v17 = vpop.f32.mrf.mxu0 }
 0x6e4   :  { %v17964_v2 = vpop.f32.mrf.mxu1  ;;  %v17966_v13 = vpop.f32.mrf.mxu0 }
 0x6e6   :  { %v15864_v56 = vpop.f32.mrf.mxu1  ;;  %v15870_v0 = vpop.f32.mrf.mxu0 }
 0x6e8   :  { %v1838_v14 = vpop.f32.mrf.mxu1  ;;  %v1886_v1 = vpop.f32.mrf.mxu0 }
 0x6ea   :  { %v15865_v46 = vpop.f32.mrf.mxu1  ;;  %v15871_v27 = vpop.f32.mrf.mxu0 }
 0x6ec   :  { %v17970_v50 = vpop.f32.mrf.mxu1 }
 0x6ee   :  { %v15876_v49 = vpop.f32.mrf.mxu1 }
 0x6f0   :  { %v1934_v34 = vpop.f32.mrf.mxu1 }
 0x6f2   :  { %v15877_v39 = vpop.f32.mrf.mxu1 }
 0x718   :  { %v17974_v21 = vpop.f32.mrf.mxu0 }
 0x71a   :  { %v15882_v30 = vpop.f32.mrf.mxu0 }
 0x71c   :  { %v1982_v11 = vpop.f32.mrf.mxu0 }
 0x71e   :  { %v15883_v42 = vpop.f32.mrf.mxu0 }
 0x720   :  { %v2077_v44 = vpop.f32.mrf.mxu0  ;;  %v17976_v17 = vpop.f32.mrf.mxu1 }
 0x721   :  { %v2433_v56 = vsel %vm289_vm2, %v2077_v44, -inf }
 0x722   :  { %2434 = vmax.xlane.f32.xlu0 %v2433_v56  ;;  %v15894_v14 = vpop.f32.mrf.mxu0  ;;  %v15888_v1 = vpop.f32.mrf.mxu1 }
 0x724   :  { %v2080_v46 = vpop.f32.mrf.mxu0  ;;  %v2030_v27 = vpop.f32.mrf.mxu1 }
 0x726   :  { %v15895_v49 = vpop.f32.mrf.mxu0  ;;  %v15889_v34 = vpop.f32.mrf.mxu1 }
 0x728   :  { %v2177_v39 = vpop.f32.mrf.mxu0  ;;  %v2127_v32 = vpop.f32.mrf.mxu1 }
 0x729   :  { %v2439_v30 = vsel %vm289_vm2, %v2177_v39, -inf  ;;  %v2436_v11 = vsel %vm289_vm2, %v2127_v32, -inf }
 0x72a   :  { %2440 = vmax.xlane.f32.xlu0 %v2439_v30  ;;  %v15906_v42 = vpop.f32.mrf.mxu0  ;;  %2437 = vmax.xlane.f32.xlu1 %v2436_v11  ;;  %v15900_v62 = vpop.f32.mrf.mxu1 }
 0x72c   :  { %v2180_v38 = vpop.f32.mrf.mxu0  ;;  %v2130_v33 = vpop.f32.mrf.mxu1 }
 0x72e   :  { %v15907_v0 = vpop.f32.mrf.mxu0  ;;  %v15901_v56 = vpop.f32.mrf.mxu1 }
 0x730   :  { %v2277_v14 = vpop.f32.mrf.mxu0  ;;  %v2227_v1 = vpop.f32.mrf.mxu1 }
 0x731   :  { %v2445_v46 = vsel %vm289_vm2, %v2277_v14, -inf  ;;  %v2442_v27 = vsel %vm289_vm2, %v2227_v1, -inf }
 0x732   :  { %2446 = vmax.xlane.f32.xlu1 %v2445_v46  ;;  %v15918_v49 = vpop.f32.mrf.mxu0  ;;  %v15912_v34 = vpop.f32.mrf.mxu1  ;;  %2443 = vmax.xlane.f32.xlu0 %v2442_v27 }
 0x734   :  { %v2280_v25 = vpop.f32.mrf.mxu0  ;;  %v2230_v31 = vpop.f32.mrf.mxu1 }
 0x736   :  { %v15919_v30 = vpop.f32.mrf.mxu0  ;;  %v15913_v42 = vpop.f32.mrf.mxu1 }
 0x738   :  { %v17985_v11 = vpop.f32.mrf.mxu0  ;;  %v2327_v62 = vpop.f32.mrf.mxu1 }
 0x739   :  { %v2451_v33 = vsel %vm289_vm2, %v17985_v11, -inf  ;;  %v2448_v38 = vsel %vm289_vm2, %v2327_v62, -inf }
 0x73a   :  { %2452 = vmax.xlane.f32.xlu1 %v2451_v33  ;;  %v15930_v0 = vpop.f32.mrf.mxu0  ;;  %v15924_v56 = vpop.f32.mrf.mxu1  ;;  %2449 = vmax.xlane.f32.xlu0 %v2448_v38 }
 0x73b   :  { %v17995_v33 = vpop.permute.xlu1 %2625 }
 0x73c   :  { %v2380_v46 = vpop.f32.mrf.mxu0  ;;  %v2330_v49 = vpop.f32.mrf.mxu1 }
 0x73e   :  { %v15931_v34 = vpop.f32.mrf.mxu0  ;;  %v15925_v27 = vpop.f32.mrf.mxu1 }
 0x73f   :  { %v17997_v46 = vpop.permute.xlu1 %2673 }
 0x740   :  { %v2427_v25 = vpop.f32.mrf.mxu1 }
 0x741   :  { %v2454_v31 = vsel %vm289_vm2, %v2427_v25, -inf }
 0x742   :  { %v15936_v30 = vpop.f32.mrf.mxu1  ;;  %2455 = vmax.xlane.f32.xlu0 %v2454_v31 }
 0x744   :  { %v2430_v42 = vpop.f32.mrf.mxu1 }
 0x746   :  { %v15937_v23 = vpop.f32.mrf.mxu1 }
 0x74b   :  { %2769 = vrot.lane.b32.xlu1 %v17495_v60, %s21717_s24 }
 0x758   :  { %2721 = vrot.lane.b32.xlu0 %v17487_v51, %s21717_s24 }
 0x7ab   :  { %v2435_v38 = vpop.xlane.xlu0 %2434 }
 0x7ac   :  { %v2457_v0 = vsub.f32 %v2077_v44, %v2435_v38 }
 0x7ae   :  { %v2465_v56 = vmul.f32 1.442695, %v2457_v0 }
 0x7b0   :  { %16978 = vpow2.f32 %v2465_v56 }
 0x7b3   :  { %v2441_v49 = vpop.xlane.xlu0 %2440  ;;  %v2438_v34 = vpop.xlane.xlu1 %2437 }
 0x7b4   :  { %v2459_v27 = vsub.f32 %v2177_v39, %v2441_v49  ;;  %v2458_v31 = vsub.f32 %v2127_v32, %v2438_v34 }
 0x7b6   :  { %v2469_v30 = vmul.f32 1.442695, %v2459_v27  ;;  %v2467_v23 = vmul.f32 1.442695, %v2458_v31 }
 0x7b8   :  { %16980 = vpow2.f32 %v2469_v30 }
 0x7b9   :  { %16982 = vpow2.f32 %v2467_v23 }
 0x7bb   :  { %v2447_v42 = vpop.xlane.xlu1 %2446  ;;  %v2444_v16 = vpop.xlane.xlu0 %2443 }
 0x7bc   :  { %v2461_v12 = vsub.f32 %v2277_v14, %v2447_v42  ;;  %v2460_v29 = vsub.f32 %v2227_v1, %v2444_v16 }
 0x7bd   :  { %v17999_v20 = vpop.eup %16978 }
 0x7be   :  { %v2473_v22 = vmul.f32 1.442695, %v2461_v12  ;;  %v2481_v44 = vsel %vm289_vm2, %v17999_v20, 0.0  ;;  %v2471_v38 = vmul.f32 1.442695, %v2460_v29 }
 0x7bf   :  { %2482 = vadd.xlane.f32.xlu1 %v2481_v44 }
 0x7c0   :  { %16984 = vpow2.f32 %v2473_v22 }
 0x7c1   :  { %16986 = vpow2.f32 %v2471_v38 }
 0x7c3   :  { %v2450_v39 = vpop.xlane.xlu0 %2449  ;;  %v2453_v27 = vpop.xlane.xlu1 %2452 }
 0x7c4   :  { %v2462_v0 = vsub.f32 %v2327_v62, %v2450_v39  ;;  %v2463_v31 = vsub.f32 %v17985_v11, %v2453_v27 }
 0x7c5   :  { %v18003_v32 = vpop.eup %16980 }
 0x7c6   :  { %v18005_v56 = vpop.eup %16982  ;;  %v2487_v14 = vsel %vm289_vm2, %v18003_v32, 0.0  ;;  %v2475_v49 = vmul.f32 1.442695, %v2462_v0  ;;  %v2477_v30 = vmul.f32 1.442695, %v2463_v31 }
 0x7c7   :  { %v2484_v12 = vsel %vm289_vm2, %v18005_v56, 0.0  ;;  %2488 = vadd.xlane.f32.xlu1 %v2487_v14 }
 0x7c8   :  { %2485 = vadd.xlane.f32.xlu0 %v2484_v12  ;;  %16988 = vpow2.f32 %v2475_v49 }
 0x7c9   :  { %16990 = vpow2.f32 %v2477_v30  ;;  %v2631_v30 = vsel %vm773_vm3, %v17995_v33, 0 }
 0x7cb   :  { %v2456_v23 = vpop.xlane.xlu0 %2455 }
 0x7cc   :  { %v2464_v42 = vsub.f32 %v2427_v25, %v2456_v23  ;;  %v2770_v25 = vpop.permute.xlu1 %2769 }
 0x7cd   :  { %v18011_v16 = vpop.eup %16984 }
 0x7ce   :  { %v18013_v22 = vpop.eup %16986  ;;  %v2493_v29 = vsel %vm289_vm2, %v18011_v16, 0.0  ;;  %v2479_v44 = vmul.f32 1.442695, %v2464_v42 }
 0x7cf   :  { %2494 = vadd.xlane.f32.xlu1 %v2493_v29  ;;  %v2490_v1 = vsel %vm289_vm2, %v18013_v22, 0.0  ;;  %v2722_v49 = vpop.permute.xlu0 %2721 }
 0x7d0   :  { %2491 = vadd.xlane.f32.xlu0 %v2490_v1  ;;  %16992 = vpow2.f32 %v2479_v44  ;;  %v2727_v33 = vsel %vm773_vm3, %v2722_v49, 0 }
 0x7d5   :  { %v18019_v62 = vpop.eup %16988 }
 0x7d6   :  { %v2496_v34 = vsel %vm289_vm2, %v18019_v62, 0.0  ;;  %v18028_v38 = vpop.eup %16990 }
 0x7d7   :  { %2497 = vadd.xlane.f32.xlu0 %v2496_v34  ;;  %v2499_v39 = vsel %vm289_vm2, %v18028_v38, 0.0 }
 0x7dd   :  { %v18032_v0 = vpop.eup %16992 }
 0x7de   :  { %v2502_v11 = vsel %vm289_vm2, %v18032_v0, 0.0 }
 0x7e0   :  { %2865 = vrot.lane.b32.xlu1 %v17503_v63, %s21717_s24 }
 0x7ed   :  { %2817 = vrot.lane.b32.xlu0 %v17497_v61, %s21717_s24  ;;  %s21844_s24 = smov 104  }
 0x804   :  { %2500 = vadd.xlane.f32.xlu1 %v2499_v39 }
 0x80c   :  { %2503 = vadd.xlane.f32.xlu0 %v2502_v11 }
 0x815   :  { %2965 = vrot.lane.b32.xlu1 %v17481_v47, %s21715_s25 }
 0x819   :  { %2963 = vrot.lane.b32.xlu1 %v17481_v47, %s21707_s26 }
 0x81d   :  { %3065 = vrot.lane.b32.xlu1 %v17489_v52, %s21715_s25 }
 0x821   :  { %3063 = vrot.lane.b32.xlu1 %v17489_v52, %s21707_s26 }
 0x822   :  { %2915 = vrot.lane.b32.xlu0 %v17475_v41, %s21715_s25 }
 0x825   :  { %3165 = vrot.lane.b32.xlu1 %v17495_v60, %s21715_s25 }
 0x826   :  { %2913 = vrot.lane.b32.xlu0 %v17475_v41, %s21707_s26 }
 0x829   :  { %3163 = vrot.lane.b32.xlu1 %v17495_v60, %s21707_s26 }
 0x82a   :  { %3015 = vrot.lane.b32.xlu0 %v17479_v45, %s21715_s25 }
 0x82d   :  { %3265 = vrot.lane.b32.xlu1 %v17503_v63, %s21715_s25 }
 0x82e   :  { %3013 = vrot.lane.b32.xlu0 %v17479_v45, %s21707_s26 }
 0x831   :  { %3263 = vrot.lane.b32.xlu1 %v17503_v63, %s21707_s26 }
 0x832   :  { %3115 = vrot.lane.b32.xlu0 %v17487_v51, %s21715_s25 }
 0x835   :  { %3409 = vrot.lane.b32.xlu1 %v17475_v41, %s21705_s27 }
 0x836   :  { %3113 = vrot.lane.b32.xlu0 %v17487_v51, %s21707_s26 }
 0x83a   :  { %3215 = vrot.lane.b32.xlu0 %v17497_v61, %s21715_s25  ;;  %s21850_s25 = smov 24  }
 0x83e   :  { %3213 = vrot.lane.b32.xlu0 %v17497_v61, %s21707_s26  ;;  %s21709_s26 = smov 24  }
 0x848   :  { %v2483_v14 = vpop.xlane.xlu1 %2482 }
 0x849   :  { %16994 = vrcp.f32 %v2483_v14 }
 0x850   :  { %v2489_v12 = vpop.xlane.xlu1 %2488 }
 0x851   :  { %16996 = vrcp.f32 %v2489_v12  ;;  %v2486_v29 = vpop.xlane.xlu0 %2485  ;;  %v2679_v12 = vsel %vm773_vm3, %v17997_v46, 0 }
 0x852   :  { %16998 = vrcp.f32 %v2486_v29 }
 0x856   :  { %v16995_v1 = vpop.eup %16994 }
 0x857   :  { %v2513_v41 = vmul.f32 %v16995_v1, %v17999_v20 }
 0x858   :  { %v2495_v34 = vpop.xlane.xlu1 %2494 }
 0x859   :  { %17000 = vrcp.f32 %v2495_v34  ;;  %v2492_v27 = vpop.xlane.xlu0 %2491  ;;  %v2521_v31 = vpack.c.bf16 %v2513_v41, %v2513_v41 }
 0x85a   :  { %17002 = vrcp.f32 %v2492_v27  ;;  %v2775_v27 = vsel %vm773_vm3, %v2770_v25, 0 }
 0x85b   :  { %15941 = vmatmul.mubr.msk.bf16.vlgmr.msra.gmra.mxu0 %vm289_vm2, %v2521_v31 }
 0x85c   :  { %15951 = vmatpush3.bf16.msra.mxu0 %v2631_v30  ;;  %15952 = vmatprep.mubr.msk.bf16.mxu0 %vm17237_vm1, %v21774_v40  ;;  %v2866_v31 = vpop.permute.xlu1 %2865 }
 0x85d   :  { %15962 = vmatprep.subr.bf16.mxu0 %v21774_v40  ;;  %v2871_v25 = vsel %vm773_vm3, %v2866_v31, 0 }
 0x85e   :  { %v16997_v23 = vpop.eup %16996 }
 0x85f   :  { %v16999_v42 = vpop.eup %16998  ;;  %v2515_v20 = vmul.f32 %v16997_v23, %v18003_v32 }
 0x860   :  { %v2514_v44 = vmul.f32 %v16999_v42, %v18005_v56  ;;  %v2498_v39 = vpop.xlane.xlu0 %2497 }
 0x861   :  { %v2523_v11 = vpack.c.bf16 %v2515_v20, %v2515_v20  ;;  %17004 = vrcp.f32 %v2498_v39 }
 0x862   :  { %v2522_v14 = vpack.c.bf16 %v2514_v44, %v2514_v44 }
 0x863   :  { %15953 = vmatmul.mubr.msk.bf16.vlgmr.msra.gmra.mxu0 %vm289_vm2, %v2523_v11 }
 0x864   :  { %15947 = vmatmul.mubr.msk.bf16.vlgmr.msra.gmra.mxu1 %vm289_vm2, %v2522_v14  ;;  %15963 = vmatpush3.bf16.msra.mxu0 %v2727_v33  ;;  %v2818_v29 = vpop.permute.xlu0 %2817 }
 0x865   :  { %15957 = vmatpush3.bf16.msra.mxu1 %v2679_v12  ;;  %15958 = vmatprep.mubr.msk.bf16.mxu1 %vm17237_vm1, %v21774_v40  ;;  %v2823_v34 = vsel %vm773_vm3, %v2818_v29, 0 }
 0x866   :  { %v17001_v32 = vpop.eup %17000  ;;  %15964 = vmatprep.mubr.msk.bf16.mxu0 %vm17237_vm1, %v21774_v40  ;;  %15968 = vmatprep.subr.bf16.mxu1 %v21774_v40 }
 0x867   :  { %v17003_v56 = vpop.eup %17002  ;;  %15974 = vmatprep.subr.bf16.mxu0 %v21774_v40  ;;  %v2517_v49 = vmul.f32 %v17001_v32, %v18011_v16 }
 0x868   :  { %v2516_v46 = vmul.f32 %v17003_v56, %v18013_v22 }
 0x869   :  { %v2525_v1 = vpack.c.bf16 %v2517_v49, %v2517_v49 }
 0x86a   :  { %v2524_v41 = vpack.c.bf16 %v2516_v46, %v2516_v46 }
 0x86b   :  { %15965 = vmatmul.mubr.msk.bf16.vlgmr.msra.gmra.mxu0 %vm289_vm2, %v2525_v1 }
 0x86c   :  { %15959 = vmatmul.mubr.msk.bf16.vlgmr.msra.gmra.mxu1 %vm289_vm2, %v2524_v41  ;;  %15975 = vmatpush3.bf16.msra.mxu0 %v2823_v34 }
 0x86d   :  { %15969 = vmatpush3.bf16.msra.mxu1 %v2775_v27  ;;  %15970 = vmatprep.mubr.msk.bf16.mxu1 %vm17237_vm1, %v21774_v40 }
 0x86e   :  { %15980 = vmatprep.subr.bf16.mxu1 %v21774_v40  ;;  %15976 = vmatprep.mubr.msk.bf16.mxu0 %vm17237_vm1, %v21774_v40  ;;  %v17005_v16 = vpop.eup %17004 }
 0x86f   :  { %15986 = vmatprep.subr.bf16.mxu0 %v21774_v40  ;;  %v2518_v22 = vmul.f32 %v17005_v16, %v18019_v62 }
 0x871   :  { %v2526_v30 = vpack.c.bf16 %v2518_v22, %v2518_v22 }
 0x874   :  { %15971 = vmatmul.mubr.msk.bf16.vlgmr.msra.gmra.mxu1 %vm289_vm2, %v2526_v30 }
 0x875   :  { %15981 = vmatpush3.bf16.msra.mxu1 %v2871_v25  ;;  %15982 = vmatprep.mubr.msk.bf16.mxu1 %vm17237_vm1, %v21774_v40 }
 0x876   :  { %15992 = vmatprep.subr.bf16.mxu1 %v21774_v40 }
 0x88d   :  { %v2501_v23 = vpop.xlane.xlu1 %2500 }
 0x88e   :  { %17006 = vrcp.f32 %v2501_v23 }
 0x891   :  { %v2966_v42 = vpop.permute.xlu1 %2965 }
 0x892   :  { %v2971_v27 = vsel %vm289_vm2, %v2966_v42, 0 }
 0x895   :  { %v2964_v20 = vpop.permute.xlu1 %2963  ;;  %v2504_v44 = vpop.xlane.xlu0 %2503 }
 0x896   :  { %17008 = vrcp.f32 %v2504_v44 }
 0x899   :  { %v3066_v39 = vpop.permute.xlu1 %3065  ;;  %v2916_v62 = vpop.permute.xlu0 %2915 }
 0x89a   :  { %v2921_v56 = vsel %vm289_vm2, %v2916_v62, 0  ;;  %v3071_v30 = vsel %vm289_vm2, %v3066_v39, 0 }
 0x89b   :  { %v17007_v11 = vpop.eup %17006 }
 0x89c   :  { %v2519_v14 = vmul.f32 %v17007_v11, %v18028_v38 }
 0x89d   :  { %v2914_v33 = vpop.permute.xlu0 %2913  ;;  %v3064_v32 = vpop.permute.xlu1 %3063 }
 0x89e   :  { %v2527_v12 = vpack.c.bf16 %v2519_v14, %v2519_v14 }
 0x8a0   :  { %15977 = vmatmul.mubr.msk.bf16.vlgmr.msra.gmra.mxu0 %vm289_vm2, %v2527_v12 }
 0x8a1   :  { %15987 = vmatpush3.bf16.xpose.msra.mxu0 %v2921_v56  ;;  %15988 = vmatprep.mubr.msk.bf16.mxu0 %vm17237_vm1, %v21774_v40  ;;  %v3016_v49 = vpop.permute.xlu0 %3015  ;;  %v3166_v46 = vpop.permute.xlu1 %3165 }
 0x8a2   :  { %15998 = vmatprep.subr.bf16.mxu0 %v21774_v40  ;;  %v3021_v34 = vsel %vm289_vm2, %v3016_v49, 0 }
 0x8a3   :  { %v17009_v29 = vpop.eup %17008 }
 0x8a4   :  { %v2520_v1 = vmul.f32 %v17009_v29, %v18032_v0 }
 0x8a5   :  { %v3014_v41 = vpop.permute.xlu0 %3013  ;;  %v3164_v22 = vpop.permute.xlu1 %3163 }
 0x8a6   :  { %v2528_v38 = vpack.c.bf16 %v2520_v1, %v2520_v1 }
 0x8a8   :  { %15989 = vmatmul.mubr.msk.bf16.vlgmr.msra.gmra.mxu0 %vm289_vm2, %v2914_v33  ;;  %15983 = vmatmul.mubr.msk.bf16.vlgmr.msra.gmra.mxu1 %vm289_vm2, %v2528_v38 }
 0x8a9   :  { %15999 = vmatpush3.bf16.xpose.msra.mxu0 %v3021_v34  ;;  %15993 = vmatpush3.bf16.xpose.msra.mxu1 %v2971_v27  ;;  %v3116_v16 = vpop.permute.xlu0 %3115  ;;  %v3266_v25 = vpop.permute.xlu1 %3265 }
 0x8aa   :  { %15994 = vmatprep.mubr.msk.bf16.mxu1 %vm17237_vm1, %v21774_v40  ;;  %16000 = vmatprep.mubr.msk.bf16.mxu0 %vm17237_vm1, %v21774_v40  ;;  %v3121_v31 = vsel %vm289_vm2, %v3116_v16, 0  ;;  %v3271_v14 = vsel %vm289_vm2, %v3266_v25, 0 }
 0x8ab   :  { %16004 = vmatprep.subr.bf16.mxu1 %v21774_v40  ;;  %16010 = vmatprep.subr.bf16.mxu0 %v21774_v40 }
 0x8ad   :  { %v3114_v0 = vpop.permute.xlu0 %3113  ;;  %v3264_v42 = vpop.permute.xlu1 %3263 }
 0x8b0   :  { %16001 = vmatmul.mubr.msk.bf16.vlgmr.msra.gmra.mxu0 %vm289_vm2, %v3014_v41  ;;  %15995 = vmatmul.mubr.msk.bf16.vlgmr.msra.gmra.mxu1 %vm289_vm2, %v2964_v20  ;;  %v3171_v20 = vsel %vm289_vm2, %v3166_v46, 0 }
 0x8b1   :  { %16011 = vmatpush3.bf16.xpose.msra.mxu0 %v3121_v31  ;;  %16005 = vmatpush3.bf16.xpose.msra.mxu1 %v3071_v30  ;;  %v3216_v23 = vpop.permute.xlu0 %3215  ;;  %v3410_v39 = vpop.permute.xlu1 %3409 }
 0x8b2   :  { %16006 = vmatprep.mubr.msk.bf16.mxu1 %vm17237_vm1, %v21774_v40  ;;  %16012 = vmatprep.mubr.msk.bf16.mxu0 %vm17237_vm1, %v21774_v40  ;;  %v3221_v44 = vsel %vm289_vm2, %v3216_v23, 0  ;;  %v3415_v11 = vsel %vm773_vm3, %v3410_v39, 0 }
 0x8b3   :  { %16016 = vmatprep.subr.bf16.mxu1 %v21774_v40  ;;  %16022 = vmatprep.subr.bf16.mxu0 %v21774_v40 }
 0x8b5   :  { %v3214_v62 = vpop.permute.xlu0 %3213 }
 0x8b8   :  { %16013 = vmatmul.mubr.msk.bf16.vlgmr.msra.gmra.mxu0 %vm289_vm2, %v3114_v0  ;;  %16007 = vmatmul.mubr.msk.bf16.vlgmr.msra.gmra.mxu1 %vm289_vm2, %v3064_v32 }
 0x8b9   :  { %16023 = vmatpush3.bf16.xpose.msra.mxu0 %v3221_v44  ;;  %16017 = vmatpush3.bf16.xpose.msra.mxu1 %v3171_v20 }
 0x8ba   :  { %16018 = vmatprep.mubr.msk.bf16.mxu1 %vm17237_vm1, %v21774_v40  ;;  %16024 = vmatprep.mubr.msk.bf16.mxu0 %vm17237_vm1, %v21774_v40 }
 0x8bb   :  { %16028 = vmatprep.subr.bf16.mxu1 %v21774_v40  ;;  %16034 = vmatprep.subr.bf16.mxu0 %v21774_v40 }
 0x8c0   :  { %16025 = vmatmul.mubr.msk.bf16.vlgmr.msra.gmra.mxu0 %vm289_vm2, %v3214_v62  ;;  %16019 = vmatmul.mubr.msk.bf16.vlgmr.msra.gmra.mxu1 %vm289_vm2, %v3164_v22 }
 0x8c1   :  { %16035 = vmatpush3.bf16.msra.mxu0 %v3415_v11  ;;  %16029 = vmatpush3.bf16.xpose.msra.mxu1 %v3271_v14 }
 0x8c2   :  { %16030 = vmatprep.mubr.msk.bf16.mxu1 %vm17237_vm1, %v21774_v40  ;;  %16040 = vmatprep.subr.bf16.mxu1 %v21774_v40 }
 0x8c3   :  { %16036 = vmatprep.mubr.msk.bf16.mxu0 %vm17237_vm1, %v21774_v40  ;;  %16046 = vmatprep.subr.bf16.mxu0 %v21774_v40 }
 0x8c8   :  { %16031 = vmatmul.mubr.msk.bf16.vlgmr.msra.gmra.mxu1 %vm289_vm2, %v3264_v42 }
 0x8c9   :  { %16042 = vmatprep.mubr.msk.bf16.mxu1 %vm17237_vm1, %v21774_v40 }
 0x91b   :  { %v18158_v33 = vpop.f32.mrf.mxu0 }
 0x91d   :  { %v15942_v12 = vpop.f32.mrf.mxu0 }
 0x91f   :  { %v2574_v32 = vpop.f32.mrf.mxu0 }
 0x921   :  { %v15943_v56 = vpop.f32.mrf.mxu0 }
 0x923   :  { %v18160_v49 = vpop.f32.mrf.mxu0 }
 0x924   :  { %v18162_v29 = vpop.f32.mrf.mxu1 }
 0x925   :  { %v15954_v1 = vpop.f32.mrf.mxu0 }
 0x926   :  { %v15948_v41 = vpop.f32.mrf.mxu1 }
 0x927   :  { %v2670_v38 = vpop.f32.mrf.mxu0 }
 0x928   :  { %v2622_v34 = vpop.f32.mrf.mxu1 }
 0x929   :  { %v15955_v27 = vpop.f32.mrf.mxu0 }
 0x92a   :  { %v15949_v16 = vpop.f32.mrf.mxu1 }
 0x92b   :  { %v18166_v22 = vpop.f32.mrf.mxu0 }
 0x92c   :  { %v18168_v0 = vpop.f32.mrf.mxu1 }
 0x92d   :  { %v15966_v30 = vpop.f32.mrf.mxu0 }
 0x92e   :  { %v15960_v25 = vpop.f32.mrf.mxu1 }
 0x92f   :  { %v2766_v23 = vpop.f32.mrf.mxu0 }
 0x930   :  { %v2718_v42 = vpop.f32.mrf.mxu1 }
 0x931   :  { %v15967_v44 = vpop.f32.mrf.mxu0 }
 0x932   :  { %v15961_v20 = vpop.f32.mrf.mxu1 }
 0x934   :  { %v18172_v39 = vpop.f32.mrf.mxu1 }
 0x936   :  { %v15972_v11 = vpop.f32.mrf.mxu1 }
 0x938   :  { %v2814_v14 = vpop.f32.mrf.mxu1 }
 0x93a   :  { %v15973_v12 = vpop.f32.mrf.mxu1 }
 0x960   :  { %v18176_v32 = vpop.f32.mrf.mxu0 }
 0x962   :  { %v15978_v56 = vpop.f32.mrf.mxu0 }
 0x964   :  { %v2862_v1 = vpop.f32.mrf.mxu0 }
 0x966   :  { %v15979_v41 = vpop.f32.mrf.mxu0 }
 0x968   :  { %v2957_v38 = vpop.f32.mrf.mxu0  ;;  %v18178_v34 = vpop.f32.mrf.mxu1 }
 0x969   :  { %v3313_v27 = vsel %vm289_vm2, %v2957_v38, -inf }
 0x96a   :  { %3314 = vmax.xlane.f32.xlu0 %v3313_v27  ;;  %v15990_v30 = vpop.f32.mrf.mxu0  ;;  %v15984_v25 = vpop.f32.mrf.mxu1 }
 0x96c   :  { %v2960_v23 = vpop.f32.mrf.mxu0  ;;  %v2910_v42 = vpop.f32.mrf.mxu1 }
 0x96e   :  { %v15991_v44 = vpop.f32.mrf.mxu0  ;;  %v15985_v20 = vpop.f32.mrf.mxu1 }
 0x970   :  { %v3057_v11 = vpop.f32.mrf.mxu0  ;;  %v3007_v14 = vpop.f32.mrf.mxu1 }
 0x971   :  { %v3319_v12 = vsel %vm289_vm2, %v3057_v11, -inf  ;;  %v3316_v56 = vsel %vm289_vm2, %v3007_v14, -inf }
 0x972   :  { %3320 = vmax.xlane.f32.xlu0 %v3319_v12  ;;  %v16002_v1 = vpop.f32.mrf.mxu0  ;;  %3317 = vmax.xlane.f32.xlu1 %v3316_v56  ;;  %v15996_v41 = vpop.f32.mrf.mxu1 }
 0x974   :  { %v3060_v62 = vpop.f32.mrf.mxu0  ;;  %v3010_v46 = vpop.f32.mrf.mxu1 }
 0x976   :  { %v16003_v16 = vpop.f32.mrf.mxu0  ;;  %v15997_v27 = vpop.f32.mrf.mxu1 }
 0x978   :  { %v18185_v30 = vpop.f32.mrf.mxu0  ;;  %v3107_v25 = vpop.f32.mrf.mxu1 }
 0x979   :  { %v3325_v23 = vsel %vm289_vm2, %v18185_v30, -inf  ;;  %v3322_v42 = vsel %vm289_vm2, %v3107_v25, -inf }
 0x97a   :  { %3326 = vmax.xlane.f32.xlu1 %v3325_v23  ;;  %v16014_v44 = vpop.f32.mrf.mxu0  ;;  %v16008_v20 = vpop.f32.mrf.mxu1  ;;  %3323 = vmax.xlane.f32.xlu0 %v3322_v42 }
 0x97c   :  { %v3160_v12 = vpop.f32.mrf.mxu0  ;;  %v3110_v1 = vpop.f32.mrf.mxu1 }
 0x97e   :  { %v16015_v56 = vpop.f32.mrf.mxu0  ;;  %v16009_v41 = vpop.f32.mrf.mxu1 }
 0x980   :  { %v18190_v62 = vpop.f32.mrf.mxu0  ;;  %v18192_v46 = vpop.f32.mrf.mxu1 }
 0x981   :  { %v3331_v16 = vsel %vm289_vm2, %v18190_v62, -inf  ;;  %v3328_v27 = vsel %vm289_vm2, %v18192_v46, -inf }
 0x982   :  { %3332 = vmax.xlane.f32.xlu1 %v3331_v16  ;;  %v16026_v31 = vpop.f32.mrf.mxu0  ;;  %v16020_v23 = vpop.f32.mrf.mxu1  ;;  %3329 = vmax.xlane.f32.xlu0 %v3328_v27 }
 0x984   :  { %v3260_v44 = vpop.f32.mrf.mxu0  ;;  %v3210_v42 = vpop.f32.mrf.mxu1 }
 0x986   :  { %v16027_v20 = vpop.f32.mrf.mxu0  ;;  %v16021_v12 = vpop.f32.mrf.mxu1 }
 0x988   :  { %v3307_v1 = vpop.f32.mrf.mxu1 }
 0x989   :  { %v3334_v56 = vsel %vm289_vm2, %v3307_v1, -inf }
 0x98a   :  { %v16032_v41 = vpop.f32.mrf.mxu1  ;;  %3335 = vmax.xlane.f32.xlu0 %v3334_v56 }
 0x98c   :  { %v3310_v26 = vpop.f32.mrf.mxu1 }
 0x98e   :  { %v16033_v18 = vpop.f32.mrf.mxu1 }
 0x993   :  { %3505 = vrot.lane.b32.xlu1 %v17479_v45, %s21705_s27 }
 0x997   :  { %3553 = vrot.lane.b32.xlu1 %v17489_v52, %s21705_s27 }
 0x9a0   :  { %3457 = vrot.lane.b32.xlu0 %v17481_v47, %s21705_s27 }
 0x9f3   :  { %v3315_v31 = vpop.xlane.xlu0 %3314 }
 0x9f4   :  { %v3337_v16 = vsub.f32 %v2957_v38, %v3315_v31 }
 0x9f6   :  { %v3345_v27 = vmul.f32 1.442695, %v3337_v16 }
 0x9f8   :  { %17010 = vpow2.f32 %v3345_v27 }
 0x9fb   :  { %v3321_v23 = vpop.xlane.xlu0 %3320  ;;  %v3318_v44 = vpop.xlane.xlu1 %3317 }
 0x9fc   :  { %v3339_v42 = vsub.f32 %v3057_v11, %v3321_v23  ;;  %v3338_v20 = vsub.f32 %v3007_v14, %v3318_v44 }
 0x9fe   :  { %v3349_v12 = vmul.f32 1.442695, %v3339_v42  ;;  %v3347_v26 = vmul.f32 1.442695, %v3338_v20 }
 0xa00   :  { %17012 = vpow2.f32 %v3349_v12 }
 0xa01   :  { %17014 = vpow2.f32 %v3347_v26 }
 0xa03   :  { %v3324_v18 = vpop.xlane.xlu0 %3323  ;;  %v3327_v42 = vpop.xlane.xlu1 %3326 }
 0xa04   :  { %v3340_v56 = vsub.f32 %v3107_v25, %v3324_v18  ;;  %v3341_v20 = vsub.f32 %v18185_v30, %v3327_v42 }
 0xa05   :  { %v18205_v45 = vpop.eup %17010 }
 0xa06   :  { %v3361_v52 = vsel %vm289_vm2, %v18205_v45, 0.0  ;;  %v3351_v47 = vmul.f32 1.442695, %v3340_v56  ;;  %v3353_v26 = vmul.f32 1.442695, %v3341_v20 }
 0xa07   :  { %3362 = vadd.xlane.f32.xlu1 %v3361_v52 }
 0xa08   :  { %17016 = vpow2.f32 %v3351_v47 }
 0xa09   :  { %17018 = vpow2.f32 %v3353_v26 }
 0xa0b   :  { %v3330_v31 = vpop.xlane.xlu0 %3329  ;;  %v3333_v12 = vpop.xlane.xlu1 %3332 }
 0xa0c   :  { %v3343_v18 = vsub.f32 %v18190_v62, %v3333_v12  ;;  %v3342_v52 = vsub.f32 %v18192_v46, %v3330_v31 }
 0xa0d   :  { %v18209_v38 = vpop.eup %17012 }
 0xa0e   :  { %v18211_v41 = vpop.eup %17014  ;;  %v3367_v11 = vsel %vm289_vm2, %v18209_v38, 0.0  ;;  %v3357_v56 = vmul.f32 1.442695, %v3343_v18  ;;  %v3355_v47 = vmul.f32 1.442695, %v3342_v52 }
 0xa0f   :  { %v3364_v14 = vsel %vm289_vm2, %v18211_v41, 0.0  ;;  %3368 = vadd.xlane.f32.xlu1 %v3367_v11 }
 0xa10   :  { %3365 = vadd.xlane.f32.xlu0 %v3364_v14  ;;  %17020 = vpow2.f32 %v3357_v56 }
 0xa11   :  { %17022 = vpow2.f32 %v3355_v47 }
 0xa13   :  { %v3336_v25 = vpop.xlane.xlu0 %3335 }
 0xa14   :  { %v3344_v11 = vsub.f32 %v3307_v1, %v3336_v25  ;;  %v21775_v25 = vpack.i.bf16 %v17964_v2, %v17962_v24  ;;  %v3506_v24 = vpop.permute.xlu1 %3505 }
 0xa15   :  { %v18217_v16 = vpop.eup %17016 }
 0xa16   :  { %v3370_v27 = vsel %vm289_vm2, %v18217_v16, 0.0  ;;  %v3359_v14 = vmul.f32 1.442695, %v3344_v11 }
 0xa17   :  { %3371 = vadd.xlane.f32.xlu0 %v3370_v27  ;;  %v3458_v23 = vpop.permute.xlu0 %3457 }
 0xa18   :  { %v3463_v44 = vsel %vm773_vm3, %v3458_v23, 0  ;;  %17024 = vpow2.f32 %v3359_v14  ;;  %v21776_v23 = vpack.i.bf16 %v18168_v0, %v18160_v49  ;;  %v3554_v2 = vpop.permute.xlu1 %3553 }
 0xa19   :  { %16041 = vmatpush3.bf16.msra.mxu1 %v3463_v44  ;;  %v21777_v44 = vpack.i.bf16 %v17958_v28, %v17956_v57  ;;  %v3511_v57 = vsel %vm773_vm3, %v3506_v24, 0  ;;  %v3559_v11 = vsel %vm773_vm3, %v3554_v2, 0 }
 0xa1a   :  { %16052 = vmatprep.subr.bf16.mxu1 %v21774_v40 }
 0xa20   :  { %3649 = vrot.lane.b32.xlu1 %v17495_v60, %s21705_s27  ;;  %v18230_v60 = vpop.eup %17018 }
 0xa21   :  { %v3373_v30 = vsel %vm289_vm2, %v18230_v60, 0.0  ;;  %v18234_v27 = vpop.eup %17020 }
 0xa22   :  { %v18238_v62 = vpop.eup %17022 }
 0xa23   :  { %v3376_v46 = vsel %vm289_vm2, %v18238_v62, 0.0 }
 0xa25   :  { %v18242_v1 = vpop.eup %17024 }
 0xa26   :  { %v3382_v31 = vsel %vm289_vm2, %v18242_v1, 0.0 }
 0xa2d   :  { %3601 = vrot.lane.b32.xlu0 %v17487_v51, %s21705_s27  ;;  %v3379_v51 = vsel %vm289_vm2, %v18234_v27, 0.0 }
 0xa44   :  { %3374 = vadd.xlane.f32.xlu1 %v3373_v30 }
 0xa48   :  { %3380 = vadd.xlane.f32.xlu1 %v3379_v51 }
 0xa4c   :  { %3377 = vadd.xlane.f32.xlu0 %v3376_v46 }
 0xa50   :  { %3383 = vadd.xlane.f32.xlu0 %v3382_v31 }
 0xa59   :  { %3745 = vrot.lane.b32.xlu1 %v17503_v63, %s21705_s27  ;;  %v21778_v63 = vpack.i.bf16 %v18162_v29, %v18158_v33 }
 0xa5d   :  { %16534 = vrot.lane.b32.xlu1 %v21775_v25, %s21713_s28 }
 0xa61   :  { %16544 = vrot.lane.b32.xlu1 %v21776_v23, %s21711_s29 }
 0xa66   :  { %3697 = vrot.lane.b32.xlu0 %v17497_v61, %s21705_s27  ;;  %s21847_s27 = smov 16  }
 0xa6a   :  { %16529 = vrot.lane.b32.xlu0 %v21777_v44, %s21713_s28 }
 0xa6e   :  { %16539 = vrot.lane.b32.xlu0 %v21778_v63, %s21711_s29 }
 0xa90   :  { %v3363_v42 = vpop.xlane.xlu1 %3362 }
 0xa91   :  { %17026 = vrcp.f32 %v3363_v42 }
 0xa98   :  { %v3369_v20 = vpop.xlane.xlu1 %3368 }
 0xa99   :  { %17028 = vrcp.f32 %v3369_v20  ;;  %v3366_v49 = vpop.xlane.xlu0 %3365 }
 0xa9a   :  { %17030 = vrcp.f32 %v3366_v49 }
 0xa9c   :  { %v3650_v14 = vpop.permute.xlu1 %3649 }
 0xa9d   :  { %v3655_v51 = vsel %vm773_vm3, %v3650_v14, 0 }
 0xa9e   :  { %v17027_v0 = vpop.eup %17026 }
 0xa9f   :  { %v3393_v61 = vmul.f32 %v17027_v0, %v18205_v45 }
 0xaa0   :  { %v3372_v26 = vpop.xlane.xlu0 %3371 }
 0xaa1   :  { %v3401_v12 = vpack.c.bf16 %v3393_v61, %v3393_v61  ;;  %17032 = vrcp.f32 %v3372_v26 }
 0xaa3   :  { %16037 = vmatmul.mubr.msk.bf16.vlgmr.msra.gmra.mxu0 %vm289_vm2, %v3401_v12 }
 0xaa4   :  { %16047 = vmatpush3.bf16.msra.mxu0 %v3511_v57  ;;  %16048 = vmatprep.mubr.msk.bf16.mxu0 %vm17237_vm1, %v21774_v40  ;;  %v3602_v45 = vpop.permute.xlu0 %3601 }
 0xaa5   :  { %16058 = vmatprep.subr.bf16.mxu0 %v21774_v40  ;;  %v3607_v47 = vsel %vm773_vm3, %v3602_v45, 0 }
 0xaa6   :  { %v17029_v28 = vpop.eup %17028 }
 0xaa7   :  { %v17031_v33 = vpop.eup %17030  ;;  %v3395_v29 = vmul.f32 %v17029_v28, %v18209_v38 }
 0xaa8   :  { %v3394_v18 = vmul.f32 %v17031_v33, %v18211_v41 }
 0xaa9   :  { %v3403_v56 = vpack.c.bf16 %v3395_v29, %v3395_v29  ;;  %v16652_v29 = vld [vmem:[%s21667_s6 + $0x8] sm:$0xff]  }
 0xaaa   :  { %v3402_v52 = vpack.c.bf16 %v3394_v18, %v3394_v18 }
 0xaab   :  { %16049 = vmatmul.mubr.msk.bf16.vlgmr.msra.gmra.mxu0 %vm289_vm2, %v3403_v56  ;;  %v16653_v56 = vld [vmem:[%s21667_s6] sm:$0xff]  }
 0xaac   :  { %16043 = vmatmul.mubr.msk.bf16.vlgmr.msra.gmra.mxu1 %vm289_vm2, %v3402_v52  ;;  %16059 = vmatpush3.bf16.msra.mxu0 %v3607_v47 }
 0xaad   :  { %16053 = vmatpush3.bf16.msra.mxu1 %v3559_v11  ;;  %16054 = vmatprep.mubr.msk.bf16.mxu1 %vm17237_vm1, %v21774_v40 }
 0xaae   :  { %16064 = vmatprep.subr.bf16.mxu1 %v21774_v40  ;;  %16060 = vmatprep.mubr.msk.bf16.mxu0 %vm17237_vm1, %v21774_v40  ;;  %v17033_v38 = vpop.eup %17032 }
 0xaaf   :  { %16070 = vmatprep.subr.bf16.mxu0 %v21774_v40  ;;  %v3396_v41 = vmul.f32 %v17033_v38, %v18217_v16 }
 0xab1   :  { %v3404_v30 = vpack.c.bf16 %v3396_v41, %v3396_v41 }
 0xab4   :  { %16055 = vmatmul.mubr.msk.bf16.vlgmr.msra.gmra.mxu1 %vm289_vm2, %v3404_v30 }
 0xab5   :  { %16065 = vmatpush3.bf16.msra.mxu1 %v3655_v51  ;;  %16066 = vmatprep.mubr.msk.bf16.mxu1 %vm17237_vm1, %v21774_v40 }
 0xab6   :  { %16076 = vmatprep.subr.bf16.mxu1 %v21774_v40 }
 0xacd   :  { %v3375_v46 = vpop.xlane.xlu1 %3374 }
 0xace   :  { %17034 = vrcp.f32 %v3375_v46  ;;  %v21779_v46 = vpack.i.bf16 %v17970_v50, %v17966_v13  ;;  %v21782_v13 = vpack.i.bf16 %v18178_v34, %v18176_v32 }
 0xad1   :  { %v3381_v31 = vpop.xlane.xlu1 %3380 }
 0xad2   :  { %17036 = vrcp.f32 %v3381_v31 }
 0xad5   :  { %v3378_v25 = vpop.xlane.xlu0 %3377  ;;  %v3746_v12 = vpop.permute.xlu1 %3745 }
 0xad6   :  { %17038 = vrcp.f32 %v3378_v25  ;;  %v3751_v57 = vsel %vm773_vm3, %v3746_v12, 0 }
 0xad9   :  { %v3384_v23 = vpop.xlane.xlu0 %3383 }
 0xada   :  { %17040 = vrcp.f32 %v3384_v23 }
 0xadb   :  { %v17035_v16 = vpop.eup %17034 }
 0xadc   :  { %v3397_v44 = vmul.f32 %v17035_v16, %v18230_v60  ;;  %v21780_v16 = vpack.i.bf16 %v18172_v39, %v18166_v22 }
 0xadd   :  { %v3698_v24 = vpop.permute.xlu0 %3697 }
 0xade   :  { %v3405_v63 = vpack.c.bf16 %v3397_v44, %v3397_v44  ;;  %v3703_v42 = vsel %vm773_vm3, %v3698_v24, 0  ;;  %v21781_v24 = vpack.i.bf16 %v17976_v17, %v17974_v21 }
 0xadf   :  { %v17037_v2 = vpop.eup %17036 }
 0xae0   :  { %16061 = vmatmul.mubr.msk.bf16.vlgmr.msra.gmra.mxu0 %vm289_vm2, %v3405_v63  ;;  %v3399_v20 = vmul.f32 %v17037_v2, %v18234_v27 }
 0xae1   :  { %16071 = vmatpush3.bf16.msra.mxu0 %v3703_v42  ;;  %16072 = vmatprep.mubr.msk.bf16.mxu0 %vm17237_vm1, %v21774_v40 }
 0xae2   :  { %v3407_v61 = vpack.c.bf16 %v3399_v20, %v3399_v20  ;;  %16082 = vmatprep.subr.bf16.mxu0 %v16652_v29 }
 0xae3   :  { %v17039_v49 = vpop.eup %17038 }
 0xae4   :  { %v3398_v0 = vmul.f32 %v17039_v49, %v18238_v62 }
 0xae6   :  { %v3406_v26 = vpack.c.bf16 %v3398_v0, %v3398_v0 }
 0xae7   :  { %v17041_v60 = vpop.eup %17040 }
 0xae8   :  { %16073 = vmatmul.mubr.msk.bf16.vlgmr.msra.gmra.mxu0 %vm289_vm2, %v3407_v61  ;;  %16067 = vmatmul.mubr.msk.bf16.vlgmr.msra.gmra.mxu1 %vm289_vm2, %v3406_v26  ;;  %v3400_v28 = vmul.f32 %v17041_v60, %v18242_v1 }
 0xae9   :  { %16077 = vmatpush3.bf16.msra.mxu1 %v3751_v57  ;;  %16078 = vmatprep.mubr.msk.bf16.mxu1 %vm17237_vm1, %v21774_v40 }
 0xaea   :  { %v3408_v27 = vpack.c.bf16 %v3400_v28, %v3400_v28  ;;  %16083 = vmatpush3.bf16.msra.mxu0 %v16652_v29 }
 0xaeb   :  { %16084 = vmatprep.subr.bf16.mxu0 %v16653_v56 }
 0xaee   :  { %16085 = vmatpush3.bf16.msra.mxu0 %v16653_v56 }
 0xaf0   :  { %16079 = vmatmul.mubr.msk.bf16.vlgmr.msra.gmra.mxu1 %vm289_vm2, %v3408_v27  ;;  %v16530_v27 = vpop.permute.xlu0 %16529 }
 0xaf1   :  { %v16532_v29 = vunpack.i.h.bf16 %v16530_v27 }
 0xb63   :  { %v3451_v62 = vpop.f32.mrf.mxu0 }
 0xb65   :  { %v16038_v33 = vpop.f32.mrf.mxu0 }
 0xb66   :  { %v16535_v33 = vpop.permute.xlu1 %16534 }
 0xb67   :  { %v3454_v18 = vpop.f32.mrf.mxu0 }
 0xb68   :  { %v16531_v18 = vunpack.i.l.bf16 %v16530_v27 }
 0xb69   :  { %v16039_v45 = vpop.f32.mrf.mxu0 }
 0xb6b   :  { %v3547_v52 = vpop.f32.mrf.mxu0 }
 0xb6c   :  { %v3499_v47 = vpop.f32.mrf.mxu1 }
 0xb6d   :  { %v16548_v1 = vpack.i.bf16 %v3499_v47, %v3451_v62  ;;  %v16050_v11 = vpop.f32.mrf.mxu0  ;;  %v16540_v62 = vpop.permute.xlu0 %16539  ;;  %v3890_v47 = vsel %vm289_vm2, %v17756_v5, %v16532_v29 }
 0xb6e   :  { %v16044_v38 = vpop.f32.mrf.mxu1  ;;  %v16542_v45 = vunpack.i.h.bf16 %v16540_v62  ;;  %v16541_v56 = vunpack.i.l.bf16 %v16540_v62 }
 0xb6f   :  { %16549 = vrot.lane.b32.xlu0 %v16548_v1, %s21709_s26  ;;  %v3550_v41 = vpop.f32.mrf.mxu0  ;;  %v3889_v1 = vsel %vm289_vm2, %v17754_v55, %v16531_v18 }
 0xb70   :  { %v3502_v14 = vpop.f32.mrf.mxu1  ;;  %v3898_v41 = vsel %vm3897_vm4, %v3889_v1, %v16541_v56 }
 0xb71   :  { %v16051_v30 = vpop.f32.mrf.mxu0  ;;  %v3899_v14 = vsel %vm3897_vm4, %v3890_v47, %v16542_v45 }
 0xb72   :  { %v16045_v51 = vpop.f32.mrf.mxu1  ;;  %v16545_v30 = vpop.permute.xlu1 %16544 }
 0xb73   :  { %16559 = vrot.lane.b32.xlu0 %v21779_v46, %s21713_s28 }
 0xb74   :  { %v3595_v31 = vpop.f32.mrf.mxu1 }
 0xb75   :  { %v16553_v25 = vpack.i.bf16 %v3595_v31, %v3547_v52 }
 0xb76   :  { %v16056_v23 = vpop.f32.mrf.mxu1 }
 0xb77   :  { %16569 = vrot.lane.b32.xlu0 %v21780_v16, %s21711_s29  ;;  %16554 = vrot.lane.b32.xlu1 %v16553_v25, %s21709_s26  ;;  %v16537_v25 = vunpack.i.h.bf16 %v16535_v33  ;;  %v16536_v23 = vunpack.i.l.bf16 %v16535_v33  ;;  %v16547_v16 = vunpack.i.h.bf16 %v16545_v30 }
 0xb78   :  { %v3598_v44 = vpop.f32.mrf.mxu1 }
 0xb79   :  { %v16546_v44 = vunpack.i.l.bf16 %v16545_v30  ;;  %v3892_v55 = vsel %vm289_vm2, %v17760_v37, %v16537_v25 }
 0xb7a   :  { %v16057_v63 = vpop.f32.mrf.mxu1 }
 0xb7b   :  { %16564 = vrot.lane.b32.xlu1 %v21781_v24, %s21713_s28  ;;  %v3891_v63 = vsel %vm289_vm2, %v17758_v10, %v16536_v23 }
 0xb7f   :  { %16574 = vrot.lane.b32.xlu1 %v21782_v13, %s21711_s29 }
 0xba0   :  { %v3643_v50 = vpop.f32.mrf.mxu0 }
 0xba2   :  { %v16062_v2 = vpop.f32.mrf.mxu0 }
 0xba3   :  { %v3901_v2 = vsel %vm3897_vm4, %v3892_v55, %v16547_v16 }
 0xba4   :  { %v3646_v42 = vpop.f32.mrf.mxu0 }
 0xba6   :  { %v16063_v20 = vpop.f32.mrf.mxu0 }
 0xba8   :  { %v3739_v22 = vpop.f32.mrf.mxu0  ;;  %v3691_v39 = vpop.f32.mrf.mxu1 }
 0xba9   :  { %v16578_v49 = vpack.i.bf16 %v3691_v39, %v3643_v50  ;;  %v3900_v50 = vsel %vm3897_vm4, %v3891_v63, %v16546_v44 }
 0xbaa   :  { %v16074_v0 = vpop.f32.mrf.mxu0  ;;  %v16068_v61 = vpop.f32.mrf.mxu1 }
 0xbab   :  { %16579 = vrot.lane.b32.xlu0 %v16578_v49, %s21709_s26 }
 0xbac   :  { %v3742_v12 = vpop.f32.mrf.mxu0  ;;  %v3694_v26 = vpop.f32.mrf.mxu1 }
 0xbae   :  { %v16075_v21 = vpop.f32.mrf.mxu0  ;;  %v16069_v17 = vpop.f32.mrf.mxu1 }
 0xbb0   :  { %v3787_v60 = vpop.f32.mrf.mxu1 }
 0xbb1   :  { %v16583_v57 = vpack.i.bf16 %v3787_v60, %v3739_v22 }
 0xbb2   :  { %v16080_v28 = vpop.f32.mrf.mxu1 }
 0xbb3   :  { %16584 = vrot.lane.b32.xlu1 %v16583_v57, %s21709_s26 }
 0xbb4   :  { %v3790_v32 = vpop.f32.mrf.mxu1 }
 0xbb6   :  { %v16081_v34 = vpop.f32.mrf.mxu1 }
 0xbe1   :  { %v16550_v52 = vpop.permute.xlu0 %16549 }
 0xbe2   :  { %v16552_v11 = vunpack.i.h.bf16 %v16550_v52  ;;  %v16551_v38 = vunpack.i.l.bf16 %v16550_v52 }
 0xbe4   :  { %v3907_v51 = vsel %vm3906_vm5, %v3898_v41, %v16551_v38  ;;  %v3908_v46 = vsel %vm3906_vm5, %v3899_v14, %v16552_v11 }
 0xbe5   :  { %v3915_v31 = vpack.c.bf16 %v3908_v46, %v3907_v51  ;;  %v16560_v39 = vpop.permute.xlu0 %16559 }
 0xbe6   :  { %v16562_v0 = vunpack.i.h.bf16 %v16560_v39  ;;  %v16561_v37 = vunpack.i.l.bf16 %v16560_v39 }
 0xbe7   :  { %16086 = vmatprep.mubr.msk.bf16.mxu0 %vm185_vm0, %v3915_v31 }
 0xbe8   :  { %v3894_v21 = vsel %vm289_vm2, %v17762_v43, %v16562_v0  ;;  %v3893_v17 = vsel %vm289_vm2, %v17764_v48, %v16561_v37 }
 0xbe9   :  { %v16555_v5 = vpop.permute.xlu1 %16554  ;;  %v16570_v49 = vpop.permute.xlu0 %16569 }
 0xbea   :  { %v16557_v24 = vunpack.i.h.bf16 %v16555_v5  ;;  %v16556_v13 = vunpack.i.l.bf16 %v16555_v5  ;;  %v16572_v12 = vunpack.i.h.bf16 %v16570_v49  ;;  %v16571_v10 = vunpack.i.l.bf16 %v16570_v49 }
 0xbec   :  { %v3910_v42 = vsel %vm3906_vm5, %v3901_v2, %v16557_v24  ;;  %v3909_v20 = vsel %vm3906_vm5, %v3900_v50, %v16556_v13  ;;  %v3902_v28 = vsel %vm3897_vm4, %v3893_v17, %v16571_v10  ;;  %v3903_v32 = vsel %vm3897_vm4, %v3894_v21, %v16572_v12 }
 0xbed   :  { %v3916_v22 = vpack.c.bf16 %v3910_v42, %v3909_v20  ;;  %v16565_v61 = vpop.permute.xlu1 %16564 }
 0xbee   :  { %v16567_v29 = vunpack.i.h.bf16 %v16565_v61  ;;  %v16566_v18 = vunpack.i.l.bf16 %v16565_v61 }
 0xbef   :  { %16087 = vmatmul.mubr.msk.bf16.vlgmr.msra.gmra.mxu0 %vm185_vm0, %v3916_v22 }
 0xbf0   :  { %v3896_v48 = vsel %vm289_vm2, %v17768_v35, %v16567_v29  ;;  %v3895_v52 = vsel %vm289_vm2, %v17766_v36, %v16566_v18  ;;  %v13954_v35 = vld [vmem:[%s21668_s7] ss:$0 sm:$0xff] }
 0xbf1   :  { %v16575_v34 = vpop.permute.xlu1 %16574 }
 0xbf2   :  { %v16577_v45 = vunpack.i.h.bf16 %v16575_v34  ;;  %v16576_v56 = vunpack.i.l.bf16 %v16575_v34 }
 0xbf4   :  { %v3904_v11 = vsel %vm3897_vm4, %v3895_v52, %v16576_v56  ;;  %v3905_v38 = vsel %vm3897_vm4, %v3896_v48, %v16577_v45 }
 0xc1d   :  { %v16580_v26 = vpop.permute.xlu0 %16579 }
 0xc1e   :  { %v16582_v60 = vunpack.i.h.bf16 %v16580_v26  ;;  %v16581_v57 = vunpack.i.l.bf16 %v16580_v26 }
 0xc20   :  { %v3911_v27 = vsel %vm3906_vm5, %v3902_v28, %v16581_v57  ;;  %v3912_v62 = vsel %vm3906_vm5, %v3903_v32, %v16582_v60 }
 0xc21   :  { %v3917_v33 = vpack.c.bf16 %v3912_v62, %v3911_v27 }
 0xc23   :  { %16090 = vmatprep.mubr.msk.bf16.mxu0 %vm185_vm0, %v3917_v33 }
 0xc25   :  { %v16585_v43 = vpop.permute.xlu1 %16584 }
 0xc26   :  { %v16587_v47 = vunpack.i.h.bf16 %v16585_v43  ;;  %v16586_v1 = vunpack.i.l.bf16 %v16585_v43 }
 0xc28   :  { %v3914_v41 = vsel %vm3906_vm5, %v3905_v38, %v16587_v47  ;;  %v3913_v14 = vsel %vm3906_vm5, %v3904_v11, %v16586_v1  ;;  %v4182_v1 = vld [vmem:[%s21669_s10 + $0x80] sm:$0xff]  ;;  %v4183_v38 = vld [vmem:[%s21669_s10 + $0x88] sm:$0xff] }
 0xc29   :  { %v3918_v30 = vpack.c.bf16 %v3914_v41, %v3913_v14  ;;  %v4190_v11 = vld [vmem:[%s21669_s10 + $0xc0] sm:$0xff]  ;;  %v4191_v14 = vld [vmem:[%s21669_s10 + $0xc8] sm:$0xff] }
 0xc2a   :  { %v13980_v41 = vcombine.high %v4182_v1, %v4190_v11 }
 0xc2b   :  { %16091 = vmatmul.mubr.msk.bf16.gmra.mxu0 %vm185_vm0, %v3918_v30  ;;  %v13979_v30 = vcombine.low %v4182_v1, %v4190_v11 }
 0xc2c   :  { %4466 = vmatprep.subr.bf16.mxu1 %v13980_v41 }
 0xc2d   :  { %4467 = vmatpush1.bf16.msra.mxu1 %v13979_v30 }
 0xcaf   :  { %v16088_v51 = vpop.f32.mrf.mxu0 }
 0xcb0   :  { %v3997_v36 = vadd.f32 %v16088_v51, %v13954_v35  ;;  %v13981_v51 = vcombine.low %v4183_v38, %v4191_v14 }
 0xcb1   :  { %v3988_v46 = vpop.f32.mrf.mxu0 }
 0xcb2   :  { %v3989_v31 = vadd.f32 %v13954_v35, %v3988_v46  ;;  %v4021_v44 = vadd.f32 %v3997_v36, %v17438_v53  ;;  %v4166_v46 = vld [vmem:[%s21669_s10] sm:$0xff] }
 0xcb3   :  { %v16089_v25 = vpop.f32.mrf.mxu0  ;;  %v4174_v36 = vld [vmem:[%s21669_s10 + $0x40] sm:$0xff] }
 0xcb4   :  { %v4019_v23 = vadd.f32 %v3989_v31, %v17442_v58  ;;  %v4000_v5 = vadd.f32 %v16089_v25, %v13954_v35  ;;  %v4035_v2 = vsel %vm185_vm0, %v4021_v44, 0.0  ;;  %v4167_v31 = vld [vmem:[%s21669_s10 + $0x8] sm:$0xff]  ;;  %v13964_v25 = vcombine.high %v4166_v46, %v4174_v36 }
 0xcb5   :  { %v3991_v16 = vpop.f32.mrf.mxu0 }
 0xcb6   :  { %v3992_v55 = vadd.f32 %v13954_v35, %v3991_v16  ;;  %v4029_v63 = vsel %vm185_vm0, %v4019_v23, 0.0  ;;  %v4022_v13 = vadd.f32 %v4000_v5, %v17440_v54  ;;  %v13963_v16 = vcombine.low %v4166_v46, %v4174_v36  ;;  %4468 = vmatprep.subr.bf16.mxu1 %v13964_v25  ;;  %v18509_v46 = vld [vmem:[%s21670_s8] ss:$0 sm:$0xff] }
 0xcb7   :  { %4030 = vadd.xlane.f32.xlu0 %v4029_v63 }
 0xcb8   :  { %v4020_v24 = vadd.f32 %v3992_v55, %v17444_v59  ;;  %v4038_v58 = vsel %vm185_vm0, %v4022_v13, 0.0  ;;  %4469 = vmatpush1.bf16.msra.mxu1 %v13963_v16  ;;  %v21725_v55 = vmov 0   ;;  %v18516_v16 = vld [vmem:[%s21671_s9] ss:$0 sm:$0xff] }
 0xcb9   :  { %4486 = vmatprep.mubr.bf16.mxu1 %v21725_v55  ;;  %4559 = vmatprep.mubr.bf16.mxu0 %v21725_v55 }
 0xcba   :  { %v4032_v50 = vsel %vm185_vm0, %v4020_v24, 0.0  ;;  %16648 = vset.pattern.permute.xlu1 %v21725_v55  ;;  %16649 = vset.pattern.permute.xlu0 %v21725_v55 }
 0xcbb   :  { %4033 = vadd.xlane.f32.xlu1 %v4032_v50  ;;  %4036 = vadd.xlane.f32.xlu0 %v4035_v2 }
 0xcbf   :  { %4039 = vadd.xlane.f32.xlu0 %v4038_v58 }
 0xceb   :  { %v16092_v42 = vpop.f32.mrf.mxu0 }
 0xcec   :  { %v4013_v20 = vadd.f32 %v16092_v42, %v13954_v35 }
 0xced   :  { %v4004_v53 = vpop.f32.mrf.mxu0 }
 0xcee   :  { %v4005_v22 = vadd.f32 %v13954_v35, %v4004_v53  ;;  %v18381_v54 = vadd.f32 %v4013_v20, %v17460_v19 }
 0xcef   :  { %v16093_v39 = vpop.f32.mrf.mxu0 }
 0xcf0   :  { %v18378_v49 = vadd.f32 %v4005_v22, %v17453_v9  ;;  %v4016_v0 = vadd.f32 %v16093_v39, %v13954_v35  ;;  %v4047_v9 = vsel %vm185_vm0, %v18381_v54, 0.0 }
 0xcf1   :  { %v4007_v59 = vpop.f32.mrf.mxu0 }
 0xcf2   :  { %v4008_v37 = vadd.f32 %v13954_v35, %v4007_v59  ;;  %v4041_v61 = vsel %vm185_vm0, %v18378_v49, 0.0  ;;  %v18389_v10 = vadd.f32 %v4016_v0, %v17458_v15  ;;  %v13982_v35 = vcombine.high %v4183_v38, %v4191_v14 }
 0xcf3   :  { %4042 = vadd.xlane.f32.xlu1 %v4041_v61 }
 0xcf4   :  { %v18386_v12 = vadd.f32 %v4008_v37, %v17450_v3  ;;  %v4050_v19 = vsel %vm185_vm0, %v18389_v10, 0.0  ;;  %4539 = vmatprep.subr.bf16.mxu0 %v13982_v35 }
 0xcf5   :  { %4540 = vmatpush1.bf16.msra.mxu0 %v13981_v51 }
 0xcf6   :  { %v4044_v26 = vsel %vm185_vm0, %v18386_v12, 0.0 }
 0xcf7   :  { %4048 = vadd.xlane.f32.xlu1 %v4047_v9  ;;  %4045 = vadd.xlane.f32.xlu0 %v4044_v26 }
 0xcfb   :  { %4051 = vadd.xlane.f32.xlu0 %v4050_v19  ;;  %v4184_v19 = vld [vmem:[%s21669_s10 + $0x90] sm:$0xff] }
 0xd40   :  { %v4031_v21 = vpop.xlane.xlu0 %4030 }
 0xd41   :  { %v4054_v17 = vmul.f32 0.03125, %v4031_v21  ;;  %v4185_v21 = vld [vmem:[%s21669_s10 + $0x98] sm:$0xff] }
 0xd43   :  { %v18397_v60 = vsub.f32 %v4019_v23, %v4054_v17  ;;  %v4175_v23 = vld [vmem:[%s21669_s10 + $0x48] sm:$0xff] }
 0xd44   :  { %v4034_v3 = vpop.xlane.xlu1 %4033  ;;  %v4037_v57 = vpop.xlane.xlu0 %4036  ;;  %v13966_v5 = vcombine.high %v4167_v31, %v4175_v23 }
 0xd45   :  { %v4055_v15 = vmul.f32 0.03125, %v4034_v3  ;;  %v4056_v28 = vmul.f32 0.03125, %v4037_v57  ;;  %v4070_v32 = vmul.f32 %v18397_v60, %v18397_v60  ;;  %v4193_v3 = vld [vmem:[%s21669_s10 + $0xd8] sm:$0xff] }
 0xd46   :  { %4541 = vmatprep.subr.bf16.mxu0 %v13966_v5  ;;  %v13986_v57 = vcombine.high %v4185_v21, %v4193_v3 }
 0xd47   :  { %v18401_v34 = vsub.f32 %v4020_v24, %v4055_v15  ;;  %v18403_v27 = vsub.f32 %v4021_v44, %v4056_v28  ;;  %v4078_v62 = vsel %vm185_vm0, %v4070_v32, 0.0  ;;  %v13965_v44 = vcombine.low %v4167_v31, %v4175_v23  ;;  %v18484_v32 = vld [vmem:[%s21669_s10 + $0xa0] sm:$0xff] }
 0xd48   :  { %4079 = vadd.xlane.f32.xlu1 %v4078_v62  ;;  %v4040_v33 = vpop.xlane.xlu0 %4039  ;;  %v18489_v62 = vld [vmem:[%s21669_s10 + $0xe0] sm:$0xff] }
 0xd49   :  { %v4057_v29 = vmul.f32 0.03125, %v4040_v33  ;;  %v4071_v18 = vmul.f32 %v18401_v34, %v18401_v34  ;;  %v4072_v45 = vmul.f32 %v18403_v27, %v18403_v27  ;;  %4542 = vmatpush1.bf16.msra.mxu0 %v13965_v44  ;;  %v18494_v33 = vld [vmem:[%s21669_s10 + $0xa8] sm:$0xff] }
 0xd4a   :  { %4685 = vmatprep.subr.bf16.mxu0 %v13986_v57 }
 0xd4b   :  { %v18410_v56 = vsub.f32 %v4022_v13, %v4057_v29  ;;  %v4081_v43 = vsel %vm185_vm0, %v4071_v18, 0.0  ;;  %v4084_v48 = vsel %vm185_vm0, %v4072_v45, 0.0  ;;  %v18499_v18 = vld [vmem:[%s21669_s10 + $0xe8] sm:$0xff] }
 0xd4c   :  { %4082 = vadd.xlane.f32.xlu0 %v4081_v43  ;;  %4085 = vadd.xlane.f32.xlu1 %v4084_v48  ;;  %v13987_v48 = vcombine.low %v18484_v32, %v18489_v62 }
 0xd4d   :  { %v4073_v52 = vmul.f32 %v18410_v56, %v18410_v56 }
 0xd4f   :  { %v4087_v47 = vsel %vm185_vm0, %v4073_v52, 0.0  ;;  %v13989_v52 = vcombine.low %v18494_v33, %v18499_v18 }
 0xd50   :  { %4088 = vadd.xlane.f32.xlu0 %v4087_v47 }
 0xd7c   :  { %v4043_v63 = vpop.xlane.xlu1 %4042 }
 0xd7d   :  { %v4058_v24 = vmul.f32 0.03125, %v4043_v63  ;;  %v4168_v63 = vld [vmem:[%s21669_s10 + $0x10] sm:$0xff] }
 0xd7f   :  { %v18446_v13 = vsub.f32 %v18378_v49, %v4058_v24 }
 0xd80   :  { %v4049_v50 = vpop.xlane.xlu1 %4048  ;;  %v4046_v2 = vpop.xlane.xlu0 %4045 }
 0xd81   :  { %v4060_v58 = vmul.f32 0.03125, %v4049_v50  ;;  %v4059_v42 = vmul.f32 0.03125, %v4046_v2  ;;  %v4074_v53 = vmul.f32 %v18446_v13, %v18446_v13  ;;  %v4176_v2 = vld [vmem:[%s21669_s10 + $0x50] sm:$0xff] }
 0xd83   :  { %v18451_v20 = vsub.f32 %v18381_v54, %v4060_v58  ;;  %v18454_v22 = vsub.f32 %v18386_v12, %v4059_v42  ;;  %v4090_v39 = vsel %vm185_vm0, %v4074_v53, 0.0  ;;  %v4177_v58 = vld [vmem:[%s21669_s10 + $0x58] sm:$0xff] }
 0xd84   :  { %4091 = vadd.xlane.f32.xlu1 %v4090_v39  ;;  %v4052_v59 = vpop.xlane.xlu0 %4051  ;;  %v13985_v39 = vcombine.low %v4185_v21, %v4193_v3 }
 0xd85   :  { %v4061_v0 = vmul.f32 0.03125, %v4052_v59  ;;  %v4076_v49 = vmul.f32 %v18451_v20, %v18451_v20  ;;  %v4075_v37 = vmul.f32 %v18454_v22, %v18454_v22  ;;  %v13968_v59 = vcombine.high %v4168_v63, %v4176_v2 }
 0xd87   :  { %v18462_v61 = vsub.f32 %v18389_v10, %v4061_v0  ;;  %v4096_v54 = vsel %vm185_vm0, %v4076_v49, 0.0  ;;  %v4093_v9 = vsel %vm185_vm0, %v4075_v37, 0.0  ;;  %v4192_v10 = vld [vmem:[%s21669_s10 + $0xd0] sm:$0xff] }
 0xd88   :  { %4097 = vadd.xlane.f32.xlu1 %v4096_v54  ;;  %4094 = vadd.xlane.f32.xlu0 %v4093_v9  ;;  %v13984_v17 = vcombine.high %v4184_v19, %v4192_v10  ;;  %v13983_v53 = vcombine.low %v4184_v19, %v4192_v10  ;;  %v13967_v54 = vcombine.low %v4168_v63, %v4176_v2  ;;  %v4179_v2 = vld [vmem:[%s21669_s10 + $0x68] sm:$0xff] }
 0xd89   :  { %v4077_v12 = vmul.f32 %v18462_v61, %v18462_v61 }
 0xd8a   :  { %4612 = vmatprep.subr.bf16.mxu1 %v13984_v17 }
 0xd8b   :  { %v4099_v26 = vsel %vm185_vm0, %v4077_v12, 0.0  ;;  %v13988_v12 = vcombine.high %v18484_v32, %v18489_v62  ;;  %v4172_v32 = vld [vmem:[%s21669_s10 + $0x30] sm:$0xff] }
 0xd8c   :  { %4100 = vadd.xlane.f32.xlu0 %v4099_v26  ;;  %v13990_v26 = vcombine.high %v18494_v33, %v18499_v18  ;;  %v4180_v62 = vld [vmem:[%s21669_s10 + $0x70] sm:$0xff]  ;;  %v4173_v33 = vld [vmem:[%s21669_s10 + $0x38] sm:$0xff] }
 0xd8d   :  { %v4181_v18 = vld [vmem:[%s21669_s10 + $0x78] sm:$0xff] }
 0xdd1   :  { %v4080_v15 = vpop.xlane.xlu1 %4079 }
 0xdd2   :  { %v4102_v28 = vmul.f32 0.03125, %v4080_v15 }
 0xdd4   :  { %v4110_v29 = vadd.f32 1e-05, %v4102_v28 }
 0xdd5   :  { %v4086_v45 = vpop.xlane.xlu1 %4085  ;;  %v4083_v43 = vpop.xlane.xlu0 %4082 }
 0xdd6   :  { %17042 = vrsqrt.f32 %v4110_v29  ;;  %v4104_v47 = vmul.f32 0.03125, %v4086_v45  ;;  %v4103_v1 = vmul.f32 0.03125, %v4083_v43 }
 0xdd8   :  { %v4111_v11 = vadd.f32 1e-05, %v4103_v1  ;;  %v4112_v38 = vadd.f32 1e-05, %v4104_v47 }
 0xdd9   :  { %v4089_v41 = vpop.xlane.xlu0 %4088 }
 0xdda   :  { %v4105_v14 = vmul.f32 0.03125, %v4089_v41  ;;  %17044 = vrsqrt.f32 %v4111_v11 }
 0xddb   :  { %17046 = vrsqrt.f32 %v4112_v38 }
 0xddc   :  { %v4113_v30 = vadd.f32 1e-05, %v4105_v14 }
 0xdde   :  { %17048 = vrsqrt.f32 %v4113_v30 }
 0xde3   :  { %v17043_v51 = vpop.eup %17042 }
 0xde4   :  { %v4126_v35 = vmul.f32 %v17043_v51, %v18397_v60 }
 0xde6   :  { %v4140_v31 = vmul.f32 %v18509_v46, %v4126_v35 }
 0xde7   :  { %v17045_v36 = vpop.eup %17044 }
 0xde8   :  { %v4127_v25 = vmul.f32 %v17045_v36, %v18401_v34  ;;  %v17047_v23 = vpop.eup %17046  ;;  %v18524_v24 = vadd.f32 %v18516_v16, %v4140_v31 }
 0xde9   :  { %v4128_v34 = vmul.f32 %v17047_v23, %v18403_v27 }
 0xdea   :  { %v4141_v5 = vmul.f32 %v18509_v46, %v4127_v25 }
 0xdeb   :  { %v17049_v44 = vpop.eup %17048  ;;  %v4142_v49 = vmul.f32 %v18509_v46, %v4128_v34  ;;  %v4171_v34 = vld [vmem:[%s21669_s10 + $0x28] sm:$0xff] }
 0xdec   :  { %v4129_v60 = vmul.f32 %v17049_v44, %v18410_v56  ;;  %v18528_v50 = vadd.f32 %v18516_v16, %v4141_v5  ;;  %v4169_v56 = vld [vmem:[%s21669_s10 + $0x18] sm:$0xff] }
 0xded   :  { %v13970_v0 = vcombine.high %v4169_v56, %v4177_v58  ;;  %v13969_v9 = vcombine.low %v4169_v56, %v4177_v58  ;;  %v18559_v19 = vadd.f32 %v18516_v16, %v4142_v49  ;;  %v4188_v56 = vld [vmem:[%s21669_s10 + $0xb0] sm:$0xff]  ;;  %v13973_v49 = vcombine.low %v4171_v34, %v4179_v2 }
 0xdee   :  { %v18541_v42 = vpack.c.bf16 %v18528_v50, %v18524_v24  ;;  %v4143_v27 = vmul.f32 %v18509_v46, %v4129_v60  ;;  %v4196_v58 = vld [vmem:[%s21669_s10 + $0xf0] sm:$0xff] }
 0xdef   :  { %21784 = vst [vmem:[#allocation26_spill] sm:$0xff] %v18559_v19 }
 0xdf0   :  { %13995 = vmatmul.mubr.msk.bf16.vlgmr.msra.gmra.mxu1 %vm185_vm0, %v18541_v42  ;;  %13999 = vmatmul.mubr.msk.bf16.vlgmr.msra.gmra.mxu0 %vm185_vm0, %v18541_v42  ;;  %v18552_v37 = vadd.f32 %v18516_v16, %v4143_v27  ;;  %v4189_v27 = vld [vmem:[%s21669_s10 + $0xb8] sm:$0xff] }
 0xdf1   :  { %4496 = vmatprep.mubr.bf16.mxu1 %v21725_v55  ;;  %4569 = vmatprep.mubr.bf16.mxu0 %v21725_v55 }
 0xdf2   :  { %21783 = vst [vmem:[#allocation25_spill] sm:$0xff] %v18552_v37  ;;  %4613 = vmatpush1.bf16.msra.mxu1 %v13983_v53  ;;  %4686 = vmatpush1.bf16.msra.mxu0 %v13985_v39  ;;  %v18563_v10 = vpack.c.bf16 %v18552_v37, %v18559_v19  ;;  %v4197_v53 = vld [vmem:[%s21669_s10 + $0xf8] sm:$0xff] }
 0xdf3   :  { %4614 = vmatprep.subr.bf16.mxu1 %v13968_v59  ;;  %4687 = vmatprep.subr.bf16.mxu0 %v13970_v0  ;;  %v13974_v59 = vcombine.high %v4171_v34, %v4179_v2  ;;  %v16681_v34 = vld [vmem:[%s21672_s12 + $0x88] sm:$0xff]   ;;  %v16682_v2 = vld [vmem:[%s21672_s12 + $0x40] sm:$0xff]  }
 0xdf6   :  { %4615 = vmatpush1.bf16.msra.mxu1 %v13967_v54  ;;  %4688 = vmatpush1.bf16.msra.mxu0 %v13969_v9  ;;  %v13992_v54 = vcombine.high %v4188_v56, %v4196_v58  ;;  %v13994_v9 = vcombine.high %v4189_v27, %v4197_v53 }
 0xdf7   :  { %4758 = vmatprep.subr.bf16.mxu1 %v13988_v12  ;;  %4831 = vmatprep.subr.bf16.mxu0 %v13990_v26  ;;  %v13976_v12 = vcombine.high %v4172_v32, %v4180_v62  ;;  %v13978_v26 = vcombine.high %v4173_v33, %v4181_v18 }
 0xdf8   :  { %13996 = vmatmul.mubr.msk.bf16.gmra.mxu1 %vm185_vm0, %v18563_v10  ;;  %14000 = vmatmul.mubr.msk.bf16.gmra.mxu0 %vm185_vm0, %v18563_v10 }
 0xdf9   :  { %4506 = vmatprep.mubr.bf16.mxu1 %v21725_v55  ;;  %4579 = vmatprep.mubr.bf16.mxu0 %v21725_v55 }
 0xe0d   :  { %v4092_v21 = vpop.xlane.xlu1 %4091 }
 0xe0e   :  { %v4106_v17 = vmul.f32 0.03125, %v4092_v21  ;;  %v16654_v21 = vld [vmem:[%s21672_s12 + $0x78] sm:$0xff]  }
 0xe10   :  { %v4114_v3 = vadd.f32 1e-05, %v4106_v17  ;;  %v16655_v17 = vld [vmem:[%s21672_s12 + $0xf8] sm:$0xff]  }
 0xe11   :  { %v4098_v57 = vpop.xlane.xlu1 %4097  ;;  %v4095_v15 = vpop.xlane.xlu0 %4094 }
 0xe12   :  { %17050 = vrsqrt.f32 %v4114_v3  ;;  %v4108_v28 = vmul.f32 0.03125, %v4098_v57  ;;  %v4107_v29 = vmul.f32 0.03125, %v4095_v15  ;;  %v13975_v3 = vcombine.low %v4172_v32, %v4180_v62  ;;  %v16656_v15 = vld [vmem:[%s21672_s12 + $0x38] sm:$0xff]  }
 0xe13   :  { %v13977_v57 = vcombine.low %v4173_v33, %v4181_v18 }
 0xe14   :  { %v4115_v45 = vadd.f32 1e-05, %v4107_v29  ;;  %v4116_v43 = vadd.f32 1e-05, %v4108_v28  ;;  %v16657_v28 = vld [vmem:[%s21672_s12 + $0xb8] sm:$0xff]   ;;  %v16658_v29 = vld [vmem:[%s21672_s12 + $0x70] sm:$0xff]  }
 0xe15   :  { %v4101_v47 = vpop.xlane.xlu0 %4100 }
 0xe16   :  { %v4109_v1 = vmul.f32 0.03125, %v4101_v47  ;;  %17052 = vrsqrt.f32 %v4115_v45  ;;  %v16659_v45 = vld [vmem:[%s21672_s12 + $0xf0] sm:$0xff]  }
 0xe17   :  { %17054 = vrsqrt.f32 %v4116_v43  ;;  %v16660_v43 = vld [vmem:[%s21672_s12 + $0x30] sm:$0xff]  }
 0xe18   :  { %v4117_v11 = vadd.f32 1e-05, %v4109_v1  ;;  %v16661_v47 = vld [vmem:[%s21672_s12 + $0xb0] sm:$0xff]   ;;  %v16662_v1 = vld [vmem:[%s21672_s12 + $0x68] sm:$0xff]  }
 0xe1a   :  { %17056 = vrsqrt.f32 %v4117_v11  ;;  %v16664_v11 = vld [vmem:[%s21672_s12 + $0x28] sm:$0xff]  }
 0xe1f   :  { %v17051_v38 = vpop.eup %17050 }
 0xe20   :  { %v4130_v41 = vmul.f32 %v17051_v38, %v18446_v13  ;;  %v16665_v38 = vld [vmem:[%s21672_s12 + $0xa8] sm:$0xff]  }
 0xe22   :  { %v4144_v30 = vmul.f32 %v18509_v46, %v4130_v41  ;;  %v16666_v41 = vld [vmem:[%s21672_s12 + $0x60] sm:$0xff]  }
 0xe23   :  { %v17053_v14 = vpop.eup %17052 }
 0xe24   :  { %v4131_v51 = vmul.f32 %v17053_v14, %v18454_v22  ;;  %v17055_v35 = vpop.eup %17054  ;;  %v18577_v23 = vadd.f32 %v18516_v16, %v4144_v30  ;;  %v16667_v14 = vld [vmem:[%s21672_s12 + $0xe0] sm:$0xff]  }
 0xe25   :  { %v4132_v44 = vmul.f32 %v17055_v35, %v18451_v20  ;;  %v16668_v30 = vld [vmem:[%s21672_s12 + $0x20] sm:$0xff]   ;;  %v16670_v35 = vld [vmem:[%s21672_s12 + $0x58] sm:$0xff]  }
 0xe26   :  { %v4145_v31 = vmul.f32 %v18509_v46, %v4131_v51  ;;  %21785 = vst [vmem:[#allocation27_spill] sm:$0xff] %v18577_v23  ;;  %v16669_v51 = vld [vmem:[%s21672_s12 + $0xa0] sm:$0xff]  }
 0xe27   :  { %v17057_v36 = vpop.eup %17056  ;;  %v4146_v60 = vmul.f32 %v18509_v46, %v4132_v44  ;;  %v16675_v44 = vld [vmem:[%s21672_s12 + $0xd0] sm:$0xff]  }
 0xe28   :  { %v4133_v25 = vmul.f32 %v17057_v36, %v18462_v61  ;;  %v18581_v5 = vadd.f32 %v18516_v16, %v4145_v31  ;;  %v16672_v36 = vld [vmem:[%s21672_s12 + $0x18] sm:$0xff]  }
 0xe29   :  { %v18599_v61 = vadd.f32 %v18516_v16, %v4146_v60  ;;  %v16673_v31 = vld [vmem:[%s21672_s12 + $0x98] sm:$0xff]   ;;  %v16677_v60 = vld [vmem:[%s21672_s12 + $0x90] sm:$0xff]  }
 0xe2a   :  { %21786 = vst [vmem:[#allocation28_spill] sm:$0xff] %v18581_v5  ;;  %v18585_v13 = vpack.c.bf16 %v18581_v5, %v18577_v23  ;;  %v4147_v22 = vmul.f32 %v18509_v46, %v4133_v25  ;;  %v4170_v46 = vld [vmem:[%s21669_s10 + $0x20] sm:$0xff]  ;;  %v16674_v25 = vld [vmem:[%s21672_s12 + $0x50] sm:$0xff]  }
 0xe2b   :  { %21788 = vst [vmem:[#allocation30_spill] sm:$0xff] %v18599_v61 }
 0xe2c   :  { %13997 = vmatmul.mubr.msk.bf16.gmra.mxu1 %vm185_vm0, %v18585_v13  ;;  %14001 = vmatmul.mubr.msk.bf16.gmra.mxu0 %vm185_vm0, %v18585_v13  ;;  %v18596_v20 = vadd.f32 %v18516_v16, %v4147_v22  ;;  %v4178_v16 = vld [vmem:[%s21669_s10 + $0x60] sm:$0xff]  ;;  %v16676_v22 = vld [vmem:[%s21672_s12 + $0x10] sm:$0xff]  }
 0xe2d   :  { %4516 = vmatprep.mubr.bf16.mxu1 %v21725_v55  ;;  %4589 = vmatprep.mubr.bf16.mxu0 %v21725_v55  ;;  %v13972_v39 = vcombine.high %v4170_v46, %v4178_v16  ;;  %v13971_v0 = vcombine.low %v4170_v46, %v4178_v16  ;;  %v16678_v46 = vld [vmem:[%s21672_s12 + $0x48] sm:$0xff]  }
 0xe2e   :  { %21787 = vst [vmem:[#allocation29_spill] sm:$0xff] %v18596_v20  ;;  %v18603_v63 = vpack.c.bf16 %v18596_v20, %v18599_v61  ;;  %v16680_v16 = vld [vmem:[%s21672_s12 + $0x8] sm:$0xff]  }
 0xe34   :  { %13998 = vmatmul.mubr.msk.bf16.gmra.mxu1 %vm185_vm0, %v18603_v63  ;;  %14002 = vmatmul.mubr.msk.bf16.gmra.mxu0 %vm185_vm0, %v18603_v63 }
 0xe35   :  { %4632 = vmatprep.mubr.bf16.mxu1 %v21725_v55  ;;  %4705 = vmatprep.mubr.bf16.mxu0 %v21725_v55 }
 0xe3c   :  { %14003 = vmatmul.mubr.msk.bf16.vlgmr.msra.gmra.mxu1 %vm185_vm0, %v18541_v42  ;;  %14007 = vmatmul.mubr.msk.bf16.vlgmr.msra.gmra.mxu0 %vm185_vm0, %v18541_v42 }
 0xe3d   :  { %4642 = vmatprep.mubr.bf16.mxu1 %v21725_v55  ;;  %4715 = vmatprep.mubr.bf16.mxu0 %v21725_v55 }
 0xe3e   :  { %4759 = vmatpush1.bf16.msra.mxu1 %v13987_v48  ;;  %4832 = vmatpush1.bf16.msra.mxu0 %v13989_v52  ;;  %v13991_v48 = vcombine.low %v4188_v56, %v4196_v58  ;;  %v13993_v52 = vcombine.low %v4189_v27, %v4197_v53  ;;  %v16683_v56 = vld [vmem:[%s21672_s12 + $0xc0] sm:$0xff]   ;;  %v16686_v53 = vld [vmem:[%s21672_s12 + $0x178] sm:$0xff]  }
 0xe3f   :  { %4760 = vmatprep.subr.bf16.mxu1 %v13972_v39  ;;  %4833 = vmatprep.subr.bf16.mxu0 %v13974_v59  ;;  %v16684_v58 = vld [vmem:[%s21672_s12] sm:$0xff]   ;;  %v16687_v39 = vld [vmem:[%s21672_s12 + $0x1f8] sm:$0xff]  }
 0xe40   :  { %v16685_v27 = vld [vmem:[%s21672_s12 + $0x80] sm:$0xff]  }
 0xe42   :  { %4761 = vmatpush1.bf16.msra.mxu1 %v13971_v0  ;;  %4834 = vmatpush1.bf16.msra.mxu0 %v13973_v49 }
 0xe43   :  { %4904 = vmatprep.subr.bf16.mxu1 %v13992_v54  ;;  %4977 = vmatprep.subr.bf16.mxu0 %v13994_v9 }
 0xe44   :  { %14004 = vmatmul.mubr.msk.bf16.gmra.mxu1 %vm185_vm0, %v18563_v10  ;;  %14008 = vmatmul.mubr.msk.bf16.gmra.mxu0 %vm185_vm0, %v18563_v10 }
 0xe45   :  { %4652 = vmatprep.mubr.bf16.mxu1 %v21725_v55  ;;  %4725 = vmatprep.mubr.bf16.mxu0 %v21725_v55 }
 0xe4c   :  { %14005 = vmatmul.mubr.msk.bf16.gmra.mxu1 %vm185_vm0, %v18585_v13  ;;  %14009 = vmatmul.mubr.msk.bf16.gmra.mxu0 %vm185_vm0, %v18585_v13 }
 0xe4d   :  { %4662 = vmatprep.mubr.bf16.mxu1 %v21725_v55  ;;  %4735 = vmatprep.mubr.bf16.mxu0 %v21725_v55 }
 0xe54   :  { %14006 = vmatmul.mubr.msk.bf16.gmra.mxu1 %vm185_vm0, %v18603_v63  ;;  %14010 = vmatmul.mubr.msk.bf16.gmra.mxu0 %vm185_vm0, %v18603_v63 }
 0xe55   :  { %4778 = vmatprep.mubr.bf16.mxu1 %v21725_v55  ;;  %4851 = vmatprep.mubr.bf16.mxu0 %v21725_v55 }
 0xe5c   :  { %14011 = vmatmul.mubr.msk.bf16.vlgmr.msra.gmra.mxu1 %vm185_vm0, %v18541_v42  ;;  %14015 = vmatmul.mubr.msk.bf16.vlgmr.msra.gmra.mxu0 %vm185_vm0, %v18541_v42 }
 0xe5d   :  { %4788 = vmatprep.mubr.bf16.mxu1 %v21725_v55  ;;  %4861 = vmatprep.mubr.bf16.mxu0 %v21725_v55 }
 0xe5e   :  { %4905 = vmatpush1.bf16.msra.mxu1 %v13991_v48  ;;  %4978 = vmatpush1.bf16.msra.mxu0 %v13993_v52 }
 0xe5f   :  { %4906 = vmatprep.subr.bf16.mxu1 %v13976_v12  ;;  %4979 = vmatprep.subr.bf16.mxu0 %v13978_v26 }
 0xe62   :  { %4907 = vmatpush1.bf16.msra.mxu1 %v13975_v3  ;;  %4980 = vmatpush1.bf16.msra.mxu0 %v13977_v57 }
 0xe63   :  { %14904 = vmatprep.subr.bf16.mxu1 %v16654_v21  ;;  %14944 = vmatprep.subr.bf16.mxu0 %v16655_v17 }
 0xe64   :  { %14012 = vmatmul.mubr.msk.bf16.gmra.mxu1 %vm185_vm0, %v18563_v10  ;;  %14016 = vmatmul.mubr.msk.bf16.gmra.mxu0 %vm185_vm0, %v18563_v10 }
 0xe65   :  { %4798 = vmatprep.mubr.bf16.mxu1 %v21725_v55  ;;  %4871 = vmatprep.mubr.bf16.mxu0 %v21725_v55 }
 0xe6c   :  { %14013 = vmatmul.mubr.msk.bf16.gmra.mxu1 %vm185_vm0, %v18585_v13  ;;  %14017 = vmatmul.mubr.msk.bf16.gmra.mxu0 %vm185_vm0, %v18585_v13 }
 0xe6d   :  { %4808 = vmatprep.mubr.bf16.mxu1 %v21725_v55  ;;  %4881 = vmatprep.mubr.bf16.mxu0 %v21725_v55 }
 0xe74   :  { %14014 = vmatmul.mubr.msk.bf16.gmra.mxu1 %vm185_vm0, %v18603_v63  ;;  %14018 = vmatmul.mubr.msk.bf16.gmra.mxu0 %vm185_vm0, %v18603_v63 }
 0xe75   :  { %4924 = vmatprep.mubr.bf16.mxu1 %v21725_v55  ;;  %4997 = vmatprep.mubr.bf16.mxu0 %v21725_v55 }
 0xe7c   :  { %14019 = vmatmul.mubr.msk.bf16.vlgmr.msra.gmra.mxu1 %vm185_vm0, %v18541_v42  ;;  %14023 = vmatmul.mubr.msk.bf16.vlgmr.msra.gmra.mxu0 %vm185_vm0, %v18541_v42  ;;  %v16663_v42 = vld [vmem:[%s21672_s12 + $0xe8] sm:$0xff]  }
 0xe7d   :  { %4934 = vmatprep.mubr.bf16.mxu1 %v21725_v55  ;;  %5007 = vmatprep.mubr.bf16.mxu0 %v21725_v55 }
 0xe7e   :  { %14905 = vmatpush3.bf16.msra.mxu1 %v16656_v15  ;;  %14945 = vmatpush3.bf16.msra.mxu0 %v16657_v28 }
 0xe7f   :  { %14906 = vmatprep.subr.bf16.mxu1 %v16658_v29  ;;  %14946 = vmatprep.subr.bf16.mxu0 %v16659_v45 }
 0xe82   :  { %14907 = vmatpush3.bf16.msra.mxu1 %v16660_v43  ;;  %14947 = vmatpush3.bf16.msra.mxu0 %v16661_v47 }
 0xe83   :  { %14908 = vmatprep.subr.bf16.mxu1 %v16662_v1  ;;  %14948 = vmatprep.subr.bf16.mxu0 %v16663_v42 }
 0xe84   :  { %14020 = vmatmul.mubr.msk.bf16.gmra.mxu1 %vm185_vm0, %v18563_v10  ;;  %14024 = vmatmul.mubr.msk.bf16.gmra.mxu0 %vm185_vm0, %v18563_v10  ;;  %v16671_v10 = vld [vmem:[%s21672_s12 + $0xd8] sm:$0xff]  }
 0xe85   :  { %4944 = vmatprep.mubr.bf16.mxu1 %v21725_v55  ;;  %5017 = vmatprep.mubr.bf16.mxu0 %v21725_v55 }
 0xe86   :  { %14909 = vmatpush3.bf16.msra.mxu1 %v16664_v11  ;;  %14949 = vmatpush3.bf16.msra.mxu0 %v16665_v38 }
 0xe87   :  { %14910 = vmatprep.subr.bf16.mxu1 %v16666_v41  ;;  %14950 = vmatprep.subr.bf16.mxu0 %v16667_v14 }
 0xe8a   :  { %14911 = vmatpush3.bf16.msra.mxu1 %v16668_v30  ;;  %14951 = vmatpush3.bf16.msra.mxu0 %v16669_v51 }
 0xe8b   :  { %14912 = vmatprep.subr.bf16.mxu1 %v16670_v35  ;;  %14952 = vmatprep.subr.bf16.mxu0 %v16671_v10  ;;  %v16688_v10 = vld [vmem:[%s21672_s12 + $0x138] sm:$0xff]  }
 0xe8c   :  { %14021 = vmatmul.mubr.msk.bf16.gmra.mxu1 %vm185_vm0, %v18585_v13  ;;  %14025 = vmatmul.mubr.msk.bf16.gmra.mxu0 %vm185_vm0, %v18585_v13  ;;  %v16679_v13 = vld [vmem:[%s21672_s12 + $0xc8] sm:$0xff]  }
 0xe8d   :  { %4954 = vmatprep.mubr.bf16.mxu1 %v21725_v55  ;;  %5027 = vmatprep.mubr.bf16.mxu0 %v21725_v55 }
 0xe8e   :  { %14913 = vmatpush3.bf16.msra.mxu1 %v16672_v36  ;;  %14953 = vmatpush3.bf16.msra.mxu0 %v16673_v31 }
 0xe8f   :  { %14914 = vmatprep.subr.bf16.mxu1 %v16674_v25  ;;  %14954 = vmatprep.subr.bf16.mxu0 %v16675_v44 }
 0xe92   :  { %14915 = vmatpush3.bf16.msra.mxu1 %v16676_v22  ;;  %14955 = vmatpush3.bf16.msra.mxu0 %v16677_v60  ;;  %v16689_v22 = vld [vmem:[%s21672_s12 + $0x1b8] sm:$0xff]   ;;  %v16690_v60 = vld [vmem:[%s21672_s12 + $0x170] sm:$0xff]  }
 0xe93   :  { %14916 = vmatprep.subr.bf16.mxu1 %v16678_v46  ;;  %14956 = vmatprep.subr.bf16.mxu0 %v16679_v13 }
 0xe94   :  { %14022 = vmatmul.mubr.msk.bf16.gmra.mxu1 %vm185_vm0, %v18603_v63  ;;  %14026 = vmatmul.mubr.msk.bf16.gmra.mxu0 %vm185_vm0, %v18603_v63  ;;  %v18828_v63 = vld [vmem:[%s21750_s19] sm:$0xff] }
 0xe95   :  { %v18832_v59 = vrot.slane %v18828_v63, %v17361_v7  ;;  %v18836_v0 = vrot.slane %v18828_v63, %v17363_v8  ;;  %v18840_v9 = vrot.slane %v18828_v63, %v17354_v4  ;;  %v18844_v32 = vrot.slane %v18828_v63, %v17359_v6 }
 0xe96   :  { %14917 = vmatpush3.bf16.msra.mxu1 %v16680_v16  ;;  %14957 = vmatpush3.bf16.msra.mxu0 %v16681_v34 }
 0xe97   :  { %14918 = vmatprep.subr.bf16.mxu1 %v16682_v2  ;;  %14958 = vmatprep.subr.bf16.mxu0 %v16683_v56  ;;  %v16691_v2 = vld [vmem:[%s21672_s12 + $0x1f0] sm:$0xff]  }
 0xe9a   :  { %14919 = vmatpush3.bf16.msra.mxu1 %v16684_v58  ;;  %14959 = vmatpush3.bf16.msra.mxu0 %v16685_v27 }
 0xe9b   :  { %14984 = vmatprep.subr.bf16.mxu1 %v16686_v53  ;;  %15024 = vmatprep.subr.bf16.mxu0 %v16687_v39 }
 0xeb0   :  { %v4488_v49 = vpop.f32.mrf.mxu1  ;;  %v4561_v54 = vpop.f32.mrf.mxu0 }
 0xeb1   :  { %v4489_v17 = vadd.f32 %v4488_v49, %v18844_v32  ;;  %v4562_v3 = vadd.f32 %v4561_v54, %v18840_v9 }
 0xeb2   :  { %v4490_v62 = vpop.f32.mrf.mxu1  ;;  %v4563_v33 = vpop.f32.mrf.mxu0 }
 0xeb3   :  { %v4491_v18 = vadd.f32 %v4490_v62, %v18836_v0  ;;  %v4564_v48 = vadd.f32 %v4563_v33, %v18832_v59  ;;  %v5038_v14 = vmax.f32 %v4489_v17, 0.0  ;;  %v5040_v30 = vmax.f32 %v4562_v3, 0.0  ;;  %v16692_v33 = vld [vmem:[%s21672_s12 + $0x130] sm:$0xff]   ;;  %v16695_v17 = vld [vmem:[%s21672_s12 + $0x1e8] sm:$0xff]  }
 0xeb4   :  { %v4492_v52 = vpop.f32.mrf.mxu1  ;;  %v4565_v12 = vpop.f32.mrf.mxu0 }
 0xeb5   :  { %v4493_v26 = vadd.f32 %v4492_v52, %v18844_v32  ;;  %v4566_v21 = vadd.f32 %v4565_v12, %v18840_v9  ;;  %v5039_v57 = vmax.f32 %v4491_v18, 0.0  ;;  %v5041_v15 = vmax.f32 %v4564_v48, 0.0  ;;  %v16693_v18 = vld [vmem:[%s21672_s12 + $0x1b0] sm:$0xff]  }
 0xeb6   :  { %v4494_v28 = vpop.f32.mrf.mxu1  ;;  %v4567_v29 = vpop.f32.mrf.mxu0 }
 0xeb7   :  { %v5054_v45 = vmax.f32 %v4493_v26, 0.0  ;;  %v5056_v43 = vmax.f32 %v4566_v21, 0.0  ;;  %v4495_v47 = vadd.f32 %v4494_v28, %v18836_v0  ;;  %v4568_v1 = vadd.f32 %v4567_v29, %v18832_v59  ;;  %v16694_v21 = vld [vmem:[%s21672_s12 + $0x168] sm:$0xff]  }
 0xeb8   :  { %v4498_v42 = vpop.f32.mrf.mxu1  ;;  %v4571_v11 = vpop.f32.mrf.mxu0  ;;  %v16696_v29 = vld [vmem:[%s21672_s12 + $0x128] sm:$0xff]  }
 0xeb9   :  { %v5055_v38 = vmax.f32 %v4495_v47, 0.0  ;;  %v5057_v41 = vmax.f32 %v4568_v1, 0.0  ;;  %v5166_v46 = vpack.c.bf16 %v5054_v45, %v5038_v14  ;;  %v5168_v13 = vpack.c.bf16 %v5056_v43, %v5040_v30  ;;  %v16697_v45 = vld [vmem:[%s21672_s12 + $0x1a8] sm:$0xff]   ;;  %v16698_v1 = vld [vmem:[%s21672_s12 + $0x160] sm:$0xff]   ;;  %v16702_v30 = vld [vmem:[%s21672_s12 + $0x158] sm:$0xff]  }
 0xeba   :  { %v4500_v51 = vpop.f32.mrf.mxu1  ;;  %v4573_v35 = vpop.f32.mrf.mxu0  ;;  %v4499_v27 = vadd.f32 %v4498_v42, %v18844_v32  ;;  %v4572_v53 = vadd.f32 %v4571_v11, %v18840_v9  ;;  %v16699_v42 = vld [vmem:[%s21672_s12 + $0x1e0] sm:$0xff]  }
 0xebb   :  { %v4501_v36 = vadd.f32 %v4500_v51, %v18836_v0  ;;  %v4574_v31 = vadd.f32 %v4573_v35, %v18832_v59  ;;  %v5167_v25 = vpack.c.bf16 %v5055_v38, %v5039_v57  ;;  %v5169_v44 = vpack.c.bf16 %v5057_v41, %v5041_v15  ;;  %v16700_v41 = vld [vmem:[%s21672_s12 + $0x120] sm:$0xff]   ;;  %v16703_v51 = vld [vmem:[%s21672_s12 + $0x1d8] sm:$0xff]  }
 0xebc   :  { %v4502_v16 = vpop.f32.mrf.mxu1  ;;  %v4575_v34 = vpop.f32.mrf.mxu0  ;;  %v5070_v15 = vmax.f32 %v4499_v27, 0.0  ;;  %v5072_v28 = vmax.f32 %v4572_v53, 0.0  ;;  %v16701_v14 = vld [vmem:[%s21672_s12 + $0x1a0] sm:$0xff]   ;;  %v16704_v35 = vld [vmem:[%s21672_s12 + $0x118] sm:$0xff]  }
 0xebd   :  { %v4503_v56 = vadd.f32 %v4502_v16, %v18844_v32  ;;  %v4576_v58 = vadd.f32 %v4575_v34, %v18840_v9  ;;  %6293 = vmatprep.mubr.bf16.mxu1 %v5167_v25  ;;  %6358 = vmatprep.mubr.bf16.mxu0 %v5169_v44  ;;  %v5071_v39 = vmax.f32 %v4501_v36, 0.0  ;;  %v5073_v49 = vmax.f32 %v4574_v31, 0.0  ;;  %v16706_v36 = vld [vmem:[%s21672_s12 + $0x150] sm:$0xff]   ;;  %v16714_v16 = vld [vmem:[%s21672_s12 + $0x140] sm:$0xff]   ;;  %v16719_v27 = vld [vmem:[%s21672_s12 + $0x2f8] sm:$0xff]  }
 0xebe   :  { %v4504_v54 = vpop.f32.mrf.mxu1  ;;  %v4577_v62 = vpop.f32.mrf.mxu0  ;;  %6294 = vmatmul.mubr.bf16.vlgmr.msra.gmra.mxu1 %v5166_v46  ;;  %6359 = vmatmul.mubr.bf16.vlgmr.msra.gmra.mxu0 %v5168_v13  ;;  %v16707_v31 = vld [vmem:[%s21672_s12 + $0x1d0] sm:$0xff]   ;;  %v16712_v46 = vld [vmem:[%s21672_s12 + $0x108] sm:$0xff]   ;;  %v16715_v34 = vld [vmem:[%s21672_s12 + $0x1c0] sm:$0xff]  }
 0xebf   :  { %v5086_v48 = vmax.f32 %v4503_v56, 0.0  ;;  %v5088_v52 = vmax.f32 %v4576_v58, 0.0  ;;  %v4505_v12 = vadd.f32 %v4504_v54, %v18836_v0  ;;  %v4578_v26 = vadd.f32 %v4577_v62, %v18832_v59  ;;  %14985 = vmatpush3.bf16.msra.mxu1 %v16688_v10  ;;  %15025 = vmatpush3.bf16.msra.mxu0 %v16689_v22  ;;  %v16705_v10 = vld [vmem:[%s21672_s12 + $0x198] sm:$0xff]   ;;  %v16708_v25 = vld [vmem:[%s21672_s12 + $0x110] sm:$0xff]   ;;  %v16710_v22 = vld [vmem:[%s21672_s12 + $0x148] sm:$0xff]  }
 0xec0   :  { %14986 = vmatprep.subr.bf16.mxu1 %v16690_v60  ;;  %15026 = vmatprep.subr.bf16.mxu0 %v16691_v2  ;;  %v16709_v44 = vld [vmem:[%s21672_s12 + $0x190] sm:$0xff]   ;;  %v16711_v60 = vld [vmem:[%s21672_s12 + $0x1c8] sm:$0xff]   ;;  %v16716_v2 = vld [vmem:[%s21672_s12 + $0x100] sm:$0xff]  }
 0xec1   :  { %v5087_v3 = vmax.f32 %v4505_v12, 0.0  ;;  %v5089_v57 = vmax.f32 %v4578_v26, 0.0  ;;  %v5182_v11 = vpack.c.bf16 %v5086_v48, %v5070_v15  ;;  %v5184_v38 = vpack.c.bf16 %v5088_v52, %v5072_v28  ;;  %v16713_v13 = vld [vmem:[%s21672_s12 + $0x188] sm:$0xff]   ;;  %v16717_v56 = vld [vmem:[%s21672_s12 + $0x180] sm:$0xff]   ;;  %v16718_v58 = vld [vmem:[%s21672_s12 + $0x278] sm:$0xff]  }
 0xec3   :  { %v5183_v43 = vpack.c.bf16 %v5087_v3, %v5071_v39  ;;  %v5185_v47 = vpack.c.bf16 %v5089_v57, %v5073_v49  ;;  %14987 = vmatpush3.bf16.msra.mxu1 %v16692_v33  ;;  %15027 = vmatpush3.bf16.msra.mxu0 %v16693_v18 }
 0xec4   :  { %14988 = vmatprep.subr.bf16.mxu1 %v16694_v21  ;;  %15028 = vmatprep.subr.bf16.mxu0 %v16695_v17 }
 0xec5   :  { %6301 = vmatprep.mubr.bf16.mxu1 %v5183_v43  ;;  %6366 = vmatprep.mubr.bf16.mxu0 %v5185_v47 }
 0xec6   :  { %6302 = vmatmul.mubr.bf16.gmra.mxu1 %v5182_v11  ;;  %6367 = vmatmul.mubr.bf16.gmra.mxu0 %v5184_v38 }
 0xec7   :  { %14989 = vmatpush3.bf16.msra.mxu1 %v16696_v29  ;;  %15029 = vmatpush3.bf16.msra.mxu0 %v16697_v45 }
 0xec8   :  { %14990 = vmatprep.subr.bf16.mxu1 %v16698_v1  ;;  %15030 = vmatprep.subr.bf16.mxu0 %v16699_v42 }
 0xecb   :  { %14991 = vmatpush3.bf16.msra.mxu1 %v16700_v41  ;;  %15031 = vmatpush3.bf16.msra.mxu0 %v16701_v14 }
 0xecc   :  { %14992 = vmatprep.subr.bf16.mxu1 %v16702_v30  ;;  %15032 = vmatprep.subr.bf16.mxu0 %v16703_v51 }
 0xecf   :  { %14993 = vmatpush3.bf16.msra.mxu1 %v16704_v35  ;;  %15033 = vmatpush3.bf16.msra.mxu0 %v16705_v10 }
 0xed0   :  { %14994 = vmatprep.subr.bf16.mxu1 %v16706_v36  ;;  %15034 = vmatprep.subr.bf16.mxu0 %v16707_v31 }
 0xed3   :  { %14995 = vmatpush3.bf16.msra.mxu1 %v16708_v25  ;;  %15035 = vmatpush3.bf16.msra.mxu0 %v16709_v44 }
 0xed4   :  { %14996 = vmatprep.subr.bf16.mxu1 %v16710_v22  ;;  %15036 = vmatprep.subr.bf16.mxu0 %v16711_v60 }
 0xed7   :  { %14997 = vmatpush3.bf16.msra.mxu1 %v16712_v46  ;;  %15037 = vmatpush3.bf16.msra.mxu0 %v16713_v13 }
 0xed8   :  { %14998 = vmatprep.subr.bf16.mxu1 %v16714_v16  ;;  %15038 = vmatprep.subr.bf16.mxu0 %v16715_v34 }
 0xedb   :  { %14999 = vmatpush3.bf16.msra.mxu1 %v16716_v2  ;;  %15039 = vmatpush3.bf16.msra.mxu0 %v16717_v56 }
 0xedc   :  { %15064 = vmatprep.subr.bf16.mxu1 %v16718_v58  ;;  %15104 = vmatprep.subr.bf16.mxu0 %v16719_v27  ;;  %v21789_v27 = vld [vmem:[#allocation11_spill] sm:$0xff] }
 0xeec   :  { %v4508_v53 = vpop.f32.mrf.mxu1  ;;  %v4581_v39 = vpop.f32.mrf.mxu0 }
 0xeed   :  { %v4509_v26 = vadd.f32 %v4508_v53, %v18844_v32  ;;  %v4582_v21 = vadd.f32 %v4581_v39, %v18840_v9  ;;  %v18976_v53 = vrot.slane %v18828_v63, %v21789_v27  ;;  %v21790_v39 = vld [vmem:[#allocation18_spill] sm:$0xff] }
 0xeee   :  { %v4510_v49 = vpop.f32.mrf.mxu1  ;;  %v4583_v54 = vpop.f32.mrf.mxu0 }
 0xeef   :  { %v4511_v18 = vadd.f32 %v4510_v49, %v18836_v0  ;;  %v4584_v48 = vadd.f32 %v4583_v54, %v18832_v59  ;;  %v5102_v38 = vmax.f32 %v4509_v26, 0.0  ;;  %v5104_v41 = vmax.f32 %v4582_v21, 0.0 }
 0xef0   :  { %v4512_v62 = vpop.f32.mrf.mxu1  ;;  %v4585_v33 = vpop.f32.mrf.mxu0  ;;  %v18980_v49 = vrot.slane %v18828_v63, %v21790_v39 }
 0xef1   :  { %v4513_v52 = vadd.f32 %v4512_v62, %v18844_v32  ;;  %v4586_v12 = vadd.f32 %v4585_v33, %v18840_v9  ;;  %v5103_v47 = vmax.f32 %v4511_v18, 0.0  ;;  %v5105_v1 = vmax.f32 %v4584_v48, 0.0 }
 0xef2   :  { %v4514_v17 = vpop.f32.mrf.mxu1  ;;  %v4587_v3 = vpop.f32.mrf.mxu0 }
 0xef3   :  { %v4515_v57 = vadd.f32 %v4514_v17, %v18836_v0  ;;  %v4588_v15 = vadd.f32 %v4587_v3, %v18832_v59  ;;  %v5118_v28 = vmax.f32 %v4513_v52, 0.0  ;;  %v5120_v29 = vmax.f32 %v4586_v12, 0.0  ;;  %v21791_v12 = vld [vmem:[#allocation14_spill] sm:$0xff] }
 0xef4   :  { %v4518_v45 = vpop.f32.mrf.mxu1  ;;  %v4591_v43 = vpop.f32.mrf.mxu0 }
 0xef5   :  { %v5119_v42 = vmax.f32 %v4515_v57, 0.0  ;;  %v5121_v11 = vmax.f32 %v4588_v15, 0.0  ;;  %v5198_v10 = vpack.c.bf16 %v5118_v28, %v5102_v38  ;;  %v5200_v36 = vpack.c.bf16 %v5120_v29, %v5104_v41 }
 0xef6   :  { %v4520_v14 = vpop.f32.mrf.mxu1  ;;  %v4593_v30 = vpop.f32.mrf.mxu0  ;;  %v4519_v13 = vadd.f32 %v4518_v45, %v18844_v32  ;;  %v4592_v16 = vadd.f32 %v4591_v43, %v18840_v9 }
 0xef7   :  { %v5199_v51 = vpack.c.bf16 %v5119_v42, %v5103_v47  ;;  %v5201_v35 = vpack.c.bf16 %v5121_v11, %v5105_v1  ;;  %v4521_v31 = vadd.f32 %v4520_v14, %v18836_v0  ;;  %v4594_v22 = vadd.f32 %v4593_v30, %v18832_v59 }
 0xef8   :  { %v4522_v25 = vpop.f32.mrf.mxu1  ;;  %v4595_v44 = vpop.f32.mrf.mxu0  ;;  %v5134_v21 = vmax.f32 %v4519_v13, 0.0  ;;  %v5136_v17 = vmax.f32 %v4592_v16, 0.0 }
 0xef9   :  { %v4523_v60 = vadd.f32 %v4522_v25, %v18844_v32  ;;  %v4596_v46 = vadd.f32 %v4595_v44, %v18840_v9  ;;  %6309 = vmatprep.mubr.bf16.mxu1 %v5199_v51  ;;  %6374 = vmatprep.mubr.bf16.mxu0 %v5201_v35  ;;  %v5135_v33 = vmax.f32 %v4521_v31, 0.0  ;;  %v5137_v18 = vmax.f32 %v4594_v22, 0.0 }
 0xefa   :  { %v4524_v34 = vpop.f32.mrf.mxu1  ;;  %v4597_v2 = vpop.f32.mrf.mxu0  ;;  %6310 = vmatmul.mubr.bf16.gmra.mxu1 %v5198_v10  ;;  %6375 = vmatmul.mubr.bf16.gmra.mxu0 %v5200_v36 }
 0xefb   :  { %v4525_v56 = vadd.f32 %v4524_v34, %v18836_v0  ;;  %v4598_v58 = vadd.f32 %v4597_v2, %v18832_v59  ;;  %v5150_v54 = vmax.f32 %v4523_v60, 0.0  ;;  %v5152_v32 = vmax.f32 %v4596_v46, 0.0  ;;  %v21792_v59 = vld [vmem:[#allocation20_spill] sm:$0xff] }
 0xefc   :  { %v4634_v62 = vpop.f32.mrf.mxu1  ;;  %v4707_v9 = vpop.f32.mrf.mxu0  ;;  %v18984_v0 = vrot.slane %v18828_v63, %v21791_v12  ;;  %v18988_v26 = vrot.slane %v18828_v63, %v21792_v59 }
 0xefd   :  { %v5151_v48 = vmax.f32 %v4525_v56, 0.0  ;;  %v5153_v52 = vmax.f32 %v4598_v58, 0.0  ;;  %v5214_v29 = vpack.c.bf16 %v5150_v54, %v5134_v21  ;;  %v5216_v45 = vpack.c.bf16 %v5152_v32, %v5136_v17  ;;  %v16720_v54 = vld [vmem:[%s21672_s12 + $0x238] sm:$0xff]  }
 0xefe   :  { %v4636_v3 = vpop.f32.mrf.mxu1  ;;  %v4709_v57 = vpop.f32.mrf.mxu0  ;;  %v4635_v63 = vadd.f32 %v4634_v62, %v18984_v0  ;;  %v4708_v41 = vadd.f32 %v4707_v9, %v18988_v26  ;;  %v16721_v32 = vld [vmem:[%s21672_s12 + $0x2b8] sm:$0xff]  }
 0xeff   :  { %v5215_v15 = vpack.c.bf16 %v5151_v48, %v5135_v33  ;;  %v5217_v28 = vpack.c.bf16 %v5153_v52, %v5137_v18  ;;  %v4637_v43 = vadd.f32 %v4636_v3, %v18976_v53  ;;  %v4710_v42 = vadd.f32 %v4709_v57, %v18980_v49  ;;  %v16722_v48 = vld [vmem:[%s21672_s12 + $0x270] sm:$0xff]  }
 0xf00   :  { %v4638_v47 = vpop.f32.mrf.mxu1  ;;  %v4711_v1 = vpop.f32.mrf.mxu0  ;;  %v5042_v13 = vmax.f32 %v4635_v63, 0.0  ;;  %v5044_v16 = vmax.f32 %v4708_v41, 0.0  ;;  %v16723_v52 = vld [vmem:[%s21672_s12 + $0x2f0] sm:$0xff]  }
 0xf01   :  { %v4639_v11 = vadd.f32 %v4638_v47, %v18984_v0  ;;  %v4712_v38 = vadd.f32 %v4711_v1, %v18988_v26  ;;  %6317 = vmatprep.mubr.bf16.mxu1 %v5215_v15  ;;  %6382 = vmatprep.mubr.bf16.mxu0 %v5217_v28  ;;  %v5043_v44 = vmax.f32 %v4637_v43, 0.0  ;;  %v5045_v22 = vmax.f32 %v4710_v42, 0.0  ;;  %v16724_v1 = vld [vmem:[%s21672_s12 + $0x230] sm:$0xff]  }
 0xf02   :  { %v4640_v14 = vpop.f32.mrf.mxu1  ;;  %v4713_v30 = vpop.f32.mrf.mxu0  ;;  %6318 = vmatmul.mubr.bf16.gmra.mxu1 %v5214_v29  ;;  %6383 = vmatmul.mubr.bf16.gmra.mxu0 %v5216_v45  ;;  %v16725_v42 = vld [vmem:[%s21672_s12 + $0x2b0] sm:$0xff]  }
 0xf03   :  { %v4641_v51 = vadd.f32 %v4640_v14, %v18976_v53  ;;  %v4714_v35 = vadd.f32 %v4713_v30, %v18980_v49  ;;  %v5058_v10 = vmax.f32 %v4639_v11, 0.0  ;;  %v5060_v36 = vmax.f32 %v4712_v38, 0.0  ;;  %v16726_v14 = vld [vmem:[%s21672_s12 + $0x268] sm:$0xff]  }
 0xf04   :  { %v4644_v31 = vpop.f32.mrf.mxu1  ;;  %v4717_v25 = vpop.f32.mrf.mxu0  ;;  %v16727_v30 = vld [vmem:[%s21672_s12 + $0x2e8] sm:$0xff]  }
 0xf05   :  { %v5059_v60 = vmax.f32 %v4641_v51, 0.0  ;;  %v5061_v46 = vmax.f32 %v4714_v35, 0.0  ;;  %v5170_v62 = vpack.c.bf16 %v5058_v10, %v5042_v13  ;;  %v5172_v9 = vpack.c.bf16 %v5060_v36, %v5044_v16 }
 0xf06   :  { %v4646_v34 = vpop.f32.mrf.mxu1  ;;  %v4719_v2 = vpop.f32.mrf.mxu0  ;;  %v4645_v57 = vadd.f32 %v4644_v31, %v18984_v0  ;;  %v4718_v15 = vadd.f32 %v4717_v25, %v18988_v26 }
 0xf07   :  { %v5171_v56 = vpack.c.bf16 %v5059_v60, %v5043_v44  ;;  %v5173_v58 = vpack.c.bf16 %v5061_v46, %v5045_v22  ;;  %v4647_v21 = vadd.f32 %v4646_v34, %v18976_v53  ;;  %v4720_v28 = vadd.f32 %v4719_v2, %v18980_v49  ;;  %v16728_v46 = vld [vmem:[%s21672_s12 + $0x228] sm:$0xff]  }
 0xf08   :  { %v4648_v33 = vpop.f32.mrf.mxu1  ;;  %v4721_v18 = vpop.f32.mrf.mxu0  ;;  %v5074_v36 = vmax.f32 %v4645_v57, 0.0  ;;  %v5076_v31 = vmax.f32 %v4718_v15, 0.0  ;;  %v16732_v15 = vld [vmem:[%s21672_s12 + $0x220] sm:$0xff]  }
 0xf09   :  { %v4649_v17 = vadd.f32 %v4648_v33, %v18984_v0  ;;  %v4722_v3 = vadd.f32 %v4721_v18, %v18988_v26  ;;  %6423 = vmatprep.mubr.bf16.mxu1 %v5171_v56  ;;  %6488 = vmatprep.mubr.bf16.mxu0 %v5173_v58  ;;  %v5075_v51 = vmax.f32 %v4647_v21, 0.0  ;;  %v5077_v25 = vmax.f32 %v4720_v28, 0.0  ;;  %v16729_v58 = vld [vmem:[%s21672_s12 + $0x2a8] sm:$0xff]   ;;  %v16731_v18 = vld [vmem:[%s21672_s12 + $0x2e0] sm:$0xff]  }
 0xf0a   :  { %v4650_v29 = vpop.f32.mrf.mxu1  ;;  %v4723_v45 = vpop.f32.mrf.mxu0  ;;  %6424 = vmatmul.mubr.bf16.vlgmr.msra.gmra.mxu1 %v5170_v62  ;;  %6489 = vmatmul.mubr.bf16.vlgmr.msra.gmra.mxu0 %v5172_v9 }
 0xf0b   :  { %v4651_v43 = vadd.f32 %v4650_v29, %v18976_v53  ;;  %v4724_v47 = vadd.f32 %v4723_v45, %v18980_v49  ;;  %15065 = vmatpush3.bf16.msra.mxu1 %v16720_v54  ;;  %15105 = vmatpush3.bf16.msra.mxu0 %v16721_v32  ;;  %v5090_v11 = vmax.f32 %v4649_v17, 0.0  ;;  %v5092_v38 = vmax.f32 %v4722_v3, 0.0  ;;  %v16730_v54 = vld [vmem:[%s21672_s12 + $0x260] sm:$0xff]  }
 0xf0c   :  { %v4654_v63 = vpop.f32.mrf.mxu1  ;;  %v4727_v41 = vpop.f32.mrf.mxu0  ;;  %15066 = vmatprep.subr.bf16.mxu1 %v16722_v48  ;;  %15106 = vmatprep.subr.bf16.mxu0 %v16723_v52 }
 0xf0d   :  { %v5091_v35 = vmax.f32 %v4651_v43, 0.0  ;;  %v5093_v10 = vmax.f32 %v4724_v47, 0.0  ;;  %v5186_v13 = vpack.c.bf16 %v5090_v11, %v5074_v36  ;;  %v5188_v16 = vpack.c.bf16 %v5092_v38, %v5076_v31  ;;  %v16733_v47 = vld [vmem:[%s21672_s12 + $0x2a0] sm:$0xff]   ;;  %v16736_v31 = vld [vmem:[%s21672_s12 + $0x218] sm:$0xff]  }
 0xf0e   :  { %v4656_v44 = vpop.f32.mrf.mxu1  ;;  %v4729_v22 = vpop.f32.mrf.mxu0  ;;  %v4655_v48 = vadd.f32 %v4654_v63, %v18984_v0  ;;  %v4728_v52 = vadd.f32 %v4727_v41, %v18988_v26 }
 0xf0f   :  { %15067 = vmatpush3.bf16.msra.mxu1 %v16724_v1  ;;  %15107 = vmatpush3.bf16.msra.mxu0 %v16725_v42  ;;  %v5187_v60 = vpack.c.bf16 %v5091_v35, %v5075_v51  ;;  %v5189_v56 = vpack.c.bf16 %v5093_v10, %v5077_v25  ;;  %v4657_v32 = vadd.f32 %v4656_v44, %v18976_v53  ;;  %v16734_v1 = vld [vmem:[%s21672_s12 + $0x258] sm:$0xff]  }
 0xf10   :  { %v4658_v34 = vpop.f32.mrf.mxu1  ;;  %v4731_v2 = vpop.f32.mrf.mxu0  ;;  %15068 = vmatprep.subr.bf16.mxu1 %v16726_v14  ;;  %15108 = vmatprep.subr.bf16.mxu0 %v16727_v30  ;;  %v4730_v62 = vadd.f32 %v4729_v22, %v18980_v49  ;;  %v5106_v41 = vmax.f32 %v4655_v48, 0.0  ;;  %v5108_v14 = vmax.f32 %v4728_v52, 0.0  ;;  %v16735_v35 = vld [vmem:[%s21672_s12 + $0x2d8] sm:$0xff]   ;;  %v16740_v48 = vld [vmem:[%s21672_s12 + $0x210] sm:$0xff]  }
 0xf11   :  { %v4659_v9 = vadd.f32 %v4658_v34, %v18984_v0  ;;  %v4732_v33 = vadd.f32 %v4731_v2, %v18988_v26  ;;  %6431 = vmatprep.mubr.bf16.mxu1 %v5187_v60  ;;  %6496 = vmatprep.mubr.bf16.mxu0 %v5189_v56  ;;  %v5107_v42 = vmax.f32 %v4657_v32, 0.0 }
 0xf12   :  { %v4660_v21 = vpop.f32.mrf.mxu1  ;;  %v4733_v17 = vpop.f32.mrf.mxu0  ;;  %6432 = vmatmul.mubr.bf16.gmra.mxu1 %v5186_v13  ;;  %6497 = vmatmul.mubr.bf16.gmra.mxu0 %v5188_v16  ;;  %v5109_v11 = vmax.f32 %v4730_v62, 0.0  ;;  %v16737_v13 = vld [vmem:[%s21672_s12 + $0x298] sm:$0xff]   ;;  %v16738_v16 = vld [vmem:[%s21672_s12 + $0x250] sm:$0xff]  }
 0xf13   :  { %v4661_v3 = vadd.f32 %v4660_v21, %v18976_v53  ;;  %v4734_v57 = vadd.f32 %v4733_v17, %v18980_v49  ;;  %15069 = vmatpush3.bf16.msra.mxu1 %v16728_v46  ;;  %v5122_v28 = vmax.f32 %v4659_v9, 0.0  ;;  %v5124_v29 = vmax.f32 %v4732_v33, 0.0  ;;  %15109 = vmatpush3.bf16.msra.mxu0 %v16729_v58  ;;  %v16739_v58 = vld [vmem:[%s21672_s12 + $0x2d0] sm:$0xff]  }
 0xf14   :  { %v4664_v45 = vpop.f32.mrf.mxu1  ;;  %v4737_v43 = vpop.f32.mrf.mxu0  ;;  %15070 = vmatprep.subr.bf16.mxu1 %v16730_v54  ;;  %15110 = vmatprep.subr.bf16.mxu0 %v16731_v18 }
 0xf15   :  { %v5123_v38 = vmax.f32 %v4661_v3, 0.0  ;;  %v5125_v63 = vmax.f32 %v4734_v57, 0.0  ;;  %v5202_v25 = vpack.c.bf16 %v5122_v28, %v5106_v41  ;;  %v5204_v44 = vpack.c.bf16 %v5124_v29, %v5108_v14 }
 0xf16   :  { %v4666_v30 = vpop.f32.mrf.mxu1  ;;  %v4739_v51 = vpop.f32.mrf.mxu0  ;;  %v4665_v54 = vadd.f32 %v4664_v45, %v18984_v0  ;;  %v4738_v32 = vadd.f32 %v4737_v43, %v18988_v26  ;;  %v17234_v45 = vld [vmem:[%s21750_s19 + $0x8] sm:$0xff] }
 0xf17   :  { %15071 = vmatpush3.bf16.msra.mxu1 %v16732_v15  ;;  %v5203_v10 = vpack.c.bf16 %v5123_v38, %v5107_v42  ;;  %v5205_v36 = vpack.c.bf16 %v5125_v63, %v5109_v11  ;;  %v4667_v22 = vadd.f32 %v4666_v30, %v18976_v53  ;;  %15111 = vmatpush3.bf16.msra.mxu0 %v16733_v47  ;;  %v16743_v42 = vld [vmem:[%s21672_s12 + $0x2c8] sm:$0xff]  }
 0xf18   :  { %v4668_v60 = vpop.f32.mrf.mxu1  ;;  %v4741_v46 = vpop.f32.mrf.mxu0  ;;  %15072 = vmatprep.subr.bf16.mxu1 %v16734_v1  ;;  %v4740_v34 = vadd.f32 %v4739_v51, %v18980_v49  ;;  %15112 = vmatprep.subr.bf16.mxu0 %v16735_v35  ;;  %v5138_v28 = vmax.f32 %v4665_v54, 0.0  ;;  %v5140_v29 = vmax.f32 %v4738_v32, 0.0  ;;  %v19095_v43 = vrot.slane %v17234_v45, %v17359_v6  ;;  %v16744_v63 = vld [vmem:[%s21672_s12 + $0x208] sm:$0xff]   ;;  %v16748_v32 = vld [vmem:[%s21672_s12 + $0x200] sm:$0xff]   ;;  %v16752_v45 = vld [vmem:[%s21672_s12 + $0x338] sm:$0xff]  }
 0xf19   :  { %v4669_v2 = vadd.f32 %v4668_v60, %v18984_v0  ;;  %v4742_v56 = vadd.f32 %v4741_v46, %v18988_v26  ;;  %6439 = vmatprep.mubr.bf16.mxu1 %v5203_v10  ;;  %6504 = vmatprep.mubr.bf16.mxu0 %v5205_v36  ;;  %v16741_v26 = vld [vmem:[%s21672_s12 + $0x290] sm:$0xff]   ;;  %v16745_v36 = vld [vmem:[%s21672_s12 + $0x288] sm:$0xff]  }
 0xf1a   :  { %v4670_v62 = vpop.f32.mrf.mxu1  ;;  %v4743_v9 = vpop.f32.mrf.mxu0  ;;  %6440 = vmatmul.mubr.bf16.gmra.mxu1 %v5202_v25  ;;  %6505 = vmatmul.mubr.bf16.gmra.mxu0 %v5204_v44  ;;  %v5141_v3 = vmax.f32 %v4740_v34, 0.0  ;;  %v21793_v30 = vld [vmem:[#allocation12_spill] sm:$0xff]  ;;  %v21794_v25 = vld [vmem:[#allocation9_spill] sm:$0xff]  ;;  %v21795_v60 = vld [vmem:[#allocation7_spill] sm:$0xff] }
 0xf1b   :  { %v4671_v33 = vadd.f32 %v4670_v62, %v18976_v53  ;;  %v4744_v18 = vadd.f32 %v4743_v9, %v18980_v49  ;;  %15073 = vmatpush3.bf16.msra.mxu1 %v16736_v31  ;;  %v5154_v52 = vmax.f32 %v4669_v2, 0.0  ;;  %v5156_v21 = vmax.f32 %v4742_v56, 0.0  ;;  %15113 = vmatpush3.bf16.msra.mxu0 %v16737_v13  ;;  %v16742_v53 = vld [vmem:[%s21672_s12 + $0x248] sm:$0xff]   ;;  %v16746_v31 = vld [vmem:[%s21672_s12 + $0x240] sm:$0xff]  }
 0xf1c   :  { %v4780_v0 = vpop.f32.mrf.mxu1  ;;  %v4853_v17 = vpop.f32.mrf.mxu0  ;;  %15074 = vmatprep.subr.bf16.mxu1 %v16738_v16  ;;  %v5139_v49 = vmax.f32 %v4667_v22, 0.0  ;;  %15114 = vmatprep.subr.bf16.mxu0 %v16739_v58  ;;  %v16747_v13 = vld [vmem:[%s21672_s12 + $0x2c0] sm:$0xff]  }
 0xf1d   :  { %v5155_v57 = vmax.f32 %v4671_v33, 0.0  ;;  %v5157_v15 = vmax.f32 %v4744_v18, 0.0  ;;  %v5218_v41 = vpack.c.bf16 %v5154_v52, %v5138_v28  ;;  %v5220_v14 = vpack.c.bf16 %v5156_v21, %v5140_v29  ;;  %v16750_v52 = vld [vmem:[%s21672_s12 + $0x378] sm:$0xff]  }
 0xf1e   :  { %v4782_v47 = vpop.f32.mrf.mxu1  ;;  %v4855_v1 = vpop.f32.mrf.mxu0  ;;  %v4781_v16 = vadd.f32 %v4780_v0, %v19095_v43  ;;  %v4854_v34 = vadd.f32 %v4853_v17, %v21795_v60 }
 0xf1f   :  { %15075 = vmatpush3.bf16.msra.mxu1 %v16740_v48  ;;  %v5219_v11 = vpack.c.bf16 %v5155_v57, %v5139_v49  ;;  %v5221_v38 = vpack.c.bf16 %v5157_v15, %v5141_v3  ;;  %v4783_v51 = vadd.f32 %v4782_v47, %v21793_v30  ;;  %15115 = vmatpush3.bf16.msra.mxu0 %v16741_v26  ;;  %v16749_v48 = vld [vmem:[%s21672_s12 + $0x280] sm:$0xff]   ;;  %v16751_v15 = vld [vmem:[%s21672_s12 + $0x3f8] sm:$0xff]  }
 0xf20   :  { %v4784_v35 = vpop.f32.mrf.mxu1  ;;  %v4857_v10 = vpop.f32.mrf.mxu0  ;;  %15076 = vmatprep.subr.bf16.mxu1 %v16742_v53  ;;  %v4856_v44 = vadd.f32 %v4855_v1, %v21794_v25  ;;  %15116 = vmatprep.subr.bf16.mxu0 %v16743_v42  ;;  %v5046_v53 = vmax.f32 %v4781_v16, 0.0  ;;  %v5048_v49 = vmax.f32 %v4854_v34, 0.0  ;;  %v16756_v16 = vld [vmem:[%s21672_s12 + $0x330] sm:$0xff]  }
 0xf21   :  { %v4785_v22 = vadd.f32 %v4784_v35, %v19095_v43  ;;  %v4858_v46 = vadd.f32 %v4857_v10, %v21795_v60  ;;  %6447 = vmatprep.mubr.bf16.mxu1 %v5219_v11  ;;  %6512 = vmatprep.mubr.bf16.mxu0 %v5221_v38  ;;  %v5047_v21 = vmax.f32 %v4783_v51, 0.0  ;;  %v16755_v10 = vld [vmem:[%s21672_s12 + $0x3f0] sm:$0xff]  }
 0xf22   :  { %v4786_v2 = vpop.f32.mrf.mxu1  ;;  %v4859_v56 = vpop.f32.mrf.mxu0  ;;  %6448 = vmatmul.mubr.bf16.gmra.mxu1 %v5218_v41  ;;  %6513 = vmatmul.mubr.bf16.gmra.mxu0 %v5220_v14  ;;  %v5049_v0 = vmax.f32 %v4856_v44, 0.0  ;;  %v16754_v41 = vld [vmem:[%s21672_s12 + $0x370] sm:$0xff]  }
 0xf23   :  { %v4787_v58 = vadd.f32 %v4786_v2, %v21793_v30  ;;  %v4860_v54 = vadd.f32 %v4859_v56, %v21794_v25  ;;  %15077 = vmatpush3.bf16.msra.mxu1 %v16744_v63  ;;  %v5062_v62 = vmax.f32 %v4785_v22, 0.0  ;;  %v5064_v9 = vmax.f32 %v4858_v46, 0.0  ;;  %15117 = vmatpush3.bf16.msra.mxu0 %v16745_v36  ;;  %v16753_v63 = vld [vmem:[%s21672_s12 + $0x3b8] sm:$0xff]  }
 0xf24   :  { %v4790_v33 = vpop.f32.mrf.mxu1  ;;  %v4863_v18 = vpop.f32.mrf.mxu0  ;;  %15078 = vmatprep.subr.bf16.mxu1 %v16746_v31  ;;  %15118 = vmatprep.subr.bf16.mxu0 %v16747_v13 }
 0xf25   :  { %v5063_v17 = vmax.f32 %v4787_v58, 0.0  ;;  %v5065_v26 = vmax.f32 %v4860_v54, 0.0  ;;  %v5174_v47 = vpack.c.bf16 %v5062_v62, %v5046_v53  ;;  %v5176_v1 = vpack.c.bf16 %v5064_v9, %v5048_v49  ;;  %v16757_v54 = vld [vmem:[%s21672_s12 + $0x3b0] sm:$0xff]   ;;  %v16760_v49 = vld [vmem:[%s21672_s12 + $0x328] sm:$0xff]  }
 0xf26   :  { %v4792_v3 = vpop.f32.mrf.mxu1  ;;  %v4865_v57 = vpop.f32.mrf.mxu0  ;;  %v4791_v36 = vadd.f32 %v4790_v33, %v19095_v43  ;;  %v4864_v31 = vadd.f32 %v4863_v18, %v21795_v60 }
 0xf27   :  { %15079 = vmatpush3.bf16.msra.mxu1 %v16748_v32  ;;  %v5175_v28 = vpack.c.bf16 %v5063_v17, %v5047_v21  ;;  %v5177_v29 = vpack.c.bf16 %v5065_v26, %v5049_v0  ;;  %v4793_v42 = vadd.f32 %v4792_v3, %v21793_v30  ;;  %15119 = vmatpush3.bf16.msra.mxu0 %v16749_v48  ;;  %v16758_v32 = vld [vmem:[%s21672_s12 + $0x368] sm:$0xff]  }
 0xf28   :  { %v4794_v11 = vpop.f32.mrf.mxu1  ;;  %v4867_v38 = vpop.f32.mrf.mxu0  ;;  %15144 = vmatprep.subr.bf16.mxu1 %v16750_v52  ;;  %v4866_v14 = vadd.f32 %v4865_v57, %v21794_v25  ;;  %15184 = vmatprep.subr.bf16.mxu0 %v16751_v15  ;;  %v5078_v48 = vmax.f32 %v4791_v36, 0.0  ;;  %v5080_v52 = vmax.f32 %v4864_v31, 0.0  ;;  %v16759_v17 = vld [vmem:[%s21672_s12 + $0x3e8] sm:$0xff]   ;;  %v16764_v36 = vld [vmem:[%s21672_s12 + $0x320] sm:$0xff]  }
 0xf29   :  { %v4795_v51 = vadd.f32 %v4794_v11, %v19095_v43  ;;  %v4868_v35 = vadd.f32 %v4867_v38, %v21795_v60  ;;  %6553 = vmatprep.mubr.bf16.mxu1 %v5175_v28  ;;  %6618 = vmatprep.mubr.bf16.mxu0 %v5177_v29  ;;  %v5079_v62 = vmax.f32 %v4793_v42, 0.0  ;;  %v16763_v38 = vld [vmem:[%s21672_s12 + $0x3e0] sm:$0xff]  }
 0xf2a   :  { %v4796_v44 = vpop.f32.mrf.mxu1  ;;  %v4869_v22 = vpop.f32.mrf.mxu0  ;;  %6554 = vmatmul.mubr.bf16.vlgmr.msra.gmra.mxu1 %v5174_v47  ;;  %6619 = vmatmul.mubr.bf16.vlgmr.msra.gmra.mxu0 %v5176_v1  ;;  %v5081_v9 = vmax.f32 %v4866_v14, 0.0  ;;  %v16762_v47 = vld [vmem:[%s21672_s12 + $0x360] sm:$0xff]  }
 0xf2b   :  { %v4797_v46 = vadd.f32 %v4796_v44, %v21793_v30  ;;  %v4870_v13 = vadd.f32 %v4869_v22, %v21794_v25  ;;  %15145 = vmatpush3.bf16.msra.mxu1 %v16752_v45  ;;  %v5094_v34 = vmax.f32 %v4795_v51, 0.0  ;;  %v5096_v2 = vmax.f32 %v4868_v35, 0.0  ;;  %15185 = vmatpush3.bf16.msra.mxu0 %v16753_v63  ;;  %v16761_v45 = vld [vmem:[%s21672_s12 + $0x3a8] sm:$0xff]  }
 0xf2c   :  { %v4800_v56 = vpop.f32.mrf.mxu1  ;;  %v4873_v58 = vpop.f32.mrf.mxu0  ;;  %15146 = vmatprep.subr.bf16.mxu1 %v16754_v41  ;;  %15186 = vmatprep.subr.bf16.mxu0 %v16755_v10 }
 0xf2d   :  { %v5095_v33 = vmax.f32 %v4797_v46, 0.0  ;;  %v5097_v18 = vmax.f32 %v4870_v13, 0.0  ;;  %v5190_v3 = vpack.c.bf16 %v5094_v34, %v5078_v48  ;;  %v5192_v57 = vpack.c.bf16 %v5096_v2, %v5080_v52  ;;  %v16765_v13 = vld [vmem:[%s21672_s12 + $0x3a0] sm:$0xff]   ;;  %v16768_v52 = vld [vmem:[%s21672_s12 + $0x318] sm:$0xff]  }
 0xf2e   :  { %v4802_v21 = vpop.f32.mrf.mxu1  ;;  %v4875_v0 = vpop.f32.mrf.mxu0  ;;  %v4801_v63 = vadd.f32 %v4800_v56, %v19095_v43  ;;  %v4874_v41 = vadd.f32 %v4873_v58, %v21795_v60 }
 0xf2f   :  { %15147 = vmatpush3.bf16.msra.mxu1 %v16756_v16  ;;  %v5191_v26 = vpack.c.bf16 %v5095_v33, %v5079_v62  ;;  %v5193_v53 = vpack.c.bf16 %v5097_v18, %v5081_v9  ;;  %v4803_v15 = vadd.f32 %v4802_v21, %v21793_v30  ;;  %15187 = vmatpush3.bf16.msra.mxu0 %v16757_v54  ;;  %v16766_v16 = vld [vmem:[%s21672_s12 + $0x358] sm:$0xff]  }
 0xf30   :  { %v4804_v28 = vpop.f32.mrf.mxu1  ;;  %v4877_v29 = vpop.f32.mrf.mxu0  ;;  %15148 = vmatprep.subr.bf16.mxu1 %v16758_v32  ;;  %v4876_v1 = vadd.f32 %v4875_v0, %v21794_v25  ;;  %15188 = vmatprep.subr.bf16.mxu0 %v16759_v17  ;;  %v5110_v54 = vmax.f32 %v4801_v63, 0.0  ;;  %v5112_v32 = vmax.f32 %v4874_v41, 0.0  ;;  %v16767_v33 = vld [vmem:[%s21672_s12 + $0x3d8] sm:$0xff]   ;;  %v16772_v63 = vld [vmem:[%s21672_s12 + $0x310] sm:$0xff]  }
 0xf31   :  { %v4805_v42 = vadd.f32 %v4804_v28, %v19095_v43  ;;  %v4878_v11 = vadd.f32 %v4877_v29, %v21795_v60  ;;  %6561 = vmatprep.mubr.bf16.mxu1 %v5191_v26  ;;  %6626 = vmatprep.mubr.bf16.mxu0 %v5193_v53  ;;  %v5111_v34 = vmax.f32 %v4803_v15, 0.0  ;;  %v16771_v29 = vld [vmem:[%s21672_s12 + $0x3d0] sm:$0xff]  }
 0xf32   :  { %v4806_v14 = vpop.f32.mrf.mxu1  ;;  %v4879_v51 = vpop.f32.mrf.mxu0  ;;  %6562 = vmatmul.mubr.bf16.gmra.mxu1 %v5190_v3  ;;  %6627 = vmatmul.mubr.bf16.gmra.mxu0 %v5192_v57  ;;  %v5113_v2 = vmax.f32 %v4876_v1, 0.0  ;;  %v16770_v3 = vld [vmem:[%s21672_s12 + $0x350] sm:$0xff]  }
 0xf33   :  { %v4807_v35 = vadd.f32 %v4806_v14, %v21793_v30  ;;  %v4880_v10 = vadd.f32 %v4879_v51, %v21794_v25  ;;  %15149 = vmatpush3.bf16.msra.mxu1 %v16760_v49  ;;  %v5126_v31 = vmax.f32 %v4805_v42, 0.0  ;;  %v5128_v44 = vmax.f32 %v4878_v11, 0.0  ;;  %15189 = vmatpush3.bf16.msra.mxu0 %v16761_v45  ;;  %v16769_v49 = vld [vmem:[%s21672_s12 + $0x398] sm:$0xff]  }
 0xf34   :  { %v4810_v22 = vpop.f32.mrf.mxu1  ;;  %v4883_v46 = vpop.f32.mrf.mxu0  ;;  %15150 = vmatprep.subr.bf16.mxu1 %v16762_v47  ;;  %15190 = vmatprep.subr.bf16.mxu0 %v16763_v38 }
 0xf35   :  { %v5127_v56 = vmax.f32 %v4807_v35, 0.0  ;;  %v5129_v58 = vmax.f32 %v4880_v10, 0.0  ;;  %v5206_v21 = vpack.c.bf16 %v5126_v31, %v5110_v54  ;;  %v5208_v0 = vpack.c.bf16 %v5128_v44, %v5112_v32  ;;  %v21796_v54 = vld [vmem:[#allocation15_spill] sm:$0xff] }
 0xf36   :  { %v4812_v62 = vpop.f32.mrf.mxu1  ;;  %v4885_v9 = vpop.f32.mrf.mxu0  ;;  %v4811_v45 = vadd.f32 %v4810_v22, %v19095_v43  ;;  %v4884_v47 = vadd.f32 %v4883_v46, %v21795_v60 }
 0xf37   :  { %15151 = vmatpush3.bf16.msra.mxu1 %v16764_v36  ;;  %v5207_v18 = vpack.c.bf16 %v5127_v56, %v5111_v34  ;;  %v5209_v48 = vpack.c.bf16 %v5129_v58, %v5113_v2  ;;  %v4813_v17 = vadd.f32 %v4812_v62, %v21793_v30  ;;  %15191 = vmatpush3.bf16.msra.mxu0 %v16765_v13  ;;  %v16775_v13 = vld [vmem:[%s21672_s12 + $0x3c8] sm:$0xff]  }
 0xf38   :  { %v4814_v26 = vpop.f32.mrf.mxu1  ;;  %v4887_v53 = vpop.f32.mrf.mxu0  ;;  %15152 = vmatprep.subr.bf16.mxu1 %v16766_v16  ;;  %v4886_v57 = vadd.f32 %v4885_v9, %v21794_v25  ;;  %15192 = vmatprep.subr.bf16.mxu0 %v16767_v33  ;;  %v5142_v31 = vmax.f32 %v4811_v45, 0.0  ;;  %v5144_v44 = vmax.f32 %v4884_v47, 0.0  ;;  %v16776_v2 = vld [vmem:[%s21672_s12 + $0x308] sm:$0xff]   ;;  %v16780_v45 = vld [vmem:[%s21672_s12 + $0x300] sm:$0xff]  }
 0xf39   :  { %v4815_v15 = vadd.f32 %v4814_v26, %v19095_v43  ;;  %v4888_v28 = vadd.f32 %v4887_v53, %v21795_v60  ;;  %6569 = vmatprep.mubr.bf16.mxu1 %v5207_v18  ;;  %6634 = vmatprep.mubr.bf16.mxu0 %v5209_v48  ;;  %v16773_v60 = vld [vmem:[%s21672_s12 + $0x390] sm:$0xff]   ;;  %v16777_v33 = vld [vmem:[%s21672_s12 + $0x388] sm:$0xff]   ;;  %v16778_v18 = vld [vmem:[%s21672_s12 + $0x340] sm:$0xff]  }
 0xf3a   :  { %v4816_v1 = vpop.f32.mrf.mxu1  ;;  %v4889_v42 = vpop.f32.mrf.mxu0  ;;  %6570 = vmatmul.mubr.bf16.gmra.mxu1 %v5206_v21  ;;  %6635 = vmatmul.mubr.bf16.gmra.mxu0 %v5208_v0  ;;  %v5145_v35 = vmax.f32 %v4886_v57, 0.0  ;;  %v21797_v48 = vld [vmem:[#allocation21_spill] sm:$0xff]  ;;  %v16779_v53 = vld [vmem:[%s21672_s12 + $0x3c0] sm:$0xff]  }
 0xf3b   :  { %v4817_v11 = vadd.f32 %v4816_v1, %v21793_v30  ;;  %v4890_v38 = vadd.f32 %v4889_v42, %v21794_v25  ;;  %15153 = vmatpush3.bf16.msra.mxu1 %v16768_v52  ;;  %v5158_v41 = vmax.f32 %v4815_v15, 0.0  ;;  %v5160_v14 = vmax.f32 %v4888_v28, 0.0  ;;  %15193 = vmatpush3.bf16.msra.mxu0 %v16769_v49  ;;  %v16774_v30 = vld [vmem:[%s21672_s12 + $0x348] sm:$0xff]   ;;  %v21798_v21 = vld [vmem:[#allocation17_spill] sm:$0xff] }
 0xf3c   :  { %v4926_v43 = vpop.f32.mrf.mxu1  ;;  %v4999_v51 = vpop.f32.mrf.mxu0  ;;  %15154 = vmatprep.subr.bf16.mxu1 %v16770_v3  ;;  %v5143_v25 = vmax.f32 %v4813_v17, 0.0  ;;  %15194 = vmatprep.subr.bf16.mxu0 %v16771_v29  ;;  %v21799_v17 = vld [vmem:[#allocation23_spill] sm:$0xff] }
 0xf3d   :  { %v5159_v10 = vmax.f32 %v4817_v11, 0.0  ;;  %v5161_v36 = vmax.f32 %v4890_v38, 0.0  ;;  %v5222_v56 = vpack.c.bf16 %v5158_v41, %v5142_v31  ;;  %v5224_v58 = vpack.c.bf16 %v5160_v14, %v5144_v44  ;;  %v16781_v38 = vld [vmem:[%s21672_s12 + $0x380] sm:$0xff]  }
 0xf3e   :  { %v4928_v22 = vpop.f32.mrf.mxu1  ;;  %v5001_v46 = vpop.f32.mrf.mxu0  ;;  %v4927_v49 = vadd.f32 %v4926_v43, %v21798_v21  ;;  %v5000_v3 = vadd.f32 %v4999_v51, %v21799_v17 }
 0xf3f   :  { %15155 = vmatpush3.bf16.msra.mxu1 %v16772_v63  ;;  %v5223_v16 = vpack.c.bf16 %v5159_v10, %v5143_v25  ;;  %v5225_v34 = vpack.c.bf16 %v5161_v36, %v5145_v35  ;;  %v4929_v32 = vadd.f32 %v4928_v22, %v21796_v54  ;;  %15195 = vmatpush3.bf16.msra.mxu0 %v16773_v60 }
 0xf40   :  { %v4930_v62 = vpop.f32.mrf.mxu1  ;;  %v5003_v9 = vpop.f32.mrf.mxu0  ;;  %15156 = vmatprep.subr.bf16.mxu1 %v16774_v30  ;;  %v5002_v52 = vadd.f32 %v5001_v46, %v21797_v48  ;;  %15196 = vmatprep.subr.bf16.mxu0 %v16775_v13  ;;  %v5050_v51 = vmax.f32 %v4927_v49, 0.0  ;;  %v5052_v60 = vmax.f32 %v5000_v3, 0.0 }
 0xf41   :  { %v4931_v0 = vadd.f32 %v4930_v62, %v21798_v21  ;;  %v5004_v26 = vadd.f32 %v5003_v9, %v21799_v17  ;;  %6577 = vmatprep.mubr.bf16.mxu1 %v5223_v16  ;;  %6642 = vmatprep.mubr.bf16.mxu0 %v5225_v34  ;;  %v5051_v63 = vmax.f32 %v4929_v32, 0.0 }
 0xf42   :  { %v4932_v57 = vpop.f32.mrf.mxu1  ;;  %v5005_v15 = vpop.f32.mrf.mxu0  ;;  %6578 = vmatmul.mubr.bf16.gmra.mxu1 %v5222_v56  ;;  %6643 = vmatmul.mubr.bf16.gmra.mxu0 %v5224_v58  ;;  %v5053_v41 = vmax.f32 %v5002_v52, 0.0 }
 0xf43   :  { %v4933_v28 = vadd.f32 %v4932_v57, %v21796_v54  ;;  %v5006_v29 = vadd.f32 %v5005_v15, %v21797_v48  ;;  %15157 = vmatpush3.bf16.msra.mxu1 %v16776_v2  ;;  %v5066_v47 = vmax.f32 %v4931_v0, 0.0  ;;  %v5068_v1 = vmax.f32 %v5004_v26, 0.0  ;;  %15197 = vmatpush3.bf16.msra.mxu0 %v16777_v33 }
 0xf44   :  { %v4936_v42 = vpop.f32.mrf.mxu1  ;;  %v5009_v11 = vpop.f32.mrf.mxu0  ;;  %15158 = vmatprep.subr.bf16.mxu1 %v16778_v18  ;;  %15198 = vmatprep.subr.bf16.mxu0 %v16779_v53 }
 0xf45   :  { %v5067_v14 = vmax.f32 %v4933_v28, 0.0  ;;  %v5069_v43 = vmax.f32 %v5006_v29, 0.0  ;;  %v5178_v36 = vpack.c.bf16 %v5066_v47, %v5050_v51  ;;  %v5180_v31 = vpack.c.bf16 %v5068_v1, %v5052_v60 }
 0xf46   :  { %v4938_v30 = vpop.f32.mrf.mxu1  ;;  %v5011_v25 = vpop.f32.mrf.mxu0  ;;  %v4937_v2 = vadd.f32 %v4936_v42, %v21798_v21  ;;  %v5010_v56 = vadd.f32 %v5009_v11, %v21799_v17 }
 0xf47   :  { %15159 = vmatpush3.bf16.msra.mxu1 %v16780_v45  ;;  %v5179_v35 = vpack.c.bf16 %v5067_v14, %v5051_v63  ;;  %v5181_v10 = vpack.c.bf16 %v5069_v43, %v5053_v41  ;;  %v4939_v44 = vadd.f32 %v4938_v30, %v21796_v54  ;;  %15199 = vmatpush3.bf16.msra.mxu0 %v16781_v38 }
 0xf48   :  { %v4940_v22 = vpop.f32.mrf.mxu1  ;;  %v5013_v46 = vpop.f32.mrf.mxu0  ;;  %v5012_v13 = vadd.f32 %v5011_v25, %v21797_v48  ;;  %16106 = vmatprep.subr.bf16.mxu0 %v21774_v40  ;;  %v5082_v57 = vmax.f32 %v4937_v2, 0.0  ;;  %v5084_v15 = vmax.f32 %v5010_v56, 0.0 }
 0xf49   :  { %v4941_v16 = vadd.f32 %v4940_v22, %v21798_v21  ;;  %v5014_v34 = vadd.f32 %v5013_v46, %v21799_v17  ;;  %6683 = vmatprep.mubr.bf16.mxu1 %v5179_v35  ;;  %6748 = vmatprep.mubr.bf16.mxu0 %v5181_v10  ;;  %v5083_v26 = vmax.f32 %v4939_v44, 0.0 }
 0xf4a   :  { %v4942_v58 = vpop.f32.mrf.mxu1  ;;  %v5015_v32 = vpop.f32.mrf.mxu0  ;;  %6684 = vmatmul.mubr.bf16.vlgmr.msra.gmra.mxu1 %v5178_v36  ;;  %6749 = vmatmul.mubr.bf16.vlgmr.msra.gmra.mxu0 %v5180_v31  ;;  %v5085_v53 = vmax.f32 %v5012_v13, 0.0 }
 0xf4b   :  { %v4943_v62 = vadd.f32 %v4942_v58, %v21796_v54  ;;  %v5016_v9 = vadd.f32 %v5015_v32, %v21797_v48  ;;  %v5098_v33 = vmax.f32 %v4941_v16, 0.0  ;;  %v5100_v18 = vmax.f32 %v5014_v34, 0.0 }
 0xf4c   :  { %v4946_v52 = vpop.f32.mrf.mxu1  ;;  %v5019_v0 = vpop.f32.mrf.mxu0 }
 0xf4d   :  { %v5099_v49 = vmax.f32 %v4943_v62, 0.0  ;;  %v5101_v3 = vmax.f32 %v5016_v9, 0.0  ;;  %v5194_v1 = vpack.c.bf16 %v5098_v33, %v5082_v57  ;;  %v5196_v42 = vpack.c.bf16 %v5100_v18, %v5084_v15 }
 0xf4e   :  { %v4948_v28 = vpop.f32.mrf.mxu1  ;;  %v5021_v29 = vpop.f32.mrf.mxu0  ;;  %v4947_v51 = vadd.f32 %v4946_v52, %v21798_v21  ;;  %v5020_v60 = vadd.f32 %v5019_v0, %v21799_v17 }
 0xf4f   :  { %v5195_v45 = vpack.c.bf16 %v5099_v49, %v5083_v26  ;;  %v5197_v47 = vpack.c.bf16 %v5101_v3, %v5085_v53  ;;  %v4949_v11 = vadd.f32 %v4948_v28, %v21796_v54  ;;  %v5022_v41 = vadd.f32 %v5021_v29, %v21797_v48 }
 0xf50   :  { %v4950_v38 = vpop.f32.mrf.mxu1  ;;  %v5023_v63 = vpop.f32.mrf.mxu0  ;;  %v5114_v2 = vmax.f32 %v4947_v51, 0.0  ;;  %v5116_v56 = vmax.f32 %v5020_v60, 0.0 }
 0xf51   :  { %v4951_v14 = vadd.f32 %v4950_v38, %v21798_v21  ;;  %v5024_v43 = vadd.f32 %v5023_v63, %v21799_v17  ;;  %6691 = vmatprep.mubr.bf16.mxu1 %v5195_v45  ;;  %6756 = vmatprep.mubr.bf16.mxu0 %v5197_v47  ;;  %v5115_v46 = vmax.f32 %v4949_v11, 0.0  ;;  %v5117_v13 = vmax.f32 %v5022_v41, 0.0 }
 0xf52   :  { %v4952_v30 = vpop.f32.mrf.mxu1  ;;  %v5025_v25 = vpop.f32.mrf.mxu0  ;;  %6692 = vmatmul.mubr.bf16.gmra.mxu1 %v5194_v1  ;;  %6757 = vmatmul.mubr.bf16.gmra.mxu0 %v5196_v42 }
 0xf53   :  { %v4953_v35 = vadd.f32 %v4952_v30, %v21796_v54  ;;  %v5026_v10 = vadd.f32 %v5025_v25, %v21797_v48  ;;  %v5130_v36 = vmax.f32 %v4951_v14, 0.0  ;;  %v5132_v31 = vmax.f32 %v5024_v43, 0.0 }
 0xf54   :  { %v4956_v44 = vpop.f32.mrf.mxu1  ;;  %v5029_v22 = vpop.f32.mrf.mxu0 }
 0xf55   :  { %v5131_v16 = vmax.f32 %v4953_v35, 0.0  ;;  %v5133_v34 = vmax.f32 %v5026_v10, 0.0  ;;  %v5210_v33 = vpack.c.bf16 %v5130_v36, %v5114_v2  ;;  %v5212_v18 = vpack.c.bf16 %v5132_v31, %v5116_v56 }
 0xf56   :  { %v4958_v58 = vpop.f32.mrf.mxu1  ;;  %v5031_v32 = vpop.f32.mrf.mxu0  ;;  %v4957_v57 = vadd.f32 %v4956_v44, %v21798_v21  ;;  %v5030_v29 = vadd.f32 %v5029_v22, %v21799_v17 }
 0xf57   :  { %v5211_v62 = vpack.c.bf16 %v5131_v16, %v5115_v46  ;;  %v5213_v9 = vpack.c.bf16 %v5133_v34, %v5117_v13  ;;  %v4959_v52 = vadd.f32 %v4958_v58, %v21796_v54  ;;  %v5032_v53 = vadd.f32 %v5031_v32, %v21797_v48 }
 0xf58   :  { %v4960_v0 = vpop.f32.mrf.mxu1  ;;  %v5033_v26 = vpop.f32.mrf.mxu0  ;;  %v5146_v14 = vmax.f32 %v4957_v57, 0.0  ;;  %v5148_v43 = vmax.f32 %v5030_v29, 0.0 }
 0xf59   :  { %v4961_v49 = vadd.f32 %v4960_v0, %v21798_v21  ;;  %v5034_v3 = vadd.f32 %v5033_v26, %v21799_v17  ;;  %6699 = vmatprep.mubr.bf16.mxu1 %v5211_v62  ;;  %6764 = vmatprep.mubr.bf16.mxu0 %v5213_v9  ;;  %v5147_v1 = vmax.f32 %v4959_v52, 0.0  ;;  %v5149_v11 = vmax.f32 %v5032_v53, 0.0  ;;  %v14027_v17 = vld [vmem:[%s21673_s13] ss:$0 sm:$0xff] }
 0xf5a   :  { %v4962_v15 = vpop.f32.mrf.mxu1  ;;  %v5035_v28 = vpop.f32.mrf.mxu0  ;;  %6700 = vmatmul.mubr.bf16.gmra.mxu1 %v5210_v33  ;;  %6765 = vmatmul.mubr.bf16.gmra.mxu0 %v5212_v18 }
 0xf5b   :  { %v4963_v45 = vadd.f32 %v4962_v15, %v21796_v54  ;;  %v5036_v47 = vadd.f32 %v5035_v28, %v21797_v48  ;;  %v5162_v42 = vmax.f32 %v4961_v49, 0.0  ;;  %v5164_v38 = vmax.f32 %v5034_v3, 0.0 }
 0xf5d   :  { %v5163_v63 = vmax.f32 %v4963_v45, 0.0  ;;  %v5165_v41 = vmax.f32 %v5036_v47, 0.0  ;;  %v5226_v60 = vpack.c.bf16 %v5162_v42, %v5146_v14  ;;  %v5228_v30 = vpack.c.bf16 %v5164_v38, %v5148_v43 }
 0xf5f   :  { %v5227_v51 = vpack.c.bf16 %v5163_v63, %v5147_v1  ;;  %v5229_v21 = vpack.c.bf16 %v5165_v41, %v5149_v11 }
 0xf61   :  { %6707 = vmatprep.mubr.bf16.mxu1 %v5227_v51  ;;  %6772 = vmatprep.mubr.bf16.mxu0 %v5229_v21 }
 0xf62   :  { %6708 = vmatmul.mubr.bf16.gmra.mxu1 %v5226_v60  ;;  %6773 = vmatmul.mubr.bf16.gmra.mxu0 %v5228_v30 }
 0xf63   :  { %16108 = vmatprep.mubr.msk.bf16.mxu0 %vm17237_vm1, %v21774_v40 }
 0xf7e   :  { %v14920_v54 = vpop.f32.mrf.mxu1  ;;  %v14960_v48 = vpop.f32.mrf.mxu0 }
 0xf80   :  { %v14921_v25 = vpop.f32.mrf.mxu1  ;;  %v14961_v35 = vpop.f32.mrf.mxu0 }
 0xf81   :  { %v14922_v10 = vadd.f32 %v14921_v25, %v14920_v54  ;;  %v14962_v36 = vadd.f32 %v14961_v35, %v14960_v48 }
 0xf82   :  { %v14923_v31 = vpop.f32.mrf.mxu1  ;;  %v14963_v44 = vpop.f32.mrf.mxu0 }
 0xf83   :  { %v6296_v22 = vadd.f32 %v14922_v10, %v14027_v17 }
 0xf84   :  { %v14924_v46 = vpop.f32.mrf.mxu1  ;;  %v14964_v13 = vpop.f32.mrf.mxu0 }
 0xf85   :  { %v19284_v16 = vadd.f32 %v14962_v36, %v6296_v22  ;;  %v14925_v34 = vadd.f32 %v14924_v46, %v14923_v31  ;;  %v14965_v32 = vadd.f32 %v14964_v13, %v14963_v44 }
 0xf86   :  { %v14926_v2 = vpop.f32.mrf.mxu1  ;;  %v14966_v56 = vpop.f32.mrf.mxu0 }
 0xf87   :  { %v6299_v58 = vadd.f32 %v14925_v34, %v14027_v17 }
 0xf88   :  { %v14927_v62 = vpop.f32.mrf.mxu1  ;;  %v14967_v9 = vpop.f32.mrf.mxu0 }
 0xf89   :  { %v19286_v33 = vadd.f32 %v14965_v32, %v6299_v58  ;;  %v14928_v18 = vadd.f32 %v14927_v62, %v14926_v2  ;;  %v14968_v52 = vadd.f32 %v14967_v9, %v14966_v56 }
 0xf8a   :  { %v14929_v0 = vpop.f32.mrf.mxu1  ;;  %v14969_v26 = vpop.f32.mrf.mxu0 }
 0xf8b   :  { %v6304_v53 = vadd.f32 %v14928_v18, %v14027_v17 }
 0xf8c   :  { %v14930_v49 = vpop.f32.mrf.mxu1  ;;  %v14970_v3 = vpop.f32.mrf.mxu0 }
 0xf8d   :  { %v19288_v57 = vadd.f32 %v14968_v52, %v6304_v53  ;;  %v14931_v15 = vadd.f32 %v14930_v49, %v14929_v0  ;;  %v14971_v29 = vadd.f32 %v14970_v3, %v14969_v26 }
 0xf8f   :  { %v6307_v28 = vadd.f32 %v14931_v15, %v14027_v17 }
 0xf91   :  { %v19290_v45 = vadd.f32 %v14971_v29, %v6307_v28 }
 0xfba   :  { %v14932_v47 = vpop.f32.mrf.mxu1  ;;  %v14972_v1 = vpop.f32.mrf.mxu0 }
 0xfbc   :  { %v14933_v42 = vpop.f32.mrf.mxu1  ;;  %v14973_v11 = vpop.f32.mrf.mxu0 }
 0xfbd   :  { %v14934_v38 = vadd.f32 %v14933_v42, %v14932_v47  ;;  %v14974_v63 = vadd.f32 %v14973_v11, %v14972_v1 }
 0xfbe   :  { %v14935_v41 = vpop.f32.mrf.mxu1  ;;  %v14975_v14 = vpop.f32.mrf.mxu0 }
 0xfbf   :  { %v6312_v43 = vadd.f32 %v14934_v38, %v14027_v17 }
 0xfc0   :  { %v14936_v51 = vpop.f32.mrf.mxu1  ;;  %v14976_v21 = vpop.f32.mrf.mxu0 }
 0xfc1   :  { %v19292_v60 = vadd.f32 %v14974_v63, %v6312_v43  ;;  %v14937_v30 = vadd.f32 %v14936_v51, %v14935_v41  ;;  %v14977_v35 = vadd.f32 %v14976_v21, %v14975_v14 }
 0xfc2   :  { %v14938_v54 = vpop.f32.mrf.mxu1  ;;  %v14978_v48 = vpop.f32.mrf.mxu0 }
 0xfc3   :  { %v6315_v25 = vadd.f32 %v14937_v30, %v14027_v17 }
 0xfc4   :  { %v14939_v10 = vpop.f32.mrf.mxu1  ;;  %v14979_v36 = vpop.f32.mrf.mxu0 }
 0xfc5   :  { %v19294_v31 = vadd.f32 %v14977_v35, %v6315_v25  ;;  %v14940_v44 = vadd.f32 %v14939_v10, %v14938_v54  ;;  %v14980_v22 = vadd.f32 %v14979_v36, %v14978_v48 }
 0xfc6   :  { %v14941_v46 = vpop.f32.mrf.mxu1  ;;  %v14981_v13 = vpop.f32.mrf.mxu0 }
 0xfc7   :  { %v6320_v34 = vadd.f32 %v14940_v44, %v14027_v17 }
 0xfc8   :  { %v14942_v2 = vpop.f32.mrf.mxu1  ;;  %v14982_v56 = vpop.f32.mrf.mxu0 }
 0xfc9   :  { %v19296_v58 = vadd.f32 %v14980_v22, %v6320_v34  ;;  %v14943_v32 = vadd.f32 %v14942_v2, %v14941_v46  ;;  %v14983_v52 = vadd.f32 %v14982_v56, %v14981_v13 }
 0xfca   :  { %v15000_v62 = vpop.f32.mrf.mxu1  ;;  %v19298_v9 = vpop.f32.mrf.mxu0 }
 0xfcb   :  { %21800 = vst [vmem:[#allocation12_spill] sm:$0xff] %v19296_v58  ;;  %v6323_v18 = vadd.f32 %v14943_v32, %v14027_v17 }
 0xfcc   :  { %v15001_v0 = vpop.f32.mrf.mxu1  ;;  %v15041_v26 = vpop.f32.mrf.mxu0 }
 0xfcd   :  { %v19300_v53 = vadd.f32 %v14983_v52, %v6323_v18 }
 0xfce   :  { %v15003_v49 = vpop.f32.mrf.mxu1  ;;  %v19302_v3 = vpop.f32.mrf.mxu0 }
 0xfcf   :  { %21801 = vst [vmem:[#allocation9_spill] sm:$0xff] %v19300_v53 }
 0xfd0   :  { %v15004_v15 = vpop.f32.mrf.mxu1  ;;  %v19304_v28 = vpop.f32.mrf.mxu0 }
 0xfd2   :  { %v15006_v29 = vpop.f32.mrf.mxu1  ;;  %v19306_v47 = vpop.f32.mrf.mxu0 }
 0xfd4   :  { %v15007_v1 = vpop.f32.mrf.mxu1  ;;  %v19308_v42 = vpop.f32.mrf.mxu0 }
 0xfd6   :  { %v19310_v11 = vpop.f32.mrf.mxu1  ;;  %v19312_v17 = vpop.f32.mrf.mxu0 }
 0xfd8   :  { %v15010_v38 = vpop.f32.mrf.mxu1  ;;  %v19314_v63 = vpop.f32.mrf.mxu0 }
 0xfda   :  { %v19316_v41 = vpop.f32.mrf.mxu1  ;;  %v19318_v14 = vpop.f32.mrf.mxu0 }
 0xfdc   :  { %v19320_v43 = vpop.f32.mrf.mxu1  ;;  %v19322_v51 = vpop.f32.mrf.mxu0 }
 0xfde   :  { %v19324_v21 = vpop.f32.mrf.mxu1  ;;  %v19326_v30 = vpop.f32.mrf.mxu0 }
 0xfe0   :  { %v19328_v54 = vpop.f32.mrf.mxu1  ;;  %v19330_v48 = vpop.f32.mrf.mxu0 }
 0xfe2   :  { %v19332_v25 = vpop.f32.mrf.mxu1  ;;  %v19334_v35 = vpop.f32.mrf.mxu0 }
 0xfe3   :  { %21802 = vst [vmem:[#allocation7_spill] sm:$0xff] %v19334_v35 }
 0xfe4   :  { %v19336_v10 = vpop.f32.mrf.mxu1  ;;  %v19338_v36 = vpop.f32.mrf.mxu0 }
 0xfe5   :  { %21803 = vst [vmem:[#allocation15_spill] sm:$0xff] %v19338_v36 }
 0xfe6   :  { %v19340_v44 = vpop.f32.mrf.mxu1  ;;  %v19342_v22 = vpop.f32.mrf.mxu0 }
 0xfe7   :  { %21804 = vst [vmem:[#allocation21_spill] sm:$0xff] %v19340_v44  ;;  %21805 = vst [vmem:[#allocation17_spill] sm:$0xff] %v19342_v22  ;;  %v15002_v22 = vadd.f32 %v15001_v0, %v15000_v62  ;;  %v15008_v62 = vadd.f32 %v15007_v1, %v15006_v29 }
 0xfe8   :  { %v19344_v46 = vpop.f32.mrf.mxu1  ;;  %v19346_v13 = vpop.f32.mrf.mxu0 }
 0xfe9   :  { %21806 = vst [vmem:[#allocation23_spill] sm:$0xff] %v19344_v46  ;;  %21807 = vst [vmem:[#allocation31_spill] sm:$0xff] %v19346_v13  ;;  %v6426_v19 = vadd.f32 %v15002_v22, %v19284_v16  ;;  %v15005_v46 = vadd.f32 %v15004_v15, %v15003_v49  ;;  %v15045_v16 = vadd.f32 %v19304_v28, %v19302_v3 }
 0xfea   :  { %v15080_v34 = vpop.f32.mrf.mxu1  ;;  %v15120_v2 = vpop.f32.mrf.mxu0 }
 0xfec   :  { %v15081_v56 = vpop.f32.mrf.mxu1  ;;  %v15121_v32 = vpop.f32.mrf.mxu0 }
 0xfed   :  { %v15082_v58 = vadd.f32 %v15081_v56, %v15080_v34 }
 0xfee   :  { %v15083_v18 = vpop.f32.mrf.mxu1  ;;  %v15123_v52 = vpop.f32.mrf.mxu0 }
 0xff0   :  { %v15084_v55 = vpop.f32.mrf.mxu1  ;;  %v15124_v59 = vpop.f32.mrf.mxu0 }
 0xff1   :  { %v15085_v15 = vadd.f32 %v15084_v55, %v15083_v18 }
 0xff2   :  { %v15086_v12 = vpop.f32.mrf.mxu1  ;;  %v19348_v39 = vpop.f32.mrf.mxu0 }
 0xff4   :  { %v15087_v27 = vpop.f32.mrf.mxu1  ;;  %v19350_v6 = vpop.f32.mrf.mxu0 }
 0xff6   :  { %v15089_v4 = vpop.f32.mrf.mxu1  ;;  %v19352_v8 = vpop.f32.mrf.mxu0 }
 0xff8   :  { %v15090_v7 = vpop.f32.mrf.mxu1  ;;  %v19354_v40 = vpop.f32.mrf.mxu0 }
 0xffa   :  { %v19356_v20 = vpop.f32.mrf.mxu1  ;;  %v19358_v61 = vpop.f32.mrf.mxu0 }
 0xffb   :  { %21808 = vst [vmem:[#allocation32_spill] sm:$0xff] %v19358_v61 }
 0xffc   :  { %v19360_v5 = vpop.f32.mrf.mxu1  ;;  %v19362_v23 = vpop.f32.mrf.mxu0 }
 0xffd   :  { %21809 = vst [vmem:[#allocation33_spill] sm:$0xff] %v19362_v23  ;;  %v15042_v23 = vadd.f32 %v15041_v26, %v19298_v9  ;;  %v6434_v9 = vadd.f32 %v15008_v62, %v19288_v57  ;;  %v15011_v26 = vadd.f32 %v15010_v38, %v19310_v11  ;;  %v15014_v57 = vadd.f32 %v19320_v43, %v19316_v41 }
 0xffe   :  { %v19364_v13 = vpop.f32.mrf.mxu1  ;;  %v19366_v37 = vpop.f32.mrf.mxu0  ;;  %v15125_v11 = vadd.f32 %v15124_v59, %v15123_v52  ;;  %v15128_v59 = vadd.f32 %v19350_v6, %v19348_v39 }
 0xfff   :  { %21810 = vst [vmem:[#allocation34_spill] sm:$0xff] %v19364_v13  ;;  %21811 = vst [vmem:[#allocation35_spill] sm:$0xff] %v19366_v37  ;;  %v6491_v37 = vadd.f32 %v15042_v23, %v6426_v19  ;;  %v15122_v19 = vadd.f32 %v15121_v32, %v15120_v2  ;;  %v6442_v43 = vadd.f32 %v15014_v57, %v19292_v60 }
0x1000   :  { %v19368_v53 = vpop.f32.mrf.mxu1  ;;  %v19370_v36 = vpop.f32.mrf.mxu0 }
0x1001   :  { %21812 = vst [vmem:[#allocation36_spill] sm:$0xff] %v19368_v53  ;;  %21813 = vst [vmem:[#allocation37_spill] sm:$0xff] %v19370_v36  ;;  %v6429_v36 = vadd.f32 %v15005_v46, %v19286_v33  ;;  %v6556_v49 = vadd.f32 %v15082_v58, %v6491_v37  ;;  %v15048_v33 = vadd.f32 %v19308_v42, %v19306_v47 }
0x1002   :  { %v19372_v35 = vpop.f32.mrf.mxu1  ;;  %v19375_v44 = vpop.f32.mrf.mxu0  ;;  %v15088_v46 = vadd.f32 %v15087_v27, %v15086_v12  ;;  %v6437_v58 = vadd.f32 %v15011_v26, %v19290_v45  ;;  %v15051_v47 = vadd.f32 %v19314_v63, %v19312_v17  ;;  %v15091_v12 = vadd.f32 %v15090_v7, %v15089_v4 }
0x1003   :  { %21814 = vst [vmem:[#allocation38_spill] sm:$0xff] %v19372_v35  ;;  %v6494_v1 = vadd.f32 %v15045_v16, %v6429_v36  ;;  %v6621_v56 = vadd.f32 %v15122_v19, %v6556_v49  ;;  %v6499_v55 = vadd.f32 %v15048_v33, %v6434_v9  ;;  %v15017_v45 = vadd.f32 %v19328_v54, %v19324_v21 }
0x1004   :  { %v19377_v61 = vpop.f32.mrf.mxu1  ;;  %v19380_v13 = vpop.f32.mrf.mxu0  ;;  %v6502_v49 = vadd.f32 %v15051_v47, %v6437_v58  ;;  %v15054_v7 = vadd.f32 %v19322_v51, %v19318_v14  ;;  %v15094_v21 = vadd.f32 %v19360_v5, %v19356_v20  ;;  %v15131_v14 = vadd.f32 %v19354_v40, %v19352_v8 }
0x1005   :  { %v6564_v27 = vadd.f32 %v15088_v46, %v6499_v55  ;;  %v6445_v26 = vadd.f32 %v15017_v45, %v19294_v31  ;;  %v21818_v55 = vld [vmem:[#allocation12_spill] sm:$0xff] }
0x1006   :  { %v19382_v0 = vpop.f32.mrf.mxu1  ;;  %v19385_v53 = vpop.f32.mrf.mxu0  ;;  %v6567_v63 = vadd.f32 %v15091_v12, %v6502_v49  ;;  %v21816_v31 = vld [vmem:[#allocation34_spill] sm:$0xff] }
0x1007   :  { %21815 = vst [vmem:[#allocation39_spill] sm:$0xff] %v19385_v53  ;;  %v6559_v53 = vadd.f32 %v15085_v15, %v6494_v1 }
0x1008   :  { %v19387_v35 = vpop.f32.mrf.mxu1  ;;  %v19391_v22 = vpop.f32.mrf.mxu0  ;;  %v6632_v33 = vadd.f32 %v15131_v14, %v6567_v63  ;;  %v21817_v46 = vld [vmem:[#allocation36_spill] sm:$0xff]  ;;  %v21832_v14 = vld [vmem:[#allocation31_spill] sm:$0xff] }
0x1009   :  { %v6624_v32 = vadd.f32 %v15125_v11, %v6559_v53  ;;  %v6629_v53 = vadd.f32 %v15128_v59, %v6564_v27  ;;  %v21823_v27 = vld [vmem:[#allocation26_spill] sm:$0xff] }
0x100a   :  { %v15160_v29 = vpop.f32.mrf.mxu1  ;;  %v15200_v23 = vpop.f32.mrf.mxu0 }
0x100c   :  { %v15161_v34 = vpop.f32.mrf.mxu1  ;;  %v15201_v37 = vpop.f32.mrf.mxu0 }
0x100d   :  { %v15162_v3 = vadd.f32 %v15161_v34, %v15160_v29  ;;  %v15202_v36 = vadd.f32 %v15201_v37, %v15200_v23  ;;  %v6507_v29 = vadd.f32 %v15054_v7, %v6442_v43  ;;  %v15057_v23 = vadd.f32 %v19330_v48, %v19326_v30  ;;  %v21821_v30 = vld [vmem:[#allocation32_spill] sm:$0xff]  ;;  %v21822_v48 = vld [vmem:[#allocation33_spill] sm:$0xff]  ;;  %v21827_v7 = vld [vmem:[#allocation35_spill] sm:$0xff] }
0x100e   :  { %v15163_v28 = vpop.f32.mrf.mxu1  ;;  %v15203_v2 = vpop.f32.mrf.mxu0  ;;  %v15097_v34 = vadd.f32 %v21817_v46, %v21816_v31 }
0x100f   :  { %v6686_v38 = vadd.f32 %v15162_v3, %v6621_v56  ;;  %v6510_v37 = vadd.f32 %v15057_v23, %v6445_v26 }
0x1010   :  { %v15164_v42 = vpop.f32.mrf.mxu1  ;;  %v15204_v16 = vpop.f32.mrf.mxu0 }
0x1011   :  { %v6751_v18 = vadd.f32 %v15202_v36, %v6686_v38  ;;  %v15165_v62 = vadd.f32 %v15164_v42, %v15163_v28  ;;  %v15205_v15 = vadd.f32 %v15204_v16, %v15203_v2  ;;  %v21820_v28 = vld [vmem:[#allocation23_spill] sm:$0xff]  ;;  %v15134_v38 = vadd.f32 %v21822_v48, %v21821_v30  ;;  %v21826_v16 = vld [vmem:[#allocation38_spill] sm:$0xff] }
0x1012   :  { %v15166_v41 = vpop.f32.mrf.mxu1  ;;  %v15206_v17 = vpop.f32.mrf.mxu0  ;;  %v21824_v42 = vld [vmem:[#allocation7_spill] sm:$0xff]  ;;  %v15100_v49 = vadd.f32 %v19377_v61, %v21826_v16  ;;  %v21830_v61 = vld [vmem:[#allocation25_spill] sm:$0xff] }
0x1013   :  { %v6689_v52 = vadd.f32 %v15165_v62, %v6624_v32  ;;  %v19408_v4 = vadd.f32 %v6751_v18, %v18524_v24  ;;  %v15020_v24 = vadd.f32 %v19336_v10, %v19332_v25  ;;  %v6572_v10 = vadd.f32 %v15094_v21, %v6507_v29  ;;  %v21825_v32 = vld [vmem:[#allocation15_spill] sm:$0xff]  ;;  %v21829_v21 = vld [vmem:[#allocation9_spill] sm:$0xff] }
0x1014   :  { %v15167_v9 = vpop.f32.mrf.mxu1  ;;  %v15207_v39 = vpop.f32.mrf.mxu0  ;;  %v15060_v18 = vadd.f32 %v21825_v32, %v21824_v42  ;;  %v6575_v62 = vadd.f32 %v15097_v34, %v6510_v37  ;;  %v15140_v34 = vadd.f32 %v19380_v13, %v19375_v44  ;;  %v21834_v30 = vld [vmem:[#allocation39_spill] sm:$0xff] }
0x1015   :  { %v6754_v54 = vadd.f32 %v15205_v15, %v6689_v52  ;;  %v15168_v6 = vadd.f32 %v15167_v9, %v15166_v41  ;;  %v6791_v60 = vsel %vm185_vm0, %v19408_v4, 0.0  ;;  %v15208_v19 = vadd.f32 %v15207_v39, %v15206_v17 }
0x1016   :  { %v15169_v51 = vpop.f32.mrf.mxu1  ;;  %6792 = vadd.xlane.f32.xlu1 %v6791_v60  ;;  %v15209_v5 = vpop.f32.mrf.mxu0  ;;  %v6450_v58 = vadd.f32 %v15020_v24, %v21818_v55  ;;  %v6637_v59 = vadd.f32 %v15134_v38, %v6572_v10  ;;  %v21831_v24 = vld [vmem:[#allocation17_spill] sm:$0xff]  ;;  %v15143_v44 = vadd.f32 %v19391_v22, %v21834_v30  ;;  %v21838_v30 = vmov 0.0  }
0x1017   :  { %v6694_v1 = vadd.f32 %v15168_v6, %v6629_v53  ;;  %v19422_v20 = vadd.f32 %v6754_v54, %v18528_v50  ;;  %v21819_v50 = vld [vmem:[#allocation21_spill] sm:$0xff] }
0x1018   :  { %v15170_v25 = vpop.f32.mrf.mxu1  ;;  %v15210_v40 = vpop.f32.mrf.mxu0  ;;  %v15023_v57 = vadd.f32 %v21820_v28, %v21819_v50  ;;  %v6515_v17 = vadd.f32 %v15060_v18, %v6450_v58  ;;  %v21828_v53 = vld [vmem:[#allocation37_spill] sm:$0xff] }
0x1019   :  { %v6759_v56 = vadd.f32 %v15208_v19, %v6694_v1  ;;  %v15171_v8 = vadd.f32 %v15170_v25, %v15169_v51  ;;  %v6794_v3 = vsel %vm185_vm0, %v19422_v20, 0.0  ;;  %v15211_v2 = vadd.f32 %v15210_v40, %v15209_v5 }
0x101a   :  { %v15172_v11 = vpop.f32.mrf.mxu1  ;;  %6795 = vadd.xlane.f32.xlu0 %v6794_v3  ;;  %v15212_v47 = vpop.f32.mrf.mxu0  ;;  %v15137_v63 = vadd.f32 %v21828_v53, %v21827_v7  ;;  %v6453_v54 = vadd.f32 %v15023_v57, %v21829_v21  ;;  %v15063_v51 = vadd.f32 %v21832_v14, %v21831_v24  ;;  %v6580_v1 = vadd.f32 %v15100_v49, %v6515_v17  ;;  %v21833_v3 = vld [vmem:[#allocation27_spill] sm:$0xff] }
0x101b   :  { %v6697_v36 = vadd.f32 %v15171_v8, %v6632_v33  ;;  %v19436_v12 = vadd.f32 %v6759_v56, %v21823_v27  ;;  %v15103_v5 = vadd.f32 %v19387_v35, %v19382_v0 }
0x101c   :  { %v15173_v45 = vpop.f32.mrf.mxu1  ;;  %v15213_v52 = vpop.f32.mrf.mxu0  ;;  %v6640_v29 = vadd.f32 %v15137_v63, %v6575_v62  ;;  %v6518_v10 = vadd.f32 %v15063_v51, %v6453_v54  ;;  %v6645_v55 = vadd.f32 %v15140_v34, %v6580_v1 }
0x101d   :  { %v6762_v41 = vadd.f32 %v15211_v2, %v6697_v36  ;;  %v15174_v43 = vadd.f32 %v15173_v45, %v15172_v11  ;;  %v6797_v15 = vsel %vm185_vm0, %v19436_v12, 0.0  ;;  %v15214_v39 = vadd.f32 %v15213_v52, %v15212_v47  ;;  %v21835_v36 = vld [vmem:[#allocation28_spill] sm:$0xff]  ;;  %v21836_v45 = vld [vmem:[#allocation30_spill] sm:$0xff] }
0x101e   :  { %v15175_v9 = vpop.f32.mrf.mxu1  ;;  %6798 = vadd.xlane.f32.xlu1 %v6797_v15  ;;  %v15215_v60 = vpop.f32.mrf.mxu0  ;;  %v6583_v35 = vadd.f32 %v15103_v5, %v6518_v10 }
0x101f   :  { %v6702_v6 = vadd.f32 %v15174_v43, %v6637_v59  ;;  %v19448_v26 = vadd.f32 %v6762_v41, %v21830_v61  ;;  %v21837_v43 = vld [vmem:[#allocation29_spill] sm:$0xff] }
0x1020   :  { %v15176_v19 = vpop.f32.mrf.mxu1  ;;  %v15216_v31 = vpop.f32.mrf.mxu0  ;;  %v6648_v27 = vadd.f32 %v15143_v44, %v6583_v35 }
0x1021   :  { %v6767_v23 = vadd.f32 %v15214_v39, %v6702_v6  ;;  %v15177_v33 = vadd.f32 %v15176_v19, %v15175_v9  ;;  %v6800_v46 = vsel %vm185_vm0, %v19448_v26, 0.0  ;;  %v15217_v8 = vadd.f32 %v15216_v31, %v15215_v60 }
0x1022   :  { %v15178_v25 = vpop.f32.mrf.mxu1  ;;  %6801 = vadd.xlane.f32.xlu0 %v6800_v46  ;;  %v15218_v40 = vpop.f32.mrf.mxu0 }
0x1023   :  { %v6705_v56 = vadd.f32 %v15177_v33, %v6640_v29  ;;  %v6785_v37 = vadd.f32 %v6767_v23, %v21833_v3 }
0x1024   :  { %v15179_v58 = vpop.f32.mrf.mxu1  ;;  %v15219_v28 = vpop.f32.mrf.mxu0 }
0x1025   :  { %v6770_v0 = vadd.f32 %v15217_v8, %v6705_v56  ;;  %v15180_v50 = vadd.f32 %v15179_v58, %v15178_v25  ;;  %v6803_v57 = vsel %vm185_vm0, %v6785_v37, 0.0  ;;  %v15220_v48 = vadd.f32 %v15219_v28, %v15218_v40 }
0x1026   :  { %v15181_v11 = vpop.f32.mrf.mxu1  ;;  %6804 = vadd.xlane.f32.xlu1 %v6803_v57  ;;  %v15221_v38 = vpop.f32.mrf.mxu0  ;;  %v16782_v57 = vld [vmem:[%s21755_s4 + $0x18] sm:$0xff]  }
0x1027   :  { %v6710_v13 = vadd.f32 %v15180_v50, %v6645_v55  ;;  %v6786_v2 = vadd.f32 %v6770_v0, %v21835_v36  ;;  %16094 = vmatprep.subr.bf16.mxu1 %v16782_v57 }
0x1028   :  { %v15182_v47 = vpop.f32.mrf.mxu1  ;;  %v15222_v18 = vpop.f32.mrf.mxu0  ;;  %16095 = vmatpush3.bf16.msra.mxu1 %v16782_v57 }
0x1029   :  { %v6775_v42 = vadd.f32 %v15220_v48, %v6710_v13  ;;  %v15183_v32 = vadd.f32 %v15182_v47, %v15181_v11  ;;  %v6806_v62 = vsel %vm185_vm0, %v6786_v2, 0.0  ;;  %v15223_v49 = vadd.f32 %v15222_v18, %v15221_v38  ;;  %v16783_v11 = vld [vmem:[%s21755_s4 + $0x10] sm:$0xff]  }
0x102a   :  { %6807 = vadd.xlane.f32.xlu0 %v6806_v62  ;;  %16096 = vmatprep.subr.bf16.mxu1 %v16783_v11 }
0x102b   :  { %v6713_v16 = vadd.f32 %v15183_v32, %v6648_v27  ;;  %v6787_v59 = vadd.f32 %v6775_v42, %v21836_v45 }
0x102c   :  { %16097 = vmatpush3.bf16.msra.mxu1 %v16783_v11 }
0x102d   :  { %v6778_v41 = vadd.f32 %v15223_v49, %v6713_v16  ;;  %v6809_v22 = vsel %vm185_vm0, %v6787_v59, 0.0  ;;  %16112 = vmatprep.subr.bf16.mxu1 %v21838_v30 }
0x102e   :  { %6810 = vadd.xlane.f32.xlu1 %v6809_v22  ;;  %v14156_v22 = vld [vmem:[%s21674_s14] ss:$0 sm:$0xff] }
0x102f   :  { %v6788_v52 = vadd.f32 %v6778_v41, %v21837_v43 }
0x1031   :  { %v6812_v15 = vsel %vm185_vm0, %v6788_v52, 0.0 }
0x1032   :  { %6813 = vadd.xlane.f32.xlu0 %v6812_v15 }
0x109f   :  { %v6793_v17 = vpop.xlane.xlu1 %6792 }
0x10a0   :  { %v6815_v7 = vmul.f32 0.03125, %v6793_v17 }
0x10a2   :  { %v19469_v53 = vsub.f32 %v19408_v4, %v6815_v7 }
0x10a3   :  { %v6796_v63 = vpop.xlane.xlu0 %6795 }
0x10a4   :  { %v6816_v9 = vmul.f32 0.03125, %v6796_v63  ;;  %v6831_v21 = vmul.f32 %v19469_v53, %v19469_v53 }
0x10a6   :  { %v19474_v54 = vsub.f32 %v19422_v20, %v6816_v9  ;;  %v6839_v6 = vsel %vm185_vm0, %v6831_v21, 0.0  ;;  %v14157_v9 = vld [vmem:[%s21675_s15] ss:$0 sm:$0xff] }
0x10a7   :  { %v6799_v39 = vpop.xlane.xlu1 %6798  ;;  %6840 = vadd.xlane.f32.xlu1 %v6839_v6 }
0x10a8   :  { %v6817_v60 = vmul.f32 0.03125, %v6799_v39  ;;  %v6832_v61 = vmul.f32 %v19474_v54, %v19474_v54 }
0x10aa   :  { %v19480_v24 = vsub.f32 %v19436_v12, %v6817_v60  ;;  %v6842_v4 = vsel %vm185_vm0, %v6832_v61, 0.0 }
0x10ab   :  { %v6802_v14 = vpop.xlane.xlu0 %6801  ;;  %6843 = vadd.xlane.f32.xlu0 %v6842_v4 }
0x10ac   :  { %v6818_v51 = vmul.f32 0.03125, %v6802_v14  ;;  %v6833_v20 = vmul.f32 %v19480_v24, %v19480_v24 }
0x10ae   :  { %v19486_v29 = vsub.f32 %v19448_v26, %v6818_v51  ;;  %v6845_v1 = vsel %vm185_vm0, %v6833_v20, 0.0 }
0x10af   :  { %v6805_v19 = vpop.xlane.xlu1 %6804  ;;  %6846 = vadd.xlane.f32.xlu1 %v6845_v1 }
0x10b0   :  { %v6819_v5 = vmul.f32 0.03125, %v6805_v19  ;;  %v6834_v12 = vmul.f32 %v19486_v29, %v19486_v29 }
0x10b2   :  { %v19491_v23 = vsub.f32 %v6785_v37, %v6819_v5  ;;  %v6848_v33 = vsel %vm185_vm0, %v6834_v12, 0.0 }
0x10b3   :  { %v6808_v31 = vpop.xlane.xlu0 %6807  ;;  %6849 = vadd.xlane.f32.xlu0 %v6848_v33 }
0x10b4   :  { %v6820_v46 = vmul.f32 0.03125, %v6808_v31  ;;  %v6835_v34 = vmul.f32 %v19491_v23, %v19491_v23 }
0x10b6   :  { %v19496_v26 = vsub.f32 %v6786_v2, %v6820_v46  ;;  %v6851_v25 = vsel %vm185_vm0, %v6835_v34, 0.0 }
0x10b7   :  { %6852 = vadd.xlane.f32.xlu1 %v6851_v25  ;;  %v6811_v10 = vpop.xlane.xlu1 %6810 }
0x10b8   :  { %v6821_v56 = vmul.f32 0.03125, %v6811_v10  ;;  %v6836_v8 = vmul.f32 %v19496_v26, %v19496_v26 }
0x10ba   :  { %v19501_v40 = vsub.f32 %v6787_v59, %v6821_v56  ;;  %v6854_v3 = vsel %vm185_vm0, %v6836_v8, 0.0 }
0x10bb   :  { %6855 = vadd.xlane.f32.xlu0 %v6854_v3  ;;  %v6814_v37 = vpop.xlane.xlu0 %6813 }
0x10bc   :  { %v6822_v55 = vmul.f32 0.03125, %v6814_v37  ;;  %v6837_v58 = vmul.f32 %v19501_v40, %v19501_v40 }
0x10be   :  { %v19506_v35 = vsub.f32 %v6788_v52, %v6822_v55  ;;  %v6857_v0 = vsel %vm185_vm0, %v6837_v58, 0.0 }
0x10bf   :  { %6858 = vadd.xlane.f32.xlu1 %v6857_v0 }
0x10c0   :  { %v6838_v50 = vmul.f32 %v19506_v35, %v19506_v35 }
0x10c2   :  { %v6860_v28 = vsel %vm185_vm0, %v6838_v50, 0.0 }
0x10c3   :  { %6861 = vadd.xlane.f32.xlu0 %v6860_v28 }
0x1130   :  { %v6841_v44 = vpop.xlane.xlu1 %6840 }
0x1131   :  { %v6863_v13 = vmul.f32 0.03125, %v6841_v44 }
0x1133   :  { %v6871_v48 = vadd.f32 1e-05, %v6863_v13 }
0x1134   :  { %v6844_v38 = vpop.xlane.xlu0 %6843 }
0x1135   :  { %17058 = vrsqrt.f32 %v6871_v48  ;;  %v6864_v36 = vmul.f32 0.03125, %v6844_v38 }
0x1137   :  { %v6872_v2 = vadd.f32 1e-05, %v6864_v36 }
0x1138   :  { %v6847_v47 = vpop.xlane.xlu1 %6846 }
0x1139   :  { %17060 = vrsqrt.f32 %v6872_v2  ;;  %v6865_v27 = vmul.f32 0.03125, %v6847_v47 }
0x113b   :  { %v6873_v42 = vadd.f32 1e-05, %v6865_v27 }
0x113c   :  { %v6850_v32 = vpop.xlane.xlu0 %6849 }
0x113d   :  { %17062 = vrsqrt.f32 %v6873_v42  ;;  %v6866_v18 = vmul.f32 0.03125, %v6850_v32 }
0x113f   :  { %v6874_v62 = vadd.f32 1e-05, %v6866_v18 }
0x1140   :  { %v6853_v16 = vpop.xlane.xlu1 %6852 }
0x1141   :  { %17064 = vrsqrt.f32 %v6874_v62  ;;  %v6867_v49 = vmul.f32 0.03125, %v6853_v16 }
0x1142   :  { %v17059_v45 = vpop.eup %17058 }
0x1143   :  { %v6875_v59 = vadd.f32 1e-05, %v6867_v49  ;;  %v6887_v41 = vmul.f32 %v17059_v45, %v19469_v53 }
0x1144   :  { %v6856_v43 = vpop.xlane.xlu0 %6855 }
0x1145   :  { %17066 = vrsqrt.f32 %v6875_v59  ;;  %v6868_v52 = vmul.f32 0.03125, %v6856_v43  ;;  %v6901_v63 = vmul.f32 %v14156_v22, %v6887_v41 }
0x1146   :  { %v17061_v15 = vpop.eup %17060 }
0x1147   :  { %v6876_v17 = vadd.f32 1e-05, %v6868_v52  ;;  %v6888_v7 = vmul.f32 %v17061_v15, %v19474_v54  ;;  %v19528_v4 = vadd.f32 %v14157_v9, %v6901_v63 }
0x1148   :  { %v6859_v21 = vpop.xlane.xlu1 %6858 }
0x1149   :  { %17068 = vrsqrt.f32 %v6876_v17  ;;  %v6869_v6 = vmul.f32 0.03125, %v6859_v21  ;;  %v6902_v53 = vmul.f32 %v14156_v22, %v6888_v7 }
0x114a   :  { %v17063_v39 = vpop.eup %17062 }
0x114b   :  { %v6889_v60 = vmul.f32 %v17063_v39, %v19480_v24  ;;  %v6877_v61 = vadd.f32 1e-05, %v6869_v6  ;;  %v19530_v14 = vadd.f32 %v14157_v9, %v6902_v53 }
0x114c   :  { %v6862_v51 = vpop.xlane.xlu0 %6861 }
0x114d   :  { %17070 = vrsqrt.f32 %v6877_v61  ;;  %v6870_v54 = vmul.f32 0.03125, %v6862_v51  ;;  %v6923_v20 = vpack.c.bf16 %v19530_v14, %v19528_v4  ;;  %v6903_v19 = vmul.f32 %v14156_v22, %v6889_v60 }
0x114e   :  { %v17065_v1 = vpop.eup %17064 }
0x114f   :  { %v6890_v5 = vmul.f32 %v17065_v1, %v19486_v29  ;;  %v6878_v12 = vadd.f32 1e-05, %v6870_v54  ;;  %16098 = vmatprep.mubr.msk.bf16.mxu1 %vm185_vm0, %v6923_v20  ;;  %v19536_v31 = vadd.f32 %v14157_v9, %v6903_v19 }
0x1151   :  { %v6904_v33 = vmul.f32 %v14156_v22, %v6890_v5  ;;  %17072 = vrsqrt.f32 %v6878_v12 }
0x1152   :  { %v17067_v24 = vpop.eup %17066 }
0x1153   :  { %v19538_v46 = vadd.f32 %v14157_v9, %v6904_v33  ;;  %v6891_v34 = vmul.f32 %v17067_v24, %v19491_v23 }
0x1155   :  { %v6924_v25 = vpack.c.bf16 %v19538_v46, %v19536_v31  ;;  %v6905_v56 = vmul.f32 %v14156_v22, %v6891_v34 }
0x1156   :  { %v17069_v10 = vpop.eup %17068 }
0x1157   :  { %16099 = vmatmul.mubr.msk.bf16.vlgmr.msra.gmra.mxu1 %vm185_vm0, %v6924_v25  ;;  %v6892_v29 = vmul.f32 %v17069_v10, %v19496_v26  ;;  %v19546_v55 = vadd.f32 %v14157_v9, %v6905_v56 }
0x1159   :  { %v6906_v8 = vmul.f32 %v14156_v22, %v6892_v29 }
0x115a   :  { %v17071_v3 = vpop.eup %17070 }
0x115b   :  { %v6893_v37 = vmul.f32 %v17071_v3, %v19501_v40  ;;  %v19548_v58 = vadd.f32 %v14157_v9, %v6906_v8 }
0x115d   :  { %v6925_v23 = vpack.c.bf16 %v19548_v58, %v19546_v55  ;;  %v6907_v28 = vmul.f32 %v14156_v22, %v6893_v37 }
0x115e   :  { %v17073_v0 = vpop.eup %17072 }
0x115f   :  { %v6894_v50 = vmul.f32 %v17073_v0, %v19506_v35  ;;  %16102 = vmatprep.mubr.msk.bf16.mxu1 %vm185_vm0, %v6925_v23  ;;  %v19554_v26 = vadd.f32 %v14157_v9, %v6907_v28  ;;  %v14163_v35 = vld [vmem:[%s21666_s5 + $0x1] ss:$0 sm:$0xff]  ;;  %s21839_s5 = smov 56  }
0x1161   :  { %v6908_v57 = vmul.f32 %v14156_v22, %v6894_v50 }
0x1163   :  { %v19556_v11 = vadd.f32 %v14157_v9, %v6908_v57 }
0x1165   :  { %v6926_v40 = vpack.c.bf16 %v19556_v11, %v19554_v26 }
0x1167   :  { %16103 = vmatmul.mubr.msk.bf16.gmra.mxu1 %vm185_vm0, %v6926_v40 }
0x1168   :  { %16114 = vmatprep.mubr.msk.bf16.mxu1 %vm17237_vm1, %v21838_v30 }
0x1217   :  { %v16100_v44 = vpop.f32.mrf.mxu1 }
0x1218   :  { %v7007_v36 = vadd.f32 %v16100_v44, %v14163_v35 }
0x1219   :  { %v6998_v13 = vpop.f32.mrf.mxu1 }
0x121a   :  { %v6999_v48 = vadd.f32 %v14163_v35, %v6998_v13  ;;  %v19570_v42 = vpack.c.bf16 %v7007_v36, %v7007_v36 }
0x121b   :  { %v16101_v38 = vpop.f32.mrf.mxu1 }
0x121c   :  { %v19566_v2 = vpack.c.bf16 %v6999_v48, %v6999_v48  ;;  %v7010_v32 = vadd.f32 %v16101_v38, %v14163_v35 }
0x121d   :  { %v7001_v47 = vpop.f32.mrf.mxu1 }
0x121e   :  { %v7002_v27 = vadd.f32 %v14163_v35, %v7001_v47  ;;  %7053 = vrot.lane.b32.xlu1 %v19566_v2, %s17238_s3  ;;  %v19578_v62 = vpack.c.bf16 %v7010_v32, %v7010_v32 }
0x1220   :  { %v19572_v18 = vpack.c.bf16 %v7002_v27, %v7002_v27 }
0x1222   :  { %7101 = vrot.lane.b32.xlu0 %v19572_v18, %s17238_s3  ;;  %7149 = vrot.lane.b32.xlu1 %v19570_v42, %s17238_s3 }
0x1226   :  { %7197 = vrot.lane.b32.xlu1 %v19578_v62, %s17238_s3 }
0x1227   :  { %v16104_v16 = vpop.f32.mrf.mxu1 }
0x1228   :  { %v7023_v41 = vadd.f32 %v16104_v16, %v14163_v35 }
0x1229   :  { %v7014_v49 = vpop.f32.mrf.mxu1 }
0x122a   :  { %v7015_v45 = vadd.f32 %v14163_v35, %v7014_v49  ;;  %v19586_v15 = vpack.c.bf16 %v7023_v41, %v7023_v41 }
0x122b   :  { %v16105_v59 = vpop.f32.mrf.mxu1 }
0x122c   :  { %v19582_v22 = vpack.c.bf16 %v7015_v45, %v7015_v45  ;;  %v7026_v17 = vadd.f32 %v16105_v59, %v14163_v35 }
0x122d   :  { %v7017_v43 = vpop.f32.mrf.mxu1 }
0x122e   :  { %v7018_v52 = vadd.f32 %v14163_v35, %v7017_v43  ;;  %7245 = vrot.lane.b32.xlu0 %v19582_v22, %s17238_s3  ;;  %v19594_v63 = vpack.c.bf16 %v7026_v17, %v7026_v17 }
0x1230   :  { %v19588_v7 = vpack.c.bf16 %v7018_v52, %v7018_v52 }
0x1232   :  { %7293 = vrot.lane.b32.xlu1 %v19588_v7, %s17238_s3  ;;  %7341 = vrot.lane.b32.xlu0 %v19586_v15, %s17238_s3 }
0x1236   :  { %7389 = vrot.lane.b32.xlu1 %v19594_v63, %s17238_s3  ;;  %7581 = vrot.lane.b32.xlu0 %v19572_v18, %s17239_s0  ;;  %s21840_s3 = smov 80  }
0x123a   :  { %7533 = vrot.lane.b32.xlu1 %v19566_v2, %s17239_s0 }
0x123e   :  { %7629 = vrot.lane.b32.xlu1 %v19570_v42, %s17239_s0 }
0x1242   :  { %7677 = vrot.lane.b32.xlu1 %v19578_v62, %s17239_s0 }
0x1290   :  { %v7054_v9 = vpop.permute.xlu1 %7053 }
0x1291   :  { %v7059_v21 = vsel %vm289_vm2, %v7054_v9, 0 }
0x1292   :  { %16107 = vmatpush3.bf16.xpose.msra.mxu0 %v7059_v21 }
0x1293   :  { %16118 = vmatprep.subr.bf16.mxu0 %v21838_v30 }
0x1294   :  { %v7102_v6 = vpop.permute.xlu0 %7101  ;;  %v7150_v53 = vpop.permute.xlu1 %7149 }
0x1295   :  { %v7107_v39 = vsel %vm289_vm2, %v7102_v6, 0  ;;  %v7155_v60 = vsel %vm289_vm2, %v7150_v53, 0 }
0x1296   :  { %16113 = vmatpush3.bf16.xpose.msra.mxu1 %v7107_v39 }
0x1297   :  { %16124 = vmatprep.subr.bf16.mxu1 %v21838_v30 }
0x1298   :  { %v7198_v61 = vpop.permute.xlu1 %7197 }
0x1299   :  { %16109 = vmatmul.mubr.msk.bf16.vlgmr.msra.gmra.mxu0 %vm289_vm2, %v19566_v2  ;;  %v7203_v51 = vsel %vm289_vm2, %v7198_v61, 0 }
0x129a   :  { %16119 = vmatpush3.bf16.xpose.msra.mxu0 %v7155_v60  ;;  %16120 = vmatprep.mubr.msk.bf16.mxu0 %vm17237_vm1, %v21838_v30 }
0x129b   :  { %16130 = vmatprep.subr.bf16.mxu0 %v21838_v30 }
0x129d   :  { %16115 = vmatmul.mubr.msk.bf16.vlgmr.msra.gmra.mxu1 %vm289_vm2, %v19572_v18 }
0x129e   :  { %16125 = vmatpush3.bf16.xpose.msra.mxu1 %v7203_v51  ;;  %16126 = vmatprep.mubr.msk.bf16.mxu1 %vm17237_vm1, %v21838_v30 }
0x129f   :  { %16136 = vmatprep.subr.bf16.mxu1 %v21838_v30 }
0x12a0   :  { %v7246_v54 = vpop.permute.xlu0 %7245 }
0x12a1   :  { %v7251_v20 = vsel %vm289_vm2, %v7246_v54, 0  ;;  %16121 = vmatmul.mubr.msk.bf16.vlgmr.msra.gmra.mxu0 %vm289_vm2, %v19570_v42 }
0x12a2   :  { %16131 = vmatpush3.bf16.xpose.msra.mxu0 %v7251_v20  ;;  %16132 = vmatprep.mubr.msk.bf16.mxu0 %vm17237_vm1, %v21838_v30 }
0x12a3   :  { %16142 = vmatprep.subr.bf16.mxu0 %v21838_v30 }
0x12a4   :  { %v7294_v1 = vpop.permute.xlu1 %7293  ;;  %v7342_v5 = vpop.permute.xlu0 %7341 }
0x12a5   :  { %v7299_v19 = vsel %vm289_vm2, %v7294_v1, 0  ;;  %16127 = vmatmul.mubr.msk.bf16.vlgmr.msra.gmra.mxu1 %vm289_vm2, %v19578_v62  ;;  %v7347_v33 = vsel %vm289_vm2, %v7342_v5, 0 }
0x12a6   :  { %16137 = vmatpush3.bf16.xpose.msra.mxu1 %v7299_v19  ;;  %16138 = vmatprep.mubr.msk.bf16.mxu1 %vm17237_vm1, %v21838_v30 }
0x12a7   :  { %16148 = vmatprep.subr.bf16.mxu1 %v21838_v30 }
0x12a8   :  { %v7390_v12 = vpop.permute.xlu1 %7389  ;;  %v7582_v10 = vpop.permute.xlu0 %7581 }
0x12a9   :  { %16133 = vmatmul.mubr.msk.bf16.vlgmr.msra.gmra.mxu0 %vm289_vm2, %v19582_v22  ;;  %v7395_v24 = vsel %vm289_vm2, %v7390_v12, 0  ;;  %v7587_v29 = vsel %vm773_vm3, %v7582_v10, 0 }
0x12aa   :  { %16143 = vmatpush3.bf16.xpose.msra.mxu0 %v7347_v33  ;;  %16144 = vmatprep.mubr.msk.bf16.mxu0 %vm17237_vm1, %v21838_v30 }
0x12ab   :  { %16154 = vmatprep.subr.bf16.mxu0 %v21838_v30 }
0x12ac   :  { %v7534_v34 = vpop.permute.xlu1 %7533 }
0x12ad   :  { %16139 = vmatmul.mubr.msk.bf16.vlgmr.msra.gmra.mxu1 %vm289_vm2, %v19588_v7  ;;  %v7539_v25 = vsel %vm773_vm3, %v7534_v34, 0 }
0x12ae   :  { %16149 = vmatpush3.bf16.xpose.msra.mxu1 %v7395_v24  ;;  %16150 = vmatprep.mubr.msk.bf16.mxu1 %vm17237_vm1, %v21838_v30 }
0x12af   :  { %16160 = vmatprep.subr.bf16.mxu1 %v21838_v30 }
0x12b0   :  { %v19673_v12 = vpop.permute.xlu1 %7629 }
0x12b1   :  { %16145 = vmatmul.mubr.msk.bf16.vlgmr.msra.gmra.mxu0 %vm289_vm2, %v19586_v15 }
0x12b2   :  { %16155 = vmatpush3.bf16.msra.mxu0 %v7539_v25  ;;  %16156 = vmatprep.mubr.msk.bf16.mxu0 %vm17237_vm1, %v21838_v30 }
0x12b3   :  { %16166 = vmatprep.subr.bf16.mxu0 %v21838_v30 }
0x12b4   :  { %v19675_v33 = vpop.permute.xlu1 %7677 }
0x12b5   :  { %16151 = vmatmul.mubr.msk.bf16.vlgmr.msra.gmra.mxu1 %vm289_vm2, %v19594_v63 }
0x12b6   :  { %16161 = vmatpush3.bf16.msra.mxu1 %v7587_v29  ;;  %16162 = vmatprep.mubr.msk.bf16.mxu1 %vm17237_vm1, %v21838_v30 }
0x12b7   :  { %16172 = vmatprep.subr.bf16.mxu1 %v21838_v30 }
0x1359   :  { %v7095_v56 = vpop.f32.mrf.mxu0 }
0x135a   :  { %v7437_v8 = vsel %vm289_vm2, %v7095_v56, -inf }
0x135b   :  { %7438 = vmax.xlane.f32.xlu0 %v7437_v8  ;;  %v16110_v3 = vpop.f32.mrf.mxu0 }
0x135d   :  { %v7098_v37 = vpop.f32.mrf.mxu0  ;;  %v7143_v23 = vpop.f32.mrf.mxu1 }
0x135e   :  { %v7440_v0 = vsel %vm289_vm2, %v7143_v23, -inf }
0x135f   :  { %v16116_v50 = vpop.f32.mrf.mxu1  ;;  %7441 = vmax.xlane.f32.xlu1 %v7440_v0  ;;  %v16111_v28 = vpop.f32.mrf.mxu0 }
0x1361   :  { %v7146_v57 = vpop.f32.mrf.mxu1  ;;  %v7191_v40 = vpop.f32.mrf.mxu0 }
0x1362   :  { %v7443_v44 = vsel %vm289_vm2, %v7191_v40, -inf }
0x1363   :  { %v16117_v35 = vpop.f32.mrf.mxu1  ;;  %7444 = vmax.xlane.f32.xlu0 %v7443_v44  ;;  %v16122_v13 = vpop.f32.mrf.mxu0 }
0x1365   :  { %v7194_v48 = vpop.f32.mrf.mxu0  ;;  %v7239_v38 = vpop.f32.mrf.mxu1 }
0x1366   :  { %v7446_v36 = vsel %vm289_vm2, %v7239_v38, -inf }
0x1367   :  { %v16123_v47 = vpop.f32.mrf.mxu0  ;;  %7447 = vmax.xlane.f32.xlu0 %v7446_v36  ;;  %v16128_v27 = vpop.f32.mrf.mxu1 }
0x1369   :  { %v7242_v32 = vpop.f32.mrf.mxu1  ;;  %v7287_v16 = vpop.f32.mrf.mxu0 }
0x136a   :  { %v7449_v49 = vsel %vm289_vm2, %v7287_v16, -inf }
0x136b   :  { %7450 = vmax.xlane.f32.xlu1 %v7449_v49  ;;  %v16129_v45 = vpop.f32.mrf.mxu1  ;;  %v16134_v59 = vpop.f32.mrf.mxu0 }
0x136d   :  { %v7290_v41 = vpop.f32.mrf.mxu0  ;;  %v7335_v43 = vpop.f32.mrf.mxu1 }
0x136e   :  { %v7452_v52 = vsel %vm289_vm2, %v7335_v43, -inf }
0x136f   :  { %v16135_v17 = vpop.f32.mrf.mxu0  ;;  %7453 = vmax.xlane.f32.xlu0 %v7452_v52  ;;  %v16140_v9 = vpop.f32.mrf.mxu1 }
0x1371   :  { %v7338_v21 = vpop.f32.mrf.mxu1  ;;  %v19664_v6 = vpop.f32.mrf.mxu0 }
0x1372   :  { %v7455_v53 = vsel %vm289_vm2, %v19664_v6, -inf }
0x1373   :  { %7456 = vmax.xlane.f32.xlu1 %v7455_v53  ;;  %v16141_v39 = vpop.f32.mrf.mxu1  ;;  %v16146_v60 = vpop.f32.mrf.mxu0 }
0x1375   :  { %v7386_v61 = vpop.f32.mrf.mxu0  ;;  %v7431_v51 = vpop.f32.mrf.mxu1 }
0x1376   :  { %v7458_v54 = vsel %vm289_vm2, %v7431_v51, -inf }
0x1377   :  { %v16147_v20 = vpop.f32.mrf.mxu0  ;;  %7459 = vmax.xlane.f32.xlu0 %v7458_v54  ;;  %v16152_v1 = vpop.f32.mrf.mxu1 }
0x1379   :  { %v7434_v19 = vpop.f32.mrf.mxu1 }
0x137b   :  { %v16153_v5 = vpop.f32.mrf.mxu1 }
0x1384   :  { %7773 = vrot.lane.b32.xlu1 %v19588_v7, %s17239_s0 }
0x138d   :  { %7725 = vrot.lane.b32.xlu0 %v19582_v22, %s17239_s0 }
0x13e4   :  { %v7439_v24 = vpop.xlane.xlu0 %7438 }
0x13e5   :  { %v7461_v34 = vsub.f32 %v7095_v56, %v7439_v24 }
0x13e7   :  { %v7469_v25 = vmul.f32 1.442695, %v7461_v34 }
0x13e8   :  { %v7442_v10 = vpop.xlane.xlu1 %7441 }
0x13e9   :  { %17074 = vpow2.f32 %v7469_v25  ;;  %v7462_v29 = vsub.f32 %v7143_v23, %v7442_v10 }
0x13eb   :  { %v7471_v8 = vmul.f32 1.442695, %v7462_v29 }
0x13ec   :  { %v7445_v3 = vpop.xlane.xlu0 %7444 }
0x13ed   :  { %17076 = vpow2.f32 %v7471_v8  ;;  %v7463_v37 = vsub.f32 %v7191_v40, %v7445_v3  ;;  %v7635_v3 = vsel %vm773_vm3, %v19673_v12, 0 }
0x13ef   :  { %v7473_v0 = vmul.f32 1.442695, %v7463_v37 }
0x13f0   :  { %v7448_v50 = vpop.xlane.xlu0 %7447 }
0x13f1   :  { %17078 = vpow2.f32 %v7473_v0  ;;  %v7464_v28 = vsub.f32 %v7239_v38, %v7448_v50 }
0x13f3   :  { %v7475_v57 = vmul.f32 1.442695, %v7464_v28 }
0x13f4   :  { %v7451_v44 = vpop.xlane.xlu1 %7450 }
0x13f5   :  { %17080 = vpow2.f32 %v7475_v57  ;;  %v7465_v35 = vsub.f32 %v7287_v16, %v7451_v44  ;;  %v7683_v57 = vsel %vm773_vm3, %v19675_v33, 0 }
0x13f6   :  { %v19677_v13 = vpop.eup %17074 }
0x13f7   :  { %v7477_v48 = vmul.f32 1.442695, %v7465_v35  ;;  %v7485_v56 = vsel %vm289_vm2, %v19677_v13, 0.0 }
0x13f8   :  { %7486 = vadd.xlane.f32.xlu1 %v7485_v56  ;;  %v7454_v23 = vpop.xlane.xlu0 %7453 }
0x13f9   :  { %17082 = vpow2.f32 %v7477_v48  ;;  %v7466_v36 = vsub.f32 %v7335_v43, %v7454_v23 }
0x13fa   :  { %v19681_v47 = vpop.eup %17076 }
0x13fb   :  { %v7479_v40 = vmul.f32 1.442695, %v7466_v36  ;;  %v7488_v38 = vsel %vm289_vm2, %v19681_v47, 0.0 }
0x13fc   :  { %7489 = vadd.xlane.f32.xlu0 %v7488_v38  ;;  %v7457_v52 = vpop.xlane.xlu1 %7456 }
0x13fd   :  { %17084 = vpow2.f32 %v7479_v40  ;;  %v7467_v17 = vsub.f32 %v19664_v6, %v7457_v52 }
0x13fe   :  { %v19685_v27 = vpop.eup %17078 }
0x13ff   :  { %v7491_v32 = vsel %vm289_vm2, %v19685_v27, 0.0  ;;  %v7481_v21 = vmul.f32 1.442695, %v7467_v17 }
0x1400   :  { %7492 = vadd.xlane.f32.xlu1 %v7491_v32  ;;  %v7460_v9 = vpop.xlane.xlu0 %7459  ;;  %v7774_v6 = vpop.permute.xlu1 %7773 }
0x1401   :  { %v7468_v53 = vsub.f32 %v7431_v51, %v7460_v9  ;;  %17086 = vpow2.f32 %v7481_v21  ;;  %v7779_v23 = vsel %vm773_vm3, %v7774_v6, 0 }
0x1402   :  { %v19689_v16 = vpop.eup %17080 }
0x1403   :  { %v7494_v49 = vsel %vm289_vm2, %v19689_v16, 0.0  ;;  %v7483_v39 = vmul.f32 1.442695, %v7468_v53 }
0x1404   :  { %7495 = vadd.xlane.f32.xlu0 %v7494_v49  ;;  %v7726_v51 = vpop.permute.xlu0 %7725 }
0x1405   :  { %17088 = vpow2.f32 %v7483_v39 }
0x1406   :  { %v19693_v45 = vpop.eup %17082 }
0x1407   :  { %v7497_v59 = vsel %vm289_vm2, %v19693_v45, 0.0 }
0x1408   :  { %7498 = vadd.xlane.f32.xlu1 %v7497_v59 }
0x140a   :  { %v19697_v41 = vpop.eup %17084 }
0x140b   :  { %v7500_v43 = vsel %vm289_vm2, %v19697_v41, 0.0 }
0x140c   :  { %7501 = vadd.xlane.f32.xlu0 %v7500_v43 }
0x140e   :  { %v19706_v60 = vpop.eup %17086 }
0x140f   :  { %v7503_v61 = vsel %vm289_vm2, %v19706_v60, 0.0 }
0x1412   :  { %v19710_v54 = vpop.eup %17088 }
0x1413   :  { %v7506_v20 = vsel %vm289_vm2, %v19710_v54, 0.0 }
0x1419   :  { %7869 = vrot.lane.b32.xlu1 %v19594_v63, %s17239_s0 }
0x1422   :  { %7821 = vrot.lane.b32.xlu0 %v19586_v15, %s17239_s0  ;;  %s21841_s0 = smov 112  }
0x143d   :  { %7504 = vadd.xlane.f32.xlu1 %v7503_v61 }
0x1441   :  { %7507 = vadd.xlane.f32.xlu0 %v7506_v20 }
0x144e   :  { %7969 = vrot.lane.b32.xlu1 %v19572_v18, %s17240_s11 }
0x1452   :  { %7967 = vrot.lane.b32.xlu1 %v19572_v18, %s17241_s20 }
0x1456   :  { %8069 = vrot.lane.b32.xlu1 %v19578_v62, %s17240_s11 }
0x1457   :  { %7919 = vrot.lane.b32.xlu0 %v19566_v2, %s17240_s11 }
0x145a   :  { %8067 = vrot.lane.b32.xlu1 %v19578_v62, %s17241_s20 }
0x145b   :  { %7917 = vrot.lane.b32.xlu0 %v19566_v2, %s17241_s20 }
0x145e   :  { %8169 = vrot.lane.b32.xlu1 %v19588_v7, %s17240_s11 }
0x145f   :  { %8019 = vrot.lane.b32.xlu0 %v19570_v42, %s17240_s11 }
0x1462   :  { %8167 = vrot.lane.b32.xlu1 %v19588_v7, %s17241_s20 }
0x1463   :  { %8017 = vrot.lane.b32.xlu0 %v19570_v42, %s17241_s20 }
0x1466   :  { %8269 = vrot.lane.b32.xlu1 %v19594_v63, %s17240_s11 }
0x1467   :  { %8119 = vrot.lane.b32.xlu0 %v19582_v22, %s17240_s11 }
0x146a   :  { %8267 = vrot.lane.b32.xlu1 %v19594_v63, %s17241_s20 }
0x146b   :  { %8117 = vrot.lane.b32.xlu0 %v19582_v22, %s17241_s20 }
0x146e   :  { %8413 = vrot.lane.b32.xlu1 %v19566_v2, %s21839_s5 }
0x146f   :  { %8219 = vrot.lane.b32.xlu0 %v19586_v15, %s17240_s11  ;;  %s21842_s11 = smov 48  }
0x1472   :  { %8509 = vrot.lane.b32.xlu1 %v19570_v42, %s21839_s5 }
0x1473   :  { %8217 = vrot.lane.b32.xlu0 %v19586_v15, %s17241_s20  ;;  %s21843_s20 = smov 72  }
0x1476   :  { %8557 = vrot.lane.b32.xlu1 %v19578_v62, %s21839_s5 }
0x1477   :  { %8461 = vrot.lane.b32.xlu0 %v19572_v18, %s21839_s5 }
0x1481   :  { %v7487_v1 = vpop.xlane.xlu1 %7486 }
0x1482   :  { %17090 = vrcp.f32 %v7487_v1 }
0x1485   :  { %v7490_v19 = vpop.xlane.xlu0 %7489 }
0x1486   :  { %17092 = vrcp.f32 %v7490_v19 }
0x1489   :  { %v7493_v5 = vpop.xlane.xlu1 %7492 }
0x148a   :  { %17094 = vrcp.f32 %v7493_v5 }
0x148d   :  { %v7496_v24 = vpop.xlane.xlu0 %7495 }
0x148e   :  { %17096 = vrcp.f32 %v7496_v24 }
0x148f   :  { %v17091_v34 = vpop.eup %17090 }
0x1490   :  { %v7517_v25 = vmul.f32 %v17091_v34, %v19677_v13  ;;  %v7731_v13 = vsel %vm773_vm3, %v7726_v51, 0 }
0x1491   :  { %v7499_v10 = vpop.xlane.xlu1 %7498 }
0x1492   :  { %v7525_v29 = vpack.c.bf16 %v7517_v25, %v7517_v25  ;;  %17098 = vrcp.f32 %v7499_v10 }
0x1493   :  { %v17093_v8 = vpop.eup %17092 }
0x1494   :  { %v7518_v37 = vmul.f32 %v17093_v8, %v19681_v47  ;;  %16157 = vmatmul.mubr.msk.bf16.vlgmr.msra.gmra.mxu0 %vm289_vm2, %v7525_v29 }
0x1495   :  { %16167 = vmatpush3.bf16.msra.mxu0 %v7635_v3  ;;  %v7502_v0 = vpop.xlane.xlu0 %7501  ;;  %16168 = vmatprep.mubr.msk.bf16.mxu0 %vm17237_vm1, %v21838_v30 }
0x1496   :  { %v7526_v50 = vpack.c.bf16 %v7518_v37, %v7518_v37  ;;  %17100 = vrcp.f32 %v7502_v0  ;;  %16178 = vmatprep.subr.bf16.mxu0 %v21838_v30 }
0x1497   :  { %v17095_v28 = vpop.eup %17094 }
0x1498   :  { %v7519_v44 = vmul.f32 %v17095_v28, %v19685_v27  ;;  %16163 = vmatmul.mubr.msk.bf16.vlgmr.msra.gmra.mxu1 %vm289_vm2, %v7526_v50 }
0x1499   :  { %16173 = vmatpush3.bf16.msra.mxu1 %v7683_v57  ;;  %16174 = vmatprep.mubr.msk.bf16.mxu1 %vm17237_vm1, %v21838_v30  ;;  %v7822_v47 = vpop.permute.xlu0 %7821 }
0x149a   :  { %v7527_v12 = vpack.c.bf16 %v7519_v44, %v7519_v44  ;;  %16184 = vmatprep.subr.bf16.mxu1 %v21838_v30  ;;  %v7827_v32 = vsel %vm773_vm3, %v7822_v47, 0 }
0x149b   :  { %v17097_v35 = vpop.eup %17096 }
0x149c   :  { %v7520_v48 = vmul.f32 %v17097_v35, %v19689_v16  ;;  %16169 = vmatmul.mubr.msk.bf16.vlgmr.msra.gmra.mxu0 %vm289_vm2, %v7527_v12  ;;  %v7870_v16 = vpop.permute.xlu1 %7869 }
0x149d   :  { %16179 = vmatpush3.bf16.msra.mxu0 %v7731_v13  ;;  %16180 = vmatprep.mubr.msk.bf16.mxu0 %vm17237_vm1, %v21838_v30 }
0x149e   :  { %v7528_v33 = vpack.c.bf16 %v7520_v48, %v7520_v48  ;;  %16190 = vmatprep.subr.bf16.mxu0 %v21838_v30 }
0x149f   :  { %v17099_v56 = vpop.eup %17098 }
0x14a0   :  { %v7521_v36 = vmul.f32 %v17099_v56, %v19693_v45  ;;  %16175 = vmatmul.mubr.msk.bf16.vlgmr.msra.gmra.mxu1 %vm289_vm2, %v7528_v33  ;;  %v7875_v45 = vsel %vm773_vm3, %v7870_v16, 0 }
0x14a1   :  { %16185 = vmatpush3.bf16.msra.mxu1 %v7779_v23  ;;  %16186 = vmatprep.mubr.msk.bf16.mxu1 %vm17237_vm1, %v21838_v30 }
0x14a2   :  { %v7529_v40 = vpack.c.bf16 %v7521_v36, %v7521_v36  ;;  %16196 = vmatprep.subr.bf16.mxu1 %v21838_v30 }
0x14a3   :  { %v17101_v38 = vpop.eup %17100 }
0x14a4   :  { %v7522_v27 = vmul.f32 %v17101_v38, %v19697_v41  ;;  %16181 = vmatmul.mubr.msk.bf16.vlgmr.msra.gmra.mxu0 %vm289_vm2, %v7529_v40 }
0x14a5   :  { %16191 = vmatpush3.bf16.msra.mxu0 %v7827_v32  ;;  %16192 = vmatprep.mubr.msk.bf16.mxu0 %vm17237_vm1, %v21838_v30 }
0x14a6   :  { %v7530_v49 = vpack.c.bf16 %v7522_v27, %v7522_v27  ;;  %16202 = vmatprep.subr.bf16.mxu0 %v21838_v30 }
0x14a8   :  { %16187 = vmatmul.mubr.msk.bf16.vlgmr.msra.gmra.mxu1 %vm289_vm2, %v7530_v49 }
0x14a9   :  { %16197 = vmatpush3.bf16.msra.mxu1 %v7875_v45  ;;  %16198 = vmatprep.mubr.msk.bf16.mxu1 %vm17237_vm1, %v21838_v30 }
0x14aa   :  { %16208 = vmatprep.subr.bf16.mxu1 %v21838_v30 }
0x14c6   :  { %v7505_v59 = vpop.xlane.xlu1 %7504 }
0x14c7   :  { %17102 = vrcp.f32 %v7505_v59 }
0x14ca   :  { %v7508_v41 = vpop.xlane.xlu0 %7507  ;;  %v7970_v43 = vpop.permute.xlu1 %7969 }
0x14cb   :  { %17104 = vrcp.f32 %v7508_v41 }
0x14ce   :  { %v7920_v52 = vpop.permute.xlu0 %7919  ;;  %v7968_v17 = vpop.permute.xlu1 %7967 }
0x14cf   :  { %v7925_v19 = vsel %vm289_vm2, %v7920_v52, 0 }
0x14d2   :  { %v7918_v9 = vpop.permute.xlu0 %7917  ;;  %v8070_v21 = vpop.permute.xlu1 %8069 }
0x14d3   :  { %v8075_v29 = vsel %vm289_vm2, %v8070_v21, 0 }
0x14d4   :  { %v17103_v53 = vpop.eup %17102 }
0x14d5   :  { %v7523_v39 = vmul.f32 %v17103_v53, %v19706_v60  ;;  %v7975_v60 = vsel %vm289_vm2, %v7970_v43, 0 }
0x14d6   :  { %v8020_v61 = vpop.permute.xlu0 %8019  ;;  %v8068_v51 = vpop.permute.xlu1 %8067 }
0x14d7   :  { %v7531_v20 = vpack.c.bf16 %v7523_v39, %v7523_v39 }
0x14d8   :  { %v17105_v6 = vpop.eup %17104 }
0x14d9   :  { %v7524_v1 = vmul.f32 %v17105_v6, %v19710_v54  ;;  %16193 = vmatmul.mubr.msk.bf16.vlgmr.msra.gmra.mxu0 %vm289_vm2, %v7531_v20  ;;  %v8025_v54 = vsel %vm289_vm2, %v8020_v61, 0 }
0x14da   :  { %16203 = vmatpush3.bf16.xpose.msra.mxu0 %v7925_v19  ;;  %16204 = vmatprep.mubr.msk.bf16.mxu0 %vm17237_vm1, %v21838_v30  ;;  %v8018_v24 = vpop.permute.xlu0 %8017  ;;  %v8170_v34 = vpop.permute.xlu1 %8169 }
0x14db   :  { %v7532_v5 = vpack.c.bf16 %v7524_v1, %v7524_v1  ;;  %16214 = vmatprep.subr.bf16.mxu0 %v21838_v30  ;;  %v8175_v0 = vsel %vm289_vm2, %v8170_v34, 0 }
0x14dd   :  { %16199 = vmatmul.mubr.msk.bf16.vlgmr.msra.gmra.mxu1 %vm289_vm2, %v7532_v5 }
0x14de   :  { %16209 = vmatpush3.bf16.xpose.msra.mxu1 %v7975_v60  ;;  %16210 = vmatprep.mubr.msk.bf16.mxu1 %vm17237_vm1, %v21838_v30  ;;  %v8120_v25 = vpop.permute.xlu0 %8119  ;;  %v8168_v10 = vpop.permute.xlu1 %8167 }
0x14df   :  { %16220 = vmatprep.subr.bf16.mxu1 %v21838_v30  ;;  %v8125_v3 = vsel %vm289_vm2, %v8120_v25, 0 }
0x14e1   :  { %16205 = vmatmul.mubr.msk.bf16.vlgmr.msra.gmra.mxu0 %vm289_vm2, %v7918_v9 }
0x14e2   :  { %16215 = vmatpush3.bf16.xpose.msra.mxu0 %v8025_v54  ;;  %16216 = vmatprep.mubr.msk.bf16.mxu0 %vm17237_vm1, %v21838_v30  ;;  %v8118_v8 = vpop.permute.xlu0 %8117  ;;  %v8270_v37 = vpop.permute.xlu1 %8269 }
0x14e3   :  { %16226 = vmatprep.subr.bf16.mxu0 %v21838_v30  ;;  %v8275_v12 = vsel %vm289_vm2, %v8270_v37, 0 }
0x14e5   :  { %16211 = vmatmul.mubr.msk.bf16.vlgmr.msra.gmra.mxu1 %vm289_vm2, %v7968_v17 }
0x14e6   :  { %16221 = vmatpush3.bf16.xpose.msra.mxu1 %v8075_v29  ;;  %16222 = vmatprep.mubr.msk.bf16.mxu1 %vm17237_vm1, %v21838_v30  ;;  %v8220_v50 = vpop.permute.xlu0 %8219  ;;  %v8268_v28 = vpop.permute.xlu1 %8267 }
0x14e7   :  { %16232 = vmatprep.subr.bf16.mxu1 %v21838_v30  ;;  %v8225_v57 = vsel %vm289_vm2, %v8220_v50, 0 }
0x14e9   :  { %16217 = vmatmul.mubr.msk.bf16.vlgmr.msra.gmra.mxu0 %vm289_vm2, %v8018_v24 }
0x14ea   :  { %16227 = vmatpush3.bf16.xpose.msra.mxu0 %v8125_v3  ;;  %16228 = vmatprep.mubr.msk.bf16.mxu0 %vm17237_vm1, %v21838_v30  ;;  %v8218_v44 = vpop.permute.xlu0 %8217  ;;  %v8414_v35 = vpop.permute.xlu1 %8413 }
0x14eb   :  { %16238 = vmatprep.subr.bf16.mxu0 %v21838_v30  ;;  %v8419_v13 = vsel %vm773_vm3, %v8414_v35, 0 }
0x14ed   :  { %16223 = vmatmul.mubr.msk.bf16.vlgmr.msra.gmra.mxu1 %vm289_vm2, %v8068_v51 }
0x14ee   :  { %16233 = vmatpush3.bf16.xpose.msra.mxu1 %v8175_v0  ;;  %16234 = vmatprep.mubr.msk.bf16.mxu1 %vm17237_vm1, %v21838_v30  ;;  %v8462_v48 = vpop.permute.xlu0 %8461 }
0x14ef   :  { %16244 = vmatprep.subr.bf16.mxu1 %v21838_v30  ;;  %v8467_v33 = vsel %vm773_vm3, %v8462_v48, 0 }
0x14f1   :  { %16229 = vmatmul.mubr.msk.bf16.vlgmr.msra.gmra.mxu0 %vm289_vm2, %v8118_v8 }
0x14f2   :  { %16239 = vmatpush3.bf16.xpose.msra.mxu0 %v8225_v57  ;;  %16240 = vmatprep.mubr.msk.bf16.mxu0 %vm17237_vm1, %v21838_v30 }
0x14f3   :  { %16250 = vmatprep.subr.bf16.mxu0 %v21838_v30 }
0x14f5   :  { %16235 = vmatmul.mubr.msk.bf16.vlgmr.msra.gmra.mxu1 %vm289_vm2, %v8168_v10 }
0x14f6   :  { %16245 = vmatpush3.bf16.xpose.msra.mxu1 %v8275_v12  ;;  %16246 = vmatprep.mubr.msk.bf16.mxu1 %vm17237_vm1, %v21838_v30 }
0x14f7   :  { %16256 = vmatprep.subr.bf16.mxu1 %v21838_v30 }
0x14f9   :  { %16241 = vmatmul.mubr.msk.bf16.vlgmr.msra.gmra.mxu0 %vm289_vm2, %v8218_v44 }
0x14fa   :  { %16251 = vmatpush3.bf16.msra.mxu0 %v8419_v13  ;;  %16252 = vmatprep.mubr.msk.bf16.mxu0 %vm17237_vm1, %v21838_v30 }
0x14fb   :  { %16262 = vmatprep.subr.bf16.mxu0 %v21838_v30 }
0x14fd   :  { %16247 = vmatmul.mubr.msk.bf16.vlgmr.msra.gmra.mxu1 %vm289_vm2, %v8268_v28 }
0x14fe   :  { %16257 = vmatpush3.bf16.msra.mxu1 %v8467_v33  ;;  %16258 = vmatprep.mubr.msk.bf16.mxu1 %vm17237_vm1, %v21838_v30 }
0x14ff   :  { %16268 = vmatprep.subr.bf16.mxu1 %v21838_v30 }
0x1554   :  { %v19844_v56 = vpop.f32.mrf.mxu0 }
0x1556   :  { %v16158_v23 = vpop.f32.mrf.mxu0 }
0x1558   :  { %v7578_v36 = vpop.f32.mrf.mxu0  ;;  %v19846_v47 = vpop.f32.mrf.mxu1 }
0x155a   :  { %v16159_v40 = vpop.f32.mrf.mxu0  ;;  %v16164_v38 = vpop.f32.mrf.mxu1 }
0x155c   :  { %v7626_v27 = vpop.f32.mrf.mxu1  ;;  %v19848_v32 = vpop.f32.mrf.mxu0 }
0x155e   :  { %v16165_v16 = vpop.f32.mrf.mxu1  ;;  %v16170_v49 = vpop.f32.mrf.mxu0 }
0x1560   :  { %v7674_v45 = vpop.f32.mrf.mxu0  ;;  %v19850_v59 = vpop.f32.mrf.mxu1 }
0x1562   :  { %v16171_v41 = vpop.f32.mrf.mxu0  ;;  %v16176_v43 = vpop.f32.mrf.mxu1 }
0x1564   :  { %v7722_v52 = vpop.f32.mrf.mxu1  ;;  %v19852_v17 = vpop.f32.mrf.mxu0 }
0x1566   :  { %v16177_v9 = vpop.f32.mrf.mxu1  ;;  %v16182_v21 = vpop.f32.mrf.mxu0 }
0x1568   :  { %v7770_v53 = vpop.f32.mrf.mxu0  ;;  %v19854_v39 = vpop.f32.mrf.mxu1 }
0x156a   :  { %v16183_v61 = vpop.f32.mrf.mxu0  ;;  %v16188_v20 = vpop.f32.mrf.mxu1 }
0x156c   :  { %v7818_v6 = vpop.f32.mrf.mxu1 }
0x156e   :  { %v16189_v51 = vpop.f32.mrf.mxu1 }
0x1599   :  { %v19856_v1 = vpop.f32.mrf.mxu0 }
0x159b   :  { %v16194_v19 = vpop.f32.mrf.mxu0 }
0x159d   :  { %v7866_v5 = vpop.f32.mrf.mxu0  ;;  %v19858_v24 = vpop.f32.mrf.mxu1 }
0x159f   :  { %v16195_v60 = vpop.f32.mrf.mxu0  ;;  %v16200_v34 = vpop.f32.mrf.mxu1 }
0x15a1   :  { %v7914_v54 = vpop.f32.mrf.mxu1  ;;  %v7961_v25 = vpop.f32.mrf.mxu0 }
0x15a2   :  { %v8317_v10 = vsel %vm289_vm2, %v7961_v25, -inf }
0x15a3   :  { %v16201_v29 = vpop.f32.mrf.mxu1  ;;  %8318 = vmax.xlane.f32.xlu0 %v8317_v10  ;;  %v16206_v8 = vpop.f32.mrf.mxu0 }
0x15a4   :  { %v19875_v8 = vpop.permute.xlu1 %8509 }
0x15a5   :  { %v7964_v3 = vpop.f32.mrf.mxu0  ;;  %v8011_v37 = vpop.f32.mrf.mxu1 }
0x15a6   :  { %v8320_v0 = vsel %vm289_vm2, %v8011_v37, -inf }
0x15a7   :  { %v16207_v50 = vpop.f32.mrf.mxu0  ;;  %8321 = vmax.xlane.f32.xlu1 %v8320_v0  ;;  %v16212_v28 = vpop.f32.mrf.mxu1 }
0x15a8   :  { %v19877_v3 = vpop.permute.xlu1 %8557 }
0x15a9   :  { %v8014_v57 = vpop.f32.mrf.mxu1  ;;  %v8061_v44 = vpop.f32.mrf.mxu0 }
0x15aa   :  { %v8323_v12 = vsel %vm289_vm2, %v8061_v44, -inf }
0x15ab   :  { %8324 = vmax.xlane.f32.xlu0 %v8323_v12  ;;  %v16213_v35 = vpop.f32.mrf.mxu1  ;;  %v16218_v13 = vpop.f32.mrf.mxu0 }
0x15ad   :  { %v8064_v48 = vpop.f32.mrf.mxu0  ;;  %v8111_v33 = vpop.f32.mrf.mxu1 }
0x15ae   :  { %v8326_v23 = vsel %vm289_vm2, %v8111_v33, -inf }
0x15af   :  { %v16219_v36 = vpop.f32.mrf.mxu0  ;;  %8327 = vmax.xlane.f32.xlu0 %v8326_v23  ;;  %v16224_v40 = vpop.f32.mrf.mxu1 }
0x15b1   :  { %v8114_v38 = vpop.f32.mrf.mxu1  ;;  %v8161_v27 = vpop.f32.mrf.mxu0 }
0x15b2   :  { %v8329_v16 = vsel %vm289_vm2, %v8161_v27, -inf }
0x15b3   :  { %v16230_v49 = vpop.f32.mrf.mxu0  ;;  %8330 = vmax.xlane.f32.xlu1 %v8329_v16  ;;  %v16225_v45 = vpop.f32.mrf.mxu1 }
0x15b5   :  { %v8164_v41 = vpop.f32.mrf.mxu0  ;;  %v8211_v43 = vpop.f32.mrf.mxu1 }
0x15b6   :  { %v8332_v52 = vsel %vm289_vm2, %v8211_v43, -inf }
0x15b7   :  { %v16231_v9 = vpop.f32.mrf.mxu0  ;;  %8333 = vmax.xlane.f32.xlu0 %v8332_v52  ;;  %v16236_v21 = vpop.f32.mrf.mxu1 }
0x15b9   :  { %v8214_v53 = vpop.f32.mrf.mxu1  ;;  %v19866_v61 = vpop.f32.mrf.mxu0 }
0x15ba   :  { %v8335_v20 = vsel %vm289_vm2, %v19866_v61, -inf }
0x15bb   :  { %v16242_v6 = vpop.f32.mrf.mxu0  ;;  %8336 = vmax.xlane.f32.xlu1 %v8335_v20  ;;  %v16237_v51 = vpop.f32.mrf.mxu1 }
0x15bd   :  { %v8264_v19 = vpop.f32.mrf.mxu0  ;;  %v8311_v5 = vpop.f32.mrf.mxu1 }
0x15be   :  { %v8338_v60 = vsel %vm289_vm2, %v8311_v5, -inf }
0x15bf   :  { %v16243_v34 = vpop.f32.mrf.mxu0  ;;  %8339 = vmax.xlane.f32.xlu0 %v8338_v60  ;;  %v16248_v54 = vpop.f32.mrf.mxu1 }
0x15c1   :  { %v8314_v10 = vpop.f32.mrf.mxu1 }
0x15c3   :  { %v16249_v29 = vpop.f32.mrf.mxu1 }
0x15cc   :  { %8653 = vrot.lane.b32.xlu1 %v19588_v7, %s21839_s5 }
0x15d5   :  { %8605 = vrot.lane.b32.xlu0 %v19582_v22, %s21839_s5 }
0x162c   :  { %v8319_v0 = vpop.xlane.xlu0 %8318 }
0x162d   :  { %v8341_v50 = vsub.f32 %v7961_v25, %v8319_v0 }
0x162f   :  { %v8349_v28 = vmul.f32 1.442695, %v8341_v50 }
0x1630   :  { %v8322_v57 = vpop.xlane.xlu1 %8321 }
0x1631   :  { %17106 = vpow2.f32 %v8349_v28  ;;  %v8342_v12 = vsub.f32 %v8011_v37, %v8322_v57 }
0x1633   :  { %v8351_v35 = vmul.f32 1.442695, %v8342_v12 }
0x1634   :  { %v8325_v13 = vpop.xlane.xlu0 %8324 }
0x1635   :  { %17108 = vpow2.f32 %v8351_v35  ;;  %v8343_v48 = vsub.f32 %v8061_v44, %v8325_v13 }
0x1637   :  { %v8353_v23 = vmul.f32 1.442695, %v8343_v48 }
0x1638   :  { %v8328_v36 = vpop.xlane.xlu0 %8327 }
0x1639   :  { %17110 = vpow2.f32 %v8353_v23  ;;  %v8344_v40 = vsub.f32 %v8111_v33, %v8328_v36 }
0x163b   :  { %v8355_v38 = vmul.f32 1.442695, %v8344_v40 }
0x163c   :  { %v8331_v16 = vpop.xlane.xlu1 %8330 }
0x163d   :  { %17112 = vpow2.f32 %v8355_v38  ;;  %v8345_v49 = vsub.f32 %v8161_v27, %v8331_v16 }
0x163e   :  { %v19879_v45 = vpop.eup %17106 }
0x163f   :  { %v8357_v41 = vmul.f32 1.442695, %v8345_v49  ;;  %v8365_v25 = vsel %vm289_vm2, %v19879_v45, 0.0 }
0x1640   :  { %8366 = vadd.xlane.f32.xlu1 %v8365_v25  ;;  %v8334_v37 = vpop.xlane.xlu0 %8333 }
0x1641   :  { %17114 = vpow2.f32 %v8357_v41  ;;  %v8346_v52 = vsub.f32 %v8211_v43, %v8334_v37  ;;  %v8515_v41 = vsel %vm773_vm3, %v19875_v8, 0 }
0x1642   :  { %v19883_v9 = vpop.eup %17108 }
0x1643   :  { %v8359_v44 = vmul.f32 1.442695, %v8346_v52  ;;  %v8368_v33 = vsel %vm289_vm2, %v19883_v9, 0.0 }
0x1644   :  { %8369 = vadd.xlane.f32.xlu0 %v8368_v33  ;;  %v8337_v60 = vpop.xlane.xlu1 %8336 }
0x1645   :  { %17116 = vpow2.f32 %v8359_v44  ;;  %v8347_v34 = vsub.f32 %v19866_v61, %v8337_v60  ;;  %v8563_v44 = vsel %vm773_vm3, %v19877_v3, 0 }
0x1646   :  { %v19887_v21 = vpop.eup %17110 }
0x1647   :  { %v8371_v27 = vsel %vm289_vm2, %v19887_v21, 0.0  ;;  %v8361_v10 = vmul.f32 1.442695, %v8347_v34 }
0x1648   :  { %8372 = vadd.xlane.f32.xlu1 %v8371_v27  ;;  %v8340_v54 = vpop.xlane.xlu0 %8339  ;;  %v8654_v61 = vpop.permute.xlu1 %8653 }
0x1649   :  { %v8348_v29 = vsub.f32 %v8311_v5, %v8340_v54  ;;  %17118 = vpow2.f32 %v8361_v10 }
0x164a   :  { %v19891_v53 = vpop.eup %17112 }
0x164b   :  { %v8374_v20 = vsel %vm289_vm2, %v19891_v53, 0.0  ;;  %v8363_v0 = vmul.f32 1.442695, %v8348_v29 }
0x164c   :  { %8375 = vadd.xlane.f32.xlu0 %v8374_v20  ;;  %v8606_v5 = vpop.permute.xlu0 %8605 }
0x164d   :  { %17120 = vpow2.f32 %v8363_v0  ;;  %v8611_v27 = vsel %vm773_vm3, %v8606_v5, 0 }
0x164e   :  { %v19895_v43 = vpop.eup %17114 }
0x164f   :  { %v8377_v6 = vsel %vm289_vm2, %v19895_v43, 0.0 }
0x1650   :  { %8378 = vadd.xlane.f32.xlu1 %v8377_v6  ;;  %v8659_v6 = vsel %vm773_vm3, %v8654_v61, 0 }
0x1652   :  { %v19899_v51 = vpop.eup %17116 }
0x1653   :  { %v8380_v19 = vsel %vm289_vm2, %v19899_v51, 0.0 }
0x1654   :  { %8381 = vadd.xlane.f32.xlu0 %v8380_v19 }
0x1656   :  { %v19908_v50 = vpop.eup %17118 }
0x1657   :  { %v8383_v28 = vsel %vm289_vm2, %v19908_v50, 0.0 }
0x165a   :  { %v19912_v57 = vpop.eup %17120 }
0x165b   :  { %v8386_v12 = vsel %vm289_vm2, %v19912_v57, 0.0 }
0x1661   :  { %8749 = vrot.lane.b32.xlu1 %v19594_v63, %s21839_s5 }
0x166a   :  { %8701 = vrot.lane.b32.xlu0 %v19586_v15, %s21839_s5 }
0x1685   :  { %8384 = vadd.xlane.f32.xlu1 %v8383_v28 }
0x1689   :  { %8387 = vadd.xlane.f32.xlu0 %v8386_v12 }
0x1696   :  { %8849 = vrot.lane.b32.xlu1 %v19572_v18, %s21840_s3 }
0x169a   :  { %8847 = vrot.lane.b32.xlu1 %v19572_v18, %s21841_s0 }
0x169e   :  { %8949 = vrot.lane.b32.xlu1 %v19578_v62, %s21840_s3 }
0x169f   :  { %8799 = vrot.lane.b32.xlu0 %v19566_v2, %s21840_s3 }
0x16a2   :  { %8947 = vrot.lane.b32.xlu1 %v19578_v62, %s21841_s0 }
0x16a3   :  { %8797 = vrot.lane.b32.xlu0 %v19566_v2, %s21841_s0 }
0x16a6   :  { %9049 = vrot.lane.b32.xlu1 %v19588_v7, %s21840_s3 }
0x16a7   :  { %8899 = vrot.lane.b32.xlu0 %v19570_v42, %s21840_s3 }
0x16aa   :  { %9047 = vrot.lane.b32.xlu1 %v19588_v7, %s21841_s0 }
0x16ab   :  { %8897 = vrot.lane.b32.xlu0 %v19570_v42, %s21841_s0 }
0x16ae   :  { %9149 = vrot.lane.b32.xlu1 %v19594_v63, %s21840_s3 }
0x16af   :  { %8999 = vrot.lane.b32.xlu0 %v19582_v22, %s21840_s3 }
0x16b2   :  { %9147 = vrot.lane.b32.xlu1 %v19594_v63, %s21841_s0 }
0x16b3   :  { %8997 = vrot.lane.b32.xlu0 %v19582_v22, %s21841_s0 }
0x16b6   :  { %9293 = vrot.lane.b32.xlu1 %v19566_v2, %s21842_s11 }
0x16b7   :  { %9099 = vrot.lane.b32.xlu0 %v19586_v15, %s21840_s3 }
0x16ba   :  { %9389 = vrot.lane.b32.xlu1 %v19570_v42, %s21842_s11 }
0x16bb   :  { %9097 = vrot.lane.b32.xlu0 %v19586_v15, %s21841_s0 }
0x16be   :  { %9437 = vrot.lane.b32.xlu1 %v19578_v62, %s21842_s11 }
0x16bf   :  { %9341 = vrot.lane.b32.xlu0 %v19572_v18, %s21842_s11 }
0x16c9   :  { %v8367_v35 = vpop.xlane.xlu1 %8366 }
0x16ca   :  { %17122 = vrcp.f32 %v8367_v35 }
0x16cd   :  { %v8370_v13 = vpop.xlane.xlu0 %8369 }
0x16ce   :  { %17124 = vrcp.f32 %v8370_v13 }
0x16d1   :  { %v8373_v48 = vpop.xlane.xlu1 %8372 }
0x16d2   :  { %17126 = vrcp.f32 %v8373_v48 }
0x16d5   :  { %v8376_v23 = vpop.xlane.xlu0 %8375 }
0x16d6   :  { %17128 = vrcp.f32 %v8376_v23 }
0x16d7   :  { %v17123_v36 = vpop.eup %17122 }
0x16d8   :  { %v8397_v40 = vmul.f32 %v17123_v36, %v19879_v45 }
0x16d9   :  { %v8379_v38 = vpop.xlane.xlu1 %8378 }
0x16da   :  { %v8405_v16 = vpack.c.bf16 %v8397_v40, %v8397_v40  ;;  %17130 = vrcp.f32 %v8379_v38 }
0x16db   :  { %v17125_v49 = vpop.eup %17124 }
0x16dc   :  { %v8398_v25 = vmul.f32 %v17125_v49, %v19883_v9  ;;  %16253 = vmatmul.mubr.msk.bf16.vlgmr.msra.gmra.mxu0 %vm289_vm2, %v8405_v16 }
0x16dd   :  { %16263 = vmatpush3.bf16.msra.mxu0 %v8515_v41  ;;  %v8382_v37 = vpop.xlane.xlu0 %8381  ;;  %16264 = vmatprep.mubr.msk.bf16.mxu0 %vm17237_vm1, %v21838_v30  ;;  %v8750_v29 = vpop.permute.xlu1 %8749 }
0x16de   :  { %v8406_v52 = vpack.c.bf16 %v8398_v25, %v8398_v25  ;;  %17132 = vrcp.f32 %v8382_v37  ;;  %16274 = vmatprep.subr.bf16.mxu0 %v21838_v30  ;;  %v8755_v0 = vsel %vm773_vm3, %v8750_v29, 0 }
0x16df   :  { %v17127_v45 = vpop.eup %17126 }
0x16e0   :  { %v8399_v33 = vmul.f32 %v17127_v45, %v19887_v21  ;;  %16259 = vmatmul.mubr.msk.bf16.vlgmr.msra.gmra.mxu1 %vm289_vm2, %v8406_v52 }
0x16e1   :  { %16269 = vmatpush3.bf16.msra.mxu1 %v8563_v44  ;;  %16270 = vmatprep.mubr.msk.bf16.mxu1 %vm17237_vm1, %v21838_v30  ;;  %v8702_v60 = vpop.permute.xlu0 %8701 }
0x16e2   :  { %v8407_v8 = vpack.c.bf16 %v8399_v33, %v8399_v33  ;;  %16280 = vmatprep.subr.bf16.mxu1 %v21838_v30  ;;  %v8707_v10 = vsel %vm773_vm3, %v8702_v60, 0 }
0x16e3   :  { %v17129_v9 = vpop.eup %17128 }
0x16e4   :  { %v8400_v20 = vmul.f32 %v17129_v9, %v19891_v53  ;;  %16265 = vmatmul.mubr.msk.bf16.vlgmr.msra.gmra.mxu0 %vm289_vm2, %v8407_v8 }
0x16e5   :  { %16275 = vmatpush3.bf16.msra.mxu0 %v8611_v27  ;;  %16276 = vmatprep.mubr.msk.bf16.mxu0 %vm17237_vm1, %v21838_v30 }
0x16e6   :  { %v8408_v3 = vpack.c.bf16 %v8400_v20, %v8400_v20  ;;  %16286 = vmatprep.subr.bf16.mxu0 %v21838_v30 }
0x16e7   :  { %v17131_v21 = vpop.eup %17130 }
0x16e8   :  { %v8401_v19 = vmul.f32 %v17131_v21, %v19895_v43  ;;  %16271 = vmatmul.mubr.msk.bf16.vlgmr.msra.gmra.mxu1 %vm289_vm2, %v8408_v3 }
0x16e9   :  { %16281 = vmatpush3.bf16.msra.mxu1 %v8659_v6  ;;  %16282 = vmatprep.mubr.msk.bf16.mxu1 %vm17237_vm1, %v21838_v30 }
0x16ea   :  { %v8409_v53 = vpack.c.bf16 %v8401_v19, %v8401_v19  ;;  %16292 = vmatprep.subr.bf16.mxu1 %v21838_v30 }
0x16eb   :  { %v17133_v34 = vpop.eup %17132 }
0x16ec   :  { %v8402_v54 = vmul.f32 %v17133_v34, %v19899_v51  ;;  %16277 = vmatmul.mubr.msk.bf16.vlgmr.msra.gmra.mxu0 %vm289_vm2, %v8409_v53 }
0x16ed   :  { %16287 = vmatpush3.bf16.msra.mxu0 %v8707_v10  ;;  %16288 = vmatprep.mubr.msk.bf16.mxu0 %vm17237_vm1, %v21838_v30 }
0x16ee   :  { %v8410_v43 = vpack.c.bf16 %v8402_v54, %v8402_v54  ;;  %16298 = vmatprep.subr.bf16.mxu0 %v21838_v30 }
0x16f0   :  { %16283 = vmatmul.mubr.msk.bf16.vlgmr.msra.gmra.mxu1 %vm289_vm2, %v8410_v43 }
0x16f1   :  { %16293 = vmatpush3.bf16.msra.mxu1 %v8755_v0  ;;  %16294 = vmatprep.mubr.msk.bf16.mxu1 %vm17237_vm1, %v21838_v30 }
0x16f2   :  { %16304 = vmatprep.subr.bf16.mxu1 %v21838_v30 }
0x170e   :  { %v8385_v51 = vpop.xlane.xlu1 %8384 }
0x170f   :  { %17134 = vrcp.f32 %v8385_v51 }
0x1712   :  { %v8388_v28 = vpop.xlane.xlu0 %8387  ;;  %v8850_v12 = vpop.permute.xlu1 %8849 }
0x1713   :  { %17136 = vrcp.f32 %v8388_v28 }
0x1716   :  { %v8800_v61 = vpop.permute.xlu0 %8799  ;;  %v8848_v5 = vpop.permute.xlu1 %8847 }
0x1717   :  { %v8805_v41 = vsel %vm289_vm2, %v8800_v61, 0 }
0x171a   :  { %v8798_v35 = vpop.permute.xlu0 %8797  ;;  %v8950_v13 = vpop.permute.xlu1 %8949 }
0x171b   :  { %v8955_v33 = vsel %vm289_vm2, %v8950_v13, 0 }
0x171c   :  { %v17135_v48 = vpop.eup %17134 }
0x171d   :  { %v8403_v23 = vmul.f32 %v17135_v48, %v19908_v50  ;;  %v8855_v50 = vsel %vm289_vm2, %v8850_v12, 0 }
0x171e   :  { %v8900_v36 = vpop.permute.xlu0 %8899  ;;  %v8948_v16 = vpop.permute.xlu1 %8947 }
0x171f   :  { %v8411_v40 = vpack.c.bf16 %v8403_v23, %v8403_v23 }
0x1720   :  { %v17137_v38 = vpop.eup %17136 }
0x1721   :  { %v8404_v49 = vmul.f32 %v17137_v38, %v19912_v57  ;;  %16289 = vmatmul.mubr.msk.bf16.vlgmr.msra.gmra.mxu0 %vm289_vm2, %v8411_v40  ;;  %v8905_v57 = vsel %vm289_vm2, %v8900_v36, 0 }
0x1722   :  { %16299 = vmatpush3.bf16.xpose.msra.mxu0 %v8805_v41  ;;  %16300 = vmatprep.mubr.msk.bf16.mxu0 %vm17237_vm1, %v21838_v30  ;;  %v8898_v37 = vpop.permute.xlu0 %8897  ;;  %v9050_v52 = vpop.permute.xlu1 %9049 }
0x1723   :  { %v8412_v25 = vpack.c.bf16 %v8404_v49, %v8404_v49  ;;  %16310 = vmatprep.subr.bf16.mxu0 %v21838_v30  ;;  %v9055_v20 = vsel %vm289_vm2, %v9050_v52, 0 }
0x1725   :  { %16295 = vmatmul.mubr.msk.bf16.vlgmr.msra.gmra.mxu1 %vm289_vm2, %v8412_v25 }
0x1726   :  { %16305 = vmatpush3.bf16.xpose.msra.mxu1 %v8855_v50  ;;  %16306 = vmatprep.mubr.msk.bf16.mxu1 %vm17237_vm1, %v21838_v30  ;;  %v9000_v45 = vpop.permute.xlu0 %8999  ;;  %v9048_v44 = vpop.permute.xlu1 %9047 }
0x1727   :  { %16316 = vmatprep.subr.bf16.mxu1 %v21838_v30  ;;  %v9005_v9 = vsel %vm289_vm2, %v9000_v45, 0 }
0x1729   :  { %16301 = vmatmul.mubr.msk.bf16.vlgmr.msra.gmra.mxu0 %vm289_vm2, %v8798_v35 }
0x172a   :  { %16311 = vmatpush3.bf16.xpose.msra.mxu0 %v8905_v57  ;;  %16312 = vmatprep.mubr.msk.bf16.mxu0 %vm17237_vm1, %v21838_v30  ;;  %v8998_v8 = vpop.permute.xlu0 %8997  ;;  %v9150_v27 = vpop.permute.xlu1 %9149 }
0x172b   :  { %16322 = vmatprep.subr.bf16.mxu0 %v21838_v30  ;;  %v9155_v60 = vsel %vm289_vm2, %v9150_v27, 0 }
0x172d   :  { %16307 = vmatmul.mubr.msk.bf16.vlgmr.msra.gmra.mxu1 %vm289_vm2, %v8848_v5 }
0x172e   :  { %16317 = vmatpush3.bf16.xpose.msra.mxu1 %v8955_v33  ;;  %16318 = vmatprep.mubr.msk.bf16.mxu1 %vm17237_vm1, %v21838_v30  ;;  %v9100_v3 = vpop.permute.xlu0 %9099  ;;  %v9148_v21 = vpop.permute.xlu1 %9147 }
0x172f   :  { %16328 = vmatprep.subr.bf16.mxu1 %v21838_v30  ;;  %v9105_v6 = vsel %vm289_vm2, %v9100_v3, 0 }
0x1731   :  { %16313 = vmatmul.mubr.msk.bf16.vlgmr.msra.gmra.mxu0 %vm289_vm2, %v8898_v37 }
0x1732   :  { %16323 = vmatpush3.bf16.xpose.msra.mxu0 %v9005_v9  ;;  %16324 = vmatprep.mubr.msk.bf16.mxu0 %vm17237_vm1, %v21838_v30  ;;  %v9098_v19 = vpop.permute.xlu0 %9097  ;;  %v9294_v53 = vpop.permute.xlu1 %9293 }
0x1733   :  { %16334 = vmatprep.subr.bf16.mxu0 %v21838_v30  ;;  %v9299_v34 = vsel %vm773_vm3, %v9294_v53, 0 }
0x1735   :  { %16319 = vmatmul.mubr.msk.bf16.vlgmr.msra.gmra.mxu1 %vm289_vm2, %v8948_v16 }
0x1736   :  { %16329 = vmatpush3.bf16.xpose.msra.mxu1 %v9055_v20  ;;  %16330 = vmatprep.mubr.msk.bf16.mxu1 %vm17237_vm1, %v21838_v30  ;;  %v9342_v54 = vpop.permute.xlu0 %9341 }
0x1737   :  { %16340 = vmatprep.subr.bf16.mxu1 %v21838_v30  ;;  %v9347_v10 = vsel %vm773_vm3, %v9342_v54, 0 }
0x1739   :  { %16325 = vmatmul.mubr.msk.bf16.vlgmr.msra.gmra.mxu0 %vm289_vm2, %v8998_v8 }
0x173a   :  { %16335 = vmatpush3.bf16.xpose.msra.mxu0 %v9105_v6  ;;  %16336 = vmatprep.mubr.msk.bf16.mxu0 %vm17237_vm1, %v21838_v30 }
0x173b   :  { %16346 = vmatprep.subr.bf16.mxu0 %v21838_v30 }
0x173d   :  { %16331 = vmatmul.mubr.msk.bf16.vlgmr.msra.gmra.mxu1 %vm289_vm2, %v9048_v44 }
0x173e   :  { %16341 = vmatpush3.bf16.xpose.msra.mxu1 %v9155_v60  ;;  %16342 = vmatprep.mubr.msk.bf16.mxu1 %vm17237_vm1, %v21838_v30 }
0x173f   :  { %16352 = vmatprep.subr.bf16.mxu1 %v21838_v30 }
0x1741   :  { %16337 = vmatmul.mubr.msk.bf16.vlgmr.msra.gmra.mxu0 %vm289_vm2, %v9098_v19 }
0x1742   :  { %16347 = vmatpush3.bf16.msra.mxu0 %v9299_v34  ;;  %16348 = vmatprep.mubr.msk.bf16.mxu0 %vm17237_vm1, %v21838_v30 }
0x1743   :  { %16358 = vmatprep.subr.bf16.mxu0 %v21838_v30 }
0x1745   :  { %16343 = vmatmul.mubr.msk.bf16.vlgmr.msra.gmra.mxu1 %vm289_vm2, %v9148_v21 }
0x1746   :  { %16353 = vmatpush3.bf16.msra.mxu1 %v9347_v10  ;;  %16354 = vmatprep.mubr.msk.bf16.mxu1 %vm17237_vm1, %v21838_v30 }
0x1747   :  { %16364 = vmatprep.subr.bf16.mxu1 %v21838_v30 }
0x179c   :  { %v20046_v29 = vpop.f32.mrf.mxu0 }
0x179e   :  { %v16254_v43 = vpop.f32.mrf.mxu0 }
0x17a0   :  { %v8458_v0 = vpop.f32.mrf.mxu0  ;;  %v20048_v51 = vpop.f32.mrf.mxu1 }
0x17a1   :  { %v16588_v28 = vpack.i.bf16 %v20048_v51, %v20046_v29 }
0x17a2   :  { %v16255_v12 = vpop.f32.mrf.mxu0  ;;  %v16260_v61 = vpop.f32.mrf.mxu1 }
0x17a4   :  { %v8506_v5 = vpop.f32.mrf.mxu1  ;;  %v20052_v35 = vpop.f32.mrf.mxu0 }
0x17a6   :  { %v16261_v13 = vpop.f32.mrf.mxu1  ;;  %v16266_v48 = vpop.f32.mrf.mxu0 }
0x17a8   :  { %v8554_v23 = vpop.f32.mrf.mxu0  ;;  %v20054_v36 = vpop.f32.mrf.mxu1 }
0x17a9   :  { %v16593_v40 = vpack.i.bf16 %v20054_v36, %v20052_v35 }
0x17aa   :  { %v16267_v38 = vpop.f32.mrf.mxu0  ;;  %v16272_v16 = vpop.f32.mrf.mxu1 }
0x17ac   :  { %v8602_v49 = vpop.f32.mrf.mxu1  ;;  %v20058_v41 = vpop.f32.mrf.mxu0 }
0x17ae   :  { %v16273_v25 = vpop.f32.mrf.mxu1  ;;  %v16278_v37 = vpop.f32.mrf.mxu0 }
0x17b0   :  { %v8650_v50 = vpop.f32.mrf.mxu0  ;;  %v20060_v52 = vpop.f32.mrf.mxu1 }
0x17b2   :  { %v16279_v45 = vpop.f32.mrf.mxu0  ;;  %v16284_v44 = vpop.f32.mrf.mxu1 }
0x17b4   :  { %v8698_v33 = vpop.f32.mrf.mxu1 }
0x17b6   :  { %v16285_v8 = vpop.f32.mrf.mxu1 }
0x17e1   :  { %v20064_v9 = vpop.f32.mrf.mxu0 }
0x17e3   :  { %v16290_v27 = vpop.f32.mrf.mxu0 }
0x17e5   :  { %v8746_v20 = vpop.f32.mrf.mxu0  ;;  %v20066_v3 = vpop.f32.mrf.mxu1 }
0x17e7   :  { %v16291_v6 = vpop.f32.mrf.mxu0  ;;  %v16296_v19 = vpop.f32.mrf.mxu1 }
0x17e9   :  { %v8794_v60 = vpop.f32.mrf.mxu1  ;;  %v8841_v53 = vpop.f32.mrf.mxu0 }
0x17ea   :  { %v9197_v34 = vsel %vm289_vm2, %v8841_v53, -inf }
0x17eb   :  { %v16297_v54 = vpop.f32.mrf.mxu1  ;;  %9198 = vmax.xlane.f32.xlu0 %v9197_v34  ;;  %v16302_v10 = vpop.f32.mrf.mxu0 }
0x17ed   :  { %v8844_v43 = vpop.f32.mrf.mxu0  ;;  %v8891_v0 = vpop.f32.mrf.mxu1 }
0x17ee   :  { %v9200_v12 = vsel %vm289_vm2, %v8891_v0, -inf }
0x17ef   :  { %v16303_v61 = vpop.f32.mrf.mxu0  ;;  %9201 = vmax.xlane.f32.xlu1 %v9200_v12  ;;  %v16308_v5 = vpop.f32.mrf.mxu1 }
0x17f1   :  { %v8894_v13 = vpop.f32.mrf.mxu1  ;;  %v8941_v48 = vpop.f32.mrf.mxu0 }
0x17f2   :  { %v9203_v23 = vsel %vm289_vm2, %v8941_v48, -inf }
0x17f3   :  { %9204 = vmax.xlane.f32.xlu0 %v9203_v23  ;;  %v16309_v38 = vpop.f32.mrf.mxu1  ;;  %v16314_v16 = vpop.f32.mrf.mxu0 }
0x17f5   :  { %v8944_v49 = vpop.f32.mrf.mxu0  ;;  %v8991_v25 = vpop.f32.mrf.mxu1 }
0x17f6   :  { %v9206_v37 = vsel %vm289_vm2, %v8991_v25, -inf }
0x17f7   :  { %v16315_v50 = vpop.f32.mrf.mxu0  ;;  %9207 = vmax.xlane.f32.xlu0 %v9206_v37  ;;  %v16320_v45 = vpop.f32.mrf.mxu1 }
0x17f8   :  { %v20085_v45 = vpop.permute.xlu1 %9389 }
0x17f9   :  { %v8994_v44 = vpop.f32.mrf.mxu1  ;;  %v9041_v33 = vpop.f32.mrf.mxu0 }
0x17fa   :  { %v9209_v8 = vsel %vm289_vm2, %v9041_v33, -inf }
0x17fb   :  { %v16326_v27 = vpop.f32.mrf.mxu0  ;;  %9210 = vmax.xlane.f32.xlu1 %v9209_v8  ;;  %v16321_v20 = vpop.f32.mrf.mxu1 }
0x17fc   :  { %v20087_v44 = vpop.permute.xlu1 %9437 }
0x17fd   :  { %v9044_v6 = vpop.f32.mrf.mxu0  ;;  %v9091_v19 = vpop.f32.mrf.mxu1 }
0x17fe   :  { %v9212_v60 = vsel %vm289_vm2, %v9091_v19, -inf }
0x17ff   :  { %v16327_v34 = vpop.f32.mrf.mxu0  ;;  %9213 = vmax.xlane.f32.xlu0 %v9212_v60  ;;  %v16332_v54 = vpop.f32.mrf.mxu1 }
0x1801   :  { %v9094_v10 = vpop.f32.mrf.mxu1  ;;  %v20076_v43 = vpop.f32.mrf.mxu0 }
0x1802   :  { %v9215_v12 = vsel %vm289_vm2, %v20076_v43, -inf }
0x1803   :  { %v16338_v61 = vpop.f32.mrf.mxu0  ;;  %9216 = vmax.xlane.f32.xlu1 %v9215_v12  ;;  %v16333_v5 = vpop.f32.mrf.mxu1 }
0x1805   :  { %v9144_v13 = vpop.f32.mrf.mxu0  ;;  %v9191_v23 = vpop.f32.mrf.mxu1 }
0x1806   :  { %v9218_v38 = vsel %vm289_vm2, %v9191_v23, -inf }
0x1807   :  { %v16339_v16 = vpop.f32.mrf.mxu0  ;;  %9219 = vmax.xlane.f32.xlu0 %v9218_v38  ;;  %v16344_v49 = vpop.f32.mrf.mxu1 }
0x1809   :  { %v9194_v37 = vpop.f32.mrf.mxu1 }
0x180b   :  { %v16345_v50 = vpop.f32.mrf.mxu1 }
0x1814   :  { %9533 = vrot.lane.b32.xlu1 %v19588_v7, %s21842_s11 }
0x181d   :  { %9485 = vrot.lane.b32.xlu0 %v19582_v22, %s21842_s11 }
0x1874   :  { %v9199_v8 = vpop.xlane.xlu0 %9198 }
0x1875   :  { %v9221_v27 = vsub.f32 %v8841_v53, %v9199_v8 }
0x1877   :  { %v9229_v20 = vmul.f32 1.442695, %v9221_v27 }
0x1878   :  { %v9202_v6 = vpop.xlane.xlu1 %9201 }
0x1879   :  { %17138 = vpow2.f32 %v9229_v20  ;;  %v9222_v60 = vsub.f32 %v8891_v0, %v9202_v6 }
0x187b   :  { %v9231_v34 = vmul.f32 1.442695, %v9222_v60 }
0x187c   :  { %v9205_v54 = vpop.xlane.xlu0 %9204 }
0x187d   :  { %17140 = vpow2.f32 %v9231_v34  ;;  %v9223_v10 = vsub.f32 %v8941_v48, %v9205_v54 }
0x187f   :  { %v9233_v12 = vmul.f32 1.442695, %v9223_v10 }
0x1880   :  { %v9208_v61 = vpop.xlane.xlu0 %9207 }
0x1881   :  { %17142 = vpow2.f32 %v9233_v12  ;;  %v9224_v5 = vsub.f32 %v8991_v25, %v9208_v61 }
0x1883   :  { %v9235_v13 = vmul.f32 1.442695, %v9224_v5 }
0x1884   :  { %v9211_v38 = vpop.xlane.xlu1 %9210 }
0x1885   :  { %17144 = vpow2.f32 %v9235_v13  ;;  %v9225_v16 = vsub.f32 %v9041_v33, %v9211_v38 }
0x1886   :  { %v20089_v49 = vpop.eup %17138 }
0x1887   :  { %v9237_v37 = vmul.f32 1.442695, %v9225_v16  ;;  %v9245_v53 = vsel %vm289_vm2, %v20089_v49, 0.0 }
0x1888   :  { %9246 = vadd.xlane.f32.xlu1 %v9245_v53  ;;  %v9214_v0 = vpop.xlane.xlu0 %9213 }
0x1889   :  { %17146 = vpow2.f32 %v9237_v37  ;;  %v9226_v50 = vsub.f32 %v9091_v19, %v9214_v0 }
0x188a   :  { %v20093_v8 = vpop.eup %17140 }
0x188b   :  { %v9239_v48 = vmul.f32 1.442695, %v9226_v50  ;;  %v9248_v25 = vsel %vm289_vm2, %v20093_v8, 0.0 }
0x188c   :  { %9249 = vadd.xlane.f32.xlu0 %v9248_v25  ;;  %v9217_v10 = vpop.xlane.xlu1 %9216 }
0x188d   :  { %17148 = vpow2.f32 %v9239_v48  ;;  %v9227_v12 = vsub.f32 %v20076_v43, %v9217_v10 }
0x188e   :  { %v20097_v27 = vpop.eup %17142 }
0x188f   :  { %v9251_v33 = vsel %vm289_vm2, %v20097_v27, 0.0  ;;  %v9241_v5 = vmul.f32 1.442695, %v9227_v12  ;;  %v9395_v12 = vsel %vm773_vm3, %v20085_v45, 0 }
0x1890   :  { %9252 = vadd.xlane.f32.xlu1 %v9251_v33  ;;  %v9220_v61 = vpop.xlane.xlu0 %9219  ;;  %v9534_v43 = vpop.permute.xlu1 %9533 }
0x1891   :  { %v9228_v13 = vsub.f32 %v9191_v23, %v9220_v61  ;;  %17150 = vpow2.f32 %v9241_v5 }
0x1892   :  { %v20101_v20 = vpop.eup %17144 }
0x1893   :  { %v9254_v6 = vsel %vm289_vm2, %v20101_v20, 0.0  ;;  %v9243_v38 = vmul.f32 1.442695, %v9228_v13 }
0x1894   :  { %9255 = vadd.xlane.f32.xlu0 %v9254_v6  ;;  %v9486_v23 = vpop.permute.xlu0 %9485 }
0x1895   :  { %17152 = vpow2.f32 %v9243_v38  ;;  %v9443_v38 = vsel %vm773_vm3, %v20087_v44, 0 }
0x1896   :  { %v20105_v19 = vpop.eup %17146 }
0x1897   :  { %v9257_v60 = vsel %vm289_vm2, %v20105_v19, 0.0 }
0x1898   :  { %9258 = vadd.xlane.f32.xlu1 %v9257_v60 }
0x189a   :  { %v20109_v34 = vpop.eup %17148 }
0x189b   :  { %v9260_v54 = vsel %vm289_vm2, %v20109_v34, 0.0 }
0x189c   :  { %9261 = vadd.xlane.f32.xlu0 %v9260_v54 }
0x189e   :  { %v20118_v16 = vpop.eup %17150 }
0x189f   :  { %v9263_v37 = vsel %vm289_vm2, %v20118_v16, 0.0 }
0x18a2   :  { %v20122_v53 = vpop.eup %17152 }
0x18a3   :  { %v9266_v0 = vsel %vm289_vm2, %v20122_v53, 0.0 }
0x18a9   :  { %9629 = vrot.lane.b32.xlu1 %v19594_v63, %s21842_s11 }
0x18b2   :  { %9581 = vrot.lane.b32.xlu0 %v19586_v15, %s21842_s11 }
0x18cd   :  { %9264 = vadd.xlane.f32.xlu1 %v9263_v37 }
0x18d1   :  { %9267 = vadd.xlane.f32.xlu0 %v9266_v0  ;;  %v9491_v0 = vsel %vm773_vm3, %v9486_v23, 0 }
0x18de   :  { %9729 = vrot.lane.b32.xlu1 %v19572_v18, %s21843_s20 }
0x18e2   :  { %9727 = vrot.lane.b32.xlu1 %v19572_v18, %s21844_s24 }
0x18e6   :  { %9829 = vrot.lane.b32.xlu1 %v19578_v62, %s21843_s20 }
0x18e7   :  { %9679 = vrot.lane.b32.xlu0 %v19566_v2, %s21843_s20 }
0x18ea   :  { %9827 = vrot.lane.b32.xlu1 %v19578_v62, %s21844_s24 }
0x18eb   :  { %9677 = vrot.lane.b32.xlu0 %v19566_v2, %s21844_s24 }
0x18ee   :  { %9929 = vrot.lane.b32.xlu1 %v19588_v7, %s21843_s20 }
0x18ef   :  { %9779 = vrot.lane.b32.xlu0 %v19570_v42, %s21843_s20 }
0x18f2   :  { %9927 = vrot.lane.b32.xlu1 %v19588_v7, %s21844_s24 }
0x18f3   :  { %9777 = vrot.lane.b32.xlu0 %v19570_v42, %s21844_s24 }
0x18f6   :  { %10029 = vrot.lane.b32.xlu1 %v19594_v63, %s21843_s20 }
0x18f7   :  { %9879 = vrot.lane.b32.xlu0 %v19582_v22, %s21843_s20 }
0x18fa   :  { %10027 = vrot.lane.b32.xlu1 %v19594_v63, %s21844_s24 }
0x18fb   :  { %9877 = vrot.lane.b32.xlu0 %v19582_v22, %s21844_s24 }
0x18fe   :  { %10173 = vrot.lane.b32.xlu1 %v19566_v2, %s21845_s1 }
0x18ff   :  { %9979 = vrot.lane.b32.xlu0 %v19586_v15, %s21843_s20 }
0x1903   :  { %9977 = vrot.lane.b32.xlu0 %v19586_v15, %s21844_s24 }
0x1911   :  { %v9247_v50 = vpop.xlane.xlu1 %9246 }
0x1912   :  { %17154 = vrcp.f32 %v9247_v50 }
0x1915   :  { %v9250_v48 = vpop.xlane.xlu0 %9249 }
0x1916   :  { %17156 = vrcp.f32 %v9250_v48  ;;  %v9539_v48 = vsel %vm773_vm3, %v9534_v43, 0 }
0x1919   :  { %v9253_v25 = vpop.xlane.xlu1 %9252 }
0x191a   :  { %17158 = vrcp.f32 %v9253_v25 }
0x191d   :  { %v9256_v33 = vpop.xlane.xlu0 %9255 }
0x191e   :  { %17160 = vrcp.f32 %v9256_v33 }
0x191f   :  { %v17155_v6 = vpop.eup %17154 }
0x1920   :  { %v9277_v60 = vmul.f32 %v17155_v6, %v20089_v49 }
0x1921   :  { %v9259_v2 = vpop.xlane.xlu1 %9258 }
0x1922   :  { %v9285_v54 = vpack.c.bf16 %v9277_v60, %v9277_v60  ;;  %17162 = vrcp.f32 %v9259_v2 }
0x1923   :  { %v17157_v10 = vpop.eup %17156 }
0x1924   :  { %v9278_v61 = vmul.f32 %v17157_v10, %v20093_v8  ;;  %16349 = vmatmul.mubr.msk.bf16.vlgmr.msra.gmra.mxu0 %vm289_vm2, %v9285_v54 }
0x1925   :  { %16359 = vmatpush3.bf16.msra.mxu0 %v9395_v12  ;;  %v9262_v5 = vpop.xlane.xlu0 %9261  ;;  %16360 = vmatprep.mubr.msk.bf16.mxu0 %vm17237_vm1, %v21838_v30  ;;  %v9630_v43 = vpop.permute.xlu1 %9629 }
0x1926   :  { %v9286_v13 = vpack.c.bf16 %v9278_v61, %v9278_v61  ;;  %17164 = vrcp.f32 %v9262_v5  ;;  %16370 = vmatprep.subr.bf16.mxu0 %v21838_v30  ;;  %v9635_v2 = vsel %vm773_vm3, %v9630_v43, 0 }
0x1927   :  { %v17159_v49 = vpop.eup %17158 }
0x1928   :  { %v9279_v37 = vmul.f32 %v17159_v49, %v20097_v27  ;;  %16355 = vmatmul.mubr.msk.bf16.vlgmr.msra.gmra.mxu1 %vm289_vm2, %v9286_v13 }
0x1929   :  { %16365 = vmatpush3.bf16.msra.mxu1 %v9443_v38  ;;  %16366 = vmatprep.mubr.msk.bf16.mxu1 %vm17237_vm1, %v21838_v30  ;;  %v9582_v33 = vpop.permute.xlu0 %9581 }
0x192a   :  { %v9287_v45 = vpack.c.bf16 %v9279_v37, %v9279_v37  ;;  %16376 = vmatprep.subr.bf16.mxu1 %v21838_v30  ;;  %v9587_v60 = vsel %vm773_vm3, %v9582_v33, 0 }
0x192b   :  { %v17161_v8 = vpop.eup %17160 }
0x192c   :  { %v9280_v50 = vmul.f32 %v17161_v8, %v20101_v20  ;;  %16361 = vmatmul.mubr.msk.bf16.vlgmr.msra.gmra.mxu0 %vm289_vm2, %v9287_v45 }
0x192d   :  { %16371 = vmatpush3.bf16.msra.mxu0 %v9491_v0  ;;  %16372 = vmatprep.mubr.msk.bf16.mxu0 %vm17237_vm1, %v21838_v30 }
0x192e   :  { %v9288_v44 = vpack.c.bf16 %v9280_v50, %v9280_v50  ;;  %16382 = vmatprep.subr.bf16.mxu0 %v21838_v30 }
0x192f   :  { %v17163_v27 = vpop.eup %17162 }
0x1930   :  { %v9281_v25 = vmul.f32 %v17163_v27, %v20105_v19  ;;  %16367 = vmatmul.mubr.msk.bf16.vlgmr.msra.gmra.mxu1 %vm289_vm2, %v9288_v44 }
0x1931   :  { %16377 = vmatpush3.bf16.msra.mxu1 %v9539_v48  ;;  %16378 = vmatprep.mubr.msk.bf16.mxu1 %vm17237_vm1, %v21838_v30 }
0x1932   :  { %v9289_v20 = vpack.c.bf16 %v9281_v25, %v9281_v25  ;;  %16388 = vmatprep.subr.bf16.mxu1 %v21838_v30 }
0x1933   :  { %v17165_v23 = vpop.eup %17164 }
0x1934   :  { %v9282_v6 = vmul.f32 %v17165_v23, %v20109_v34  ;;  %16373 = vmatmul.mubr.msk.bf16.vlgmr.msra.gmra.mxu0 %vm289_vm2, %v9289_v20 }
0x1935   :  { %16383 = vmatpush3.bf16.msra.mxu0 %v9587_v60  ;;  %16384 = vmatprep.mubr.msk.bf16.mxu0 %vm17237_vm1, %v21838_v30 }
0x1936   :  { %v9290_v19 = vpack.c.bf16 %v9282_v6, %v9282_v6  ;;  %16394 = vmatprep.subr.bf16.mxu0 %v21838_v30 }
0x1938   :  { %16379 = vmatmul.mubr.msk.bf16.vlgmr.msra.gmra.mxu1 %vm289_vm2, %v9290_v19 }
0x1939   :  { %16389 = vmatpush3.bf16.msra.mxu1 %v9635_v2  ;;  %16390 = vmatprep.mubr.msk.bf16.mxu1 %vm17237_vm1, %v21838_v30 }
0x193a   :  { %16400 = vmatprep.subr.bf16.mxu1 %v21838_v30 }
0x1956   :  { %v9265_v34 = vpop.xlane.xlu1 %9264 }
0x1957   :  { %17166 = vrcp.f32 %v9265_v34 }
0x195a   :  { %v9268_v54 = vpop.xlane.xlu0 %9267  ;;  %v9730_v10 = vpop.permute.xlu1 %9729 }
0x195b   :  { %17168 = vrcp.f32 %v9268_v54 }
0x195e   :  { %v9680_v12 = vpop.permute.xlu0 %9679  ;;  %v9728_v61 = vpop.permute.xlu1 %9727 }
0x195f   :  { %v9685_v44 = vsel %vm289_vm2, %v9680_v12, 0 }
0x1962   :  { %v9678_v5 = vpop.permute.xlu0 %9677  ;;  %v9830_v13 = vpop.permute.xlu1 %9829 }
0x1963   :  { %v9835_v23 = vsel %vm289_vm2, %v9830_v13, 0 }
0x1964   :  { %v17167_v49 = vpop.eup %17166 }
0x1965   :  { %v9283_v38 = vmul.f32 %v17167_v49, %v20118_v16  ;;  %v9735_v16 = vsel %vm289_vm2, %v9730_v10, 0 }
0x1966   :  { %v9780_v37 = vpop.permute.xlu0 %9779  ;;  %v9828_v0 = vpop.permute.xlu1 %9827 }
0x1967   :  { %v9291_v45 = vpack.c.bf16 %v9283_v38, %v9283_v38 }
0x1968   :  { %v17169_v8 = vpop.eup %17168 }
0x1969   :  { %v9284_v50 = vmul.f32 %v17169_v8, %v20122_v53  ;;  %16385 = vmatmul.mubr.msk.bf16.vlgmr.msra.gmra.mxu0 %vm289_vm2, %v9291_v45  ;;  %v9785_v53 = vsel %vm289_vm2, %v9780_v37, 0 }
0x196a   :  { %16395 = vmatpush3.bf16.xpose.msra.mxu0 %v9685_v44  ;;  %16396 = vmatprep.mubr.msk.bf16.mxu0 %vm17237_vm1, %v21838_v30  ;;  %v9778_v48 = vpop.permute.xlu0 %9777  ;;  %v9930_v25 = vpop.permute.xlu1 %9929 }
0x196b   :  { %v9292_v27 = vpack.c.bf16 %v9284_v50, %v9284_v50  ;;  %16406 = vmatprep.subr.bf16.mxu0 %v21838_v30  ;;  %v9935_v19 = vsel %vm289_vm2, %v9930_v25, 0 }
0x196d   :  { %16391 = vmatmul.mubr.msk.bf16.vlgmr.msra.gmra.mxu1 %vm289_vm2, %v9292_v27 }
0x196e   :  { %16401 = vmatpush3.bf16.xpose.msra.mxu1 %v9735_v16  ;;  %16402 = vmatprep.mubr.msk.bf16.mxu1 %vm17237_vm1, %v21838_v30  ;;  %v9880_v33 = vpop.permute.xlu0 %9879  ;;  %v9928_v20 = vpop.permute.xlu1 %9927 }
0x196f   :  { %16412 = vmatprep.subr.bf16.mxu1 %v21838_v30  ;;  %v9885_v60 = vsel %vm289_vm2, %v9880_v33, 0 }
0x1971   :  { %16397 = vmatmul.mubr.msk.bf16.vlgmr.msra.gmra.mxu0 %vm289_vm2, %v9678_v5 }
0x1972   :  { %16407 = vmatpush3.bf16.xpose.msra.mxu0 %v9785_v53  ;;  %16408 = vmatprep.mubr.msk.bf16.mxu0 %vm17237_vm1, %v21838_v30  ;;  %v9878_v6 = vpop.permute.xlu0 %9877  ;;  %v10030_v43 = vpop.permute.xlu1 %10029 }
0x1973   :  { %16418 = vmatprep.subr.bf16.mxu0 %v21838_v30  ;;  %v10035_v10 = vsel %vm289_vm2, %v10030_v43, 0 }
0x1975   :  { %16403 = vmatmul.mubr.msk.bf16.vlgmr.msra.gmra.mxu1 %vm289_vm2, %v9728_v61 }
0x1976   :  { %16413 = vmatpush3.bf16.xpose.msra.mxu1 %v9835_v23  ;;  %16414 = vmatprep.mubr.msk.bf16.mxu1 %vm17237_vm1, %v21838_v30  ;;  %v9980_v2 = vpop.permute.xlu0 %9979  ;;  %v10028_v34 = vpop.permute.xlu1 %10027 }
0x1977   :  { %16424 = vmatprep.subr.bf16.mxu1 %v21838_v30  ;;  %v9985_v54 = vsel %vm289_vm2, %v9980_v2, 0 }
0x1979   :  { %16409 = vmatmul.mubr.msk.bf16.vlgmr.msra.gmra.mxu0 %vm289_vm2, %v9778_v48 }
0x197a   :  { %16419 = vmatpush3.bf16.xpose.msra.mxu0 %v9885_v60  ;;  %16420 = vmatprep.mubr.msk.bf16.mxu0 %vm17237_vm1, %v21838_v30  ;;  %v10174_v12 = vpop.permute.xlu1 %10173  ;;  %v9978_v61 = vpop.permute.xlu0 %9977 }
0x197b   :  { %16430 = vmatprep.subr.bf16.mxu0 %v21838_v30  ;;  %v10179_v5 = vsel %vm773_vm3, %v10174_v12, 0 }
0x197d   :  { %16415 = vmatmul.mubr.msk.bf16.vlgmr.msra.gmra.mxu1 %vm289_vm2, %v9828_v0 }
0x197e   :  { %16425 = vmatpush3.bf16.xpose.msra.mxu1 %v9935_v19  ;;  %16426 = vmatprep.mubr.msk.bf16.mxu1 %vm17237_vm1, %v21838_v30 }
0x197f   :  { %16436 = vmatprep.subr.bf16.mxu1 %v21838_v30 }
0x1981   :  { %16421 = vmatmul.mubr.msk.bf16.vlgmr.msra.gmra.mxu0 %vm289_vm2, %v9878_v6 }
0x1982   :  { %16431 = vmatpush3.bf16.xpose.msra.mxu0 %v9985_v54  ;;  %16432 = vmatprep.mubr.msk.bf16.mxu0 %vm17237_vm1, %v21838_v30 }
0x1983   :  { %16442 = vmatprep.subr.bf16.mxu0 %v21838_v30 }
0x1985   :  { %16427 = vmatmul.mubr.msk.bf16.vlgmr.msra.gmra.mxu1 %vm289_vm2, %v9928_v20 }
0x1986   :  { %16437 = vmatpush3.bf16.xpose.msra.mxu1 %v10035_v10  ;;  %16438 = vmatprep.mubr.msk.bf16.mxu1 %vm17237_vm1, %v21838_v30 }
0x1987   :  { %16448 = vmatprep.subr.bf16.mxu1 %v21838_v30 }
0x1989   :  { %16433 = vmatmul.mubr.msk.bf16.vlgmr.msra.gmra.mxu0 %vm289_vm2, %v9978_v61 }
0x198a   :  { %16443 = vmatpush3.bf16.msra.mxu0 %v10179_v5  ;;  %16444 = vmatprep.mubr.msk.bf16.mxu0 %vm17237_vm1, %v21838_v30 }
0x198b   :  { %16454 = vmatprep.subr.bf16.mxu0 %v21838_v30 }
0x198d   :  { %16439 = vmatmul.mubr.msk.bf16.vlgmr.msra.gmra.mxu1 %vm289_vm2, %v10028_v34 }
0x198e   :  { %16450 = vmatprep.mubr.msk.bf16.mxu1 %vm17237_vm1, %v21838_v30 }
0x19e4   :  { %v20248_v13 = vpop.f32.mrf.mxu0 }
0x19e6   :  { %v16350_v49 = vpop.f32.mrf.mxu0 }
0x19e8   :  { %v9338_v38 = vpop.f32.mrf.mxu0  ;;  %v20250_v37 = vpop.f32.mrf.mxu1 }
0x19ea   :  { %v16351_v8 = vpop.f32.mrf.mxu0  ;;  %v16356_v0 = vpop.f32.mrf.mxu1 }
0x19ec   :  { %v9386_v50 = vpop.f32.mrf.mxu1  ;;  %v20254_v44 = vpop.f32.mrf.mxu0 }
0x19ee   :  { %v16357_v27 = vpop.f32.mrf.mxu1  ;;  %v16362_v48 = vpop.f32.mrf.mxu0 }
0x19f0   :  { %v9434_v16 = vpop.f32.mrf.mxu0  ;;  %v20256_v25 = vpop.f32.mrf.mxu1 }
0x19f1   :  { %v16603_v53 = vpack.i.bf16 %v20256_v25, %v20254_v44 }
0x19f2   :  { %v16363_v33 = vpop.f32.mrf.mxu0  ;;  %v16368_v20 = vpop.f32.mrf.mxu1 }
0x19f4   :  { %v9482_v23 = vpop.f32.mrf.mxu1  ;;  %v20260_v6 = vpop.f32.mrf.mxu0 }
0x19f6   :  { %v16369_v60 = vpop.f32.mrf.mxu1  ;;  %v16374_v43 = vpop.f32.mrf.mxu0 }
0x19f8   :  { %v9530_v19 = vpop.f32.mrf.mxu0  ;;  %v20262_v2 = vpop.f32.mrf.mxu1 }
0x19fa   :  { %v16375_v54 = vpop.f32.mrf.mxu0  ;;  %v16380_v10 = vpop.f32.mrf.mxu1 }
0x19fc   :  { %v9578_v12 = vpop.f32.mrf.mxu1 }
0x19fe   :  { %v16381_v61 = vpop.f32.mrf.mxu1 }
0x1a29   :  { %v20266_v5 = vpop.f32.mrf.mxu0 }
0x1a2b   :  { %v16386_v49 = vpop.f32.mrf.mxu0 }
0x1a2d   :  { %v9626_v38 = vpop.f32.mrf.mxu0  ;;  %v20268_v8 = vpop.f32.mrf.mxu1 }
0x1a2f   :  { %v16387_v50 = vpop.f32.mrf.mxu0  ;;  %v16392_v27 = vpop.f32.mrf.mxu1 }
0x1a31   :  { %v9674_v48 = vpop.f32.mrf.mxu1  ;;  %v9721_v16 = vpop.f32.mrf.mxu0 }
0x1a32   :  { %v10077_v33 = vsel %vm289_vm2, %v9721_v16, -inf }
0x1a33   :  { %v16393_v20 = vpop.f32.mrf.mxu1  ;;  %10078 = vmax.xlane.f32.xlu0 %v10077_v33  ;;  %v16398_v23 = vpop.f32.mrf.mxu0 }
0x1a35   :  { %v9724_v60 = vpop.f32.mrf.mxu0  ;;  %v9771_v43 = vpop.f32.mrf.mxu1 }
0x1a36   :  { %v10080_v19 = vsel %vm289_vm2, %v9771_v43, -inf }
0x1a37   :  { %v16399_v54 = vpop.f32.mrf.mxu0  ;;  %10081 = vmax.xlane.f32.xlu1 %v10080_v19  ;;  %v16404_v10 = vpop.f32.mrf.mxu1 }
0x1a39   :  { %v9774_v12 = vpop.f32.mrf.mxu1  ;;  %v9821_v61 = vpop.f32.mrf.mxu0 }
0x1a3a   :  { %v10083_v49 = vsel %vm289_vm2, %v9821_v61, -inf }
0x1a3b   :  { %10084 = vmax.xlane.f32.xlu0 %v10083_v49  ;;  %v16405_v38 = vpop.f32.mrf.mxu1  ;;  %v16410_v50 = vpop.f32.mrf.mxu0 }
0x1a3d   :  { %v9824_v27 = vpop.f32.mrf.mxu0  ;;  %v9871_v48 = vpop.f32.mrf.mxu1 }
0x1a3e   :  { %v10086_v20 = vsel %vm289_vm2, %v9871_v48, -inf }
0x1a3f   :  { %v16411_v33 = vpop.f32.mrf.mxu0  ;;  %10087 = vmax.xlane.f32.xlu0 %v10086_v20  ;;  %v16416_v23 = vpop.f32.mrf.mxu1 }
0x1a41   :  { %v9874_v60 = vpop.f32.mrf.mxu1  ;;  %v20276_v0 = vpop.f32.mrf.mxu0 }
0x1a42   :  { %v10089_v19 = vsel %vm289_vm2, %v20276_v0, -inf }
0x1a43   :  { %v16422_v54 = vpop.f32.mrf.mxu0  ;;  %10090 = vmax.xlane.f32.xlu1 %v10089_v19  ;;  %v16417_v10 = vpop.f32.mrf.mxu1 }
0x1a45   :  { %v9924_v12 = vpop.f32.mrf.mxu0  ;;  %v20280_v49 = vpop.f32.mrf.mxu1 }
0x1a46   :  { %v10092_v38 = vsel %vm289_vm2, %v20280_v49, -inf }
0x1a47   :  { %v16423_v50 = vpop.f32.mrf.mxu0  ;;  %10093 = vmax.xlane.f32.xlu0 %v10092_v38  ;;  %v16428_v27 = vpop.f32.mrf.mxu1 }
0x1a49   :  { %v9974_v20 = vpop.f32.mrf.mxu1  ;;  %v10021_v33 = vpop.f32.mrf.mxu0 }
0x1a4a   :  { %v10095_v23 = vsel %vm289_vm2, %v10021_v33, -inf }
0x1a4b   :  { %v16434_v60 = vpop.f32.mrf.mxu0  ;;  %10096 = vmax.xlane.f32.xlu1 %v10095_v23  ;;  %v16429_v21 = vpop.f32.mrf.mxu1 }
0x1a4d   :  { %v10024_v34 = vpop.f32.mrf.mxu0  ;;  %v10071_v54 = vpop.f32.mrf.mxu1 }
0x1a4e   :  { %v10098_v19 = vsel %vm289_vm2, %v10071_v54, -inf }
0x1a4f   :  { %v16435_v10 = vpop.f32.mrf.mxu0  ;;  %10099 = vmax.xlane.f32.xlu0 %v10098_v19  ;;  %v16440_v12 = vpop.f32.mrf.mxu1 }
0x1a51   :  { %v10074_v57 = vpop.f32.mrf.mxu1 }
0x1a53   :  { %v16441_v45 = vpop.f32.mrf.mxu1 }
0x1a5c   :  { %10269 = vrot.lane.b32.xlu1 %v19570_v42, %s21845_s1 }
0x1a60   :  { %10317 = vrot.lane.b32.xlu1 %v19578_v62, %s21845_s1 }
0x1a65   :  { %10221 = vrot.lane.b32.xlu0 %v19572_v18, %s21845_s1 }
0x1abc   :  { %v10079_v38 = vpop.xlane.xlu0 %10078 }
0x1abd   :  { %v10101_v21 = vsub.f32 %v9721_v16, %v10079_v38 }
0x1abf   :  { %v10109_v34 = vmul.f32 1.442695, %v10101_v21 }
0x1ac0   :  { %v10082_v50 = vpop.xlane.xlu1 %10081 }
0x1ac1   :  { %17170 = vpow2.f32 %v10109_v34  ;;  %v10102_v27 = vsub.f32 %v9771_v43, %v10082_v50 }
0x1ac3   :  { %v10111_v20 = vmul.f32 1.442695, %v10102_v27 }
0x1ac4   :  { %v10085_v23 = vpop.xlane.xlu0 %10084 }
0x1ac5   :  { %17172 = vpow2.f32 %v10111_v20  ;;  %v10103_v57 = vsub.f32 %v9821_v61, %v10085_v23 }
0x1ac7   :  { %v10113_v45 = vmul.f32 1.442695, %v10103_v57 }
0x1ac8   :  { %v10088_v60 = vpop.xlane.xlu0 %10087 }
0x1ac9   :  { %17174 = vpow2.f32 %v10113_v45  ;;  %v10104_v42 = vsub.f32 %v9871_v48, %v10088_v60 }
0x1acb   :  { %v10115_v19 = vmul.f32 1.442695, %v10104_v42 }
0x1acc   :  { %v10091_v27 = vpop.xlane.xlu1 %10090 }
0x1acd   :  { %17176 = vpow2.f32 %v10115_v19  ;;  %v10105_v20 = vsub.f32 %v20276_v0, %v10091_v27 }
0x1ace   :  { %v20292_v62 = vpop.eup %17170 }
0x1acf   :  { %v10125_v18 = vsel %vm289_vm2, %v20292_v62, 0.0  ;;  %v10117_v45 = vmul.f32 1.442695, %v10105_v20 }
0x1ad0   :  { %10126 = vadd.xlane.f32.xlu1 %v10125_v18  ;;  %v10094_v10 = vpop.xlane.xlu0 %10093 }
0x1ad1   :  { %v10106_v57 = vsub.f32 %v20280_v49, %v10094_v10  ;;  %17178 = vpow2.f32 %v10117_v45 }
0x1ad2   :  { %v20296_v16 = vpop.eup %17172 }
0x1ad3   :  { %v10128_v43 = vsel %vm289_vm2, %v20296_v16, 0.0  ;;  %v10119_v42 = vmul.f32 1.442695, %v10106_v57 }
0x1ad4   :  { %10129 = vadd.xlane.f32.xlu0 %v10128_v43  ;;  %v10097_v23 = vpop.xlane.xlu1 %10096 }
0x1ad5   :  { %v10107_v60 = vsub.f32 %v10021_v33, %v10097_v23  ;;  %17180 = vpow2.f32 %v10119_v42 }
0x1ad6   :  { %v20300_v61 = vpop.eup %17174 }
0x1ad7   :  { %v10131_v48 = vsel %vm289_vm2, %v20300_v61, 0.0  ;;  %v10121_v19 = vmul.f32 1.442695, %v10107_v60 }
0x1ad8   :  { %10132 = vadd.xlane.f32.xlu1 %v10131_v48  ;;  %v10100_v12 = vpop.xlane.xlu0 %10099  ;;  %v10270_v35 = vpop.permute.xlu1 %10269 }
0x1ad9   :  { %v10108_v18 = vsub.f32 %v10071_v54, %v10100_v12  ;;  %17182 = vpow2.f32 %v10121_v19 }
0x1ada   :  { %v20304_v38 = vpop.eup %17176 }
0x1adb   :  { %v10134_v21 = vsel %vm289_vm2, %v20304_v38, 0.0  ;;  %v10123_v43 = vmul.f32 1.442695, %v10108_v18 }
0x1adc   :  { %v10222_v34 = vpop.permute.xlu0 %10221  ;;  %10135 = vadd.xlane.f32.xlu0 %v10134_v21  ;;  %v10318_v36 = vpop.permute.xlu1 %10317 }
0x1add   :  { %v10227_v50 = vsel %vm773_vm3, %v10222_v34, 0  ;;  %17184 = vpow2.f32 %v10123_v43  ;;  %v10323_v34 = vsel %vm773_vm3, %v10318_v36, 0 }
0x1ade   :  { %16449 = vmatpush3.bf16.msra.mxu1 %v10227_v50 }
0x1adf   :  { %16460 = vmatprep.subr.bf16.mxu1 %v21838_v30 }
0x1ae9   :  { %10413 = vrot.lane.b32.xlu1 %v19588_v7, %s21845_s1  ;;  %v20316_v7 = vpop.eup %17178 }
0x1aea   :  { %v20318_v48 = vpop.eup %17180 }
0x1aeb   :  { %v20322_v0 = vpop.eup %17182  ;;  %v10140_v49 = vsel %vm289_vm2, %v20318_v48, 0.0 }
0x1aec   :  { %v10143_v33 = vsel %vm289_vm2, %v20322_v0, 0.0  ;;  %v20328_v54 = vpop.eup %17184 }
0x1aed   :  { %v10146_v10 = vsel %vm289_vm2, %v20328_v54, 0.0 }
0x1af2   :  { %10365 = vrot.lane.b32.xlu0 %v19582_v22, %s21845_s1  ;;  %v10137_v22 = vsel %vm289_vm2, %v20316_v7, 0.0 }
0x1b0d   :  { %10138 = vadd.xlane.f32.xlu1 %v10137_v22 }
0x1b11   :  { %10141 = vadd.xlane.f32.xlu0 %v10140_v49  ;;  %10144 = vadd.xlane.f32.xlu1 %v10143_v33 }
0x1b15   :  { %10147 = vadd.xlane.f32.xlu0 %v10146_v10 }
0x1b22   :  { %10509 = vrot.lane.b32.xlu1 %v19594_v63, %s21845_s1  ;;  %v21848_v63 = vpack.i.bf16 %v20250_v37, %v20248_v13 }
0x1b26   :  { %16594 = vrot.lane.b32.xlu1 %v16593_v40, %s21846_s2 }
0x1b2a   :  { %16604 = vrot.lane.b32.xlu1 %v16603_v53, %s21847_s27 }
0x1b2b   :  { %10461 = vrot.lane.b32.xlu0 %v19586_v15, %s21845_s1 }
0x1b2f   :  { %16589 = vrot.lane.b32.xlu0 %v16588_v28, %s21846_s2  ;;  %v10275_v28 = vsel %vm773_vm3, %v10270_v35, 0 }
0x1b33   :  { %16599 = vrot.lane.b32.xlu0 %v21848_v63, %s21847_s27 }
0x1b59   :  { %v10127_v40 = vpop.xlane.xlu1 %10126 }
0x1b5a   :  { %17186 = vrcp.f32 %v10127_v40 }
0x1b5d   :  { %v10130_v12 = vpop.xlane.xlu0 %10129 }
0x1b5e   :  { %17188 = vrcp.f32 %v10130_v12 }
0x1b61   :  { %v10133_v44 = vpop.xlane.xlu1 %10132 }
0x1b62   :  { %17190 = vrcp.f32 %v10133_v44 }
0x1b65   :  { %v10136_v25 = vpop.xlane.xlu0 %10135  ;;  %v10414_v57 = vpop.permute.xlu1 %10413 }
0x1b66   :  { %17192 = vrcp.f32 %v10136_v25  ;;  %v10419_v45 = vsel %vm773_vm3, %v10414_v57, 0 }
0x1b67   :  { %v17187_v15 = vpop.eup %17186 }
0x1b68   :  { %v10157_v53 = vmul.f32 %v17187_v15, %v20292_v62 }
0x1b69   :  { %v10366_v50 = vpop.permute.xlu0 %10365 }
0x1b6a   :  { %v10165_v29 = vpack.c.bf16 %v10157_v53, %v10157_v53  ;;  %v10371_v23 = vsel %vm773_vm3, %v10366_v50, 0  ;;  %v21849_v53 = vmov 0  }
0x1b6b   :  { %v17189_v51 = vpop.eup %17188 }
0x1b6c   :  { %v10158_v13 = vmul.f32 %v17189_v51, %v20296_v16  ;;  %16445 = vmatmul.mubr.msk.bf16.vlgmr.msra.gmra.mxu0 %vm289_vm2, %v10165_v29 }
0x1b6d   :  { %16455 = vmatpush3.bf16.msra.mxu0 %v10275_v28  ;;  %16456 = vmatprep.mubr.msk.bf16.mxu0 %vm17237_vm1, %v21838_v30  ;;  %v16785_v28 = vld [vmem:[%s21667_s6 + $0x10] sm:$0xff]  }
0x1b6e   :  { %v10166_v37 = vpack.c.bf16 %v10158_v13, %v10158_v13  ;;  %16466 = vmatprep.subr.bf16.mxu0 %v21838_v30 }
0x1b6f   :  { %v17191_v21 = vpop.eup %17190 }
0x1b70   :  { %v10159_v62 = vmul.f32 %v17191_v21, %v20300_v61  ;;  %16451 = vmatmul.mubr.msk.bf16.vlgmr.msra.gmra.mxu1 %vm289_vm2, %v10166_v37 }
0x1b71   :  { %16461 = vmatpush3.bf16.msra.mxu1 %v10323_v34  ;;  %16462 = vmatprep.mubr.msk.bf16.mxu1 %vm17237_vm1, %v21838_v30 }
0x1b72   :  { %v10167_v16 = vpack.c.bf16 %v10159_v62, %v10159_v62  ;;  %16472 = vmatprep.subr.bf16.mxu1 %v21838_v30 }
0x1b73   :  { %v17193_v27 = vpop.eup %17192 }
0x1b74   :  { %v10160_v20 = vmul.f32 %v17193_v27, %v20304_v38  ;;  %16457 = vmatmul.mubr.msk.bf16.vlgmr.msra.gmra.mxu0 %vm289_vm2, %v10167_v16 }
0x1b75   :  { %16467 = vmatpush3.bf16.msra.mxu0 %v10371_v23  ;;  %16468 = vmatprep.mubr.msk.bf16.mxu0 %vm17237_vm1, %v21838_v30 }
0x1b76   :  { %v10168_v61 = vpack.c.bf16 %v10160_v20, %v10160_v20  ;;  %16478 = vmatprep.subr.bf16.mxu0 %v21838_v30  ;;  %v21851_v20 = vpack.i.bf16 %v20060_v52, %v20058_v41  ;;  %v21854_v41 = vpack.i.bf16 %v20268_v8, %v20266_v5 }
0x1b78   :  { %16463 = vmatmul.mubr.msk.bf16.vlgmr.msra.gmra.mxu1 %vm289_vm2, %v10168_v61 }
0x1b79   :  { %16473 = vmatpush3.bf16.msra.mxu1 %v10419_v45  ;;  %16474 = vmatprep.mubr.msk.bf16.mxu1 %vm17237_vm1, %v21838_v30 }
0x1b7a   :  { %16484 = vmatprep.subr.bf16.mxu1 %v21838_v30 }
0x1b96   :  { %v10139_v38 = vpop.xlane.xlu1 %10138 }
0x1b97   :  { %17194 = vrcp.f32 %v10139_v38 }
0x1b9a   :  { %v10142_v60 = vpop.xlane.xlu0 %10141  ;;  %v10145_v42 = vpop.xlane.xlu1 %10144 }
0x1b9b   :  { %17196 = vrcp.f32 %v10142_v60  ;;  %v21852_v60 = vpack.i.bf16 %v20262_v2, %v20260_v6 }
0x1b9c   :  { %17198 = vrcp.f32 %v10145_v42 }
0x1b9e   :  { %v10148_v19 = vpop.xlane.xlu0 %10147  ;;  %v10510_v36 = vpop.permute.xlu1 %10509 }
0x1b9f   :  { %17200 = vrcp.f32 %v10148_v19 }
0x1ba2   :  { %v10462_v22 = vpop.permute.xlu0 %10461 }
0x1ba3   :  { %v10467_v35 = vsel %vm773_vm3, %v10462_v22, 0 }
0x1ba4   :  { %v17195_v18 = vpop.eup %17194 }
0x1ba5   :  { %v10161_v43 = vmul.f32 %v17195_v18, %v20316_v7  ;;  %v10515_v7 = vsel %vm773_vm3, %v10510_v36, 0  ;;  %v21853_v18 = vpack.i.bf16 %v20066_v3, %v20064_v9 }
0x1ba7   :  { %v10169_v49 = vpack.c.bf16 %v10161_v43, %v10161_v43 }
0x1ba8   :  { %v17197_v33 = vpop.eup %17196 }
0x1ba9   :  { %v17199_v10 = vpop.eup %17198  ;;  %v10162_v63 = vmul.f32 %v17197_v33, %v20318_v48  ;;  %16469 = vmatmul.mubr.msk.bf16.vlgmr.msra.gmra.mxu0 %vm289_vm2, %v10169_v49 }
0x1baa   :  { %16479 = vmatpush3.bf16.msra.mxu0 %v10467_v35  ;;  %16480 = vmatprep.mubr.msk.bf16.mxu0 %vm17237_vm1, %v21838_v30  ;;  %v10163_v12 = vmul.f32 %v17199_v10, %v20322_v0  ;;  %v16784_v0 = vld [vmem:[%s21667_s6 + $0x18] sm:$0xff]  }
0x1bab   :  { %v10170_v40 = vpack.c.bf16 %v10162_v63, %v10162_v63  ;;  %16490 = vmatprep.subr.bf16.mxu0 %v16784_v0 }
0x1bac   :  { %v17201_v44 = vpop.eup %17200  ;;  %v10171_v48 = vpack.c.bf16 %v10163_v12, %v10163_v12 }
0x1bad   :  { %16475 = vmatmul.mubr.msk.bf16.vlgmr.msra.gmra.mxu1 %vm289_vm2, %v10170_v40  ;;  %v10164_v25 = vmul.f32 %v17201_v44, %v20328_v54 }
0x1bae   :  { %16485 = vmatpush3.bf16.msra.mxu1 %v10515_v7  ;;  %16486 = vmatprep.mubr.msk.bf16.mxu1 %vm17237_vm1, %v21838_v30  ;;  %v16590_v7 = vpop.permute.xlu0 %16589 }
0x1baf   :  { %v10172_v15 = vpack.c.bf16 %v10164_v25, %v10164_v25  ;;  %v16595_v25 = vpop.permute.xlu1 %16594 }
0x1bb1   :  { %16481 = vmatmul.mubr.msk.bf16.vlgmr.msra.gmra.mxu0 %vm289_vm2, %v10171_v48 }
0x1bb2   :  { %16491 = vmatpush3.bf16.msra.mxu0 %v16784_v0  ;;  %v16600_v48 = vpop.permute.xlu0 %16599  ;;  %v16591_v0 = vunpack.i.l.bf16 %v16590_v7 }
0x1bb3   :  { %16492 = vmatprep.subr.bf16.mxu0 %v16785_v28 }
0x1bb5   :  { %16487 = vmatmul.mubr.msk.bf16.vlgmr.msra.gmra.mxu1 %vm289_vm2, %v10172_v15  ;;  %v16592_v15 = vunpack.i.h.bf16 %v16590_v7 }
0x1bb6   :  { %11253 = vmatprep.mubr.bf16.mxu1 %v21849_v53  ;;  %16493 = vmatpush3.bf16.msra.mxu0 %v16785_v28 }
0x1c2c   :  { %v10215_v29 = vpop.f32.mrf.mxu0 }
0x1c2e   :  { %v16446_v51 = vpop.f32.mrf.mxu0 }
0x1c2f   :  { %v16601_v51 = vunpack.i.l.bf16 %v16600_v48 }
0x1c30   :  { %v10218_v54 = vpop.f32.mrf.mxu0  ;;  %v10263_v13 = vpop.f32.mrf.mxu1 }
0x1c31   :  { %v16608_v37 = vpack.i.bf16 %v10263_v13, %v10215_v29  ;;  %v16602_v29 = vunpack.i.h.bf16 %v16600_v48  ;;  %v10654_v54 = vsel %vm289_vm2, %v19846_v47, %v16592_v15  ;;  %v10653_v13 = vsel %vm289_vm2, %v19844_v56, %v16591_v0 }
0x1c32   :  { %v16447_v21 = vpop.f32.mrf.mxu0  ;;  %v16452_v34 = vpop.f32.mrf.mxu1 }
0x1c33   :  { %16609 = vrot.lane.b32.xlu0 %v16608_v37, %s21850_s25  ;;  %v10661_v34 = vsel %vm3897_vm4, %v10653_v13, %v16601_v51 }
0x1c34   :  { %v10266_v62 = vpop.f32.mrf.mxu1  ;;  %v10311_v50 = vpop.f32.mrf.mxu0 }
0x1c35   :  { %v10662_v62 = vsel %vm3897_vm4, %v10654_v54, %v16602_v29 }
0x1c36   :  { %v16453_v16 = vpop.f32.mrf.mxu1  ;;  %v16458_v27 = vpop.f32.mrf.mxu0 }
0x1c37   :  { %16619 = vrot.lane.b32.xlu0 %v21851_v20, %s21846_s2 }
0x1c38   :  { %v10314_v23 = vpop.f32.mrf.mxu0  ;;  %v10359_v57 = vpop.f32.mrf.mxu1 }
0x1c39   :  { %v16613_v61 = vpack.i.bf16 %v10359_v57, %v10311_v50  ;;  %v16605_v50 = vpop.permute.xlu1 %16604  ;;  %v16597_v23 = vunpack.i.h.bf16 %v16595_v25  ;;  %v16596_v57 = vunpack.i.l.bf16 %v16595_v25 }
0x1c3a   :  { %v16459_v45 = vpop.f32.mrf.mxu0  ;;  %v16464_v38 = vpop.f32.mrf.mxu1 }
0x1c3b   :  { %16629 = vrot.lane.b32.xlu0 %v21852_v60, %s21847_s27  ;;  %16614 = vrot.lane.b32.xlu1 %v16613_v61, %s21850_s25  ;;  %v16607_v61 = vunpack.i.h.bf16 %v16605_v50  ;;  %v16606_v45 = vunpack.i.l.bf16 %v16605_v50  ;;  %v10656_v56 = vsel %vm289_vm2, %v19850_v59, %v16597_v23  ;;  %v10655_v38 = vsel %vm289_vm2, %v19848_v32, %v16596_v57 }
0x1c3c   :  { %v10362_v42 = vpop.f32.mrf.mxu1 }
0x1c3e   :  { %v16465_v19 = vpop.f32.mrf.mxu1 }
0x1c3f   :  { %16624 = vrot.lane.b32.xlu1 %v21853_v18, %s21846_s2  ;;  %v10663_v19 = vsel %vm3897_vm4, %v10655_v38, %v16606_v45  ;;  %v10664_v18 = vsel %vm3897_vm4, %v10656_v56, %v16607_v61 }
0x1c43   :  { %16634 = vrot.lane.b32.xlu1 %v21854_v41, %s21847_s27 }
0x1c69   :  { %v10407_v52 = vpop.f32.mrf.mxu0 }
0x1c6b   :  { %v16470_v43 = vpop.f32.mrf.mxu0 }
0x1c6d   :  { %v10410_v22 = vpop.f32.mrf.mxu0  ;;  %v10455_v49 = vpop.f32.mrf.mxu1 }
0x1c6e   :  { %v16638_v6 = vpack.i.bf16 %v10455_v49, %v10407_v52 }
0x1c6f   :  { %v16471_v2 = vpop.f32.mrf.mxu0  ;;  %v16476_v33 = vpop.f32.mrf.mxu1 }
0x1c70   :  { %16639 = vrot.lane.b32.xlu0 %v16638_v6, %s21850_s25 }
0x1c71   :  { %v10458_v10 = vpop.f32.mrf.mxu1  ;;  %v10503_v63 = vpop.f32.mrf.mxu0 }
0x1c73   :  { %v16477_v35 = vpop.f32.mrf.mxu1  ;;  %v16482_v36 = vpop.f32.mrf.mxu0 }
0x1c75   :  { %v10506_v9 = vpop.f32.mrf.mxu0  ;;  %v10551_v3 = vpop.f32.mrf.mxu1 }
0x1c76   :  { %v16643_v40 = vpack.i.bf16 %v10551_v3, %v10503_v63 }
0x1c77   :  { %v16483_v12 = vpop.f32.mrf.mxu0  ;;  %v16488_v44 = vpop.f32.mrf.mxu1 }
0x1c78   :  { %16644 = vrot.lane.b32.xlu1 %v16643_v40, %s21850_s25 }
0x1c79   :  { %v10554_v5 = vpop.f32.mrf.mxu1 }
0x1c7b   :  { %v16489_v8 = vpop.f32.mrf.mxu1 }
0x1ca5   :  { %v16610_v28 = vpop.permute.xlu0 %16609 }
0x1ca6   :  { %v16612_v37 = vunpack.i.h.bf16 %v16610_v28  ;;  %v16611_v21 = vunpack.i.l.bf16 %v16610_v28 }
0x1ca8   :  { %v10670_v16 = vsel %vm3906_vm5, %v10662_v62, %v16612_v37  ;;  %v10669_v27 = vsel %vm3906_vm5, %v10661_v34, %v16611_v21 }
0x1ca9   :  { %v10677_v20 = vpack.c.bf16 %v10670_v16, %v10669_v27  ;;  %v16620_v22 = vpop.permute.xlu0 %16619 }
0x1caa   :  { %v16622_v6 = vunpack.i.h.bf16 %v16620_v22  ;;  %v16621_v59 = vunpack.i.l.bf16 %v16620_v22 }
0x1cab   :  { %16494 = vmatprep.mubr.msk.bf16.mxu0 %vm185_vm0, %v10677_v20 }
0x1cac   :  { %v10658_v63 = vsel %vm289_vm2, %v19854_v39, %v16622_v6  ;;  %v10657_v35 = vsel %vm289_vm2, %v19852_v17, %v16621_v59 }
0x1cad   :  { %v16615_v47 = vpop.permute.xlu1 %16614  ;;  %v16630_v49 = vpop.permute.xlu0 %16629 }
0x1cae   :  { %v16617_v60 = vunpack.i.h.bf16 %v16615_v47  ;;  %v16616_v42 = vunpack.i.l.bf16 %v16615_v47  ;;  %v16632_v33 = vunpack.i.h.bf16 %v16630_v49  ;;  %v16631_v32 = vunpack.i.l.bf16 %v16630_v49 }
0x1cb0   :  { %v10671_v41 = vsel %vm3906_vm5, %v10663_v19, %v16616_v42  ;;  %v10672_v52 = vsel %vm3906_vm5, %v10664_v18, %v16617_v60  ;;  %v10665_v3 = vsel %vm3897_vm4, %v10657_v35, %v16631_v32  ;;  %v10666_v40 = vsel %vm3897_vm4, %v10658_v63, %v16632_v33 }
0x1cb1   :  { %v10678_v43 = vpack.c.bf16 %v10672_v52, %v10671_v41  ;;  %v16625_v2 = vpop.permute.xlu1 %16624 }
0x1cb2   :  { %v16627_v7 = vunpack.i.h.bf16 %v16625_v2  ;;  %v16626_v48 = vunpack.i.l.bf16 %v16625_v2 }
0x1cb3   :  { %16495 = vmatmul.mubr.msk.bf16.vlgmr.msra.gmra.mxu0 %vm185_vm0, %v10678_v43 }
0x1cb4   :  { %v10660_v17 = vsel %vm289_vm2, %v19858_v24, %v16627_v7  ;;  %v10659_v0 = vsel %vm289_vm2, %v19856_v1, %v16626_v48  ;;  %v14247_v1 = vld [vmem:[%s21668_s7 + $0x1] ss:$0 sm:$0xff] }
0x1cb5   :  { %v16635_v12 = vpop.permute.xlu1 %16634 }
0x1cb6   :  { %v16637_v25 = vunpack.i.h.bf16 %v16635_v12  ;;  %v16636_v15 = vunpack.i.l.bf16 %v16635_v12 }
0x1cb8   :  { %v10667_v28 = vsel %vm3897_vm4, %v10659_v0, %v16636_v15  ;;  %v10668_v54 = vsel %vm3897_vm4, %v10660_v17, %v16637_v25  ;;  %v14274_v17 = vld [vmem:[%s21669_s10 + $0x180] sm:$0xff] }
0x1cb9   :  { %v14282_v0 = vld [vmem:[%s21669_s10 + $0x1c0] sm:$0xff] }
0x1ce2   :  { %v16640_v10 = vpop.permute.xlu0 %16639 }
0x1ce3   :  { %v16642_v36 = vunpack.i.h.bf16 %v16640_v10  ;;  %v16641_v9 = vunpack.i.l.bf16 %v16640_v10 }
0x1ce5   :  { %v10674_v44 = vsel %vm3906_vm5, %v10666_v40, %v16642_v36  ;;  %v10673_v5 = vsel %vm3906_vm5, %v10665_v3, %v16641_v9 }
0x1ce6   :  { %v10679_v8 = vpack.c.bf16 %v10674_v44, %v10673_v5 }
0x1ce8   :  { %16498 = vmatprep.mubr.msk.bf16.mxu0 %vm185_vm0, %v10679_v8 }
0x1cea   :  { %v16645_v39 = vpop.permute.xlu1 %16644 }
0x1ceb   :  { %v16647_v29 = vunpack.i.h.bf16 %v16645_v39  ;;  %v16646_v51 = vunpack.i.l.bf16 %v16645_v39 }
0x1ced   :  { %v10675_v13 = vsel %vm3906_vm5, %v10667_v28, %v16646_v51  ;;  %v10676_v37 = vsel %vm3906_vm5, %v10668_v54, %v16647_v29  ;;  %v14275_v29 = vld [vmem:[%s21669_s10 + $0x188] sm:$0xff]  ;;  %v14309_v51 = vcombine.high %v14274_v17, %v14282_v0  ;;  %v14308_v54 = vcombine.low %v14274_v17, %v14282_v0 }
0x1cee   :  { %v10680_v21 = vpack.c.bf16 %v10676_v37, %v10675_v13  ;;  %v14283_v28 = vld [vmem:[%s21669_s10 + $0x1c8] sm:$0xff] }
0x1cef   :  { %v14310_v13 = vcombine.low %v14275_v29, %v14283_v28  ;;  %v14311_v37 = vcombine.high %v14275_v29, %v14283_v28  ;;  %11233 = vmatprep.subr.bf16.mxu1 %v14309_v51  ;;  %v20593_v28 = vld [vmem:[%s21670_s8 + $0x1] ss:$0 sm:$0xff] }
0x1cf0   :  { %16499 = vmatmul.mubr.msk.bf16.gmra.mxu0 %vm185_vm0, %v10680_v21  ;;  %11234 = vmatpush1.bf16.msra.mxu1 %v14308_v54  ;;  %v14258_v21 = vld [vmem:[%s21669_s10 + $0x100] sm:$0xff] }
0x1cf1   :  { %11326 = vmatprep.mubr.bf16.mxu0 %v21849_v53  ;;  %11306 = vmatprep.subr.bf16.mxu0 %v14311_v37 }
0x1cf2   :  { %11307 = vmatpush1.bf16.msra.mxu0 %v14310_v13 }
0x1d73   :  { %v16496_v34 = vpop.f32.mrf.mxu0 }
0x1d74   :  { %v10761_v62 = vadd.f32 %v16496_v34, %v14247_v1  ;;  %v14266_v34 = vld [vmem:[%s21669_s10 + $0x140] sm:$0xff] }
0x1d75   :  { %v10752_v24 = vpop.f32.mrf.mxu0 }
0x1d76   :  { %v10753_v50 = vadd.f32 %v14247_v1, %v10752_v24  ;;  %v10785_v23 = vadd.f32 %v10761_v62, %v19536_v31  ;;  %v14293_v24 = vcombine.high %v14258_v21, %v14266_v34  ;;  %v14267_v62 = vld [vmem:[%s21669_s10 + $0x148] sm:$0xff] }
0x1d77   :  { %v16497_v16 = vpop.f32.mrf.mxu0 }
0x1d78   :  { %v10783_v27 = vadd.f32 %v10753_v50, %v19528_v4  ;;  %v10764_v57 = vadd.f32 %v16497_v16, %v14247_v1  ;;  %v10801_v60 = vsel %vm185_vm0, %v10785_v23, 0.0  ;;  %v14292_v50 = vcombine.low %v14258_v21, %v14266_v34  ;;  %11235 = vmatprep.subr.bf16.mxu1 %v14293_v24  ;;  %v20600_v34 = vld [vmem:[%s21671_s9 + $0x1] ss:$0 sm:$0xff] }
0x1d79   :  { %v10755_v20 = vpop.f32.mrf.mxu0 }
0x1d7a   :  { %v10756_v61 = vadd.f32 %v14247_v1, %v10755_v20  ;;  %v10795_v45 = vsel %vm185_vm0, %v10783_v27, 0.0  ;;  %v10786_v56 = vadd.f32 %v10764_v57, %v19538_v46  ;;  %11236 = vmatpush1.bf16.msra.mxu1 %v14292_v50 }
0x1d7b   :  { %10796 = vadd.xlane.f32.xlu0 %v10795_v45 }
0x1d7c   :  { %v10784_v47 = vadd.f32 %v10756_v61, %v19530_v14  ;;  %v10804_v4 = vsel %vm185_vm0, %v10786_v56, 0.0 }
0x1d7e   :  { %v10798_v38 = vsel %vm185_vm0, %v10784_v47, 0.0 }
0x1d7f   :  { %10799 = vadd.xlane.f32.xlu1 %v10798_v38  ;;  %10802 = vadd.xlane.f32.xlu0 %v10801_v60 }
0x1d83   :  { %10805 = vadd.xlane.f32.xlu0 %v10804_v4 }
0x1db0   :  { %v16500_v42 = vpop.f32.mrf.mxu0 }
0x1db1   :  { %v10777_v19 = vadd.f32 %v16500_v42, %v14247_v1 }
0x1db2   :  { %v10768_v31 = vpop.f32.mrf.mxu0 }
0x1db3   :  { %v10769_v18 = vadd.f32 %v14247_v1, %v10768_v31  ;;  %v20469_v46 = vadd.f32 %v10777_v19, %v19554_v26 }
0x1db4   :  { %v16501_v41 = vpop.f32.mrf.mxu0 }
0x1db5   :  { %v20466_v52 = vadd.f32 %v10769_v18, %v19546_v55  ;;  %v10780_v43 = vadd.f32 %v16501_v41, %v14247_v1  ;;  %v10813_v55 = vsel %vm185_vm0, %v20469_v46, 0.0 }
0x1db6   :  { %v10771_v14 = vpop.f32.mrf.mxu0 }
0x1db7   :  { %v10772_v22 = vadd.f32 %v14247_v1, %v10771_v14  ;;  %v10807_v49 = vsel %vm185_vm0, %v20466_v52, 0.0  ;;  %v20477_v59 = vadd.f32 %v10780_v43, %v19556_v11  ;;  %v14259_v1 = vld [vmem:[%s21669_s10 + $0x108] sm:$0xff] }
0x1db8   :  { %10808 = vadd.xlane.f32.xlu1 %v10807_v49  ;;  %v14294_v16 = vcombine.low %v14259_v1, %v14267_v62  ;;  %v14276_v49 = vld [vmem:[%s21669_s10 + $0x190] sm:$0xff] }
0x1db9   :  { %v20474_v6 = vadd.f32 %v10772_v22, %v19548_v58  ;;  %v10816_v26 = vsel %vm185_vm0, %v20477_v59, 0.0 }
0x1dbb   :  { %v10810_v2 = vsel %vm185_vm0, %v20474_v6, 0.0 }
0x1dbc   :  { %10814 = vadd.xlane.f32.xlu1 %v10813_v55  ;;  %10811 = vadd.xlane.f32.xlu0 %v10810_v2  ;;  %v14285_v2 = vld [vmem:[%s21669_s10 + $0x1d8] sm:$0xff] }
0x1dc0   :  { %10817 = vadd.xlane.f32.xlu0 %v10816_v26 }
0x1e04   :  { %v10797_v33 = vpop.xlane.xlu0 %10796 }
0x1e05   :  { %v10819_v32 = vmul.f32 0.03125, %v10797_v33 }
0x1e07   :  { %v20485_v10 = vsub.f32 %v10783_v27, %v10819_v32  ;;  %v14295_v27 = vcombine.high %v14259_v1, %v14267_v62  ;;  %v14260_v62 = vld [vmem:[%s21669_s10 + $0x110] sm:$0xff] }
0x1e08   :  { %v10800_v58 = vpop.xlane.xlu1 %10799  ;;  %v10803_v63 = vpop.xlane.xlu0 %10802 }
0x1e09   :  { %v10820_v11 = vmul.f32 0.03125, %v10800_v58  ;;  %v10821_v35 = vmul.f32 0.03125, %v10803_v63  ;;  %v10835_v36 = vmul.f32 %v20485_v10, %v20485_v10  ;;  %11308 = vmatprep.subr.bf16.mxu0 %v14295_v27  ;;  %v20568_v58 = vld [vmem:[%s21669_s10 + $0x1a0] sm:$0xff]  ;;  %v14268_v27 = vld [vmem:[%s21669_s10 + $0x150] sm:$0xff] }
0x1e0a   :  { %11309 = vmatpush1.bf16.msra.mxu0 %v14294_v16  ;;  %v20573_v63 = vld [vmem:[%s21669_s10 + $0x1e0] sm:$0xff] }
0x1e0b   :  { %v20489_v9 = vsub.f32 %v10784_v47, %v10820_v11  ;;  %v20491_v3 = vsub.f32 %v10785_v23, %v10821_v35  ;;  %v10843_v40 = vsel %vm185_vm0, %v10835_v36, 0.0  ;;  %v20578_v11 = vld [vmem:[%s21669_s10 + $0x1a8] sm:$0xff] }
0x1e0c   :  { %10844 = vadd.xlane.f32.xlu1 %v10843_v40  ;;  %v10806_v12 = vpop.xlane.xlu0 %10805  ;;  %v20583_v36 = vld [vmem:[%s21669_s10 + $0x1e8] sm:$0xff] }
0x1e0d   :  { %v10822_v44 = vmul.f32 0.03125, %v10806_v12  ;;  %v10836_v5 = vmul.f32 %v20489_v9, %v20489_v9  ;;  %v10837_v8 = vmul.f32 %v20491_v3, %v20491_v3 }
0x1e0f   :  { %v20498_v7 = vsub.f32 %v10786_v56, %v10822_v44  ;;  %v10846_v48 = vsel %vm185_vm0, %v10836_v5, 0.0  ;;  %v10849_v25 = vsel %vm185_vm0, %v10837_v8, 0.0  ;;  %v14316_v44 = vcombine.low %v20568_v58, %v20573_v63 }
0x1e10   :  { %10847 = vadd.xlane.f32.xlu0 %v10846_v48  ;;  %10850 = vadd.xlane.f32.xlu1 %v10849_v25  ;;  %v14318_v5 = vcombine.low %v20578_v11, %v20583_v36 }
0x1e11   :  { %v10838_v15 = vmul.f32 %v20498_v7, %v20498_v7 }
0x1e13   :  { %v10852_v39 = vsel %vm185_vm0, %v10838_v15, 0.0 }
0x1e14   :  { %10853 = vadd.xlane.f32.xlu0 %v10852_v39 }
0x1e41   :  { %v10809_v20 = vpop.xlane.xlu1 %10808 }
0x1e42   :  { %v10823_v23 = vmul.f32 0.03125, %v10809_v20  ;;  %v14269_v20 = vld [vmem:[%s21669_s10 + $0x158] sm:$0xff] }
0x1e44   :  { %v20530_v57 = vsub.f32 %v20466_v52, %v10823_v23 }
0x1e45   :  { %v10815_v61 = vpop.xlane.xlu1 %10814  ;;  %v10812_v45 = vpop.xlane.xlu0 %10811 }
0x1e46   :  { %v10825_v47 = vmul.f32 0.03125, %v10815_v61  ;;  %v10824_v56 = vmul.f32 0.03125, %v10812_v45  ;;  %v10839_v38 = vmul.f32 %v20530_v57, %v20530_v57 }
0x1e48   :  { %v20535_v60 = vsub.f32 %v20469_v46, %v10825_v47  ;;  %v20538_v4 = vsub.f32 %v20474_v6, %v10824_v56  ;;  %v10855_v42 = vsel %vm185_vm0, %v10839_v38, 0.0  ;;  %v14284_v6 = vld [vmem:[%s21669_s10 + $0x1d0] sm:$0xff]  ;;  %v14297_v47 = vcombine.high %v14260_v62, %v14268_v27 }
0x1e49   :  { %10856 = vadd.xlane.f32.xlu1 %v10855_v42  ;;  %v10818_v31 = vpop.xlane.xlu0 %10817  ;;  %v14313_v55 = vcombine.high %v14276_v49, %v14284_v6  ;;  %v14312_v61 = vcombine.low %v14276_v49, %v14284_v6 }
0x1e4a   :  { %v10826_v19 = vmul.f32 0.03125, %v10818_v31  ;;  %v10841_v18 = vmul.f32 %v20535_v60, %v20535_v60  ;;  %v10840_v41 = vmul.f32 %v20538_v4, %v20538_v4  ;;  %v14296_v31 = vcombine.low %v14260_v62, %v14268_v27  ;;  %v14288_v27 = vld [vmem:[%s21669_s10 + $0x1f0] sm:$0xff] }
0x1e4b   :  { %11379 = vmatprep.subr.bf16.mxu1 %v14313_v55 }
0x1e4c   :  { %v20546_v52 = vsub.f32 %v20477_v59, %v10826_v19  ;;  %v10861_v14 = vsel %vm185_vm0, %v10841_v18, 0.0  ;;  %v10858_v46 = vsel %vm185_vm0, %v10840_v41, 0.0  ;;  %v14277_v59 = vld [vmem:[%s21669_s10 + $0x198] sm:$0xff]  ;;  %v14317_v18 = vcombine.high %v20568_v58, %v20573_v63  ;;  %v14264_v58 = vld [vmem:[%s21669_s10 + $0x130] sm:$0xff] }
0x1e4d   :  { %10862 = vadd.xlane.f32.xlu1 %v10861_v14  ;;  %10859 = vadd.xlane.f32.xlu0 %v10858_v46  ;;  %v14315_v26 = vcombine.high %v14277_v59, %v14285_v2  ;;  %v14314_v45 = vcombine.low %v14277_v59, %v14285_v2  ;;  %v14319_v41 = vcombine.high %v20578_v11, %v20583_v36  ;;  %v14272_v63 = vld [vmem:[%s21669_s10 + $0x170] sm:$0xff]  ;;  %v14265_v11 = vld [vmem:[%s21669_s10 + $0x138] sm:$0xff] }
0x1e4e   :  { %v10842_v43 = vmul.f32 %v20546_v52, %v20546_v52  ;;  %v14273_v36 = vld [vmem:[%s21669_s10 + $0x178] sm:$0xff] }
0x1e4f   :  { %11452 = vmatprep.subr.bf16.mxu0 %v14315_v26 }
0x1e50   :  { %v10864_v22 = vsel %vm185_vm0, %v10842_v43, 0.0 }
0x1e51   :  { %10865 = vadd.xlane.f32.xlu0 %v10864_v22 }
0x1e95   :  { %v10845_v33 = vpop.xlane.xlu1 %10844 }
0x1e96   :  { %v10867_v32 = vmul.f32 0.03125, %v10845_v33 }
0x1e98   :  { %v10875_v35 = vadd.f32 1e-05, %v10867_v32 }
0x1e99   :  { %v10851_v40 = vpop.xlane.xlu1 %10850  ;;  %v10848_v12 = vpop.xlane.xlu0 %10847 }
0x1e9a   :  { %17202 = vrsqrt.f32 %v10875_v35  ;;  %v10869_v8 = vmul.f32 0.03125, %v10851_v40  ;;  %v10868_v48 = vmul.f32 0.03125, %v10848_v12 }
0x1e9c   :  { %v10876_v25 = vadd.f32 1e-05, %v10868_v48  ;;  %v10877_v15 = vadd.f32 1e-05, %v10869_v8 }
0x1e9d   :  { %v10854_v39 = vpop.xlane.xlu0 %10853 }
0x1e9e   :  { %v10870_v17 = vmul.f32 0.03125, %v10854_v39  ;;  %17204 = vrsqrt.f32 %v10876_v25 }
0x1e9f   :  { %17206 = vrsqrt.f32 %v10877_v15 }
0x1ea0   :  { %v10878_v0 = vadd.f32 1e-05, %v10870_v17 }
0x1ea2   :  { %17208 = vrsqrt.f32 %v10878_v0 }
0x1ea7   :  { %v17203_v29 = vpop.eup %17202 }
0x1ea8   :  { %v10891_v51 = vmul.f32 %v17203_v29, %v20485_v10 }
0x1eaa   :  { %v10905_v13 = vmul.f32 %v20593_v28, %v10891_v51 }
0x1eab   :  { %v17205_v54 = vpop.eup %17204 }
0x1eac   :  { %v10892_v37 = vmul.f32 %v17205_v54, %v20489_v9  ;;  %v17207_v21 = vpop.eup %17206  ;;  %v20608_v50 = vadd.f32 %v20600_v34, %v10905_v13 }
0x1ead   :  { %v10893_v9 = vmul.f32 %v17207_v21, %v20491_v3 }
0x1eae   :  { %v10906_v24 = vmul.f32 %v20593_v28, %v10892_v37 }
0x1eaf   :  { %v17209_v1 = vpop.eup %17208  ;;  %v10907_v38 = vmul.f32 %v20593_v28, %v10893_v9  ;;  %v14280_v9 = vld [vmem:[%s21669_s10 + $0x1b0] sm:$0xff] }
0x1eb0   :  { %v10894_v10 = vmul.f32 %v17209_v1, %v20498_v7  ;;  %v20612_v16 = vadd.f32 %v20600_v34, %v10906_v24  ;;  %v14261_v7 = vld [vmem:[%s21669_s10 + $0x118] sm:$0xff]  ;;  %v14263_v1 = vld [vmem:[%s21669_s10 + $0x128] sm:$0xff] }
0x1eb1   :  { %v14299_v56 = vcombine.high %v14261_v7, %v14269_v20  ;;  %v14298_v19 = vcombine.low %v14261_v7, %v14269_v20  ;;  %v20643_v14 = vadd.f32 %v20600_v34, %v10907_v38  ;;  %v14271_v24 = vld [vmem:[%s21669_s10 + $0x168] sm:$0xff]  ;;  %v14281_v7 = vld [vmem:[%s21669_s10 + $0x1b8] sm:$0xff]  ;;  %v14307_v38 = vcombine.high %v14265_v11, %v14273_v36 }
0x1eb2   :  { %v20625_v23 = vpack.c.bf16 %v20612_v16, %v20608_v50  ;;  %v10908_v3 = vmul.f32 %v20593_v28, %v10894_v10  ;;  %v14303_v62 = vcombine.high %v14263_v1, %v14271_v24  ;;  %v14289_v20 = vld [vmem:[%s21669_s10 + $0x1f8] sm:$0xff] }
0x1eb3   :  { %21856 = vst [vmem:[#allocation36_spill] sm:$0xff] %v20643_v14 }
0x1eb4   :  { %14324 = vmatmul.mubr.msk.bf16.vlgmr.msra.gmra.mxu1 %vm185_vm0, %v20625_v23  ;;  %14328 = vmatmul.mubr.msk.bf16.vlgmr.msra.gmra.mxu0 %vm185_vm0, %v20625_v23  ;;  %v20636_v42 = vadd.f32 %v20600_v34, %v10908_v3 }
0x1eb5   :  { %11263 = vmatprep.mubr.bf16.mxu1 %v21849_v53  ;;  %11336 = vmatprep.mubr.bf16.mxu0 %v21849_v53 }
0x1eb6   :  { %21855 = vst [vmem:[#allocation34_spill] sm:$0xff] %v20636_v42  ;;  %11380 = vmatpush1.bf16.msra.mxu1 %v14312_v61  ;;  %11453 = vmatpush1.bf16.msra.mxu0 %v14314_v45  ;;  %v20647_v46 = vpack.c.bf16 %v20636_v42, %v20643_v14  ;;  %v14302_v61 = vcombine.low %v14263_v1, %v14271_v24  ;;  %v16818_v1 = vld [vmem:[%s21672_s12 + $0x578] sm:$0xff]   ;;  %v20912_v24 = vld [vmem:[%s21750_s19 + $0x10] sm:$0xff] }
0x1eb7   :  { %11381 = vmatprep.subr.bf16.mxu1 %v14297_v47  ;;  %11454 = vmatprep.subr.bf16.mxu0 %v14299_v56  ;;  %v14321_v45 = vcombine.high %v14280_v9, %v14288_v27  ;;  %v14323_v47 = vcombine.high %v14281_v7, %v14289_v20  ;;  %v14305_v56 = vcombine.high %v14264_v58, %v14272_v63 }
0x1eba   :  { %11382 = vmatpush1.bf16.msra.mxu1 %v14296_v31  ;;  %11455 = vmatpush1.bf16.msra.mxu0 %v14298_v19  ;;  %v14304_v31 = vcombine.low %v14264_v58, %v14272_v63  ;;  %v14306_v19 = vcombine.low %v14265_v11, %v14273_v36 }
0x1ebb   :  { %11525 = vmatprep.subr.bf16.mxu1 %v14317_v18  ;;  %11598 = vmatprep.subr.bf16.mxu0 %v14319_v41  ;;  %v16786_v18 = vld [vmem:[%s21672_s12 + $0x478] sm:$0xff]  }
0x1ebc   :  { %14325 = vmatmul.mubr.msk.bf16.gmra.mxu1 %vm185_vm0, %v20647_v46  ;;  %14329 = vmatmul.mubr.msk.bf16.gmra.mxu0 %vm185_vm0, %v20647_v46  ;;  %v16787_v41 = vld [vmem:[%s21672_s12 + $0x4f8] sm:$0xff]  }
0x1ebd   :  { %11273 = vmatprep.mubr.bf16.mxu1 %v21849_v53  ;;  %11346 = vmatprep.mubr.bf16.mxu0 %v21849_v53 }
0x1ed2   :  { %v10857_v43 = vpop.xlane.xlu1 %10856 }
0x1ed3   :  { %v10871_v22 = vmul.f32 0.03125, %v10857_v43  ;;  %v16788_v43 = vld [vmem:[%s21672_s12 + $0x438] sm:$0xff]  }
0x1ed5   :  { %v10879_v49 = vadd.f32 1e-05, %v10871_v22  ;;  %v16789_v22 = vld [vmem:[%s21672_s12 + $0x4b8] sm:$0xff]  }
0x1ed6   :  { %v10863_v6 = vpop.xlane.xlu1 %10862  ;;  %v10860_v59 = vpop.xlane.xlu0 %10859 }
0x1ed7   :  { %17210 = vrsqrt.f32 %v10879_v49  ;;  %v10873_v55 = vmul.f32 0.03125, %v10863_v6  ;;  %v10872_v2 = vmul.f32 0.03125, %v10860_v59  ;;  %v16790_v49 = vld [vmem:[%s21672_s12 + $0x470] sm:$0xff]  }
0x1ed8   :  { %v16791_v6 = vld [vmem:[%s21672_s12 + $0x4f0] sm:$0xff]  }
0x1ed9   :  { %v10880_v26 = vadd.f32 1e-05, %v10872_v2  ;;  %v10881_v33 = vadd.f32 1e-05, %v10873_v55  ;;  %v16792_v59 = vld [vmem:[%s21672_s12 + $0x430] sm:$0xff]   ;;  %v16795_v2 = vld [vmem:[%s21672_s12 + $0x4e8] sm:$0xff]  }
0x1eda   :  { %v10866_v32 = vpop.xlane.xlu0 %10865  ;;  %v16793_v55 = vld [vmem:[%s21672_s12 + $0x4b0] sm:$0xff]  }
0x1edb   :  { %v10874_v35 = vmul.f32 0.03125, %v10866_v32  ;;  %17212 = vrsqrt.f32 %v10880_v26  ;;  %v16796_v26 = vld [vmem:[%s21672_s12 + $0x428] sm:$0xff]   ;;  %v16798_v32 = vld [vmem:[%s21672_s12 + $0x460] sm:$0xff]  }
0x1edc   :  { %17214 = vrsqrt.f32 %v10881_v33  ;;  %v16797_v33 = vld [vmem:[%s21672_s12 + $0x4a8] sm:$0xff]  }
0x1edd   :  { %v10882_v40 = vadd.f32 1e-05, %v10874_v35  ;;  %v16799_v35 = vld [vmem:[%s21672_s12 + $0x4e0] sm:$0xff]  }
0x1edf   :  { %17216 = vrsqrt.f32 %v10882_v40  ;;  %v16800_v40 = vld [vmem:[%s21672_s12 + $0x420] sm:$0xff]  }
0x1ee4   :  { %v17211_v12 = vpop.eup %17210 }
0x1ee5   :  { %v10895_v8 = vmul.f32 %v17211_v12, %v20530_v57  ;;  %v16801_v12 = vld [vmem:[%s21672_s12 + $0x4a0] sm:$0xff]  }
0x1ee7   :  { %v10909_v25 = vmul.f32 %v20593_v28, %v10895_v8  ;;  %v16803_v8 = vld [vmem:[%s21672_s12 + $0x4d8] sm:$0xff]  }
0x1ee8   :  { %v17213_v48 = vpop.eup %17212 }
0x1ee9   :  { %v10896_v15 = vmul.f32 %v17213_v48, %v20538_v4  ;;  %v17215_v39 = vpop.eup %17214  ;;  %v20661_v51 = vadd.f32 %v20600_v34, %v10909_v25  ;;  %v16804_v48 = vld [vmem:[%s21672_s12 + $0x418] sm:$0xff]  }
0x1eea   :  { %v10897_v54 = vmul.f32 %v17215_v39, %v20535_v60  ;;  %v16805_v25 = vld [vmem:[%s21672_s12 + $0x498] sm:$0xff]   ;;  %v16807_v39 = vld [vmem:[%s21672_s12 + $0x4d0] sm:$0xff]  }
0x1eeb   :  { %v10910_v0 = vmul.f32 %v20593_v28, %v10896_v15  ;;  %21857 = vst [vmem:[#allocation12_spill] sm:$0xff] %v20661_v51  ;;  %v16806_v15 = vld [vmem:[%s21672_s12 + $0x450] sm:$0xff]  }
0x1eec   :  { %v17217_v17 = vpop.eup %17216  ;;  %v10911_v37 = vmul.f32 %v20593_v28, %v10897_v54  ;;  %v16812_v54 = vld [vmem:[%s21672_s12 + $0x408] sm:$0xff]  }
0x1eed   :  { %v10898_v29 = vmul.f32 %v17217_v17, %v20546_v52  ;;  %v20665_v13 = vadd.f32 %v20600_v34, %v10910_v0  ;;  %v16808_v17 = vld [vmem:[%s21672_s12 + $0x410] sm:$0xff]  }
0x1eee   :  { %v20683_v52 = vadd.f32 %v20600_v34, %v10911_v37  ;;  %v16809_v0 = vld [vmem:[%s21672_s12 + $0x490] sm:$0xff]   ;;  %v16815_v37 = vld [vmem:[%s21672_s12 + $0x4c0] sm:$0xff]  }
0x1eef   :  { %21858 = vst [vmem:[#allocation21_spill] sm:$0xff] %v20665_v13  ;;  %v20669_v57 = vpack.c.bf16 %v20665_v13, %v20661_v51  ;;  %v10912_v4 = vmul.f32 %v20593_v28, %v10898_v29  ;;  %v14262_v28 = vld [vmem:[%s21669_s10 + $0x120] sm:$0xff]  ;;  %v16810_v29 = vld [vmem:[%s21672_s12 + $0x448] sm:$0xff]  }
0x1ef0   :  { %21860 = vst [vmem:[#allocation32_spill] sm:$0xff] %v20683_v52 }
0x1ef1   :  { %14326 = vmatmul.mubr.msk.bf16.gmra.mxu1 %vm185_vm0, %v20669_v57  ;;  %14330 = vmatmul.mubr.msk.bf16.gmra.mxu0 %vm185_vm0, %v20669_v57  ;;  %v20680_v60 = vadd.f32 %v20600_v34, %v10912_v4  ;;  %v14270_v34 = vld [vmem:[%s21669_s10 + $0x160] sm:$0xff] }
0x1ef2   :  { %11283 = vmatprep.mubr.bf16.mxu1 %v21849_v53  ;;  %11356 = vmatprep.mubr.bf16.mxu0 %v21849_v53  ;;  %v14301_v10 = vcombine.high %v14262_v28, %v14270_v34  ;;  %v14300_v3 = vcombine.low %v14262_v28, %v14270_v34  ;;  %v16814_v4 = vld [vmem:[%s21672_s12 + $0x440] sm:$0xff]  }
0x1ef3   :  { %21859 = vst [vmem:[#allocation23_spill] sm:$0xff] %v20680_v60  ;;  %v20687_v21 = vpack.c.bf16 %v20680_v60, %v20683_v52  ;;  %v16816_v28 = vld [vmem:[%s21672_s12 + $0x400] sm:$0xff]  }
0x1ef4   :  { %v16817_v34 = vld [vmem:[%s21672_s12 + $0x480] sm:$0xff]  }
0x1ef9   :  { %14327 = vmatmul.mubr.msk.bf16.gmra.mxu1 %vm185_vm0, %v20687_v21  ;;  %14331 = vmatmul.mubr.msk.bf16.gmra.mxu0 %vm185_vm0, %v20687_v21 }
0x1efa   :  { %11399 = vmatprep.mubr.bf16.mxu1 %v21849_v53  ;;  %11472 = vmatprep.mubr.bf16.mxu0 %v21849_v53 }
0x1f01   :  { %14332 = vmatmul.mubr.msk.bf16.vlgmr.msra.gmra.mxu1 %vm185_vm0, %v20625_v23  ;;  %14336 = vmatmul.mubr.msk.bf16.vlgmr.msra.gmra.mxu0 %vm185_vm0, %v20625_v23 }
0x1f02   :  { %11409 = vmatprep.mubr.bf16.mxu1 %v21849_v53  ;;  %11482 = vmatprep.mubr.bf16.mxu0 %v21849_v53 }
0x1f03   :  { %11526 = vmatpush1.bf16.msra.mxu1 %v14316_v44  ;;  %11599 = vmatpush1.bf16.msra.mxu0 %v14318_v5  ;;  %v14320_v44 = vcombine.low %v14280_v9, %v14288_v27  ;;  %v14322_v5 = vcombine.low %v14281_v7, %v14289_v20  ;;  %v21861_v9 = vld [vmem:[#allocation5_spill] sm:$0xff]  ;;  %v21862_v7 = vld [vmem:[#allocation6_spill] sm:$0xff] }
0x1f04   :  { %11527 = vmatprep.subr.bf16.mxu1 %v14301_v10  ;;  %11600 = vmatprep.subr.bf16.mxu0 %v14303_v62  ;;  %v20916_v27 = vrot.slane %v20912_v24, %v21861_v9  ;;  %v20920_v20 = vrot.slane %v20912_v24, %v21862_v7  ;;  %v16824_v9 = vld [vmem:[%s21672_s12 + $0x530] sm:$0xff]  }
0x1f05   :  { %v16825_v7 = vld [vmem:[%s21672_s12 + $0x5b0] sm:$0xff]  }
0x1f07   :  { %11528 = vmatpush1.bf16.msra.mxu1 %v14300_v3  ;;  %11601 = vmatpush1.bf16.msra.mxu0 %v14302_v61  ;;  %v21863_v3 = vld [vmem:[#allocation3_spill] sm:$0xff] }
0x1f08   :  { %11671 = vmatprep.subr.bf16.mxu1 %v14321_v45  ;;  %11744 = vmatprep.subr.bf16.mxu0 %v14323_v47  ;;  %v20924_v61 = vrot.slane %v20912_v24, %v21863_v3  ;;  %v21864_v45 = vld [vmem:[#allocation4_spill] sm:$0xff] }
0x1f09   :  { %14333 = vmatmul.mubr.msk.bf16.gmra.mxu1 %vm185_vm0, %v20647_v46  ;;  %14337 = vmatmul.mubr.msk.bf16.gmra.mxu0 %vm185_vm0, %v20647_v46  ;;  %v20928_v47 = vrot.slane %v20912_v24, %v21864_v45 }
0x1f0a   :  { %11419 = vmatprep.mubr.bf16.mxu1 %v21849_v53  ;;  %11492 = vmatprep.mubr.bf16.mxu0 %v21849_v53 }
0x1f11   :  { %14334 = vmatmul.mubr.msk.bf16.gmra.mxu1 %vm185_vm0, %v20669_v57  ;;  %14338 = vmatmul.mubr.msk.bf16.gmra.mxu0 %vm185_vm0, %v20669_v57 }
0x1f12   :  { %11429 = vmatprep.mubr.bf16.mxu1 %v21849_v53  ;;  %11502 = vmatprep.mubr.bf16.mxu0 %v21849_v53 }
0x1f19   :  { %14335 = vmatmul.mubr.msk.bf16.gmra.mxu1 %vm185_vm0, %v20687_v21  ;;  %14339 = vmatmul.mubr.msk.bf16.gmra.mxu0 %vm185_vm0, %v20687_v21 }
0x1f1a   :  { %11545 = vmatprep.mubr.bf16.mxu1 %v21849_v53  ;;  %11618 = vmatprep.mubr.bf16.mxu0 %v21849_v53 }
0x1f21   :  { %14340 = vmatmul.mubr.msk.bf16.vlgmr.msra.gmra.mxu1 %vm185_vm0, %v20625_v23  ;;  %14344 = vmatmul.mubr.msk.bf16.vlgmr.msra.gmra.mxu0 %vm185_vm0, %v20625_v23 }
0x1f22   :  { %11555 = vmatprep.mubr.bf16.mxu1 %v21849_v53  ;;  %11628 = vmatprep.mubr.bf16.mxu0 %v21849_v53 }
0x1f23   :  { %11672 = vmatpush1.bf16.msra.mxu1 %v14320_v44  ;;  %11745 = vmatpush1.bf16.msra.mxu0 %v14322_v5 }
0x1f24   :  { %11673 = vmatprep.subr.bf16.mxu1 %v14305_v56  ;;  %11746 = vmatprep.subr.bf16.mxu0 %v14307_v38 }
0x1f27   :  { %11674 = vmatpush1.bf16.msra.mxu1 %v14304_v31  ;;  %11747 = vmatpush1.bf16.msra.mxu0 %v14306_v19 }
0x1f28   :  { %15364 = vmatprep.subr.bf16.mxu1 %v16786_v18  ;;  %15404 = vmatprep.subr.bf16.mxu0 %v16787_v41 }
0x1f29   :  { %14341 = vmatmul.mubr.msk.bf16.gmra.mxu1 %vm185_vm0, %v20647_v46  ;;  %14345 = vmatmul.mubr.msk.bf16.gmra.mxu0 %vm185_vm0, %v20647_v46 }
0x1f2a   :  { %11565 = vmatprep.mubr.bf16.mxu1 %v21849_v53  ;;  %11638 = vmatprep.mubr.bf16.mxu0 %v21849_v53 }
0x1f31   :  { %14342 = vmatmul.mubr.msk.bf16.gmra.mxu1 %vm185_vm0, %v20669_v57  ;;  %14346 = vmatmul.mubr.msk.bf16.gmra.mxu0 %vm185_vm0, %v20669_v57 }
0x1f32   :  { %11575 = vmatprep.mubr.bf16.mxu1 %v21849_v53  ;;  %11648 = vmatprep.mubr.bf16.mxu0 %v21849_v53 }
0x1f39   :  { %14343 = vmatmul.mubr.msk.bf16.gmra.mxu1 %vm185_vm0, %v20687_v21  ;;  %14347 = vmatmul.mubr.msk.bf16.gmra.mxu0 %vm185_vm0, %v20687_v21 }
0x1f3a   :  { %11691 = vmatprep.mubr.bf16.mxu1 %v21849_v53  ;;  %11764 = vmatprep.mubr.bf16.mxu0 %v21849_v53 }
0x1f41   :  { %14348 = vmatmul.mubr.msk.bf16.vlgmr.msra.gmra.mxu1 %vm185_vm0, %v20625_v23  ;;  %14352 = vmatmul.mubr.msk.bf16.vlgmr.msra.gmra.mxu0 %vm185_vm0, %v20625_v23  ;;  %v16794_v23 = vld [vmem:[%s21672_s12 + $0x468] sm:$0xff]  }
0x1f42   :  { %11701 = vmatprep.mubr.bf16.mxu1 %v21849_v53  ;;  %11774 = vmatprep.mubr.bf16.mxu0 %v21849_v53 }
0x1f43   :  { %15365 = vmatpush3.bf16.msra.mxu1 %v16788_v43  ;;  %15405 = vmatpush3.bf16.msra.mxu0 %v16789_v22 }
0x1f44   :  { %15366 = vmatprep.subr.bf16.mxu1 %v16790_v49  ;;  %15406 = vmatprep.subr.bf16.mxu0 %v16791_v6 }
0x1f47   :  { %15367 = vmatpush3.bf16.msra.mxu1 %v16792_v59  ;;  %15407 = vmatpush3.bf16.msra.mxu0 %v16793_v55 }
0x1f48   :  { %15368 = vmatprep.subr.bf16.mxu1 %v16794_v23  ;;  %15408 = vmatprep.subr.bf16.mxu0 %v16795_v2 }
0x1f49   :  { %14349 = vmatmul.mubr.msk.bf16.gmra.mxu1 %vm185_vm0, %v20647_v46  ;;  %14353 = vmatmul.mubr.msk.bf16.gmra.mxu0 %vm185_vm0, %v20647_v46  ;;  %v16802_v46 = vld [vmem:[%s21672_s12 + $0x458] sm:$0xff]  }
0x1f4a   :  { %11711 = vmatprep.mubr.bf16.mxu1 %v21849_v53  ;;  %11784 = vmatprep.mubr.bf16.mxu0 %v21849_v53 }
0x1f4b   :  { %15369 = vmatpush3.bf16.msra.mxu1 %v16796_v26  ;;  %15409 = vmatpush3.bf16.msra.mxu0 %v16797_v33 }
0x1f4c   :  { %15370 = vmatprep.subr.bf16.mxu1 %v16798_v32  ;;  %15410 = vmatprep.subr.bf16.mxu0 %v16799_v35 }
0x1f4f   :  { %15371 = vmatpush3.bf16.msra.mxu1 %v16800_v40  ;;  %15411 = vmatpush3.bf16.msra.mxu0 %v16801_v12 }
0x1f50   :  { %15372 = vmatprep.subr.bf16.mxu1 %v16802_v46  ;;  %15412 = vmatprep.subr.bf16.mxu0 %v16803_v8 }
0x1f51   :  { %14350 = vmatmul.mubr.msk.bf16.gmra.mxu1 %vm185_vm0, %v20669_v57  ;;  %14354 = vmatmul.mubr.msk.bf16.gmra.mxu0 %vm185_vm0, %v20669_v57  ;;  %v16813_v57 = vld [vmem:[%s21672_s12 + $0x488] sm:$0xff]  }
0x1f52   :  { %11721 = vmatprep.mubr.bf16.mxu1 %v21849_v53  ;;  %11794 = vmatprep.mubr.bf16.mxu0 %v21849_v53  ;;  %v16811_v53 = vld [vmem:[%s21672_s12 + $0x4c8] sm:$0xff]  }
0x1f53   :  { %15373 = vmatpush3.bf16.msra.mxu1 %v16804_v48  ;;  %15413 = vmatpush3.bf16.msra.mxu0 %v16805_v25  ;;  %v16820_v48 = vld [vmem:[%s21672_s12 + $0x538] sm:$0xff]  }
0x1f54   :  { %15374 = vmatprep.subr.bf16.mxu1 %v16806_v15  ;;  %15414 = vmatprep.subr.bf16.mxu0 %v16807_v39  ;;  %v16821_v25 = vld [vmem:[%s21672_s12 + $0x5b8] sm:$0xff]  }
0x1f57   :  { %15375 = vmatpush3.bf16.msra.mxu1 %v16808_v17  ;;  %15415 = vmatpush3.bf16.msra.mxu0 %v16809_v0 }
0x1f58   :  { %15376 = vmatprep.subr.bf16.mxu1 %v16810_v29  ;;  %15416 = vmatprep.subr.bf16.mxu0 %v16811_v53  ;;  %v16822_v53 = vld [vmem:[%s21672_s12 + $0x570] sm:$0xff]  }
0x1f59   :  { %14351 = vmatmul.mubr.msk.bf16.gmra.mxu1 %vm185_vm0, %v20687_v21  ;;  %14355 = vmatmul.mubr.msk.bf16.gmra.mxu0 %vm185_vm0, %v20687_v21  ;;  %v16819_v21 = vld [vmem:[%s21672_s12 + $0x5f8] sm:$0xff]  }
0x1f5b   :  { %15377 = vmatpush3.bf16.msra.mxu1 %v16812_v54  ;;  %15417 = vmatpush3.bf16.msra.mxu0 %v16813_v57  ;;  %v16823_v54 = vld [vmem:[%s21672_s12 + $0x5f0] sm:$0xff]  }
0x1f5c   :  { %15378 = vmatprep.subr.bf16.mxu1 %v16814_v4  ;;  %15418 = vmatprep.subr.bf16.mxu0 %v16815_v37 }
0x1f5f   :  { %15379 = vmatpush3.bf16.msra.mxu1 %v16816_v28  ;;  %15419 = vmatpush3.bf16.msra.mxu0 %v16817_v34 }
0x1f60   :  { %15444 = vmatprep.subr.bf16.mxu1 %v16818_v1  ;;  %15484 = vmatprep.subr.bf16.mxu0 %v16819_v21 }
0x1f74   :  { %v11255_v10 = vpop.f32.mrf.mxu1  ;;  %v11328_v62 = vpop.f32.mrf.mxu0 }
0x1f75   :  { %v11256_v31 = vadd.f32 %v11255_v10, %v20928_v47  ;;  %v11329_v19 = vadd.f32 %v11328_v62, %v20924_v61 }
0x1f76   :  { %v11257_v58 = vpop.f32.mrf.mxu1  ;;  %v11330_v63 = vpop.f32.mrf.mxu0 }
0x1f77   :  { %v11258_v44 = vadd.f32 %v11257_v58, %v20920_v20  ;;  %v11331_v5 = vadd.f32 %v11330_v63, %v20916_v27  ;;  %v11805_v32 = vmax.f32 %v11256_v31, 0.0  ;;  %v11807_v35 = vmax.f32 %v11329_v19, 0.0  ;;  %v16826_v63 = vld [vmem:[%s21672_s12 + $0x568] sm:$0xff]  }
0x1f78   :  { %v11259_v11 = vpop.f32.mrf.mxu1  ;;  %v11332_v36 = vpop.f32.mrf.mxu0 }
0x1f79   :  { %v11260_v56 = vadd.f32 %v11259_v11, %v20928_v47  ;;  %v11333_v38 = vadd.f32 %v11332_v36, %v20924_v61  ;;  %v11806_v23 = vmax.f32 %v11258_v44, 0.0  ;;  %v11808_v2 = vmax.f32 %v11331_v5, 0.0  ;;  %v16827_v11 = vld [vmem:[%s21672_s12 + $0x5e8] sm:$0xff]  }
0x1f7a   :  { %v11261_v18 = vpop.f32.mrf.mxu1  ;;  %v11334_v41 = vpop.f32.mrf.mxu0 }
0x1f7b   :  { %v11262_v43 = vadd.f32 %v11261_v18, %v20920_v20  ;;  %v11335_v22 = vadd.f32 %v11334_v41, %v20916_v27  ;;  %v11821_v49 = vmax.f32 %v11260_v56, 0.0  ;;  %v11823_v6 = vmax.f32 %v11333_v38, 0.0  ;;  %v16828_v41 = vld [vmem:[%s21672_s12 + $0x528] sm:$0xff]  }
0x1f7c   :  { %v11265_v59 = vpop.f32.mrf.mxu1  ;;  %v11338_v55 = vpop.f32.mrf.mxu0 }
0x1f7d   :  { %v11822_v26 = vmax.f32 %v11262_v43, 0.0  ;;  %v11824_v33 = vmax.f32 %v11335_v22, 0.0  ;;  %v11933_v15 = vpack.c.bf16 %v11821_v49, %v11805_v32  ;;  %v11935_v39 = vpack.c.bf16 %v11823_v6, %v11807_v35  ;;  %v16829_v43 = vld [vmem:[%s21672_s12 + $0x5a8] sm:$0xff]   ;;  %v16830_v6 = vld [vmem:[%s21672_s12 + $0x560] sm:$0xff]   ;;  %v16837_v32 = vld [vmem:[%s21672_s12 + $0x598] sm:$0xff]  }
0x1f7e   :  { %v11267_v40 = vpop.f32.mrf.mxu1  ;;  %v11340_v12 = vpop.f32.mrf.mxu0  ;;  %v11266_v28 = vadd.f32 %v11265_v59, %v20928_v47  ;;  %v11339_v34 = vadd.f32 %v11338_v55, %v20924_v61  ;;  %v16831_v59 = vld [vmem:[%s21672_s12 + $0x5e0] sm:$0xff]   ;;  %v16838_v35 = vld [vmem:[%s21672_s12 + $0x550] sm:$0xff]  }
0x1f7f   :  { %v11934_v46 = vpack.c.bf16 %v11822_v26, %v11806_v23  ;;  %v11936_v8 = vpack.c.bf16 %v11824_v33, %v11808_v2  ;;  %v11268_v17 = vadd.f32 %v11267_v40, %v20920_v20  ;;  %v11341_v57 = vadd.f32 %v11340_v12, %v20916_v27  ;;  %v16832_v55 = vld [vmem:[%s21672_s12 + $0x520] sm:$0xff]   ;;  %v16834_v2 = vld [vmem:[%s21672_s12 + $0x558] sm:$0xff]   ;;  %v16839_v40 = vld [vmem:[%s21672_s12 + $0x5d0] sm:$0xff]  }
0x1f80   :  { %v11269_v0 = vpop.f32.mrf.mxu1  ;;  %v11342_v29 = vpop.f32.mrf.mxu0  ;;  %v11837_v38 = vmax.f32 %v11266_v28, 0.0  ;;  %v11839_v31 = vmax.f32 %v11339_v34, 0.0  ;;  %v16833_v23 = vld [vmem:[%s21672_s12 + $0x5a0] sm:$0xff]   ;;  %v16835_v26 = vld [vmem:[%s21672_s12 + $0x5d8] sm:$0xff]   ;;  %v16840_v12 = vld [vmem:[%s21672_s12 + $0x510] sm:$0xff]  }
0x1f81   :  { %v11270_v4 = vadd.f32 %v11269_v0, %v20928_v47  ;;  %v11343_v37 = vadd.f32 %v11342_v29, %v20924_v61  ;;  %13062 = vmatprep.mubr.bf16.mxu1 %v11934_v46  ;;  %13127 = vmatprep.mubr.bf16.mxu0 %v11936_v8  ;;  %v11838_v36 = vmax.f32 %v11268_v17, 0.0  ;;  %v11840_v44 = vmax.f32 %v11341_v57, 0.0  ;;  %v16836_v33 = vld [vmem:[%s21672_s12 + $0x518] sm:$0xff]   ;;  %v16841_v46 = vld [vmem:[%s21672_s12 + $0x590] sm:$0xff]   ;;  %v16842_v8 = vld [vmem:[%s21672_s12 + $0x548] sm:$0xff]  }
0x1f82   :  { %v11271_v1 = vpop.f32.mrf.mxu1  ;;  %v11344_v21 = vpop.f32.mrf.mxu0  ;;  %13063 = vmatmul.mubr.bf16.vlgmr.msra.gmra.mxu1 %v11933_v15  ;;  %13128 = vmatmul.mubr.bf16.vlgmr.msra.gmra.mxu0 %v11935_v39  ;;  %v16845_v15 = vld [vmem:[%s21672_s12 + $0x588] sm:$0xff]   ;;  %v16846_v39 = vld [vmem:[%s21672_s12 + $0x540] sm:$0xff]  }
0x1f83   :  { %v11272_v10 = vadd.f32 %v11271_v1, %v20920_v20  ;;  %v11345_v62 = vadd.f32 %v11344_v21, %v20916_v27  ;;  %15445 = vmatpush3.bf16.msra.mxu1 %v16820_v48  ;;  %15485 = vmatpush3.bf16.msra.mxu0 %v16821_v25  ;;  %v11853_v3 = vmax.f32 %v11270_v4, 0.0  ;;  %v11855_v58 = vmax.f32 %v11343_v37, 0.0  ;;  %v16843_v48 = vld [vmem:[%s21672_s12 + $0x5c8] sm:$0xff]   ;;  %v16847_v17 = vld [vmem:[%s21672_s12 + $0x5c0] sm:$0xff]  }
0x1f84   :  { %15446 = vmatprep.subr.bf16.mxu1 %v16822_v53  ;;  %15486 = vmatprep.subr.bf16.mxu0 %v16823_v54  ;;  %v16844_v25 = vld [vmem:[%s21672_s12 + $0x508] sm:$0xff]   ;;  %v16848_v0 = vld [vmem:[%s21672_s12 + $0x500] sm:$0xff]   ;;  %v16850_v53 = vld [vmem:[%s21672_s12 + $0x678] sm:$0xff]  }
0x1f85   :  { %v11854_v5 = vmax.f32 %v11272_v10, 0.0  ;;  %v11856_v56 = vmax.f32 %v11345_v62, 0.0  ;;  %v11949_v22 = vpack.c.bf16 %v11853_v3, %v11837_v38  ;;  %v11951_v49 = vpack.c.bf16 %v11855_v58, %v11839_v31  ;;  %v16849_v29 = vld [vmem:[%s21672_s12 + $0x580] sm:$0xff]   ;;  %v16851_v54 = vld [vmem:[%s21672_s12 + $0x6f8] sm:$0xff]  }
0x1f87   :  { %v11950_v19 = vpack.c.bf16 %v11854_v5, %v11838_v36  ;;  %v11952_v18 = vpack.c.bf16 %v11856_v56, %v11840_v44  ;;  %15447 = vmatpush3.bf16.msra.mxu1 %v16824_v9  ;;  %15487 = vmatpush3.bf16.msra.mxu0 %v16825_v7 }
0x1f88   :  { %15448 = vmatprep.subr.bf16.mxu1 %v16826_v63  ;;  %15488 = vmatprep.subr.bf16.mxu0 %v16827_v11 }
0x1f89   :  { %13070 = vmatprep.mubr.bf16.mxu1 %v11950_v19  ;;  %13135 = vmatprep.mubr.bf16.mxu0 %v11952_v18 }
0x1f8a   :  { %13071 = vmatmul.mubr.bf16.gmra.mxu1 %v11949_v22  ;;  %13136 = vmatmul.mubr.bf16.gmra.mxu0 %v11951_v49 }
0x1f8b   :  { %15449 = vmatpush3.bf16.msra.mxu1 %v16828_v41  ;;  %15489 = vmatpush3.bf16.msra.mxu0 %v16829_v43 }
0x1f8c   :  { %15450 = vmatprep.subr.bf16.mxu1 %v16830_v6  ;;  %15490 = vmatprep.subr.bf16.mxu0 %v16831_v59 }
0x1f8f   :  { %15451 = vmatpush3.bf16.msra.mxu1 %v16832_v55  ;;  %15491 = vmatpush3.bf16.msra.mxu0 %v16833_v23 }
0x1f90   :  { %15452 = vmatprep.subr.bf16.mxu1 %v16834_v2  ;;  %15492 = vmatprep.subr.bf16.mxu0 %v16835_v26 }
0x1f93   :  { %15453 = vmatpush3.bf16.msra.mxu1 %v16836_v33  ;;  %15493 = vmatpush3.bf16.msra.mxu0 %v16837_v32 }
0x1f94   :  { %15454 = vmatprep.subr.bf16.mxu1 %v16838_v35  ;;  %15494 = vmatprep.subr.bf16.mxu0 %v16839_v40 }
0x1f97   :  { %15455 = vmatpush3.bf16.msra.mxu1 %v16840_v12  ;;  %15495 = vmatpush3.bf16.msra.mxu0 %v16841_v46 }
0x1f98   :  { %15456 = vmatprep.subr.bf16.mxu1 %v16842_v8  ;;  %15496 = vmatprep.subr.bf16.mxu0 %v16843_v48 }
0x1f9b   :  { %15457 = vmatpush3.bf16.msra.mxu1 %v16844_v25  ;;  %15497 = vmatpush3.bf16.msra.mxu0 %v16845_v15 }
0x1f9c   :  { %15458 = vmatprep.subr.bf16.mxu1 %v16846_v39  ;;  %15498 = vmatprep.subr.bf16.mxu0 %v16847_v17  ;;  %v21865_v17 = vld [vmem:[#allocation11_spill] sm:$0xff] }
0x1f9f   :  { %15459 = vmatpush3.bf16.msra.mxu1 %v16848_v0  ;;  %15499 = vmatpush3.bf16.msra.mxu0 %v16849_v29  ;;  %v21060_v0 = vrot.slane %v20912_v24, %v21865_v17  ;;  %v21866_v29 = vld [vmem:[#allocation18_spill] sm:$0xff] }
0x1fa0   :  { %15524 = vmatprep.subr.bf16.mxu1 %v16850_v53  ;;  %15564 = vmatprep.subr.bf16.mxu0 %v16851_v54  ;;  %v21064_v53 = vrot.slane %v20912_v24, %v21866_v29 }
0x1fb1   :  { %v11275_v57 = vpop.f32.mrf.mxu1  ;;  %v11348_v4 = vpop.f32.mrf.mxu0 }
0x1fb2   :  { %v11276_v7 = vadd.f32 %v11275_v57, %v20928_v47  ;;  %v11349_v3 = vadd.f32 %v11348_v4, %v20924_v61 }
0x1fb3   :  { %v11277_v37 = vpop.f32.mrf.mxu1  ;;  %v11350_v28 = vpop.f32.mrf.mxu0 }
0x1fb4   :  { %v11278_v21 = vadd.f32 %v11277_v37, %v20920_v20  ;;  %v11351_v10 = vadd.f32 %v11350_v28, %v20916_v27  ;;  %v11869_v43 = vmax.f32 %v11276_v7, 0.0  ;;  %v11871_v22 = vmax.f32 %v11349_v3, 0.0 }
0x1fb5   :  { %v11279_v34 = vpop.f32.mrf.mxu1  ;;  %v11352_v1 = vpop.f32.mrf.mxu0 }
0x1fb6   :  { %v11280_v62 = vadd.f32 %v11279_v34, %v20928_v47  ;;  %v11353_v9 = vadd.f32 %v11352_v1, %v20924_v61  ;;  %v11870_v31 = vmax.f32 %v11278_v21, 0.0  ;;  %v11872_v19 = vmax.f32 %v11351_v10, 0.0  ;;  %v21867_v1 = vld [vmem:[#allocation14_spill] sm:$0xff] }
0x1fb7   :  { %v11281_v58 = vpop.f32.mrf.mxu1  ;;  %v11354_v63 = vpop.f32.mrf.mxu0 }
0x1fb8   :  { %v11282_v11 = vadd.f32 %v11281_v58, %v20920_v20  ;;  %v11355_v36 = vadd.f32 %v11354_v63, %v20916_v27  ;;  %v11885_v44 = vmax.f32 %v11280_v62, 0.0  ;;  %v11887_v5 = vmax.f32 %v11353_v9, 0.0 }
0x1fb9   :  { %v11285_v56 = vpop.f32.mrf.mxu1  ;;  %v11358_v38 = vpop.f32.mrf.mxu0 }
0x1fba   :  { %v11886_v18 = vmax.f32 %v11282_v11, 0.0  ;;  %v11888_v41 = vmax.f32 %v11355_v36, 0.0  ;;  %v11965_v23 = vpack.c.bf16 %v11885_v44, %v11869_v43  ;;  %v11967_v2 = vpack.c.bf16 %v11887_v5, %v11871_v22 }
0x1fbb   :  { %v11287_v49 = vpop.f32.mrf.mxu1  ;;  %v11360_v6 = vpop.f32.mrf.mxu0  ;;  %v11286_v46 = vadd.f32 %v11285_v56, %v20928_v47  ;;  %v11359_v8 = vadd.f32 %v11358_v38, %v20924_v61 }
0x1fbc   :  { %v11966_v59 = vpack.c.bf16 %v11886_v18, %v11870_v31  ;;  %v11968_v55 = vpack.c.bf16 %v11888_v41, %v11872_v19  ;;  %v11288_v26 = vadd.f32 %v11287_v49, %v20920_v20  ;;  %v11361_v35 = vadd.f32 %v11360_v6, %v20916_v27 }
0x1fbd   :  { %v11289_v33 = vpop.f32.mrf.mxu1  ;;  %v11362_v32 = vpop.f32.mrf.mxu0  ;;  %v11901_v10 = vmax.f32 %v11286_v46, 0.0  ;;  %v11903_v62 = vmax.f32 %v11359_v8, 0.0 }
0x1fbe   :  { %v11290_v40 = vadd.f32 %v11289_v33, %v20928_v47  ;;  %v11363_v12 = vadd.f32 %v11362_v32, %v20924_v61  ;;  %13078 = vmatprep.mubr.bf16.mxu1 %v11966_v59  ;;  %13143 = vmatprep.mubr.bf16.mxu0 %v11968_v55  ;;  %v11902_v4 = vmax.f32 %v11288_v26, 0.0  ;;  %v11904_v37 = vmax.f32 %v11361_v35, 0.0 }
0x1fbf   :  { %v11291_v48 = vpop.f32.mrf.mxu1  ;;  %v11364_v25 = vpop.f32.mrf.mxu0  ;;  %13079 = vmatmul.mubr.bf16.gmra.mxu1 %v11965_v23  ;;  %13144 = vmatmul.mubr.bf16.gmra.mxu0 %v11967_v2 }
0x1fc0   :  { %v11292_v15 = vadd.f32 %v11291_v48, %v20920_v20  ;;  %v11365_v39 = vadd.f32 %v11364_v25, %v20916_v27  ;;  %v11917_v54 = vmax.f32 %v11290_v40, 0.0  ;;  %v11919_v47 = vmax.f32 %v11363_v12, 0.0  ;;  %v21868_v27 = vld [vmem:[#allocation20_spill] sm:$0xff]  ;;  %v16852_v48 = vld [vmem:[%s21672_s12 + $0x638] sm:$0xff]  }
0x1fc1   :  { %v11401_v57 = vpop.f32.mrf.mxu1  ;;  %v11474_v61 = vpop.f32.mrf.mxu0  ;;  %v21068_v20 = vrot.slane %v20912_v24, %v21867_v1  ;;  %v21072_v21 = vrot.slane %v20912_v24, %v21868_v27  ;;  %v16853_v25 = vld [vmem:[%s21672_s12 + $0x6b8] sm:$0xff]  }
0x1fc2   :  { %v11918_v28 = vmax.f32 %v11292_v15, 0.0  ;;  %v11920_v34 = vmax.f32 %v11365_v39, 0.0  ;;  %v11981_v63 = vpack.c.bf16 %v11917_v54, %v11901_v10  ;;  %v11983_v11 = vpack.c.bf16 %v11919_v47, %v11903_v62  ;;  %v16854_v47 = vld [vmem:[%s21672_s12 + $0x670] sm:$0xff]  }
0x1fc3   :  { %v11403_v9 = vpop.f32.mrf.mxu1  ;;  %v11476_v7 = vpop.f32.mrf.mxu0  ;;  %v11402_v24 = vadd.f32 %v11401_v57, %v21068_v20  ;;  %v11475_v19 = vadd.f32 %v11474_v61, %v21072_v21  ;;  %v16855_v57 = vld [vmem:[%s21672_s12 + $0x6f0] sm:$0xff]  }
0x1fc4   :  { %v11982_v3 = vpack.c.bf16 %v11918_v28, %v11902_v4  ;;  %v11984_v58 = vpack.c.bf16 %v11920_v34, %v11904_v37  ;;  %v11404_v36 = vadd.f32 %v11403_v9, %v21060_v0  ;;  %v11477_v56 = vadd.f32 %v11476_v7, %v21064_v53  ;;  %v16856_v9 = vld [vmem:[%s21672_s12 + $0x630] sm:$0xff]  }
0x1fc5   :  { %v11405_v44 = vpop.f32.mrf.mxu1  ;;  %v11478_v5 = vpop.f32.mrf.mxu0  ;;  %v11809_v32 = vmax.f32 %v11402_v24, 0.0  ;;  %v11811_v35 = vmax.f32 %v11475_v19, 0.0 }
0x1fc6   :  { %v11406_v38 = vadd.f32 %v11405_v44, %v21068_v20  ;;  %v11479_v31 = vadd.f32 %v11478_v5, %v21072_v21  ;;  %13086 = vmatprep.mubr.bf16.mxu1 %v11982_v3  ;;  %13151 = vmatprep.mubr.bf16.mxu0 %v11984_v58  ;;  %v11810_v23 = vmax.f32 %v11404_v36, 0.0  ;;  %v11812_v2 = vmax.f32 %v11477_v56, 0.0  ;;  %v16858_v36 = vld [vmem:[%s21672_s12 + $0x668] sm:$0xff]  }
0x1fc7   :  { %v11407_v18 = vpop.f32.mrf.mxu1  ;;  %v11480_v41 = vpop.f32.mrf.mxu0  ;;  %13087 = vmatmul.mubr.bf16.gmra.mxu1 %v11981_v63  ;;  %13152 = vmatmul.mubr.bf16.gmra.mxu0 %v11983_v11  ;;  %v16857_v11 = vld [vmem:[%s21672_s12 + $0x6b0] sm:$0xff]  }
0x1fc8   :  { %v11408_v43 = vadd.f32 %v11407_v18, %v21060_v0  ;;  %v11481_v22 = vadd.f32 %v11480_v41, %v21064_v53  ;;  %v11825_v49 = vmax.f32 %v11406_v38, 0.0  ;;  %v11827_v6 = vmax.f32 %v11479_v31, 0.0 }
0x1fc9   :  { %v11411_v59 = vpop.f32.mrf.mxu1  ;;  %v11484_v55 = vpop.f32.mrf.mxu0 }
0x1fca   :  { %v11826_v26 = vmax.f32 %v11408_v43, 0.0  ;;  %v11828_v33 = vmax.f32 %v11481_v22, 0.0  ;;  %v11937_v15 = vpack.c.bf16 %v11825_v49, %v11809_v32  ;;  %v11939_v39 = vpack.c.bf16 %v11827_v6, %v11811_v35  ;;  %v16859_v22 = vld [vmem:[%s21672_s12 + $0x6e8] sm:$0xff]  }
0x1fcb   :  { %v11413_v40 = vpop.f32.mrf.mxu1  ;;  %v11486_v12 = vpop.f32.mrf.mxu0  ;;  %v11412_v28 = vadd.f32 %v11411_v59, %v21068_v20  ;;  %v11485_v34 = vadd.f32 %v11484_v55, %v21072_v21  ;;  %v16860_v49 = vld [vmem:[%s21672_s12 + $0x628] sm:$0xff]  }
0x1fcc   :  { %v11938_v46 = vpack.c.bf16 %v11826_v26, %v11810_v23  ;;  %v11940_v8 = vpack.c.bf16 %v11828_v33, %v11812_v2  ;;  %v11414_v17 = vadd.f32 %v11413_v40, %v21060_v0  ;;  %v11487_v61 = vadd.f32 %v11486_v12, %v21064_v53  ;;  %v16861_v26 = vld [vmem:[%s21672_s12 + $0x6a8] sm:$0xff]   ;;  %v16862_v33 = vld [vmem:[%s21672_s12 + $0x660] sm:$0xff]  }
0x1fcd   :  { %v11415_v29 = vpop.f32.mrf.mxu1  ;;  %v11488_v54 = vpop.f32.mrf.mxu0  ;;  %v11841_v31 = vmax.f32 %v11412_v28, 0.0  ;;  %v11843_v24 = vmax.f32 %v11485_v34, 0.0  ;;  %v16863_v12 = vld [vmem:[%s21672_s12 + $0x6e0] sm:$0xff]  }
0x1fce   :  { %v11416_v4 = vadd.f32 %v11415_v29, %v21068_v20  ;;  %v11489_v37 = vadd.f32 %v11488_v54, %v21072_v21  ;;  %13192 = vmatprep.mubr.bf16.mxu1 %v11938_v46  ;;  %13257 = vmatprep.mubr.bf16.mxu0 %v11940_v8  ;;  %v11842_v44 = vmax.f32 %v11414_v17, 0.0  ;;  %v11844_v5 = vmax.f32 %v11487_v61, 0.0  ;;  %v16864_v17 = vld [vmem:[%s21672_s12 + $0x620] sm:$0xff]  }
0x1fcf   :  { %v11417_v1 = vpop.f32.mrf.mxu1  ;;  %v11490_v27 = vpop.f32.mrf.mxu0  ;;  %13193 = vmatmul.mubr.bf16.vlgmr.msra.gmra.mxu1 %v11937_v15  ;;  %13258 = vmatmul.mubr.bf16.vlgmr.msra.gmra.mxu0 %v11939_v39  ;;  %v16865_v61 = vld [vmem:[%s21672_s12 + $0x6a0] sm:$0xff]  }
0x1fd0   :  { %v11418_v10 = vadd.f32 %v11417_v1, %v21060_v0  ;;  %v11491_v62 = vadd.f32 %v11490_v27, %v21064_v53  ;;  %15525 = vmatpush3.bf16.msra.mxu1 %v16852_v48  ;;  %15565 = vmatpush3.bf16.msra.mxu0 %v16853_v25  ;;  %v11857_v7 = vmax.f32 %v11416_v4, 0.0  ;;  %v11859_v3 = vmax.f32 %v11489_v37, 0.0  ;;  %v16866_v4 = vld [vmem:[%s21672_s12 + $0x658] sm:$0xff]  }
0x1fd1   :  { %v11421_v58 = vpop.f32.mrf.mxu1  ;;  %v11494_v63 = vpop.f32.mrf.mxu0  ;;  %15526 = vmatprep.subr.bf16.mxu1 %v16854_v47  ;;  %15566 = vmatprep.subr.bf16.mxu0 %v16855_v57 }
0x1fd2   :  { %v11858_v56 = vmax.f32 %v11418_v10, 0.0  ;;  %v11860_v38 = vmax.f32 %v11491_v62, 0.0  ;;  %v11953_v6 = vpack.c.bf16 %v11857_v7, %v11841_v31  ;;  %v11955_v59 = vpack.c.bf16 %v11859_v3, %v11843_v24  ;;  %v16870_v31 = vld [vmem:[%s21672_s12 + $0x650] sm:$0xff]  }
0x1fd3   :  { %v11423_v19 = vpop.f32.mrf.mxu1  ;;  %v11496_v18 = vpop.f32.mrf.mxu0  ;;  %v11422_v46 = vadd.f32 %v11421_v58, %v21068_v20  ;;  %v11495_v8 = vadd.f32 %v11494_v63, %v21072_v21  ;;  %v16867_v58 = vld [vmem:[%s21672_s12 + $0x6d8] sm:$0xff]  }
0x1fd4   :  { %v11954_v41 = vpack.c.bf16 %v11858_v56, %v11842_v44  ;;  %v11956_v43 = vpack.c.bf16 %v11860_v38, %v11844_v5  ;;  %15527 = vmatpush3.bf16.msra.mxu1 %v16856_v9  ;;  %v11424_v55 = vadd.f32 %v11423_v19, %v21060_v0  ;;  %15567 = vmatpush3.bf16.msra.mxu0 %v16857_v11  ;;  %v16868_v63 = vld [vmem:[%s21672_s12 + $0x618] sm:$0xff]  }
0x1fd5   :  { %v11425_v23 = vpop.f32.mrf.mxu1  ;;  %v11498_v2 = vpop.f32.mrf.mxu0  ;;  %15528 = vmatprep.subr.bf16.mxu1 %v16858_v36  ;;  %v11497_v32 = vadd.f32 %v11496_v18, %v21064_v53  ;;  %15568 = vmatprep.subr.bf16.mxu0 %v16859_v22  ;;  %v11873_v27 = vmax.f32 %v11422_v46, 0.0  ;;  %v11875_v10 = vmax.f32 %v11495_v8, 0.0  ;;  %v16869_v38 = vld [vmem:[%s21672_s12 + $0x698] sm:$0xff]  }
0x1fd6   :  { %v11426_v35 = vadd.f32 %v11425_v23, %v21068_v20  ;;  %v11499_v40 = vadd.f32 %v11498_v2, %v21072_v21  ;;  %13200 = vmatprep.mubr.bf16.mxu1 %v11954_v41  ;;  %13265 = vmatprep.mubr.bf16.mxu0 %v11956_v43  ;;  %v11874_v37 = vmax.f32 %v11424_v55, 0.0  ;;  %v16871_v41 = vld [vmem:[%s21672_s12 + $0x6d0] sm:$0xff]   ;;  %v17235_v8 = vld [vmem:[%s21750_s19 + $0x18] sm:$0xff] }
0x1fd7   :  { %v11427_v48 = vpop.f32.mrf.mxu1  ;;  %v11500_v25 = vpop.f32.mrf.mxu0  ;;  %13201 = vmatmul.mubr.bf16.gmra.mxu1 %v11953_v6  ;;  %13266 = vmatmul.mubr.bf16.gmra.mxu0 %v11955_v59  ;;  %v11876_v28 = vmax.f32 %v11497_v32, 0.0  ;;  %v16872_v23 = vld [vmem:[%s21672_s12 + $0x610] sm:$0xff]  }
0x1fd8   :  { %v11428_v15 = vadd.f32 %v11427_v48, %v21060_v0  ;;  %v11501_v39 = vadd.f32 %v11500_v25, %v21064_v53  ;;  %15529 = vmatpush3.bf16.msra.mxu1 %v16860_v49  ;;  %v11889_v29 = vmax.f32 %v11426_v35, 0.0  ;;  %v11891_v54 = vmax.f32 %v11499_v40, 0.0  ;;  %15569 = vmatpush3.bf16.msra.mxu0 %v16861_v26 }
0x1fd9   :  { %v11431_v47 = vpop.f32.mrf.mxu1  ;;  %v11504_v57 = vpop.f32.mrf.mxu0  ;;  %15530 = vmatprep.subr.bf16.mxu1 %v16862_v33  ;;  %15570 = vmatprep.subr.bf16.mxu0 %v16863_v12  ;;  %v21179_v48 = vrot.slane %v17235_v8, %v21864_v45 }
0x1fda   :  { %v11890_v34 = vmax.f32 %v11428_v15, 0.0  ;;  %v11892_v1 = vmax.f32 %v11501_v39, 0.0  ;;  %v11969_v11 = vpack.c.bf16 %v11889_v29, %v11873_v27  ;;  %v11971_v36 = vpack.c.bf16 %v11891_v54, %v11875_v10  ;;  %v16875_v29 = vld [vmem:[%s21672_s12 + $0x6c8] sm:$0xff]   ;;  %v21870_v27 = vld [vmem:[#allocation10_spill] sm:$0xff] }
0x1fdb   :  { %v11433_v62 = vpop.f32.mrf.mxu1  ;;  %v11506_v9 = vpop.f32.mrf.mxu0  ;;  %v11432_v43 = vadd.f32 %v11431_v47, %v21068_v20  ;;  %v11505_v22 = vadd.f32 %v11504_v57, %v21072_v21  ;;  %v16876_v54 = vld [vmem:[%s21672_s12 + $0x608] sm:$0xff]  }
0x1fdc   :  { %v11970_v7 = vpack.c.bf16 %v11890_v34, %v11874_v37  ;;  %v11972_v3 = vpack.c.bf16 %v11892_v1, %v11876_v28  ;;  %15531 = vmatpush3.bf16.msra.mxu1 %v16864_v17  ;;  %v11434_v44 = vadd.f32 %v11433_v62, %v21060_v0  ;;  %15571 = vmatpush3.bf16.msra.mxu0 %v16865_v61  ;;  %v21869_v61 = vld [vmem:[#allocation13_spill] sm:$0xff]  ;;  %v16877_v34 = vld [vmem:[%s21672_s12 + $0x688] sm:$0xff]   ;;  %v16878_v1 = vld [vmem:[%s21672_s12 + $0x640] sm:$0xff]  }
0x1fdd   :  { %v11435_v5 = vpop.f32.mrf.mxu1  ;;  %v11508_v56 = vpop.f32.mrf.mxu0  ;;  %15532 = vmatprep.subr.bf16.mxu1 %v16866_v4  ;;  %v11507_v24 = vadd.f32 %v11506_v9, %v21064_v53  ;;  %15572 = vmatprep.subr.bf16.mxu0 %v16867_v58  ;;  %v11905_v12 = vmax.f32 %v11432_v43, 0.0  ;;  %v11907_v46 = vmax.f32 %v11505_v22, 0.0  ;;  %v21871_v9 = vld [vmem:[#allocation8_spill] sm:$0xff] }
0x1fde   :  { %v11436_v19 = vadd.f32 %v11435_v5, %v21068_v20  ;;  %v11509_v18 = vadd.f32 %v11508_v56, %v21072_v21  ;;  %13208 = vmatprep.mubr.bf16.mxu1 %v11970_v7  ;;  %13273 = vmatprep.mubr.bf16.mxu0 %v11972_v3  ;;  %v16873_v21 = vld [vmem:[%s21672_s12 + $0x690] sm:$0xff]   ;;  %v16879_v3 = vld [vmem:[%s21672_s12 + $0x6c0] sm:$0xff]  }
0x1fdf   :  { %v11437_v49 = vpop.f32.mrf.mxu1  ;;  %v11510_v6 = vpop.f32.mrf.mxu0  ;;  %13209 = vmatmul.mubr.bf16.gmra.mxu1 %v11969_v11  ;;  %13274 = vmatmul.mubr.bf16.gmra.mxu0 %v11971_v36  ;;  %v11908_v32 = vmax.f32 %v11507_v24, 0.0  ;;  %v16880_v56 = vld [vmem:[%s21672_s12 + $0x600] sm:$0xff]  }
0x1fe0   :  { %v11438_v59 = vadd.f32 %v11437_v49, %v21060_v0  ;;  %v11511_v55 = vadd.f32 %v11510_v6, %v21064_v53  ;;  %15533 = vmatpush3.bf16.msra.mxu1 %v16868_v63  ;;  %v11921_v2 = vmax.f32 %v11436_v19, 0.0  ;;  %v11923_v26 = vmax.f32 %v11509_v18, 0.0  ;;  %15573 = vmatpush3.bf16.msra.mxu0 %v16869_v38  ;;  %v16874_v0 = vld [vmem:[%s21672_s12 + $0x648] sm:$0xff]   ;;  %v16881_v18 = vld [vmem:[%s21672_s12 + $0x680] sm:$0xff]  }
0x1fe1   :  { %v11547_v20 = vpop.f32.mrf.mxu1  ;;  %v11620_v33 = vpop.f32.mrf.mxu0  ;;  %15534 = vmatprep.subr.bf16.mxu1 %v16870_v31  ;;  %v11906_v53 = vmax.f32 %v11434_v44, 0.0  ;;  %15574 = vmatprep.subr.bf16.mxu0 %v16871_v41  ;;  %v16882_v41 = vld [vmem:[%s21672_s12 + $0x778] sm:$0xff]  }
0x1fe2   :  { %v11922_v35 = vmax.f32 %v11438_v59, 0.0  ;;  %v11924_v40 = vmax.f32 %v11511_v55, 0.0  ;;  %v11985_v47 = vpack.c.bf16 %v11921_v2, %v11905_v12  ;;  %v11987_v57 = vpack.c.bf16 %v11923_v26, %v11907_v46  ;;  %v16883_v26 = vld [vmem:[%s21672_s12 + $0x7f8] sm:$0xff]   ;;  %v16886_v46 = vld [vmem:[%s21672_s12 + $0x770] sm:$0xff]  }
0x1fe3   :  { %v11549_v25 = vpop.f32.mrf.mxu1  ;;  %v11622_v15 = vpop.f32.mrf.mxu0  ;;  %v11548_v58 = vadd.f32 %v11547_v20, %v21179_v48  ;;  %v11621_v63 = vadd.f32 %v11620_v33, %v21871_v9  ;;  %v16885_v12 = vld [vmem:[%s21672_s12 + $0x7b8] sm:$0xff]  }
0x1fe4   :  { %v11986_v39 = vpack.c.bf16 %v11922_v35, %v11906_v53  ;;  %v11988_v17 = vpack.c.bf16 %v11924_v40, %v11908_v32  ;;  %15535 = vmatpush3.bf16.msra.mxu1 %v16872_v23  ;;  %v11550_v4 = vadd.f32 %v11549_v25, %v21869_v61  ;;  %15575 = vmatpush3.bf16.msra.mxu0 %v16873_v21  ;;  %v16884_v21 = vld [vmem:[%s21672_s12 + $0x738] sm:$0xff]  }
0x1fe5   :  { %v11551_v37 = vpop.f32.mrf.mxu1  ;;  %v11624_v28 = vpop.f32.mrf.mxu0  ;;  %15536 = vmatprep.subr.bf16.mxu1 %v16874_v0  ;;  %v11623_v10 = vadd.f32 %v11622_v15, %v21870_v27  ;;  %15576 = vmatprep.subr.bf16.mxu0 %v16875_v29  ;;  %v11813_v59 = vmax.f32 %v11548_v58, 0.0  ;;  %v11815_v55 = vmax.f32 %v11621_v63, 0.0 }
0x1fe6   :  { %v11552_v62 = vadd.f32 %v11551_v37, %v21179_v48  ;;  %v11625_v7 = vadd.f32 %v11624_v28, %v21871_v9  ;;  %13216 = vmatprep.mubr.bf16.mxu1 %v11986_v39  ;;  %13281 = vmatprep.mubr.bf16.mxu0 %v11988_v17  ;;  %v11814_v43 = vmax.f32 %v11550_v4, 0.0  ;;  %v16887_v39 = vld [vmem:[%s21672_s12 + $0x7f0] sm:$0xff]  }
0x1fe7   :  { %v11553_v11 = vpop.f32.mrf.mxu1  ;;  %v11626_v36 = vpop.f32.mrf.mxu0  ;;  %13217 = vmatmul.mubr.bf16.gmra.mxu1 %v11985_v47  ;;  %13282 = vmatmul.mubr.bf16.gmra.mxu0 %v11987_v57  ;;  %v11816_v22 = vmax.f32 %v11623_v10, 0.0  ;;  %v16888_v37 = vld [vmem:[%s21672_s12 + $0x730] sm:$0xff]  }
0x1fe8   :  { %v11554_v44 = vadd.f32 %v11553_v11, %v21869_v61  ;;  %v11627_v5 = vadd.f32 %v11626_v36, %v21870_v27  ;;  %15537 = vmatpush3.bf16.msra.mxu1 %v16876_v54  ;;  %v11829_v38 = vmax.f32 %v11552_v62, 0.0  ;;  %v11831_v31 = vmax.f32 %v11625_v7, 0.0  ;;  %15577 = vmatpush3.bf16.msra.mxu0 %v16877_v34  ;;  %v16889_v62 = vld [vmem:[%s21672_s12 + $0x7b0] sm:$0xff]   ;;  %v16890_v7 = vld [vmem:[%s21672_s12 + $0x768] sm:$0xff]  }
0x1fe9   :  { %v11557_v24 = vpop.f32.mrf.mxu1  ;;  %v11630_v19 = vpop.f32.mrf.mxu0  ;;  %15538 = vmatprep.subr.bf16.mxu1 %v16878_v1  ;;  %15578 = vmatprep.subr.bf16.mxu0 %v16879_v3 }
0x1fea   :  { %v11830_v49 = vmax.f32 %v11554_v44, 0.0  ;;  %v11832_v6 = vmax.f32 %v11627_v5, 0.0  ;;  %v11941_v0 = vpack.c.bf16 %v11829_v38, %v11813_v59  ;;  %v11943_v53 = vpack.c.bf16 %v11831_v31, %v11815_v55  ;;  %v16891_v38 = vld [vmem:[%s21672_s12 + $0x7e8] sm:$0xff]   ;;  %v16894_v59 = vld [vmem:[%s21672_s12 + $0x760] sm:$0xff]  }
0x1feb   :  { %v11559_v23 = vpop.f32.mrf.mxu1  ;;  %v11632_v2 = vpop.f32.mrf.mxu0  ;;  %v11558_v17 = vadd.f32 %v11557_v24, %v21179_v48  ;;  %v11631_v29 = vadd.f32 %v11630_v19, %v21871_v9  ;;  %v16892_v19 = vld [vmem:[%s21672_s12 + $0x728] sm:$0xff]  }
0x1fec   :  { %v11942_v20 = vpack.c.bf16 %v11830_v49, %v11814_v43  ;;  %v11944_v33 = vpack.c.bf16 %v11832_v6, %v11816_v22  ;;  %15539 = vmatpush3.bf16.msra.mxu1 %v16880_v56  ;;  %v11560_v32 = vadd.f32 %v11559_v23, %v21869_v61  ;;  %15579 = vmatpush3.bf16.msra.mxu0 %v16881_v18  ;;  %v16893_v6 = vld [vmem:[%s21672_s12 + $0x7a8] sm:$0xff]  }
0x1fed   :  { %v11561_v35 = vpop.f32.mrf.mxu1  ;;  %v11634_v40 = vpop.f32.mrf.mxu0  ;;  %15604 = vmatprep.subr.bf16.mxu1 %v16882_v41  ;;  %v11633_v8 = vadd.f32 %v11632_v2, %v21870_v27  ;;  %15644 = vmatprep.subr.bf16.mxu0 %v16883_v26  ;;  %v11845_v36 = vmax.f32 %v11558_v17, 0.0  ;;  %v11847_v44 = vmax.f32 %v11631_v29, 0.0  ;;  %v16895_v26 = vld [vmem:[%s21672_s12 + $0x7e0] sm:$0xff]  }
0x1fee   :  { %v11562_v25 = vadd.f32 %v11561_v35, %v21179_v48  ;;  %v11635_v15 = vadd.f32 %v11634_v40, %v21871_v9  ;;  %13322 = vmatprep.mubr.bf16.mxu1 %v11942_v20  ;;  %13387 = vmatprep.mubr.bf16.mxu0 %v11944_v33  ;;  %v11846_v3 = vmax.f32 %v11560_v32, 0.0  ;;  %v16896_v35 = vld [vmem:[%s21672_s12 + $0x720] sm:$0xff]  }
0x1fef   :  { %v11563_v54 = vpop.f32.mrf.mxu1  ;;  %v11636_v47 = vpop.f32.mrf.mxu0  ;;  %13323 = vmatmul.mubr.bf16.vlgmr.msra.gmra.mxu1 %v11941_v0  ;;  %13388 = vmatmul.mubr.bf16.vlgmr.msra.gmra.mxu0 %v11943_v53  ;;  %v11848_v58 = vmax.f32 %v11633_v8, 0.0 }
0x1ff0   :  { %v11564_v57 = vadd.f32 %v11563_v54, %v21869_v61  ;;  %v11637_v4 = vadd.f32 %v11636_v47, %v21870_v27  ;;  %15605 = vmatpush3.bf16.msra.mxu1 %v16884_v21  ;;  %v11861_v28 = vmax.f32 %v11562_v25, 0.0  ;;  %v11863_v34 = vmax.f32 %v11635_v15, 0.0  ;;  %15645 = vmatpush3.bf16.msra.mxu0 %v16885_v12  ;;  %v16897_v25 = vld [vmem:[%s21672_s12 + $0x7a0] sm:$0xff]   ;;  %v16898_v15 = vld [vmem:[%s21672_s12 + $0x758] sm:$0xff]  }
0x1ff1   :  { %v11567_v1 = vpop.f32.mrf.mxu1  ;;  %v11640_v10 = vpop.f32.mrf.mxu0  ;;  %15606 = vmatprep.subr.bf16.mxu1 %v16886_v46  ;;  %15646 = vmatprep.subr.bf16.mxu0 %v16887_v39 }
0x1ff2   :  { %v11862_v63 = vmax.f32 %v11564_v57, 0.0  ;;  %v11864_v11 = vmax.f32 %v11637_v4, 0.0  ;;  %v11957_v18 = vpack.c.bf16 %v11861_v28, %v11845_v36  ;;  %v11959_v41 = vpack.c.bf16 %v11863_v34, %v11847_v44  ;;  %v16899_v28 = vld [vmem:[%s21672_s12 + $0x7d8] sm:$0xff]   ;;  %v16902_v36 = vld [vmem:[%s21672_s12 + $0x750] sm:$0xff]  }
0x1ff3   :  { %v11569_v5 = vpop.f32.mrf.mxu1  ;;  %v11642_v56 = vpop.f32.mrf.mxu0  ;;  %v11568_v20 = vadd.f32 %v11567_v1, %v21179_v48  ;;  %v11641_v33 = vadd.f32 %v11640_v10, %v21871_v9  ;;  %v16900_v10 = vld [vmem:[%s21672_s12 + $0x718] sm:$0xff]  }
0x1ff4   :  { %v11958_v31 = vpack.c.bf16 %v11862_v63, %v11846_v3  ;;  %v11960_v24 = vpack.c.bf16 %v11864_v11, %v11848_v58  ;;  %15607 = vmatpush3.bf16.msra.mxu1 %v16888_v37  ;;  %v11570_v43 = vadd.f32 %v11569_v5, %v21869_v61  ;;  %15647 = vmatpush3.bf16.msra.mxu0 %v16889_v62  ;;  %v16901_v11 = vld [vmem:[%s21672_s12 + $0x798] sm:$0xff]  }
0x1ff5   :  { %v11571_v22 = vpop.f32.mrf.mxu1  ;;  %v11644_v49 = vpop.f32.mrf.mxu0  ;;  %15608 = vmatprep.subr.bf16.mxu1 %v16890_v7  ;;  %v11643_v55 = vadd.f32 %v11642_v56, %v21870_v27  ;;  %15648 = vmatprep.subr.bf16.mxu0 %v16891_v38  ;;  %v11877_v47 = vmax.f32 %v11568_v20, 0.0  ;;  %v11879_v57 = vmax.f32 %v11641_v33, 0.0  ;;  %v16903_v38 = vld [vmem:[%s21672_s12 + $0x7d0] sm:$0xff]  }
0x1ff6   :  { %v11572_v23 = vadd.f32 %v11571_v22, %v21179_v48  ;;  %v11645_v2 = vadd.f32 %v11644_v49, %v21871_v9  ;;  %13330 = vmatprep.mubr.bf16.mxu1 %v11958_v31  ;;  %13395 = vmatprep.mubr.bf16.mxu0 %v11960_v24  ;;  %v11878_v39 = vmax.f32 %v11570_v43, 0.0  ;;  %v16904_v22 = vld [vmem:[%s21672_s12 + $0x710] sm:$0xff]  }
0x1ff7   :  { %v11573_v21 = vpop.f32.mrf.mxu1  ;;  %v11646_v0 = vpop.f32.mrf.mxu0  ;;  %13331 = vmatmul.mubr.bf16.gmra.mxu1 %v11957_v18  ;;  %13396 = vmatmul.mubr.bf16.gmra.mxu0 %v11959_v41  ;;  %v11880_v17 = vmax.f32 %v11643_v55, 0.0 }
0x1ff8   :  { %v11574_v53 = vadd.f32 %v11573_v21, %v21869_v61  ;;  %v11647_v32 = vadd.f32 %v11646_v0, %v21870_v27  ;;  %15609 = vmatpush3.bf16.msra.mxu1 %v16892_v19  ;;  %v11893_v40 = vmax.f32 %v11572_v23, 0.0  ;;  %v11895_v12 = vmax.f32 %v11645_v2, 0.0  ;;  %15649 = vmatpush3.bf16.msra.mxu0 %v16893_v6  ;;  %v16907_v0 = vld [vmem:[%s21672_s12 + $0x7c8] sm:$0xff]  }
0x1ff9   :  { %v11577_v46 = vpop.f32.mrf.mxu1  ;;  %v11650_v8 = vpop.f32.mrf.mxu0  ;;  %15610 = vmatprep.subr.bf16.mxu1 %v16894_v59  ;;  %15650 = vmatprep.subr.bf16.mxu0 %v16895_v26 }
0x1ffa   :  { %v11894_v29 = vmax.f32 %v11574_v53, 0.0  ;;  %v11896_v54 = vmax.f32 %v11647_v32, 0.0  ;;  %v11973_v62 = vpack.c.bf16 %v11893_v40, %v11877_v47  ;;  %v11975_v7 = vpack.c.bf16 %v11895_v12, %v11879_v57  ;;  %v21874_v47 = vld [vmem:[#allocation19_spill] sm:$0xff] }
0x1ffb   :  { %v11579_v4 = vpop.f32.mrf.mxu1  ;;  %v11652_v37 = vpop.f32.mrf.mxu0  ;;  %v11578_v31 = vadd.f32 %v11577_v46, %v21179_v48  ;;  %v11651_v24 = vadd.f32 %v11650_v8, %v21871_v9  ;;  %v21872_v46 = vld [vmem:[#allocation16_spill] sm:$0xff] }
0x1ffc   :  { %v11974_v34 = vpack.c.bf16 %v11894_v29, %v11878_v39  ;;  %v11976_v1 = vpack.c.bf16 %v11896_v54, %v11880_v17  ;;  %15611 = vmatpush3.bf16.msra.mxu1 %v16896_v35  ;;  %v11580_v3 = vadd.f32 %v11579_v4, %v21869_v61  ;;  %15651 = vmatpush3.bf16.msra.mxu0 %v16897_v25  ;;  %v16908_v35 = vld [vmem:[%s21672_s12 + $0x708] sm:$0xff]   ;;  %v16910_v17 = vld [vmem:[%s21672_s12 + $0x740] sm:$0xff]  }
0x1ffd   :  { %v11581_v58 = vpop.f32.mrf.mxu1  ;;  %v11654_v63 = vpop.f32.mrf.mxu0  ;;  %15612 = vmatprep.subr.bf16.mxu1 %v16898_v15  ;;  %v11653_v44 = vadd.f32 %v11652_v37, %v21870_v27  ;;  %15652 = vmatprep.subr.bf16.mxu0 %v16899_v28  ;;  %v11909_v26 = vmax.f32 %v11578_v31, 0.0  ;;  %v11911_v20 = vmax.f32 %v11651_v24, 0.0  ;;  %v16909_v39 = vld [vmem:[%s21672_s12 + $0x788] sm:$0xff]   ;;  %v21873_v29 = vld [vmem:[#allocation22_spill] sm:$0xff] }
0x1ffe   :  { %v11582_v5 = vadd.f32 %v11581_v58, %v21179_v48  ;;  %v11655_v56 = vadd.f32 %v11654_v63, %v21871_v9  ;;  %13338 = vmatprep.mubr.bf16.mxu1 %v11974_v34  ;;  %13403 = vmatprep.mubr.bf16.mxu0 %v11976_v1  ;;  %v16905_v9 = vld [vmem:[%s21672_s12 + $0x790] sm:$0xff]   ;;  %v16911_v28 = vld [vmem:[%s21672_s12 + $0x7c0] sm:$0xff]  }
0x1fff   :  { %v11583_v19 = vpop.f32.mrf.mxu1  ;;  %v11656_v18 = vpop.f32.mrf.mxu0  ;;  %13339 = vmatmul.mubr.bf16.gmra.mxu1 %v11973_v62  ;;  %13404 = vmatmul.mubr.bf16.gmra.mxu0 %v11975_v7  ;;  %v11912_v55 = vmax.f32 %v11653_v44, 0.0  ;;  %v21875_v4 = vld [vmem:[#allocation24_spill] sm:$0xff]  ;;  %v16912_v58 = vld [vmem:[%s21672_s12 + $0x700] sm:$0xff]  }
0x2000   :  { %v11584_v41 = vadd.f32 %v11583_v19, %v21869_v61  ;;  %v11657_v43 = vadd.f32 %v11656_v18, %v21870_v27  ;;  %15613 = vmatpush3.bf16.msra.mxu1 %v16900_v10  ;;  %v11925_v49 = vmax.f32 %v11582_v5, 0.0  ;;  %v11927_v6 = vmax.f32 %v11655_v56, 0.0  ;;  %15653 = vmatpush3.bf16.msra.mxu0 %v16901_v11  ;;  %v16906_v61 = vld [vmem:[%s21672_s12 + $0x748] sm:$0xff]   ;;  %v16913_v5 = vld [vmem:[%s21672_s12 + $0x780] sm:$0xff]  }
0x2001   :  { %v11693_v48 = vpop.f32.mrf.mxu1  ;;  %v11766_v59 = vpop.f32.mrf.mxu0  ;;  %15614 = vmatprep.subr.bf16.mxu1 %v16902_v36  ;;  %v11910_v27 = vmax.f32 %v11580_v3, 0.0  ;;  %15654 = vmatprep.subr.bf16.mxu0 %v16903_v38 }
0x2002   :  { %v11926_v23 = vmax.f32 %v11584_v41, 0.0  ;;  %v11928_v2 = vmax.f32 %v11657_v43, 0.0  ;;  %v11989_v40 = vpack.c.bf16 %v11925_v49, %v11909_v26  ;;  %v11991_v12 = vpack.c.bf16 %v11927_v6, %v11911_v20 }
0x2003   :  { %v11695_v33 = vpop.f32.mrf.mxu1  ;;  %v11768_v21 = vpop.f32.mrf.mxu0  ;;  %v11694_v34 = vadd.f32 %v11693_v48, %v21874_v47  ;;  %v11767_v1 = vadd.f32 %v11766_v59, %v21875_v4 }
0x2004   :  { %v11990_v53 = vpack.c.bf16 %v11926_v23, %v11910_v27  ;;  %v11992_v32 = vpack.c.bf16 %v11928_v2, %v11912_v55  ;;  %15615 = vmatpush3.bf16.msra.mxu1 %v16904_v22  ;;  %v11696_v8 = vadd.f32 %v11695_v33, %v21872_v46  ;;  %15655 = vmatpush3.bf16.msra.mxu0 %v16905_v9 }
0x2005   :  { %v11697_v25 = vpop.f32.mrf.mxu1  ;;  %v11770_v15 = vpop.f32.mrf.mxu0  ;;  %15616 = vmatprep.subr.bf16.mxu1 %v16906_v61  ;;  %v11769_v54 = vadd.f32 %v11768_v21, %v21873_v29  ;;  %15656 = vmatprep.subr.bf16.mxu0 %v16907_v0  ;;  %v11817_v19 = vmax.f32 %v11694_v34, 0.0  ;;  %v11819_v18 = vmax.f32 %v11767_v1, 0.0 }
0x2006   :  { %v11698_v57 = vadd.f32 %v11697_v25, %v21874_v47  ;;  %v11771_v37 = vadd.f32 %v11770_v15, %v21875_v4  ;;  %13346 = vmatprep.mubr.bf16.mxu1 %v11990_v53  ;;  %13411 = vmatprep.mubr.bf16.mxu0 %v11992_v32  ;;  %v11818_v56 = vmax.f32 %v11696_v8, 0.0 }
0x2007   :  { %v11699_v10 = vpop.f32.mrf.mxu1  ;;  %v11772_v62 = vpop.f32.mrf.mxu0  ;;  %13347 = vmatmul.mubr.bf16.gmra.mxu1 %v11989_v40  ;;  %13412 = vmatmul.mubr.bf16.gmra.mxu0 %v11991_v12  ;;  %v11820_v38 = vmax.f32 %v11769_v54, 0.0 }
0x2008   :  { %v11700_v7 = vadd.f32 %v11699_v10, %v21872_v46  ;;  %v11773_v3 = vadd.f32 %v11772_v62, %v21873_v29  ;;  %15617 = vmatpush3.bf16.msra.mxu1 %v16908_v35  ;;  %v11833_v63 = vmax.f32 %v11698_v57, 0.0  ;;  %v11835_v11 = vmax.f32 %v11771_v37, 0.0  ;;  %15657 = vmatpush3.bf16.msra.mxu0 %v16909_v39 }
0x2009   :  { %v11703_v36 = vpop.f32.mrf.mxu1  ;;  %v11776_v44 = vpop.f32.mrf.mxu0  ;;  %15618 = vmatprep.subr.bf16.mxu1 %v16910_v17  ;;  %15658 = vmatprep.subr.bf16.mxu0 %v16911_v28 }
0x200a   :  { %v11834_v31 = vmax.f32 %v11700_v7, 0.0  ;;  %v11836_v24 = vmax.f32 %v11773_v3, 0.0  ;;  %v11945_v6 = vpack.c.bf16 %v11833_v63, %v11817_v19  ;;  %v11947_v48 = vpack.c.bf16 %v11835_v11, %v11819_v18 }
0x200b   :  { %v11705_v41 = vpop.f32.mrf.mxu1  ;;  %v11778_v43 = vpop.f32.mrf.mxu0  ;;  %v11704_v2 = vadd.f32 %v11703_v36, %v21874_v47  ;;  %v11777_v26 = vadd.f32 %v11776_v44, %v21875_v4 }
0x200c   :  { %v11946_v22 = vpack.c.bf16 %v11834_v31, %v11818_v56  ;;  %v11948_v49 = vpack.c.bf16 %v11836_v24, %v11820_v38  ;;  %15619 = vmatpush3.bf16.msra.mxu1 %v16912_v58  ;;  %v11706_v59 = vadd.f32 %v11705_v41, %v21872_v46  ;;  %15659 = vmatpush3.bf16.msra.mxu0 %v16913_v5 }
0x200d   :  { %v11707_v9 = vpop.f32.mrf.mxu1  ;;  %v11780_v61 = vpop.f32.mrf.mxu0  ;;  %16502 = vmatprep.subr.mxu1 %v21838_v30  ;;  %v11779_v27 = vadd.f32 %v11778_v43, %v21873_v29  ;;  %v11849_v39 = vmax.f32 %v11704_v2, 0.0  ;;  %v11851_v17 = vmax.f32 %v11777_v26, 0.0 }
0x200e   :  { %v11708_v55 = vadd.f32 %v11707_v9, %v21874_v47  ;;  %v11781_v23 = vadd.f32 %v11780_v61, %v21875_v4  ;;  %13452 = vmatprep.mubr.bf16.mxu1 %v11946_v22  ;;  %13517 = vmatprep.mubr.bf16.mxu0 %v11948_v49  ;;  %v11850_v12 = vmax.f32 %v11706_v59, 0.0 }
0x200f   :  { %v11709_v20 = vpop.f32.mrf.mxu1  ;;  %v11782_v33 = vpop.f32.mrf.mxu0  ;;  %13453 = vmatmul.mubr.bf16.vlgmr.msra.gmra.mxu1 %v11945_v6  ;;  %13518 = vmatmul.mubr.bf16.vlgmr.msra.gmra.mxu0 %v11947_v48  ;;  %v11852_v8 = vmax.f32 %v11779_v27, 0.0 }
0x2010   :  { %v11710_v21 = vadd.f32 %v11709_v20, %v21872_v46  ;;  %v11783_v0 = vadd.f32 %v11782_v33, %v21873_v29  ;;  %v11865_v53 = vmax.f32 %v11708_v55, 0.0  ;;  %v11867_v32 = vmax.f32 %v11781_v23, 0.0 }
0x2011   :  { %v11713_v35 = vpop.f32.mrf.mxu1  ;;  %v11786_v40 = vpop.f32.mrf.mxu0 }
0x2012   :  { %v11866_v25 = vmax.f32 %v11710_v21, 0.0  ;;  %v11868_v15 = vmax.f32 %v11783_v0, 0.0  ;;  %v11961_v34 = vpack.c.bf16 %v11865_v53, %v11849_v39  ;;  %v11963_v1 = vpack.c.bf16 %v11867_v32, %v11851_v17 }
0x2013   :  { %v11715_v54 = vpop.f32.mrf.mxu1  ;;  %v11788_v57 = vpop.f32.mrf.mxu0  ;;  %v11714_v11 = vadd.f32 %v11713_v35, %v21874_v47  ;;  %v11787_v36 = vadd.f32 %v11786_v40, %v21875_v4 }
0x2014   :  { %v11962_v37 = vpack.c.bf16 %v11866_v25, %v11850_v12  ;;  %v11964_v28 = vpack.c.bf16 %v11868_v15, %v11852_v8  ;;  %v11716_v10 = vadd.f32 %v11715_v54, %v21872_v46  ;;  %v11789_v3 = vadd.f32 %v11788_v57, %v21873_v29 }
0x2015   :  { %v11717_v62 = vpop.f32.mrf.mxu1  ;;  %v11790_v7 = vpop.f32.mrf.mxu0  ;;  %v11881_v6 = vmax.f32 %v11714_v11, 0.0  ;;  %v11883_v48 = vmax.f32 %v11787_v36, 0.0 }
0x2016   :  { %v11718_v58 = vadd.f32 %v11717_v62, %v21874_v47  ;;  %v11791_v63 = vadd.f32 %v11790_v7, %v21875_v4  ;;  %13460 = vmatprep.mubr.bf16.mxu1 %v11962_v37  ;;  %13525 = vmatprep.mubr.bf16.mxu0 %v11964_v28  ;;  %v11882_v41 = vmax.f32 %v11716_v10, 0.0  ;;  %v11884_v43 = vmax.f32 %v11789_v3, 0.0 }
0x2017   :  { %v11719_v44 = vpop.f32.mrf.mxu1  ;;  %v11792_v5 = vpop.f32.mrf.mxu0  ;;  %13461 = vmatmul.mubr.bf16.gmra.mxu1 %v11961_v34  ;;  %13526 = vmatmul.mubr.bf16.gmra.mxu0 %v11963_v1 }
0x2018   :  { %v11720_v56 = vadd.f32 %v11719_v44, %v21872_v46  ;;  %v11793_v38 = vadd.f32 %v11792_v5, %v21873_v29  ;;  %v11897_v31 = vmax.f32 %v11718_v58, 0.0  ;;  %v11899_v24 = vmax.f32 %v11791_v63, 0.0 }
0x2019   :  { %v11723_v19 = vpop.f32.mrf.mxu1  ;;  %v11796_v18 = vpop.f32.mrf.mxu0 }
0x201a   :  { %v11898_v22 = vmax.f32 %v11720_v56, 0.0  ;;  %v11900_v49 = vmax.f32 %v11793_v38, 0.0  ;;  %v11977_v55 = vpack.c.bf16 %v11897_v31, %v11881_v6  ;;  %v11979_v23 = vpack.c.bf16 %v11899_v24, %v11883_v48 }
0x201b   :  { %v11725_v59 = vpop.f32.mrf.mxu1  ;;  %v11798_v9 = vpop.f32.mrf.mxu0  ;;  %v11724_v53 = vadd.f32 %v11723_v19, %v21874_v47  ;;  %v11797_v40 = vadd.f32 %v11796_v18, %v21875_v4 }
0x201c   :  { %v11978_v61 = vpack.c.bf16 %v11898_v22, %v11882_v41  ;;  %v11980_v27 = vpack.c.bf16 %v11900_v49, %v11884_v43  ;;  %v11726_v2 = vadd.f32 %v11725_v59, %v21872_v46  ;;  %v11799_v33 = vadd.f32 %v11798_v9, %v21873_v29 }
0x201d   :  { %v11727_v26 = vpop.f32.mrf.mxu1  ;;  %v11800_v20 = vpop.f32.mrf.mxu0  ;;  %v11913_v37 = vmax.f32 %v11724_v53, 0.0  ;;  %v11915_v28 = vmax.f32 %v11797_v40, 0.0 }
0x201e   :  { %v11728_v21 = vadd.f32 %v11727_v26, %v21874_v47  ;;  %v11801_v0 = vadd.f32 %v11800_v20, %v21875_v4  ;;  %13468 = vmatprep.mubr.bf16.mxu1 %v11978_v61  ;;  %13533 = vmatprep.mubr.bf16.mxu0 %v11980_v27  ;;  %v11914_v25 = vmax.f32 %v11726_v2, 0.0  ;;  %v11916_v39 = vmax.f32 %v11799_v33, 0.0  ;;  %v21368_v4 = vld [vmem:[%s21673_s13 + $0x1] ss:$0 sm:$0xff] }
0x201f   :  { %v11729_v32 = vpop.f32.mrf.mxu1  ;;  %v11802_v35 = vpop.f32.mrf.mxu0  ;;  %13469 = vmatmul.mubr.bf16.gmra.mxu1 %v11977_v55  ;;  %13534 = vmatmul.mubr.bf16.gmra.mxu0 %v11979_v23 }
0x2020   :  { %v11730_v12 = vadd.f32 %v11729_v32, %v21872_v46  ;;  %v11803_v8 = vadd.f32 %v11802_v35, %v21873_v29  ;;  %v11929_v15 = vmax.f32 %v11728_v21, 0.0  ;;  %v11931_v17 = vmax.f32 %v11801_v0, 0.0 }
0x2022   :  { %v11930_v54 = vmax.f32 %v11730_v12, 0.0  ;;  %v11932_v57 = vmax.f32 %v11803_v8, 0.0  ;;  %v11993_v1 = vpack.c.bf16 %v11929_v15, %v11913_v37  ;;  %v11995_v10 = vpack.c.bf16 %v11931_v17, %v11915_v28 }
0x2024   :  { %v11994_v34 = vpack.c.bf16 %v11930_v54, %v11914_v25  ;;  %v11996_v47 = vpack.c.bf16 %v11932_v57, %v11916_v39 }
0x2026   :  { %13476 = vmatprep.mubr.bf16.mxu1 %v11994_v34  ;;  %13541 = vmatprep.mubr.bf16.mxu0 %v11996_v47 }
0x2027   :  { %13477 = vmatmul.mubr.bf16.gmra.mxu1 %v11993_v1  ;;  %13542 = vmatmul.mubr.bf16.gmra.mxu0 %v11995_v10 }
0x2028   :  { %16504 = vmatprep.mubr.msk.f32.mxu1 %vm17237_vm1, %v21838_v30 }
0x2042   :  { %v15380_v46 = vpop.f32.mrf.mxu1  ;;  %v15420_v29 = vpop.f32.mrf.mxu0 }
0x2044   :  { %v15381_v62 = vpop.f32.mrf.mxu1  ;;  %v15421_v7 = vpop.f32.mrf.mxu0 }
0x2045   :  { %v15382_v3 = vadd.f32 %v15381_v62, %v15380_v46  ;;  %v15422_v58 = vadd.f32 %v15421_v7, %v15420_v29 }
0x2046   :  { %v15383_v63 = vpop.f32.mrf.mxu1  ;;  %v15423_v11 = vpop.f32.mrf.mxu0 }
0x2047   :  { %v13065_v36 = vadd.f32 %v15382_v3, %v21368_v4 }
0x2048   :  { %v15384_v44 = vpop.f32.mrf.mxu1  ;;  %v15424_v5 = vpop.f32.mrf.mxu0 }
0x2049   :  { %v21371_v56 = vadd.f32 %v15422_v58, %v13065_v36  ;;  %v15385_v30 = vadd.f32 %v15384_v44, %v15383_v63  ;;  %v15425_v38 = vadd.f32 %v15424_v5, %v15423_v11 }
0x204a   :  { %v15386_v31 = vpop.f32.mrf.mxu1  ;;  %v15426_v24 = vpop.f32.mrf.mxu0 }
0x204b   :  { %v13068_v19 = vadd.f32 %v15385_v30, %v21368_v4 }
0x204c   :  { %v15387_v18 = vpop.f32.mrf.mxu1  ;;  %v15427_v41 = vpop.f32.mrf.mxu0 }
0x204d   :  { %v21374_v43 = vadd.f32 %v15425_v38, %v13068_v19  ;;  %v15388_v22 = vadd.f32 %v15387_v18, %v15386_v31  ;;  %v15428_v49 = vadd.f32 %v15427_v41, %v15426_v24 }
0x204e   :  { %v15389_v6 = vpop.f32.mrf.mxu1  ;;  %v15429_v48 = vpop.f32.mrf.mxu0 }
0x204f   :  { %v13073_v59 = vadd.f32 %v15388_v22, %v21368_v4 }
0x2050   :  { %v15390_v9 = vpop.f32.mrf.mxu1  ;;  %v15430_v61 = vpop.f32.mrf.mxu0 }
0x2051   :  { %v21377_v27 = vadd.f32 %v15428_v49, %v13073_v59  ;;  %v15391_v55 = vadd.f32 %v15390_v9, %v15389_v6  ;;  %v15431_v23 = vadd.f32 %v15430_v61, %v15429_v48 }
0x2053   :  { %v13076_v2 = vadd.f32 %v15391_v55, %v21368_v4 }
0x2055   :  { %v21380_v26 = vadd.f32 %v15431_v23, %v13076_v2 }
0x207f   :  { %v15392_v20 = vpop.f32.mrf.mxu1  ;;  %v15432_v33 = vpop.f32.mrf.mxu0 }
0x2081   :  { %v15393_v21 = vpop.f32.mrf.mxu1  ;;  %v15433_v0 = vpop.f32.mrf.mxu0 }
0x2082   :  { %v15394_v53 = vadd.f32 %v15393_v21, %v15392_v20  ;;  %v15434_v32 = vadd.f32 %v15433_v0, %v15432_v33 }
0x2083   :  { %v15395_v35 = vpop.f32.mrf.mxu1  ;;  %v15435_v40 = vpop.f32.mrf.mxu0 }
0x2084   :  { %v13081_v12 = vadd.f32 %v15394_v53, %v21368_v4 }
0x2085   :  { %v15396_v8 = vpop.f32.mrf.mxu1  ;;  %v15436_v25 = vpop.f32.mrf.mxu0 }
0x2086   :  { %v21383_v15 = vadd.f32 %v15434_v32, %v13081_v12  ;;  %v15397_v39 = vadd.f32 %v15396_v8, %v15395_v35  ;;  %v15437_v17 = vadd.f32 %v15436_v25, %v15435_v40 }
0x2087   :  { %v15398_v54 = vpop.f32.mrf.mxu1  ;;  %v15438_v57 = vpop.f32.mrf.mxu0 }
0x2088   :  { %v13084_v37 = vadd.f32 %v15397_v39, %v21368_v4 }
0x2089   :  { %v15399_v28 = vpop.f32.mrf.mxu1  ;;  %v15439_v34 = vpop.f32.mrf.mxu0 }
0x208a   :  { %v21386_v47 = vadd.f32 %v15437_v17, %v13084_v37  ;;  %v15400_v1 = vadd.f32 %v15399_v28, %v15398_v54  ;;  %v15440_v10 = vadd.f32 %v15439_v34, %v15438_v57 }
0x208b   :  { %v15401_v46 = vpop.f32.mrf.mxu1  ;;  %v15441_v29 = vpop.f32.mrf.mxu0 }
0x208c   :  { %v13089_v62 = vadd.f32 %v15400_v1, %v21368_v4 }
0x208d   :  { %v15402_v7 = vpop.f32.mrf.mxu1  ;;  %v15442_v3 = vpop.f32.mrf.mxu0 }
0x208e   :  { %v21389_v58 = vadd.f32 %v15440_v10, %v13089_v62  ;;  %v15403_v63 = vadd.f32 %v15402_v7, %v15401_v46  ;;  %v15443_v11 = vadd.f32 %v15442_v3, %v15441_v29 }
0x208f   :  { %v15460_v36 = vpop.f32.mrf.mxu1  ;;  %v21391_v44 = vpop.f32.mrf.mxu0 }
0x2090   :  { %21876 = vst [vmem:[#allocation33_spill] sm:$0xff] %v21389_v58  ;;  %v13092_v5 = vadd.f32 %v15403_v63, %v21368_v4 }
0x2091   :  { %v15461_v30 = vpop.f32.mrf.mxu1  ;;  %v15501_v38 = vpop.f32.mrf.mxu0 }
0x2092   :  { %v21394_v31 = vadd.f32 %v15443_v11, %v13092_v5 }
0x2093   :  { %v15463_v24 = vpop.f32.mrf.mxu1  ;;  %v21396_v19 = vpop.f32.mrf.mxu0 }
0x2094   :  { %21877 = vst [vmem:[#allocation26_spill] sm:$0xff] %v21394_v31 }
0x2095   :  { %v15464_v18 = vpop.f32.mrf.mxu1  ;;  %v21398_v41 = vpop.f32.mrf.mxu0 }
0x2097   :  { %v15466_v22 = vpop.f32.mrf.mxu1  ;;  %v21400_v49 = vpop.f32.mrf.mxu0 }
0x2099   :  { %v15467_v6 = vpop.f32.mrf.mxu1  ;;  %v21402_v48 = vpop.f32.mrf.mxu0 }
0x209b   :  { %v21404_v59 = vpop.f32.mrf.mxu1  ;;  %v21406_v9 = vpop.f32.mrf.mxu0 }
0x209d   :  { %v15470_v4 = vpop.f32.mrf.mxu1  ;;  %v21408_v61 = vpop.f32.mrf.mxu0 }
0x209f   :  { %v21410_v55 = vpop.f32.mrf.mxu1  ;;  %v21412_v23 = vpop.f32.mrf.mxu0 }
0x20a1   :  { %v21414_v2 = vpop.f32.mrf.mxu1  ;;  %v21416_v20 = vpop.f32.mrf.mxu0 }
0x20a3   :  { %v21418_v33 = vpop.f32.mrf.mxu1  ;;  %v21420_v21 = vpop.f32.mrf.mxu0 }
0x20a5   :  { %v21422_v0 = vpop.f32.mrf.mxu1  ;;  %v21424_v53 = vpop.f32.mrf.mxu0 }
0x20a7   :  { %v21426_v32 = vpop.f32.mrf.mxu1  ;;  %v21428_v35 = vpop.f32.mrf.mxu0 }
0x20a8   :  { %21878 = vst [vmem:[#allocation7_spill] sm:$0xff] %v21428_v35 }
0x20a9   :  { %v21430_v40 = vpop.f32.mrf.mxu1  ;;  %v21432_v12 = vpop.f32.mrf.mxu0 }
0x20aa   :  { %21879 = vst [vmem:[#allocation15_spill] sm:$0xff] %v21432_v12 }
0x20ab   :  { %v21434_v8 = vpop.f32.mrf.mxu1  ;;  %v21436_v25 = vpop.f32.mrf.mxu0 }
0x20ac   :  { %21880 = vst [vmem:[#allocation38_spill] sm:$0xff] %v21434_v8  ;;  %21881 = vst [vmem:[#allocation35_spill] sm:$0xff] %v21436_v25  ;;  %v15462_v25 = vadd.f32 %v15461_v30, %v15460_v36  ;;  %v15468_v36 = vadd.f32 %v15467_v6, %v15466_v22 }
0x20ad   :  { %v21438_v39 = vpop.f32.mrf.mxu1  ;;  %v21440_v17 = vpop.f32.mrf.mxu0 }
0x20ae   :  { %21882 = vst [vmem:[#allocation37_spill] sm:$0xff] %v21438_v39  ;;  %21883 = vst [vmem:[#allocation9_spill] sm:$0xff] %v21440_v17  ;;  %v13195_v14 = vadd.f32 %v15462_v25, %v21371_v56  ;;  %v15465_v39 = vadd.f32 %v15464_v18, %v15463_v24  ;;  %v15505_v56 = vadd.f32 %v21398_v41, %v21396_v19 }
0x20af   :  { %v15540_v54 = vpop.f32.mrf.mxu1  ;;  %v15580_v57 = vpop.f32.mrf.mxu0 }
0x20b1   :  { %v15541_v37 = vpop.f32.mrf.mxu1  ;;  %v15581_v28 = vpop.f32.mrf.mxu0 }
0x20b2   :  { %v15542_v58 = vadd.f32 %v15541_v37, %v15540_v54 }
0x20b3   :  { %v15543_v34 = vpop.f32.mrf.mxu1  ;;  %v15583_v1 = vpop.f32.mrf.mxu0 }
0x20b5   :  { %v15544_v10 = vpop.f32.mrf.mxu1  ;;  %v15584_v46 = vpop.f32.mrf.mxu0 }
0x20b6   :  { %v15545_v18 = vadd.f32 %v15544_v10, %v15543_v34 }
0x20b7   :  { %v15546_v29 = vpop.f32.mrf.mxu1  ;;  %v21442_v62 = vpop.f32.mrf.mxu0 }
0x20b9   :  { %v15547_v7 = vpop.f32.mrf.mxu1  ;;  %v21444_v3 = vpop.f32.mrf.mxu0 }
0x20bb   :  { %v15549_v63 = vpop.f32.mrf.mxu1  ;;  %v21446_v11 = vpop.f32.mrf.mxu0 }
0x20bd   :  { %v15550_v5 = vpop.f32.mrf.mxu1  ;;  %v21448_v45 = vpop.f32.mrf.mxu0 }
0x20bf   :  { %v21450_v60 = vpop.f32.mrf.mxu1  ;;  %v21452_v52 = vpop.f32.mrf.mxu0 }
0x20c0   :  { %21884 = vst [vmem:[#allocation25_spill] sm:$0xff] %v21452_v52 }
0x20c1   :  { %v21454_v13 = vpop.f32.mrf.mxu1  ;;  %v21456_v51 = vpop.f32.mrf.mxu0 }
0x20c2   :  { %21885 = vst [vmem:[#allocation17_spill] sm:$0xff] %v21456_v51  ;;  %v15502_v51 = vadd.f32 %v15501_v38, %v21391_v44  ;;  %v13203_v44 = vadd.f32 %v15468_v36, %v21377_v27  ;;  %v15471_v38 = vadd.f32 %v15470_v4, %v21404_v59  ;;  %v15474_v27 = vadd.f32 %v21414_v2, %v21410_v55 }
0x20c3   :  { %v21458_v17 = vpop.f32.mrf.mxu1  ;;  %v21460_v42 = vpop.f32.mrf.mxu0  ;;  %v15585_v59 = vadd.f32 %v15584_v46, %v15583_v1  ;;  %v15588_v55 = vadd.f32 %v21444_v3, %v21442_v62 }
0x20c4   :  { %21886 = vst [vmem:[#allocation31_spill] sm:$0xff] %v21458_v17  ;;  %21887 = vst [vmem:[#allocation27_spill] sm:$0xff] %v21460_v42  ;;  %v13260_v42 = vadd.f32 %v15502_v51, %v13195_v14  ;;  %v15582_v14 = vadd.f32 %v15581_v28, %v15580_v57  ;;  %v13206_v41 = vadd.f32 %v15471_v38, %v21380_v26 }
0x20c5   :  { %v21462_v31 = vpop.f32.mrf.mxu1  ;;  %v21464_v12 = vpop.f32.mrf.mxu0  ;;  %v15551_v28 = vadd.f32 %v15550_v5, %v15549_v63  ;;  %v15477_v26 = vadd.f32 %v21422_v0, %v21418_v33  ;;  %v13211_v1 = vadd.f32 %v15474_v27, %v21383_v15  ;;  %v15554_v33 = vadd.f32 %v21454_v13, %v21450_v60 }
0x20c6   :  { %21888 = vst [vmem:[#allocation39_spill] sm:$0xff] %v21462_v31  ;;  %21889 = vst [vmem:[#allocation28_spill] sm:$0xff] %v21464_v12  ;;  %v13198_v12 = vadd.f32 %v15465_v39, %v21374_v43  ;;  %v13325_v24 = vadd.f32 %v15542_v58, %v13260_v42  ;;  %v15508_v43 = vadd.f32 %v21402_v48, %v21400_v49 }
0x20c7   :  { %v21466_v35 = vpop.f32.mrf.mxu1  ;;  %v21469_v8 = vpop.f32.mrf.mxu0  ;;  %v15548_v39 = vadd.f32 %v15547_v7, %v15546_v29  ;;  %v15511_v49 = vadd.f32 %v21408_v61, %v21406_v9  ;;  %v13214_v38 = vadd.f32 %v15477_v26, %v21386_v47 }
0x20c8   :  { %21890 = vst [vmem:[#allocation30_spill] sm:$0xff] %v21466_v35  ;;  %v13263_v6 = vadd.f32 %v15505_v56, %v13198_v12  ;;  %v13390_v37 = vadd.f32 %v15582_v14, %v13325_v24  ;;  %v13268_v58 = vadd.f32 %v15508_v43, %v13203_v44 }
0x20c9   :  { %v21471_v52 = vpop.f32.mrf.mxu1  ;;  %v21474_v17 = vpop.f32.mrf.mxu0  ;;  %v13271_v24 = vadd.f32 %v15511_v49, %v13206_v41 }
0x20ca   :  { %v13333_v48 = vadd.f32 %v15548_v39, %v13268_v58  ;;  %v21894_v58 = vld [vmem:[#allocation33_spill] sm:$0xff] }
0x20cb   :  { %v21476_v30 = vpop.f32.mrf.mxu1  ;;  %v21479_v31 = vpop.f32.mrf.mxu0  ;;  %v13336_v5 = vadd.f32 %v15551_v28, %v13271_v24  ;;  %v21892_v47 = vld [vmem:[#allocation31_spill] sm:$0xff] }
0x20cc   :  { %21891 = vst [vmem:[#allocation29_spill] sm:$0xff] %v21479_v31  ;;  %v13328_v31 = vadd.f32 %v15545_v18, %v13263_v6  ;;  %v13398_v63 = vadd.f32 %v15588_v55, %v13333_v48  ;;  %v21899_v48 = vld [vmem:[#allocation36_spill] sm:$0xff] }
0x20cd   :  { %v21481_v35 = vpop.f32.mrf.mxu1  ;;  %v21485_v25 = vpop.f32.mrf.mxu0  ;;  %v21893_v39 = vld [vmem:[#allocation39_spill] sm:$0xff] }
0x20ce   :  { %v13393_v29 = vadd.f32 %v15585_v59, %v13328_v31  ;;  %v15514_v31 = vadd.f32 %v21416_v20, %v21412_v23  ;;  %v15591_v23 = vadd.f32 %v21448_v45, %v21446_v11 }
0x20cf   :  { %v15620_v22 = vpop.f32.mrf.mxu1  ;;  %v15660_v51 = vpop.f32.mrf.mxu0 }
0x20d0   :  { %v13401_v43 = vadd.f32 %v15591_v23, %v13336_v5  ;;  %v21908_v23 = vld [vmem:[#allocation9_spill] sm:$0xff] }
0x20d1   :  { %v15621_v54 = vpop.f32.mrf.mxu1  ;;  %v15661_v42 = vpop.f32.mrf.mxu0 }
0x20d2   :  { %v15622_v19 = vadd.f32 %v15621_v54, %v15620_v22  ;;  %v15662_v12 = vadd.f32 %v15661_v42, %v15660_v51  ;;  %v13276_v22 = vadd.f32 %v15514_v31, %v13211_v1  ;;  %v15517_v51 = vadd.f32 %v21424_v53, %v21420_v21  ;;  %v21897_v21 = vld [vmem:[#allocation25_spill] sm:$0xff]  ;;  %v21903_v31 = vld [vmem:[#allocation27_spill] sm:$0xff] }
0x20d3   :  { %v15623_v34 = vpop.f32.mrf.mxu1  ;;  %v15663_v57 = vpop.f32.mrf.mxu0  ;;  %v15557_v54 = vadd.f32 %v21893_v39, %v21892_v47  ;;  %v21898_v53 = vld [vmem:[#allocation17_spill] sm:$0xff] }
0x20d4   :  { %v13455_v4 = vadd.f32 %v15622_v19, %v13390_v37  ;;  %v13279_v42 = vadd.f32 %v15517_v51, %v13214_v38 }
0x20d5   :  { %v15624_v10 = vpop.f32.mrf.mxu1  ;;  %v15664_v56 = vpop.f32.mrf.mxu0 }
0x20d6   :  { %v13520_v7 = vadd.f32 %v15662_v12, %v13455_v4  ;;  %v15625_v36 = vadd.f32 %v15624_v10, %v15623_v34  ;;  %v15665_v18 = vadd.f32 %v15664_v56, %v15663_v57  ;;  %v21896_v34 = vld [vmem:[#allocation37_spill] sm:$0xff]  ;;  %v15594_v4 = vadd.f32 %v21898_v53, %v21897_v21  ;;  %v21900_v10 = vld [vmem:[#allocation7_spill] sm:$0xff]  ;;  %v21902_v56 = vld [vmem:[#allocation30_spill] sm:$0xff] }
0x20d7   :  { %v15626_v2 = vpop.f32.mrf.mxu1  ;;  %v15666_v9 = vpop.f32.mrf.mxu0  ;;  %v15560_v24 = vadd.f32 %v21471_v52, %v21902_v56  ;;  %v21906_v52 = vld [vmem:[#allocation34_spill] sm:$0xff]  ;;  %v21910_v21 = vld [vmem:[#allocation29_spill] sm:$0xff] }
0x20d8   :  { %v13458_v46 = vadd.f32 %v15625_v36, %v13393_v29  ;;  %v21502_v61 = vadd.f32 %v13520_v7, %v20608_v50  ;;  %v15480_v50 = vadd.f32 %v21430_v40, %v21426_v32  ;;  %v13341_v40 = vadd.f32 %v15554_v33, %v13276_v22  ;;  %v21901_v29 = vld [vmem:[#allocation15_spill] sm:$0xff]  ;;  %v21905_v33 = vld [vmem:[#allocation26_spill] sm:$0xff] }
0x20d9   :  { %v15627_v44 = vpop.f32.mrf.mxu1  ;;  %v15667_v3 = vpop.f32.mrf.mxu0  ;;  %v15520_v7 = vadd.f32 %v21901_v29, %v21900_v10  ;;  %v13344_v36 = vadd.f32 %v15557_v54, %v13279_v42  ;;  %v15600_v54 = vadd.f32 %v21474_v17, %v21469_v8  ;;  %v15603_v8 = vadd.f32 %v21485_v25, %v21910_v21 }
0x20da   :  { %v13523_v0 = vadd.f32 %v15665_v18, %v13458_v46  ;;  %v15628_v62 = vadd.f32 %v15627_v44, %v15626_v2  ;;  %v13562_v15 = vsel %vm185_vm0, %v21502_v61, 0.0  ;;  %v15668_v14 = vadd.f32 %v15667_v3, %v15666_v9 }
0x20db   :  { %v15629_v20 = vpop.f32.mrf.mxu1  ;;  %13563 = vadd.xlane.f32.xlu1 %v13562_v15  ;;  %v15669_v13 = vpop.f32.mrf.mxu0  ;;  %v13219_v41 = vadd.f32 %v15480_v50, %v21894_v58  ;;  %v13406_v55 = vadd.f32 %v15594_v4, %v13341_v40  ;;  %v21907_v50 = vld [vmem:[#allocation35_spill] sm:$0xff] }
0x20dc   :  { %v13463_v6 = vadd.f32 %v15628_v62, %v13398_v63  ;;  %v21516_v60 = vadd.f32 %v13523_v0, %v20612_v16  ;;  %v21895_v16 = vld [vmem:[#allocation38_spill] sm:$0xff]  ;;  %v21904_v63 = vld [vmem:[#allocation28_spill] sm:$0xff] }
0x20dd   :  { %v15630_v32 = vpop.f32.mrf.mxu1  ;;  %v15670_v11 = vpop.f32.mrf.mxu0  ;;  %v15483_v27 = vadd.f32 %v21896_v34, %v21895_v16  ;;  %v13284_v9 = vadd.f32 %v15520_v7, %v13219_v41  ;;  %v15597_v5 = vadd.f32 %v21904_v63, %v21903_v31 }
0x20de   :  { %v13528_v37 = vadd.f32 %v15668_v14, %v13463_v6  ;;  %v15631_v45 = vadd.f32 %v15630_v32, %v15629_v20  ;;  %v13565_v19 = vsel %vm185_vm0, %v21516_v60, 0.0  ;;  %v15671_v57 = vadd.f32 %v15670_v11, %v15669_v13 }
0x20df   :  { %v15632_v59 = vpop.f32.mrf.mxu1  ;;  %13566 = vadd.xlane.f32.xlu0 %v13565_v19  ;;  %v15672_v49 = vpop.f32.mrf.mxu0  ;;  %v13222_v0 = vadd.f32 %v15483_v27, %v21905_v33  ;;  %v15523_v20 = vadd.f32 %v21908_v23, %v21907_v50  ;;  %v13409_v22 = vadd.f32 %v15597_v5, %v13344_v36  ;;  %v13349_v6 = vadd.f32 %v15560_v24, %v13284_v9  ;;  %v21909_v19 = vld [vmem:[#allocation12_spill] sm:$0xff] }
0x20e0   :  { %v13466_v12 = vadd.f32 %v15631_v45, %v13401_v43  ;;  %v21530_v28 = vadd.f32 %v13528_v37, %v21899_v48  ;;  %v15563_v13 = vadd.f32 %v21481_v35, %v21476_v30 }
0x20e1   :  { %v15633_v26 = vpop.f32.mrf.mxu1  ;;  %v15673_v46 = vpop.f32.mrf.mxu0  ;;  %v13287_v40 = vadd.f32 %v15523_v20, %v13222_v0  ;;  %v13414_v58 = vadd.f32 %v15600_v54, %v13349_v6 }
0x20e2   :  { %v13531_v2 = vadd.f32 %v15671_v57, %v13466_v12  ;;  %v15634_v1 = vadd.f32 %v15633_v26, %v15632_v59  ;;  %v13568_v18 = vsel %vm185_vm0, %v21530_v28, 0.0  ;;  %v15674_v3 = vadd.f32 %v15673_v46, %v15672_v49  ;;  %v21911_v12 = vld [vmem:[#allocation21_spill] sm:$0xff]  ;;  %v21912_v26 = vld [vmem:[#allocation32_spill] sm:$0xff] }
0x20e3   :  { %v15635_v44 = vpop.f32.mrf.mxu1  ;;  %13569 = vadd.xlane.f32.xlu1 %v13568_v18  ;;  %v15675_v15 = vpop.f32.mrf.mxu0  ;;  %v13352_v35 = vadd.f32 %v15563_v13, %v13287_v40 }
0x20e4   :  { %v13471_v62 = vadd.f32 %v15634_v1, %v13406_v55  ;;  %v21542_v38 = vadd.f32 %v13531_v2, %v21906_v52  ;;  %v21913_v1 = vld [vmem:[#allocation23_spill] sm:$0xff] }
0x20e5   :  { %v15636_v14 = vpop.f32.mrf.mxu1  ;;  %v15676_v47 = vpop.f32.mrf.mxu0  ;;  %v13417_v48 = vadd.f32 %v15603_v8, %v13352_v35 }
0x20e6   :  { %v13536_v51 = vadd.f32 %v15674_v3, %v13471_v62  ;;  %v15637_v43 = vadd.f32 %v15636_v14, %v15635_v44  ;;  %v13571_v39 = vsel %vm185_vm0, %v21542_v38, 0.0  ;;  %v15677_v45 = vadd.f32 %v15676_v47, %v15675_v15 }
0x20e7   :  { %v15638_v32 = vpop.f32.mrf.mxu1  ;;  %13572 = vadd.xlane.f32.xlu0 %v13571_v39  ;;  %v15678_v11 = vpop.f32.mrf.mxu0 }
0x20e8   :  { %v13474_v37 = vadd.f32 %v15637_v43, %v13409_v22  ;;  %v13554_v42 = vadd.f32 %v13536_v51, %v21909_v19 }
0x20e9   :  { %v15639_v41 = vpop.f32.mrf.mxu1  ;;  %v15679_v34 = vpop.f32.mrf.mxu0 }
0x20ea   :  { %v13539_v30 = vadd.f32 %v15677_v45, %v13474_v37  ;;  %v15640_v16 = vadd.f32 %v15639_v41, %v15638_v32  ;;  %v13574_v27 = vsel %vm185_vm0, %v13554_v42, 0.0  ;;  %v15680_v53 = vadd.f32 %v15679_v34, %v15678_v11 }
0x20eb   :  { %v15641_v59 = vpop.f32.mrf.mxu1  ;;  %13575 = vadd.xlane.f32.xlu1 %v13574_v27  ;;  %v15681_v4 = vpop.f32.mrf.mxu0  ;;  %v23_v27 = vstv %s21676_s17 }
0x20ec   :  { %v13479_v17 = vadd.f32 %v15640_v16, %v13414_v58  ;;  %v13555_v57 = vadd.f32 %v13539_v30, %v21911_v12  ;;  %24 = vst [vmem:[#allocation2] sm:$0x1] %v23_v27 }
0x20ed   :  { %v15642_v49 = vpop.f32.mrf.mxu1  ;;  %v15682_v7 = vpop.f32.mrf.mxu0 }
0x20ee   :  { %v13544_v10 = vadd.f32 %v15680_v53, %v13479_v17  ;;  %v15643_v29 = vadd.f32 %v15642_v49, %v15641_v59  ;;  %v13577_v36 = vsel %vm185_vm0, %v13555_v57, 0.0  ;;  %v15683_v24 = vadd.f32 %v15682_v7, %v15681_v4 }
0x20ef   :  { %13578 = vadd.xlane.f32.xlu0 %v13577_v36 }
0x20f0   :  { %v13482_v56 = vadd.f32 %v15643_v29, %v13417_v48  ;;  %v13556_v55 = vadd.f32 %v13544_v10, %v21912_v26 }
0x20f2   :  { %v13547_v2 = vadd.f32 %v15683_v24, %v13482_v56  ;;  %v13580_v25 = vsel %vm185_vm0, %v13556_v55, 0.0 }
0x20f3   :  { %13581 = vadd.xlane.f32.xlu1 %v13580_v25  ;;  %v13760_v59 = vld [vmem:[#allocation2] sm:$0x1] }
0x20f4   :  { %v13557_v46 = vadd.f32 %v13547_v2, %v21913_v1 }
0x20f6   :  { %v13583_v18 = vsel %vm185_vm0, %v13557_v46, 0.0 }
0x20f7   :  { %13584 = vadd.xlane.f32.xlu0 %v13583_v18 }
0x2164   :  { %v13564_v9 = vpop.xlane.xlu1 %13563 }
0x2165   :  { %v13586_v31 = vmul.f32 0.03125, %v13564_v9 }
0x2167   :  { %v21563_v63 = vsub.f32 %v21502_v61, %v13586_v31 }
0x2168   :  { %v13567_v5 = vpop.xlane.xlu0 %13566 }
0x2169   :  { %v13587_v44 = vmul.f32 0.03125, %v13567_v5  ;;  %v13602_v33 = vmul.f32 %v21563_v63, %v21563_v63 }
0x216b   :  { %v21568_v0 = vsub.f32 %v21516_v60, %v13587_v44  ;;  %v13610_v62 = vsel %vm185_vm0, %v13602_v33, 0.0 }
0x216c   :  { %v13570_v3 = vpop.xlane.xlu1 %13569  ;;  %13611 = vadd.xlane.f32.xlu1 %v13610_v62 }
0x216d   :  { %v13588_v15 = vmul.f32 0.03125, %v13570_v3  ;;  %v13603_v52 = vmul.f32 %v21568_v0, %v21568_v0 }
0x216f   :  { %v21574_v50 = vsub.f32 %v21530_v28, %v13588_v15  ;;  %v13613_v61 = vsel %vm185_vm0, %v13603_v52, 0.0 }
0x2170   :  { %v13573_v23 = vpop.xlane.xlu0 %13572  ;;  %13614 = vadd.xlane.f32.xlu0 %v13613_v61 }
0x2171   :  { %v13589_v20 = vmul.f32 0.03125, %v13573_v23  ;;  %v13604_v60 = vmul.f32 %v21574_v50, %v21574_v50 }
0x2173   :  { %v21580_v22 = vsub.f32 %v21542_v38, %v13589_v20  ;;  %v13616_v6 = vsel %vm185_vm0, %v13604_v60, 0.0 }
0x2174   :  { %v13576_v14 = vpop.xlane.xlu1 %13575  ;;  %13617 = vadd.xlane.f32.xlu1 %v13616_v6 }
0x2175   :  { %v13590_v13 = vmul.f32 0.03125, %v13576_v14  ;;  %v13605_v28 = vmul.f32 %v21580_v22, %v21580_v22 }
0x2177   :  { %v21585_v51 = vsub.f32 %v13554_v42, %v13590_v13  ;;  %v13619_v43 = vsel %vm185_vm0, %v13605_v28, 0.0 }
0x2178   :  { %v13579_v47 = vpop.xlane.xlu0 %13578  ;;  %13620 = vadd.xlane.f32.xlu0 %v13619_v43 }
0x2179   :  { %v13591_v39 = vmul.f32 0.03125, %v13579_v47  ;;  %v13606_v54 = vmul.f32 %v21585_v51, %v21585_v51 }
0x217b   :  { %v21590_v38 = vsub.f32 %v13555_v57, %v13591_v39  ;;  %v13622_v32 = vsel %vm185_vm0, %v13606_v54, 0.0 }
0x217c   :  { %13623 = vadd.xlane.f32.xlu1 %v13622_v32  ;;  %v13582_v40 = vpop.xlane.xlu1 %13581 }
0x217d   :  { %v13592_v37 = vmul.f32 0.03125, %v13582_v40  ;;  %v13607_v45 = vmul.f32 %v21590_v38, %v21590_v38 }
0x217f   :  { %v21595_v11 = vsub.f32 %v13556_v55, %v13592_v37  ;;  %v13625_v19 = vsel %vm185_vm0, %v13607_v45, 0.0 }
0x2180   :  { %13626 = vadd.xlane.f32.xlu0 %v13625_v19  ;;  %v13585_v42 = vpop.xlane.xlu0 %13584 }
0x2181   :  { %v13593_v58 = vmul.f32 0.03125, %v13585_v42  ;;  %v13608_v41 = vmul.f32 %v21595_v11, %v21595_v11 }
0x2183   :  { %v21600_v35 = vsub.f32 %v13557_v46, %v13593_v58  ;;  %v13628_v30 = vsel %vm185_vm0, %v13608_v41, 0.0  ;;  %v21613_v46 = vld [vmem:[%s21674_s14 + $0x1] ss:$0 sm:$0xff] }
0x2184   :  { %13629 = vadd.xlane.f32.xlu1 %v13628_v30 }
0x2185   :  { %v13609_v16 = vmul.f32 %v21600_v35, %v21600_v35 }
0x2187   :  { %v13631_v34 = vsel %vm185_vm0, %v13609_v16, 0.0 }
0x2188   :  { %13632 = vadd.xlane.f32.xlu0 %v13631_v34 }
0x2195   :  { %13763 = vperm.xlu1 %16648, %v13760_v59  }
0x21f5   :  { %v13612_v21 = vpop.xlane.xlu1 %13611 }
0x21f6   :  { %v13634_v8 = vmul.f32 0.03125, %v13612_v21 }
0x21f8   :  { %v13642_v17 = vadd.f32 1e-05, %v13634_v8 }
0x21f9   :  { %v13615_v53 = vpop.xlane.xlu0 %13614 }
0x21fa   :  { %17218 = vrsqrt.f32 %v13642_v17  ;;  %v13635_v4 = vmul.f32 0.03125, %v13615_v53 }
0x21fc   :  { %v13643_v12 = vadd.f32 1e-05, %v13635_v4 }
0x21fd   :  { %v13618_v57 = vpop.xlane.xlu1 %13617 }
0x21fe   :  { %17220 = vrsqrt.f32 %v13643_v12  ;;  %v13636_v49 = vmul.f32 0.03125, %v13618_v57 }
0x2200   :  { %v13644_v48 = vadd.f32 1e-05, %v13636_v49 }
0x2201   :  { %v13621_v10 = vpop.xlane.xlu0 %13620 }
0x2202   :  { %17222 = vrsqrt.f32 %v13644_v48  ;;  %v13637_v29 = vmul.f32 0.03125, %v13621_v10 }
0x2204   :  { %v13645_v7 = vadd.f32 1e-05, %v13637_v29 }
0x2205   :  { %v13624_v36 = vpop.xlane.xlu1 %13623 }
0x2206   :  { %17224 = vrsqrt.f32 %v13645_v7  ;;  %v13638_v56 = vmul.f32 0.03125, %v13624_v36 }
0x2207   :  { %v17219_v24 = vpop.eup %17218 }
0x2208   :  { %v13646_v26 = vadd.f32 1e-05, %v13638_v56  ;;  %v13658_v2 = vmul.f32 %v17219_v24, %v21563_v63  ;;  %v21621_v63 = vld [vmem:[%s21675_s15 + $0x1] ss:$0 sm:$0xff] }
0x2209   :  { %v13627_v55 = vpop.xlane.xlu0 %13626 }
0x220a   :  { %17226 = vrsqrt.f32 %v13646_v26  ;;  %v13639_v25 = vmul.f32 0.03125, %v13627_v55  ;;  %v13672_v5 = vmul.f32 %v21613_v46, %v13658_v2 }
0x220b   :  { %v17221_v1 = vpop.eup %17220 }
0x220c   :  { %v13659_v18 = vmul.f32 %v17221_v1, %v21568_v0  ;;  %v13647_v9 = vadd.f32 1e-05, %v13639_v25  ;;  %v13686_v61 = vadd.f32 %v21621_v63, %v13672_v5 }
0x220d   :  { %v13630_v31 = vpop.xlane.xlu1 %13629 }
0x220e   :  { %v13673_v44 = vmul.f32 %v21613_v46, %v13659_v18  ;;  %17228 = vrsqrt.f32 %v13647_v9  ;;  %v13640_v33 = vmul.f32 0.03125, %v13630_v31  ;;  %v13694_v43 = vsel %vm185_vm0, %v13686_v61, 0.0 }
0x220f   :  { %v17223_v62 = vpop.eup %17222  ;;  %v13695_v45 = vrot.slane %v13694_v43, 4 }
0x2210   :  { %v13687_v3 = vadd.f32 %v21621_v63, %v13673_v44  ;;  %v13660_v15 = vmul.f32 %v17223_v62, %v21574_v50  ;;  %v13648_v52 = vadd.f32 1e-05, %v13640_v33 }
0x2211   :  { %v13633_v0 = vpop.xlane.xlu0 %13632  ;;  %v13696_v27 = vadd.f32 %v13695_v45, %v13694_v43 }
0x2212   :  { %v13674_v23 = vmul.f32 %v21613_v46, %v13660_v15  ;;  %17230 = vrsqrt.f32 %v13648_v52  ;;  %v13641_v20 = vmul.f32 0.03125, %v13633_v0  ;;  %v13701_v6 = vsel %vm185_vm0, %v13687_v3, 0.0 }
0x2213   :  { %v17225_v60 = vpop.eup %17224  ;;  %v13702_v54 = vrot.slane %v13701_v6, 4  ;;  %v13697_v49 = vrot.slane %v13696_v27, 2 }
0x2214   :  { %v13688_v14 = vadd.f32 %v21621_v63, %v13674_v23  ;;  %v13661_v13 = vmul.f32 %v17225_v60, %v21580_v22  ;;  %v13649_v28 = vadd.f32 1e-05, %v13641_v20 }
0x2215   :  { %v13703_v58 = vadd.f32 %v13702_v54, %v13701_v6  ;;  %v13698_v25 = vadd.f32 %v13697_v49, %v13696_v27 }
0x2216   :  { %v13708_v50 = vsel %vm185_vm0, %v13688_v14, 0.0  ;;  %v13675_v47 = vmul.f32 %v21613_v46, %v13661_v13  ;;  %17232 = vrsqrt.f32 %v13649_v28 }
0x2217   :  { %v17227_v39 = vpop.eup %17226  ;;  %v13709_v32 = vrot.slane %v13708_v50, 4  ;;  %v13704_v17 = vrot.slane %v13703_v58, 2  ;;  %v13699_v15 = vrot.slane %v13698_v25, 1 }
0x2218   :  { %v13689_v40 = vadd.f32 %v21621_v63, %v13675_v47  ;;  %v13662_v37 = vmul.f32 %v17227_v39, %v21585_v51 }
0x2219   :  { %v13710_v30 = vadd.f32 %v13709_v32, %v13708_v50  ;;  %v13705_v36 = vadd.f32 %v13704_v17, %v13703_v58  ;;  %v13700_v13 = vadd.f32 %v13699_v15, %v13698_v25 }
0x221a   :  { %v13715_v19 = vsel %vm185_vm0, %v13689_v40, 0.0  ;;  %v13676_v22 = vmul.f32 %v21613_v46, %v13662_v37 }
0x221b   :  { %v17229_v42 = vpop.eup %17228  ;;  %v13716_v41 = vrot.slane %v13715_v19, 4  ;;  %v13711_v4 = vrot.slane %v13710_v30, 2  ;;  %v13706_v5 = vrot.slane %v13705_v36, 1 }
0x221c   :  { %v13690_v16 = vadd.f32 %v21621_v63, %v13676_v22  ;;  %v13663_v34 = vmul.f32 %v17229_v42, %v21590_v38 }
0x221d   :  { %v13717_v59 = vadd.f32 %v13716_v41, %v13715_v19  ;;  %v13712_v2 = vadd.f32 %v13711_v4, %v13710_v30  ;;  %v13707_v20 = vadd.f32 %v13706_v5, %v13705_v36  ;;  %v13751_v19 = vmul.f32 0.125, %v13700_v13  ;;  %v13759_v4 = vld [vmem:[%s21677_s16] sm:$0x1] }
0x221e   :  { %v13722_v21 = vsel %vm185_vm0, %v13690_v16, 0.0  ;;  %v13677_v8 = vmul.f32 %v21613_v46, %v13663_v34 }
0x221f   :  { %v17231_v51 = vpop.eup %17230  ;;  %v13723_v53 = vrot.slane %v13722_v21, 4  ;;  %v13718_v48 = vrot.slane %v13717_v59, 2  ;;  %v13713_v3 = vrot.slane %v13712_v2, 1  ;;  %v13752_v32 = vmul.f32 0.125, %v13707_v20 }
0x2220   :  { %v13691_v12 = vadd.f32 %v21621_v63, %v13677_v8  ;;  %v13664_v57 = vmul.f32 %v17231_v51, %v21595_v11 }
0x2221   :  { %v13724_v10 = vadd.f32 %v13723_v53, %v13722_v21  ;;  %v13719_v1 = vadd.f32 %v13718_v48, %v13717_v59  ;;  %v13714_v14 = vadd.f32 %v13713_v3, %v13712_v2  ;;  %v13779_v30 = vsel %vm13778_vm6, %v13752_v32, %v13751_v19 }
0x2222   :  { %v13678_v29 = vmul.f32 %v21613_v46, %v13664_v57  ;;  %v13729_v38 = vsel %vm185_vm0, %v13691_v12, 0.0  ;;  %v13764_v12 = vpop.permute.xlu1 %13763  ;;  %v21914_v57 = vld [vmem:[#allocation4_spill] sm:$0xff] }
0x2223   :  { %v17233_v7 = vpop.eup %17232  ;;  %v13725_v56 = vrot.slane %v13724_v10, 2  ;;  %v13730_v24 = vrot.slane %v13729_v38, 4  ;;  %v13720_v52 = vrot.slane %v13719_v1, 1  ;;  %v13753_v40 = vmul.f32 0.125, %v13714_v14 }
0x2224   :  { %v13692_v26 = vadd.f32 %v21621_v63, %v13678_v29  ;;  %v13665_v55 = vmul.f32 %v17233_v7, %v21600_v35  ;;  %v13769_v49 = vrot.slane %v13764_v12, %v21914_v57 }
0x2225   :  { %v13731_v18 = vadd.f32 %v13730_v24, %v13729_v38  ;;  %v13726_v9 = vadd.f32 %v13725_v56, %v13724_v10  ;;  %v13721_v28 = vadd.f32 %v13720_v52, %v13719_v1  ;;  %v13781_v34 = vsel %vm13780_vm7, %v13753_v40, %v13779_v30 }
0x2226   :  { %v13679_v11 = vmul.f32 %v21613_v46, %v13665_v55  ;;  %v13736_v31 = vsel %vm185_vm0, %v13692_v26, 0.0 }
0x2227   :  { %v13732_v44 = vrot.slane %v13731_v18, 2  ;;  %v13737_v33 = vrot.slane %v13736_v31, 4  ;;  %v13727_v35 = vrot.slane %v13726_v9, 1  ;;  %v13754_v22 = vmul.f32 0.125, %v13721_v28 }
0x2228   :  { %v13693_v62 = vadd.f32 %v21621_v63, %v13679_v11 }
0x2229   :  { %v13733_v0 = vadd.f32 %v13732_v44, %v13731_v18  ;;  %v13738_v61 = vadd.f32 %v13737_v33, %v13736_v31  ;;  %v13728_v47 = vadd.f32 %v13727_v35, %v13726_v9  ;;  %v13783_v59 = vsel %vm13782_vm8, %v13754_v22, %v13781_v34 }
0x222a   :  { %v13743_v23 = vsel %vm185_vm0, %v13693_v62, 0.0 }
0x222b   :  { %v13734_v60 = vrot.slane %v13733_v0, 1  ;;  %v13739_v6 = vrot.slane %v13738_v61, 2  ;;  %v13744_v46 = vrot.slane %v13743_v23, 4  ;;  %v13755_v42 = vmul.f32 0.125, %v13728_v47 }
0x222d   :  { %v13740_v43 = vadd.f32 %v13739_v6, %v13738_v61  ;;  %v13745_v50 = vadd.f32 %v13744_v46, %v13743_v23  ;;  %v13735_v39 = vadd.f32 %v13734_v60, %v13733_v0  ;;  %v13785_v21 = vsel %vm13784_vm9, %v13755_v42, %v13783_v59 }
0x222f   :  { %v13741_v63 = vrot.slane %v13740_v43, 1  ;;  %v13746_v54 = vrot.slane %v13745_v50, 2  ;;  %v13756_v41 = vmul.f32 0.125, %v13735_v39 }
0x2231   :  { %v13742_v37 = vadd.f32 %v13741_v63, %v13740_v43  ;;  %v13747_v45 = vadd.f32 %v13746_v54, %v13745_v50  ;;  %v13787_v51 = vsel %vm13786_vm10, %v13756_v41, %v13785_v21 }
0x2233   :  { %v13748_v58 = vrot.slane %v13747_v45, 1  ;;  %v13757_v16 = vmul.f32 0.125, %v13742_v37 }
0x2235   :  { %v13749_v27 = vadd.f32 %v13748_v58, %v13747_v45  ;;  %v13789_v17 = vsel %vm13788_vm11, %v13757_v16, %v13787_v51 }
0x2237   :  { %v13758_v8 = vmul.f32 0.125, %v13749_v27 }
0x2239   :  { %v13791_v53 = vsel %vm13790_vm12, %v13758_v8, %v13789_v17 }
0x223a   :  { %16503 = vmatpush3.xpose.msk.msra.mxu1 %vm185_vm0, %v13791_v53 }
0x223d   :  { %16505 = vmatmul.mubr.msk.f32.vlgmr.msra.gmra.mxu1 %vm185_vm0, %v13759_v4 }
0x22fd   :  { %v13863_v48 = vpop.f32.mrf.mxu1 }
0x22fe   :  { %v13864_v10 = vadd.f32 %v13863_v48, %v13769_v49 }
0x22ff   :  { %v16506_v29 = vpop.f32.mrf.mxu1 }
0x2300   :  { %13868 = vst.msk [vmem:[%s21678_s18] sm:$0x1] %vm13867_vm13, %v13864_v10 }

</bundles_post_ra>
